<compile_context>
chip_gen: v6e
topology: v6e:2x2x1
jax: 0.10.0
libtpu: 0.0.40
codegen_flags: <defaults>
</compile_context>

<pallas_src>
import functools

import jax
import jax.numpy as jnp
from jax.experimental import pallas as pl
from jax.experimental.pallas import tpu as pltpu


_TAPS = tuple((ky, kx) for ky in range(3) for kx in range(3))


def _relation_fused_kernel(x_ref, yp1_ref, xp1_ref, yp2_ref, xp2_ref,
                           w1_ref, s1_ref, b1_ref, w2_ref, s2_ref, b2_ref,
                           fc1w_ref, fc1b_ref, fc2w_ref, fc2b_ref,
                           o_ref,
                           xs1_ref, y1_ref, xs2_ref, y2_ref,
                           *, B, H, W, Cin, C1, H1, W1, C2, H2, W2,
                           HID, PAD1, PAD2):
    f32, bf16 = jnp.float32, jnp.bfloat16
    M1, M2 = B * H * W, B * H1 * W1

    # ---------------- layer 1: write padded flat slab (bf16) ----------------
    xs1_ref[0:PAD1, :] = jnp.zeros((PAD1, Cin), bf16)
    xs1_ref[PAD1 + M1:PAD1 + M1 + PAD1, :] = jnp.zeros((PAD1, Cin), bf16)
    xs1_ref[PAD1:PAD1 + M1, :] = x_ref[...]

    # ---------------- layer 1: 3x3 conv = 9 accumulated MXU dots ----------------
    ypos1 = jnp.broadcast_to(yp1_ref[...], (M1, Cin))       # per-row y coordinate
    xpos1 = jnp.broadcast_to(xp1_ref[...], (M1, Cin))       # per-row x coordinate
    acc = jnp.zeros((M1, C1), f32)
    for t, (ky, kx) in enumerate(_TAPS):
        dy, dx = ky - 1, kx - 1
        start = PAD1 + dy * W + dx
        v = xs1_ref[start:start + M1, :]
        if (dy, dx) != (0, 0):          # zero rows whose source pixel is out of image
            m = ((ypos1 >= -dy) & (ypos1 <= H - 1 - dy) &
                 (xpos1 >= -dx) & (xpos1 <= W - 1 - dx))
            v = jnp.where(m, v, jnp.zeros_like(v))
        acc = acc + jnp.dot(v, w1_ref[t * Cin:(t + 1) * Cin, :],
                            preferred_element_type=f32)
    y1_ref[...] = jnp.maximum(acc * s1_ref[...] + b1_ref[...], 0.0)  # folded BN + ReLU

    # -------- layer 1: 2x2 max-pool, result written into padded layer-2 slab --------
    # pool over x (fastest spatial dim): rows (m, m+1) via stride-2 sublane loads.
    a = jnp.maximum(y1_ref[pl.ds(0, M1 // 2, 2), :],
                    y1_ref[pl.ds(1, M1 // 2, 2), :])        # rows ordered (b, y, x//2)
    xs2_ref[0:PAD2, :] = jnp.zeros((PAD2, C1), bf16)
    xs2_ref[PAD2 + M2:PAD2 + M2 + PAD2, :] = jnp.zeros((PAD2, C1), bf16)
    for b in range(B):                    # pool over y: max of two W1-row groups
        for yo in range(H1):
            j0 = b * (H * W1) + (2 * yo) * W1
            blk = jnp.maximum(a[j0:j0 + W1, :], a[j0 + W1:j0 + 2 * W1, :])
            dst = PAD2 + b * (H1 * W1) + yo * W1
            xs2_ref[dst:dst + W1, :] = blk.astype(bf16)

    # ---------------- layer 2: 3x3 conv = 9 accumulated MXU dots ----------------
    ypos2 = jnp.broadcast_to(yp2_ref[...], (M2, C1))
    xpos2 = jnp.broadcast_to(xp2_ref[...], (M2, C1))
    acc = jnp.zeros((M2, C2), f32)
    for t, (ky, kx) in enumerate(_TAPS):
        dy, dx = ky - 1, kx - 1
        start = PAD2 + dy * W1 + dx
        v = xs2_ref[start:start + M2, :]
        if (dy, dx) != (0, 0):
            m = ((ypos2 >= -dy) & (ypos2 <= H1 - 1 - dy) &
                 (xpos2 >= -dx) & (xpos2 <= W1 - 1 - dx))
            v = jnp.where(m, v, jnp.zeros_like(v))
        acc = acc + jnp.dot(v, w2_ref[t * C1:(t + 1) * C1, :],
                            preferred_element_type=f32)
    y2_ref[...] = jnp.maximum(acc * s2_ref[...] + b2_ref[...], 0.0)

    # ---- layer 2: 2x2 max-pool fused with NCHW flatten + fc1 (accumulated dots) ----
    # fc1_w rows were pre-permuted to (y2, x2, c) order, so each pooled (B, C2) block
    # multiplies its own 64-row weight slice; no feature scratch / partial stores.
    h = jnp.zeros((B, HID), jnp.float32) + fc1b_ref[...]
    for yo in range(H2):
        for xo in range(W2):
            base = (2 * yo) * W1 + 2 * xo
            p00 = y2_ref[pl.ds(base, B, H1 * W1), :]          # one row per image
            p01 = y2_ref[pl.ds(base + 1, B, H1 * W1), :]
            p10 = y2_ref[pl.ds(base + W1, B, H1 * W1), :]
            p11 = y2_ref[pl.ds(base + W1 + 1, B, H1 * W1), :]
            blk = jnp.maximum(jnp.maximum(p00, p01), jnp.maximum(p10, p11))
            r0 = (yo * W2 + xo) * C2
            h = h + jnp.dot(blk.astype(bf16), fc1w_ref[r0:r0 + C2, :],
                            preferred_element_type=jnp.float32)
    h = jnp.maximum(h, 0.0)

    # ---------------- fc2 (hidden -> 1) on the VPU + sigmoid ----------------
    z = jnp.sum(h * fc2w_ref[...], axis=-1, keepdims=True) + fc2b_ref[...]
    o_ref[...] = pl.reciprocal(1.0 + jnp.exp(-z), approx=True)


def relation_forward_fused(x_nhwc, p):
    B, H, W, Cin = x_nhwc.shape
    C1 = p["s1"].shape[-1]
    H1, W1 = H // 2, W // 2
    C2 = p["s2"].shape[-1]
    H2, W2 = H1 // 2, W1 // 2
    HID = p["fc1_b"].shape[-1]
    M1, M2 = B * H * W, B * H1 * W1
    PAD1 = -(-(W + 1) // 8) * 8          # >= W+1 and sublane aligned
    PAD2 = -(-(W1 + 1) // 8) * 8

    # Flat bf16 input slab (free collapse of NHWC) and per-row (y, x) coordinates used
    # by the in-kernel conv boundary masks (avoids vector int div/mod inside Mosaic).
    x2d = x_nhwc.reshape(M1, Cin).astype(jnp.bfloat16)
    r1 = jnp.arange(M1, dtype=jnp.int32)
    yp1 = ((r1 // W) % H).reshape(M1, 1)
    xp1 = (r1 % W).reshape(M1, 1)
    r2 = jnp.arange(M2, dtype=jnp.int32)
    yp2 = ((r2 // W1) % H1).reshape(M2, 1)
    xp2 = (r2 % W1).reshape(M2, 1)

    kernel = functools.partial(
        _relation_fused_kernel,
        B=B, H=H, W=W, Cin=Cin, C1=C1, H1=H1, W1=W1, C2=C2, H2=H2, W2=W2,
        HID=HID, PAD1=PAD1, PAD2=PAD2)
    vmem = pl.BlockSpec(memory_space=pltpu.MemorySpace.VMEM)
    return pl.pallas_call(
        kernel,
        out_shape=jax.ShapeDtypeStruct((B, 1), jnp.float32),
        in_specs=[vmem] * 15,
        out_specs=vmem,
        scratch_shapes=[
            pltpu.VMEM((PAD1 + M1 + PAD1, Cin), jnp.bfloat16),  # padded layer-1 slab
            pltpu.VMEM((M1, C1), jnp.float32),                  # layer-1 conv output
            pltpu.VMEM((PAD2 + M2 + PAD2, C1), jnp.bfloat16),   # padded layer-2 slab
            pltpu.VMEM((M2, C2), jnp.float32),                  # layer-2 conv output
        ],
    )(x2d, yp1, xp1, yp2, xp2,
      p["w1"], p["s1"], p["b1"], p["w2"], p["s2"], p["b2"],
      p["fc1_w"], p["fc1_b"], p["fc2_w"], p["fc2_b"])


# --------------------------------------------------------------------------
# Parameter init (deterministic, synthetic), kernel wrapper, pure-JAX reference
# --------------------------------------------------------------------------
def init_params(key, input_size, hidden_size, feat_hw):
    ks = jax.random.split(key, 12)
    eps = 1e-5

    def fold_bn(conv_b, gamma, beta, mean, var):
        scale = gamma / jnp.sqrt(var + eps)
        return scale, beta + (conv_b - mean) * scale

    # layer1: Conv2d(128 -> 64) + BN(64)  (inference mode, folded)
    w1 = 0.05 * jax.random.normal(ks[0], (3, 3, 128, 64), jnp.float32)   # HWIO
    cb1 = 0.05 * jax.random.normal(ks[1], (64,), jnp.float32)
    g1 = 1.0 + 0.1 * jax.random.normal(ks[2], (64,), jnp.float32)
    be1 = 0.1 * jax.random.normal(ks[3], (64,), jnp.float32)
    s1, b1 = fold_bn(cb1, g1, be1, jnp.zeros((64,)), jnp.ones((64,)))

    # layer2: Conv2d(64 -> 64) + BN(64)
    w2 = 0.05 * jax.random.normal(ks[4], (3, 3, 64, 64), jnp.float32)
    cb2 = 0.05 * jax.random.normal(ks[5], (64,), jnp.float32)
    g2 = 1.0 + 0.1 * jax.random.normal(ks[6], (64,), jnp.float32)
    be2 = 0.1 * jax.random.normal(ks[7], (64,), jnp.float32)
    s2, b2 = fold_bn(cb2, g2, be2, jnp.zeros((64,)), jnp.ones((64,)))

    # fc1 / fc2 in torch convention (fc1 rows index the NCHW flatten of (64, Hf, Wf)).
    Hf, Wf = feat_hw
    fc1_w = 0.05 * jax.random.normal(ks[8], (input_size, hidden_size), jnp.float32)
    fc1_b = 0.05 * jax.random.normal(ks[9], (hidden_size,), jnp.float32)
    fc2_w = 0.05 * jax.random.normal(ks[10], (hidden_size, 1), jnp.float32)
    fc2_b = 0.05 * jax.random.normal(ks[11], (1,), jnp.float32)

    # Row-permute fc1_w so the kernel's (y, x, c)-ordered pooled blocks hit the right
    # rows, then cast MXU operands to bf16 (accumulation stays f32 in-kernel).
    perm = jnp.arange(input_size).reshape(64, Hf, Wf).transpose(1, 2, 0).reshape(-1)
    kernel_params = {
        "w1": w1.reshape(9 * 128, 64).astype(jnp.bfloat16),   # rows ordered (ky, kx, ci)
        "s1": s1.reshape(1, 64), "b1": b1.reshape(1, 64),
        "w2": w2.reshape(9 * 64, 64).astype(jnp.bfloat16),
        "s2": s2.reshape(1, 64), "b2": b2.reshape(1, 64),
        "fc1_w": fc1_w[perm].astype(jnp.bfloat16),
        "fc1_b": fc1_b.reshape(1, hidden_size),
        "fc2_w": fc2_w.reshape(1, hidden_size),
        "fc2_b": fc2_b.reshape(1, 1),
    }
    ref_params = {"w1": w1, "s1": s1, "b1": b1, "w2": w2, "s2": s2, "b2": b2,
                  "fc1_w": fc1_w, "fc1_b": fc1_b, "fc2_w": fc2_w, "fc2_b": fc2_b}
    return kernel_params, ref_params


@jax.jit
def relation_network_forward(x_nchw, params):
    # NCHW (PyTorch convention) -> NHWC so channels sit on the 128-wide lane axis.
    x = jnp.transpose(x_nchw, (0, 2, 3, 1))
    return relation_forward_fused(x, params)


def relation_reference(x_nchw, r):
    """Pure-JAX/XLA reference of the PyTorch forward (inference-mode BN folded)."""
    x = jnp.transpose(x_nchw, (0, 2, 3, 1))
    dn = ("NHWC", "HWIO", "NHWC")
    y = jax.lax.conv_general_dilated(x, r["w1"], (1, 1), ((1, 1), (1, 1)),
                                     dimension_numbers=dn)
    y = jnp.maximum(y * r["s1"] + r["b1"], 0.0)
    y = jax.lax.reduce_window(y, -jnp.inf, jax.lax.max,
                              (1, 2, 2, 1), (1, 2, 2, 1), "VALID")
    y = jax.lax.conv_general_dilated(y, r["w2"], (1, 1), ((1, 1), (1, 1)),
                                     dimension_numbers=dn)
    y = jnp.maximum(y * r["s2"] + r["b2"], 0.0)
    y = jax.lax.reduce_window(y, -jnp.inf, jax.lax.max,
                              (1, 2, 2, 1), (1, 2, 2, 1), "VALID")
    feat = jnp.transpose(y, (0, 3, 1, 2)).reshape(y.shape[0], -1)  # torch .view(B, -1)
    h = jnp.maximum(feat @ r["fc1_w"] + r["fc1_b"], 0.0)
    z = h @ r["fc2_w"] + r["fc2_b"]
    return jax.nn.sigmoid(z)


if __name__ == "__main__":
    B, C, H, W = 2, 128, 8, 8               # module hard-codes 128 input channels
    input_size = 64 * (H // 4) * (W // 4)   # 64 * 2 * 2 = 256 after two 2x2 max-pools
    hidden_size = 8

    key = jax.random.PRNGKey(0)
    kx_, kp_ = jax.random.split(key)
    x = jax.random.normal(kx_, (B, C, H, W), jnp.float32)
    params, ref_params = init_params(kp_, input_size, hidden_size, (H // 4, W // 4))

    out = relation_network_forward(x, params)
    jax.block_until_ready(out)
    assert out.shape == (B, 1) and out.dtype == jnp.float32

    # Numerical check vs the f32 XLA reference (kernel uses bf16 MXU operands,
    # f32 accumulation -> small difference on the sigmoid outputs).
    ref = relation_reference(x, ref_params)
    assert float(jnp.max(jnp.abs(out - ref))) < 2e-2, (out, ref)
    print("KERNEL_OK")
</pallas_src>

<mosaic_0001>
module attributes {stable_mosaic.version = 11 : i64} {
  func.func @_relation_fused_kernel(%arg0: memref<128x128xbf16, #tpu.memory_space<vmem>>, %arg1: memref<128x1xi32, #tpu.memory_space<vmem>>, %arg2: memref<128x1xi32, #tpu.memory_space<vmem>>, %arg3: memref<32x1xi32, #tpu.memory_space<vmem>>, %arg4: memref<32x1xi32, #tpu.memory_space<vmem>>, %arg5: memref<1152x64xbf16, #tpu.memory_space<vmem>>, %arg6: memref<1x64xf32, #tpu.memory_space<vmem>>, %arg7: memref<1x64xf32, #tpu.memory_space<vmem>>, %arg8: memref<576x64xbf16, #tpu.memory_space<vmem>>, %arg9: memref<1x64xf32, #tpu.memory_space<vmem>>, %arg10: memref<1x64xf32, #tpu.memory_space<vmem>>, %arg11: memref<256x8xbf16, #tpu.memory_space<vmem>>, %arg12: memref<1x8xf32, #tpu.memory_space<vmem>>, %arg13: memref<1x8xf32, #tpu.memory_space<vmem>>, %arg14: memref<1x1xf32, #tpu.memory_space<vmem>>, %arg15: memref<2x1xf32, #tpu.memory_space<vmem>>, %arg16: memref<160x128xbf16, #tpu.memory_space<vmem>>, %arg17: memref<128x64xf32, #tpu.memory_space<vmem>>, %arg18: memref<48x64xbf16, #tpu.memory_space<vmem>>, %arg19: memref<32x64xf32, #tpu.memory_space<vmem>>) attributes {dimension_semantics = [], scalar_prefetch = 0 : i64, scratch_operands = 4 : i64, tpu.core_type = #tpu.core_type<tc>} {
    %cst = arith.constant 0.000000e+00 : bf16
    %0 = vector.broadcast %cst : bf16 to vector<16x128xbf16>
    %c0 = arith.constant 0 : index
    %c0_0 = arith.constant 0 : index
    %1 = vector.load %arg16[%c0, %c0_0] : memref<160x128xbf16, #tpu.memory_space<vmem>>, vector<16x128xbf16>
    tpu.vector_store %arg16[%c0, %c0_0], %0 {strides = array<i32>} : memref<160x128xbf16, #tpu.memory_space<vmem>>, vector<16x128xbf16>,
    %cst_1 = arith.constant 0.000000e+00 : bf16
    %2 = vector.broadcast %cst_1 : bf16 to vector<16x128xbf16>
    %c144 = arith.constant 144 : index
    %c0_2 = arith.constant 0 : index
    %3 = vector.load %arg16[%c144, %c0_2] : memref<160x128xbf16, #tpu.memory_space<vmem>>, vector<16x128xbf16>
    tpu.vector_store %arg16[%c144, %c0_2], %2 {strides = array<i32>} : memref<160x128xbf16, #tpu.memory_space<vmem>>, vector<16x128xbf16>,
    %c0_3 = arith.constant 0 : index
    %c0_4 = arith.constant 0 : index
    %4 = vector.load %arg0[%c0_3, %c0_4] : memref<128x128xbf16, #tpu.memory_space<vmem>>, vector<128x128xbf16>
    %c16 = arith.constant 16 : index
    %c0_5 = arith.constant 0 : index
    %5 = vector.load %arg16[%c16, %c0_5] : memref<160x128xbf16, #tpu.memory_space<vmem>>, vector<128x128xbf16>
    tpu.vector_store %arg16[%c16, %c0_5], %4 {strides = array<i32>} : memref<160x128xbf16, #tpu.memory_space<vmem>>, vector<128x128xbf16>,
    %c0_6 = arith.constant 0 : index
    %c0_7 = arith.constant 0 : index
    %6 = vector.load %arg1[%c0_6, %c0_7] : memref<128x1xi32, #tpu.memory_space<vmem>>, vector<128x1xi32>
    %7 = vector.shape_cast %6 : vector<128x1xi32> to vector<128x1xi32>
    %8 = vector.broadcast %7 : vector<128x1xi32> to vector<128x128xi32>
    %c0_8 = arith.constant 0 : index
    %c0_9 = arith.constant 0 : index
    %9 = vector.load %arg2[%c0_8, %c0_9] : memref<128x1xi32, #tpu.memory_space<vmem>>, vector<128x1xi32>
    %10 = vector.shape_cast %9 : vector<128x1xi32> to vector<128x1xi32>
    %11 = vector.broadcast %10 : vector<128x1xi32> to vector<128x128xi32>
    %cst_10 = arith.constant 0.000000e+00 : f32
    %12 = vector.broadcast %cst_10 : f32 to vector<128x64xf32>
    %c7 = arith.constant 7 : index
    %c0_11 = arith.constant 0 : index
    %13 = vector.load %arg16[%c7, %c0_11] : memref<160x128xbf16, #tpu.memory_space<vmem>>, vector<128x128xbf16>
    %c1_i32 = arith.constant 1 : i32
    %14 = vector.broadcast %c1_i32 : i32 to vector<128x128xi32>
    %15 = arith.cmpi sge, %8, %14 : vector<128x128xi32>
    %c8_i32 = arith.constant 8 : i32
    %16 = vector.broadcast %c8_i32 : i32 to vector<128x128xi32>
    %17 = arith.cmpi sle, %8, %16 : vector<128x128xi32>
    %18 = arith.andi %15, %17 : vector<128x128xi1>
    %c1_i32_12 = arith.constant 1 : i32
    %19 = vector.broadcast %c1_i32_12 : i32 to vector<128x128xi32>
    %20 = arith.cmpi sge, %11, %19 : vector<128x128xi32>
    %21 = arith.andi %18, %20 : vector<128x128xi1>
    %c8_i32_13 = arith.constant 8 : i32
    %22 = vector.broadcast %c8_i32_13 : i32 to vector<128x128xi32>
    %23 = arith.cmpi sle, %11, %22 : vector<128x128xi32>
    %24 = arith.andi %21, %23 : vector<128x128xi1>
    %cst_14 = arith.constant 0.000000e+00 : bf16
    %25 = vector.broadcast %cst_14 : bf16 to vector<128x128xbf16>
    %26 = arith.select %24, %13, %25 : vector<128x128xi1>, vector<128x128xbf16>
    %c0_15 = arith.constant 0 : index
    %c0_16 = arith.constant 0 : index
    %27 = vector.load %arg5[%c0_15, %c0_16] : memref<1152x64xbf16, #tpu.memory_space<vmem>>, vector<128x64xbf16>
    %cst_17 = arith.constant dense<0.000000e+00> : vector<128x64xf32>
    %28 = tpu.matmul %26, %27, %cst_17 {dimension_numbers = #tpu.dot_dimension_numbers<[1], [0], [0], [1], [0, 0, 1, 1], [], []>} : vector<128x128xbf16>, vector<128x64xbf16>, vector<128x64xf32> -> vector<128x64xf32>
    %29 = arith.addf %12, %28 : vector<128x64xf32>
    %c8 = arith.constant 8 : index
    %c0_18 = arith.constant 0 : index
    %30 = vector.load %arg16[%c8, %c0_18] : memref<160x128xbf16, #tpu.memory_space<vmem>>, vector<128x128xbf16>
    %c1_i32_19 = arith.constant 1 : i32
    %31 = vector.broadcast %c1_i32_19 : i32 to vector<128x128xi32>
    %32 = arith.cmpi sge, %8, %31 : vector<128x128xi32>
    %c8_i32_20 = arith.constant 8 : i32
    %33 = vector.broadcast %c8_i32_20 : i32 to vector<128x128xi32>
    %34 = arith.cmpi sle, %8, %33 : vector<128x128xi32>
    %35 = arith.andi %32, %34 : vector<128x128xi1>
    %c0_i32 = arith.constant 0 : i32
    %36 = vector.broadcast %c0_i32 : i32 to vector<128x128xi32>
    %37 = arith.cmpi sge, %11, %36 : vector<128x128xi32>
    %38 = arith.andi %35, %37 : vector<128x128xi1>
    %c7_i32 = arith.constant 7 : i32
    %39 = vector.broadcast %c7_i32 : i32 to vector<128x128xi32>
    %40 = arith.cmpi sle, %11, %39 : vector<128x128xi32>
    %41 = arith.andi %38, %40 : vector<128x128xi1>
    %cst_21 = arith.constant 0.000000e+00 : bf16
    %42 = vector.broadcast %cst_21 : bf16 to vector<128x128xbf16>
    %43 = arith.select %41, %30, %42 : vector<128x128xi1>, vector<128x128xbf16>
    %c128 = arith.constant 128 : index
    %c0_22 = arith.constant 0 : index
    %44 = vector.load %arg5[%c128, %c0_22] : memref<1152x64xbf16, #tpu.memory_space<vmem>>, vector<128x64xbf16>
    %cst_23 = arith.constant dense<0.000000e+00> : vector<128x64xf32>
    %45 = tpu.matmul %43, %44, %cst_23 {dimension_numbers = #tpu.dot_dimension_numbers<[1], [0], [0], [1], [0, 0, 1, 1], [], []>} : vector<128x128xbf16>, vector<128x64xbf16>, vector<128x64xf32> -> vector<128x64xf32>
    %46 = arith.addf %29, %45 : vector<128x64xf32>
    %c9 = arith.constant 9 : index
    %c0_24 = arith.constant 0 : index
    %47 = vector.load %arg16[%c9, %c0_24] : memref<160x128xbf16, #tpu.memory_space<vmem>>, vector<128x128xbf16>
    %c1_i32_25 = arith.constant 1 : i32
    %48 = vector.broadcast %c1_i32_25 : i32 to vector<128x128xi32>
    %49 = arith.cmpi sge, %8, %48 : vector<128x128xi32>
    %c8_i32_26 = arith.constant 8 : i32
    %50 = vector.broadcast %c8_i32_26 : i32 to vector<128x128xi32>
    %51 = arith.cmpi sle, %8, %50 : vector<128x128xi32>
    %52 = arith.andi %49, %51 : vector<128x128xi1>
    %c-1_i32 = arith.constant -1 : i32
    %53 = vector.broadcast %c-1_i32 : i32 to vector<128x128xi32>
    %54 = arith.cmpi sge, %11, %53 : vector<128x128xi32>
    %55 = arith.andi %52, %54 : vector<128x128xi1>
    %c6_i32 = arith.constant 6 : i32
    %56 = vector.broadcast %c6_i32 : i32 to vector<128x128xi32>
    %57 = arith.cmpi sle, %11, %56 : vector<128x128xi32>
    %58 = arith.andi %55, %57 : vector<128x128xi1>
    %cst_27 = arith.constant 0.000000e+00 : bf16
    %59 = vector.broadcast %cst_27 : bf16 to vector<128x128xbf16>
    %60 = arith.select %58, %47, %59 : vector<128x128xi1>, vector<128x128xbf16>
    %c256 = arith.constant 256 : index
    %c0_28 = arith.constant 0 : index
    %61 = vector.load %arg5[%c256, %c0_28] : memref<1152x64xbf16, #tpu.memory_space<vmem>>, vector<128x64xbf16>
    %cst_29 = arith.constant dense<0.000000e+00> : vector<128x64xf32>
    %62 = tpu.matmul %60, %61, %cst_29 {dimension_numbers = #tpu.dot_dimension_numbers<[1], [0], [0], [1], [0, 0, 1, 1], [], []>} : vector<128x128xbf16>, vector<128x64xbf16>, vector<128x64xf32> -> vector<128x64xf32>
    %63 = arith.addf %46, %62 : vector<128x64xf32>
    %c15 = arith.constant 15 : index
    %c0_30 = arith.constant 0 : index
    %64 = vector.load %arg16[%c15, %c0_30] : memref<160x128xbf16, #tpu.memory_space<vmem>>, vector<128x128xbf16>
    %c0_i32_31 = arith.constant 0 : i32
    %65 = vector.broadcast %c0_i32_31 : i32 to vector<128x128xi32>
    %66 = arith.cmpi sge, %8, %65 : vector<128x128xi32>
    %c7_i32_32 = arith.constant 7 : i32
    %67 = vector.broadcast %c7_i32_32 : i32 to vector<128x128xi32>
    %68 = arith.cmpi sle, %8, %67 : vector<128x128xi32>
    %69 = arith.andi %66, %68 : vector<128x128xi1>
    %c1_i32_33 = arith.constant 1 : i32
    %70 = vector.broadcast %c1_i32_33 : i32 to vector<128x128xi32>
    %71 = arith.cmpi sge, %11, %70 : vector<128x128xi32>
    %72 = arith.andi %69, %71 : vector<128x128xi1>
    %c8_i32_34 = arith.constant 8 : i32
    %73 = vector.broadcast %c8_i32_34 : i32 to vector<128x128xi32>
    %74 = arith.cmpi sle, %11, %73 : vector<128x128xi32>
    %75 = arith.andi %72, %74 : vector<128x128xi1>
    %cst_35 = arith.constant 0.000000e+00 : bf16
    %76 = vector.broadcast %cst_35 : bf16 to vector<128x128xbf16>
    %77 = arith.select %75, %64, %76 : vector<128x128xi1>, vector<128x128xbf16>
    %c384 = arith.constant 384 : index
    %c0_36 = arith.constant 0 : index
    %78 = vector.load %arg5[%c384, %c0_36] : memref<1152x64xbf16, #tpu.memory_space<vmem>>, vector<128x64xbf16>
    %cst_37 = arith.constant dense<0.000000e+00> : vector<128x64xf32>
    %79 = tpu.matmul %77, %78, %cst_37 {dimension_numbers = #tpu.dot_dimension_numbers<[1], [0], [0], [1], [0, 0, 1, 1], [], []>} : vector<128x128xbf16>, vector<128x64xbf16>, vector<128x64xf32> -> vector<128x64xf32>
    %80 = arith.addf %63, %79 : vector<128x64xf32>
    %c16_38 = arith.constant 16 : index
    %c0_39 = arith.constant 0 : index
    %81 = vector.load %arg16[%c16_38, %c0_39] : memref<160x128xbf16, #tpu.memory_space<vmem>>, vector<128x128xbf16>
    %c512 = arith.constant 512 : index
    %c0_40 = arith.constant 0 : index
    %82 = vector.load %arg5[%c512, %c0_40] : memref<1152x64xbf16, #tpu.memory_space<vmem>>, vector<128x64xbf16>
    %cst_41 = arith.constant dense<0.000000e+00> : vector<128x64xf32>
    %83 = tpu.matmul %81, %82, %cst_41 {dimension_numbers = #tpu.dot_dimension_numbers<[1], [0], [0], [1], [0, 0, 1, 1], [], []>} : vector<128x128xbf16>, vector<128x64xbf16>, vector<128x64xf32> -> vector<128x64xf32>
    %84 = arith.addf %80, %83 : vector<128x64xf32>
    %c17 = arith.constant 17 : index
    %c0_42 = arith.constant 0 : index
    %85 = vector.load %arg16[%c17, %c0_42] : memref<160x128xbf16, #tpu.memory_space<vmem>>, vector<128x128xbf16>
    %c0_i32_43 = arith.constant 0 : i32
    %86 = vector.broadcast %c0_i32_43 : i32 to vector<128x128xi32>
    %87 = arith.cmpi sge, %8, %86 : vector<128x128xi32>
    %c7_i32_44 = arith.constant 7 : i32
    %88 = vector.broadcast %c7_i32_44 : i32 to vector<128x128xi32>
    %89 = arith.cmpi sle, %8, %88 : vector<128x128xi32>
    %90 = arith.andi %87, %89 : vector<128x128xi1>
    %c-1_i32_45 = arith.constant -1 : i32
    %91 = vector.broadcast %c-1_i32_45 : i32 to vector<128x128xi32>
    %92 = arith.cmpi sge, %11, %91 : vector<128x128xi32>
    %93 = arith.andi %90, %92 : vector<128x128xi1>
    %c6_i32_46 = arith.constant 6 : i32
    %94 = vector.broadcast %c6_i32_46 : i32 to vector<128x128xi32>
    %95 = arith.cmpi sle, %11, %94 : vector<128x128xi32>
    %96 = arith.andi %93, %95 : vector<128x128xi1>
    %cst_47 = arith.constant 0.000000e+00 : bf16
    %97 = vector.broadcast %cst_47 : bf16 to vector<128x128xbf16>
    %98 = arith.select %96, %85, %97 : vector<128x128xi1>, vector<128x128xbf16>
    %c640 = arith.constant 640 : index
    %c0_48 = arith.constant 0 : index
    %99 = vector.load %arg5[%c640, %c0_48] : memref<1152x64xbf16, #tpu.memory_space<vmem>>, vector<128x64xbf16>
    %cst_49 = arith.constant dense<0.000000e+00> : vector<128x64xf32>
    %100 = tpu.matmul %98, %99, %cst_49 {dimension_numbers = #tpu.dot_dimension_numbers<[1], [0], [0], [1], [0, 0, 1, 1], [], []>} : vector<128x128xbf16>, vector<128x64xbf16>, vector<128x64xf32> -> vector<128x64xf32>
    %101 = arith.addf %84, %100 : vector<128x64xf32>
    %c23 = arith.constant 23 : index
    %c0_50 = arith.constant 0 : index
    %102 = vector.load %arg16[%c23, %c0_50] : memref<160x128xbf16, #tpu.memory_space<vmem>>, vector<128x128xbf16>
    %c-1_i32_51 = arith.constant -1 : i32
    %103 = vector.broadcast %c-1_i32_51 : i32 to vector<128x128xi32>
    %104 = arith.cmpi sge, %8, %103 : vector<128x128xi32>
    %c6_i32_52 = arith.constant 6 : i32
    %105 = vector.broadcast %c6_i32_52 : i32 to vector<128x128xi32>
    %106 = arith.cmpi sle, %8, %105 : vector<128x128xi32>
    %107 = arith.andi %104, %106 : vector<128x128xi1>
    %c1_i32_53 = arith.constant 1 : i32
    %108 = vector.broadcast %c1_i32_53 : i32 to vector<128x128xi32>
    %109 = arith.cmpi sge, %11, %108 : vector<128x128xi32>
    %110 = arith.andi %107, %109 : vector<128x128xi1>
    %c8_i32_54 = arith.constant 8 : i32
    %111 = vector.broadcast %c8_i32_54 : i32 to vector<128x128xi32>
    %112 = arith.cmpi sle, %11, %111 : vector<128x128xi32>
    %113 = arith.andi %110, %112 : vector<128x128xi1>
    %cst_55 = arith.constant 0.000000e+00 : bf16
    %114 = vector.broadcast %cst_55 : bf16 to vector<128x128xbf16>
    %115 = arith.select %113, %102, %114 : vector<128x128xi1>, vector<128x128xbf16>
    %c768 = arith.constant 768 : index
    %c0_56 = arith.constant 0 : index
    %116 = vector.load %arg5[%c768, %c0_56] : memref<1152x64xbf16, #tpu.memory_space<vmem>>, vector<128x64xbf16>
    %cst_57 = arith.constant dense<0.000000e+00> : vector<128x64xf32>
    %117 = tpu.matmul %115, %116, %cst_57 {dimension_numbers = #tpu.dot_dimension_numbers<[1], [0], [0], [1], [0, 0, 1, 1], [], []>} : vector<128x128xbf16>, vector<128x64xbf16>, vector<128x64xf32> -> vector<128x64xf32>
    %118 = arith.addf %101, %117 : vector<128x64xf32>
    %c24 = arith.constant 24 : index
    %c0_58 = arith.constant 0 : index
    %119 = vector.load %arg16[%c24, %c0_58] : memref<160x128xbf16, #tpu.memory_space<vmem>>, vector<128x128xbf16>
    %c-1_i32_59 = arith.constant -1 : i32
    %120 = vector.broadcast %c-1_i32_59 : i32 to vector<128x128xi32>
    %121 = arith.cmpi sge, %8, %120 : vector<128x128xi32>
    %c6_i32_60 = arith.constant 6 : i32
    %122 = vector.broadcast %c6_i32_60 : i32 to vector<128x128xi32>
    %123 = arith.cmpi sle, %8, %122 : vector<128x128xi32>
    %124 = arith.andi %121, %123 : vector<128x128xi1>
    %c0_i32_61 = arith.constant 0 : i32
    %125 = vector.broadcast %c0_i32_61 : i32 to vector<128x128xi32>
    %126 = arith.cmpi sge, %11, %125 : vector<128x128xi32>
    %127 = arith.andi %124, %126 : vector<128x128xi1>
    %c7_i32_62 = arith.constant 7 : i32
    %128 = vector.broadcast %c7_i32_62 : i32 to vector<128x128xi32>
    %129 = arith.cmpi sle, %11, %128 : vector<128x128xi32>
    %130 = arith.andi %127, %129 : vector<128x128xi1>
    %cst_63 = arith.constant 0.000000e+00 : bf16
    %131 = vector.broadcast %cst_63 : bf16 to vector<128x128xbf16>
    %132 = arith.select %130, %119, %131 : vector<128x128xi1>, vector<128x128xbf16>
    %c896 = arith.constant 896 : index
    %c0_64 = arith.constant 0 : index
    %133 = vector.load %arg5[%c896, %c0_64] : memref<1152x64xbf16, #tpu.memory_space<vmem>>, vector<128x64xbf16>
    %cst_65 = arith.constant dense<0.000000e+00> : vector<128x64xf32>
    %134 = tpu.matmul %132, %133, %cst_65 {dimension_numbers = #tpu.dot_dimension_numbers<[1], [0], [0], [1], [0, 0, 1, 1], [], []>} : vector<128x128xbf16>, vector<128x64xbf16>, vector<128x64xf32> -> vector<128x64xf32>
    %135 = arith.addf %118, %134 : vector<128x64xf32>
    %c25 = arith.constant 25 : index
    %c0_66 = arith.constant 0 : index
    %136 = vector.load %arg16[%c25, %c0_66] : memref<160x128xbf16, #tpu.memory_space<vmem>>, vector<128x128xbf16>
    %c-1_i32_67 = arith.constant -1 : i32
    %137 = vector.broadcast %c-1_i32_67 : i32 to vector<128x128xi32>
    %138 = arith.cmpi sge, %8, %137 : vector<128x128xi32>
    %c6_i32_68 = arith.constant 6 : i32
    %139 = vector.broadcast %c6_i32_68 : i32 to vector<128x128xi32>
    %140 = arith.cmpi sle, %8, %139 : vector<128x128xi32>
    %141 = arith.andi %138, %140 : vector<128x128xi1>
    %c-1_i32_69 = arith.constant -1 : i32
    %142 = vector.broadcast %c-1_i32_69 : i32 to vector<128x128xi32>
    %143 = arith.cmpi sge, %11, %142 : vector<128x128xi32>
    %144 = arith.andi %141, %143 : vector<128x128xi1>
    %c6_i32_70 = arith.constant 6 : i32
    %145 = vector.broadcast %c6_i32_70 : i32 to vector<128x128xi32>
    %146 = arith.cmpi sle, %11, %145 : vector<128x128xi32>
    %147 = arith.andi %144, %146 : vector<128x128xi1>
    %cst_71 = arith.constant 0.000000e+00 : bf16
    %148 = vector.broadcast %cst_71 : bf16 to vector<128x128xbf16>
    %149 = arith.select %147, %136, %148 : vector<128x128xi1>, vector<128x128xbf16>
    %c1024 = arith.constant 1024 : index
    %c0_72 = arith.constant 0 : index
    %150 = vector.load %arg5[%c1024, %c0_72] : memref<1152x64xbf16, #tpu.memory_space<vmem>>, vector<128x64xbf16>
    %cst_73 = arith.constant dense<0.000000e+00> : vector<128x64xf32>
    %151 = tpu.matmul %149, %150, %cst_73 {dimension_numbers = #tpu.dot_dimension_numbers<[1], [0], [0], [1], [0, 0, 1, 1], [], []>} : vector<128x128xbf16>, vector<128x64xbf16>, vector<128x64xf32> -> vector<128x64xf32>
    %152 = arith.addf %135, %151 : vector<128x64xf32>
    %c0_74 = arith.constant 0 : index
    %c0_75 = arith.constant 0 : index
    %153 = vector.load %arg6[%c0_74, %c0_75] : memref<1x64xf32, #tpu.memory_space<vmem>>, vector<1x64xf32>
    %154 = vector.broadcast %153 : vector<1x64xf32> to vector<128x64xf32>
    %155 = arith.mulf %152, %154 : vector<128x64xf32>
    %c0_76 = arith.constant 0 : index
    %c0_77 = arith.constant 0 : index
    %156 = vector.load %arg7[%c0_76, %c0_77] : memref<1x64xf32, #tpu.memory_space<vmem>>, vector<1x64xf32>
    %157 = vector.broadcast %156 : vector<1x64xf32> to vector<128x64xf32>
    %158 = arith.addf %155, %157 : vector<128x64xf32>
    %cst_78 = arith.constant 0.000000e+00 : f32
    %159 = vector.broadcast %cst_78 : f32 to vector<128x64xf32>
    %160 = arith.maximumf %158, %159 : vector<128x64xf32>
    %c0_79 = arith.constant 0 : index
    %c0_80 = arith.constant 0 : index
    %161 = vector.load %arg17[%c0_79, %c0_80] : memref<128x64xf32, #tpu.memory_space<vmem>>, vector<128x64xf32>
    tpu.vector_store %arg17[%c0_79, %c0_80], %160 {strides = array<i32>} : memref<128x64xf32, #tpu.memory_space<vmem>>, vector<128x64xf32>,
    %c0_81 = arith.constant 0 : index
    %c0_82 = arith.constant 0 : index
    %162 = tpu.strided_load %arg17[%c0_81, %c0_82] {strides = array<i32: 2, 1>} : memref<128x64xf32, #tpu.memory_space<vmem>>, vector<64x64xf32>
    %c1 = arith.constant 1 : index
    %c0_83 = arith.constant 0 : index
    %163 = tpu.strided_load %arg17[%c1, %c0_83] {strides = array<i32: 2, 1>} : memref<128x64xf32, #tpu.memory_space<vmem>>, vector<64x64xf32>
    %164 = arith.maximumf %162, %163 : vector<64x64xf32>
    %cst_84 = arith.constant 0.000000e+00 : bf16
    %165 = vector.broadcast %cst_84 : bf16 to vector<8x64xbf16>
    %c0_85 = arith.constant 0 : index
    %c0_86 = arith.constant 0 : index
    %166 = vector.load %arg18[%c0_85, %c0_86] : memref<48x64xbf16, #tpu.memory_space<vmem>>, vector<8x64xbf16>
    tpu.vector_store %arg18[%c0_85, %c0_86], %165 {strides = array<i32>} : memref<48x64xbf16, #tpu.memory_space<vmem>>, vector<8x64xbf16>,
    %cst_87 = arith.constant 0.000000e+00 : bf16
    %167 = vector.broadcast %cst_87 : bf16 to vector<8x64xbf16>
    %c40 = arith.constant 40 : index
    %c0_88 = arith.constant 0 : index
    %168 = vector.load %arg18[%c40, %c0_88] : memref<48x64xbf16, #tpu.memory_space<vmem>>, vector<8x64xbf16>
    tpu.vector_store %arg18[%c40, %c0_88], %167 {strides = array<i32>} : memref<48x64xbf16, #tpu.memory_space<vmem>>, vector<8x64xbf16>,
    %169 = vector.extract_strided_slice %164 {offsets = [0, 0], sizes = [4, 64], strides = [1, 1]} : vector<64x64xf32> to vector<4x64xf32>
    %170 = vector.extract_strided_slice %164 {offsets = [4, 0], sizes = [4, 64], strides = [1, 1]} : vector<64x64xf32> to vector<4x64xf32>
    %171 = arith.maximumf %169, %170 : vector<4x64xf32>
    %172 = arith.truncf %171 : vector<4x64xf32> to vector<4x64xbf16>
    %c8_89 = arith.constant 8 : index
    %c0_90 = arith.constant 0 : index
    %173 = vector.load %arg18[%c8_89, %c0_90] : memref<48x64xbf16, #tpu.memory_space<vmem>>, vector<4x64xbf16>
    tpu.vector_store %arg18[%c8_89, %c0_90], %172 {strides = array<i32>} : memref<48x64xbf16, #tpu.memory_space<vmem>>, vector<4x64xbf16>,
    %174 = vector.extract_strided_slice %164 {offsets = [8, 0], sizes = [4, 64], strides = [1, 1]} : vector<64x64xf32> to vector<4x64xf32>
    %175 = vector.extract_strided_slice %164 {offsets = [12, 0], sizes = [4, 64], strides = [1, 1]} : vector<64x64xf32> to vector<4x64xf32>
    %176 = arith.maximumf %174, %175 : vector<4x64xf32>
    %177 = arith.truncf %176 : vector<4x64xf32> to vector<4x64xbf16>
    %c12 = arith.constant 12 : index
    %c0_91 = arith.constant 0 : index
    %178 = vector.load %arg18[%c12, %c0_91] : memref<48x64xbf16, #tpu.memory_space<vmem>>, vector<4x64xbf16>
    tpu.vector_store %arg18[%c12, %c0_91], %177 {strides = array<i32>} : memref<48x64xbf16, #tpu.memory_space<vmem>>, vector<4x64xbf16>,
    %179 = vector.extract_strided_slice %164 {offsets = [16, 0], sizes = [4, 64], strides = [1, 1]} : vector<64x64xf32> to vector<4x64xf32>
    %180 = vector.extract_strided_slice %164 {offsets = [20, 0], sizes = [4, 64], strides = [1, 1]} : vector<64x64xf32> to vector<4x64xf32>
    %181 = arith.maximumf %179, %180 : vector<4x64xf32>
    %182 = arith.truncf %181 : vector<4x64xf32> to vector<4x64xbf16>
    %c16_92 = arith.constant 16 : index
    %c0_93 = arith.constant 0 : index
    %183 = vector.load %arg18[%c16_92, %c0_93] : memref<48x64xbf16, #tpu.memory_space<vmem>>, vector<4x64xbf16>
    tpu.vector_store %arg18[%c16_92, %c0_93], %182 {strides = array<i32>} : memref<48x64xbf16, #tpu.memory_space<vmem>>, vector<4x64xbf16>,
    %184 = vector.extract_strided_slice %164 {offsets = [24, 0], sizes = [4, 64], strides = [1, 1]} : vector<64x64xf32> to vector<4x64xf32>
    %185 = vector.extract_strided_slice %164 {offsets = [28, 0], sizes = [4, 64], strides = [1, 1]} : vector<64x64xf32> to vector<4x64xf32>
    %186 = arith.maximumf %184, %185 : vector<4x64xf32>
    %187 = arith.truncf %186 : vector<4x64xf32> to vector<4x64xbf16>
    %c20 = arith.constant 20 : index
    %c0_94 = arith.constant 0 : index
    %188 = vector.load %arg18[%c20, %c0_94] : memref<48x64xbf16, #tpu.memory_space<vmem>>, vector<4x64xbf16>
    tpu.vector_store %arg18[%c20, %c0_94], %187 {strides = array<i32>} : memref<48x64xbf16, #tpu.memory_space<vmem>>, vector<4x64xbf16>,
    %189 = vector.extract_strided_slice %164 {offsets = [32, 0], sizes = [4, 64], strides = [1, 1]} : vector<64x64xf32> to vector<4x64xf32>
    %190 = vector.extract_strided_slice %164 {offsets = [36, 0], sizes = [4, 64], strides = [1, 1]} : vector<64x64xf32> to vector<4x64xf32>
    %191 = arith.maximumf %189, %190 : vector<4x64xf32>
    %192 = arith.truncf %191 : vector<4x64xf32> to vector<4x64xbf16>
    %c24_95 = arith.constant 24 : index
    %c0_96 = arith.constant 0 : index
    %193 = vector.load %arg18[%c24_95, %c0_96] : memref<48x64xbf16, #tpu.memory_space<vmem>>, vector<4x64xbf16>
    tpu.vector_store %arg18[%c24_95, %c0_96], %192 {strides = array<i32>} : memref<48x64xbf16, #tpu.memory_space<vmem>>, vector<4x64xbf16>,
    %194 = vector.extract_strided_slice %164 {offsets = [40, 0], sizes = [4, 64], strides = [1, 1]} : vector<64x64xf32> to vector<4x64xf32>
    %195 = vector.extract_strided_slice %164 {offsets = [44, 0], sizes = [4, 64], strides = [1, 1]} : vector<64x64xf32> to vector<4x64xf32>
    %196 = arith.maximumf %194, %195 : vector<4x64xf32>
    %197 = arith.truncf %196 : vector<4x64xf32> to vector<4x64xbf16>
    %c28 = arith.constant 28 : index
    %c0_97 = arith.constant 0 : index
    %198 = vector.load %arg18[%c28, %c0_97] : memref<48x64xbf16, #tpu.memory_space<vmem>>, vector<4x64xbf16>
    tpu.vector_store %arg18[%c28, %c0_97], %197 {strides = array<i32>} : memref<48x64xbf16, #tpu.memory_space<vmem>>, vector<4x64xbf16>,
    %199 = vector.extract_strided_slice %164 {offsets = [48, 0], sizes = [4, 64], strides = [1, 1]} : vector<64x64xf32> to vector<4x64xf32>
    %200 = vector.extract_strided_slice %164 {offsets = [52, 0], sizes = [4, 64], strides = [1, 1]} : vector<64x64xf32> to vector<4x64xf32>
    %201 = arith.maximumf %199, %200 : vector<4x64xf32>
    %202 = arith.truncf %201 : vector<4x64xf32> to vector<4x64xbf16>
    %c32 = arith.constant 32 : index
    %c0_98 = arith.constant 0 : index
    %203 = vector.load %arg18[%c32, %c0_98] : memref<48x64xbf16, #tpu.memory_space<vmem>>, vector<4x64xbf16>
    tpu.vector_store %arg18[%c32, %c0_98], %202 {strides = array<i32>} : memref<48x64xbf16, #tpu.memory_space<vmem>>, vector<4x64xbf16>,
    %204 = vector.extract_strided_slice %164 {offsets = [56, 0], sizes = [4, 64], strides = [1, 1]} : vector<64x64xf32> to vector<4x64xf32>
    %205 = vector.extract_strided_slice %164 {offsets = [60, 0], sizes = [4, 64], strides = [1, 1]} : vector<64x64xf32> to vector<4x64xf32>
    %206 = arith.maximumf %204, %205 : vector<4x64xf32>
    %207 = arith.truncf %206 : vector<4x64xf32> to vector<4x64xbf16>
    %c36 = arith.constant 36 : index
    %c0_99 = arith.constant 0 : index
    %208 = vector.load %arg18[%c36, %c0_99] : memref<48x64xbf16, #tpu.memory_space<vmem>>, vector<4x64xbf16>
    tpu.vector_store %arg18[%c36, %c0_99], %207 {strides = array<i32>} : memref<48x64xbf16, #tpu.memory_space<vmem>>, vector<4x64xbf16>,
    %c0_100 = arith.constant 0 : index
    %c0_101 = arith.constant 0 : index
    %209 = vector.load %arg3[%c0_100, %c0_101] : memref<32x1xi32, #tpu.memory_space<vmem>>, vector<32x1xi32>
    %210 = vector.shape_cast %209 : vector<32x1xi32> to vector<32x1xi32>
    %211 = vector.broadcast %210 : vector<32x1xi32> to vector<32x64xi32>
    %c0_102 = arith.constant 0 : index
    %c0_103 = arith.constant 0 : index
    %212 = vector.load %arg4[%c0_102, %c0_103] : memref<32x1xi32, #tpu.memory_space<vmem>>, vector<32x1xi32>
    %213 = vector.shape_cast %212 : vector<32x1xi32> to vector<32x1xi32>
    %214 = vector.broadcast %213 : vector<32x1xi32> to vector<32x64xi32>
    %cst_104 = arith.constant 0.000000e+00 : f32
    %215 = vector.broadcast %cst_104 : f32 to vector<32x64xf32>
    %c3 = arith.constant 3 : index
    %c0_105 = arith.constant 0 : index
    %216 = vector.load %arg18[%c3, %c0_105] : memref<48x64xbf16, #tpu.memory_space<vmem>>, vector<32x64xbf16>
    %c1_i32_106 = arith.constant 1 : i32
    %217 = vector.broadcast %c1_i32_106 : i32 to vector<32x64xi32>
    %218 = arith.cmpi sge, %211, %217 : vector<32x64xi32>
    %c4_i32 = arith.constant 4 : i32
    %219 = vector.broadcast %c4_i32 : i32 to vector<32x64xi32>
    %220 = arith.cmpi sle, %211, %219 : vector<32x64xi32>
    %221 = arith.andi %218, %220 : vector<32x64xi1>
    %c1_i32_107 = arith.constant 1 : i32
    %222 = vector.broadcast %c1_i32_107 : i32 to vector<32x64xi32>
    %223 = arith.cmpi sge, %214, %222 : vector<32x64xi32>
    %224 = arith.andi %221, %223 : vector<32x64xi1>
    %c4_i32_108 = arith.constant 4 : i32
    %225 = vector.broadcast %c4_i32_108 : i32 to vector<32x64xi32>
    %226 = arith.cmpi sle, %214, %225 : vector<32x64xi32>
    %227 = arith.andi %224, %226 : vector<32x64xi1>
    %cst_109 = arith.constant 0.000000e+00 : bf16
    %228 = vector.broadcast %cst_109 : bf16 to vector<32x64xbf16>
    %229 = arith.select %227, %216, %228 : vector<32x64xi1>, vector<32x64xbf16>
    %c0_110 = arith.constant 0 : index
    %c0_111 = arith.constant 0 : index
    %230 = vector.load %arg8[%c0_110, %c0_111] : memref<576x64xbf16, #tpu.memory_space<vmem>>, vector<64x64xbf16>
    %cst_112 = arith.constant dense<0.000000e+00> : vector<32x64xf32>
    %231 = tpu.matmul %229, %230, %cst_112 {dimension_numbers = #tpu.dot_dimension_numbers<[1], [0], [0], [1], [0, 0, 1, 1], [], []>} : vector<32x64xbf16>, vector<64x64xbf16>, vector<32x64xf32> -> vector<32x64xf32>
    %232 = arith.addf %215, %231 : vector<32x64xf32>
    %c4 = arith.constant 4 : index
    %c0_113 = arith.constant 0 : index
    %233 = vector.load %arg18[%c4, %c0_113] : memref<48x64xbf16, #tpu.memory_space<vmem>>, vector<32x64xbf16>
    %c1_i32_114 = arith.constant 1 : i32
    %234 = vector.broadcast %c1_i32_114 : i32 to vector<32x64xi32>
    %235 = arith.cmpi sge, %211, %234 : vector<32x64xi32>
    %c4_i32_115 = arith.constant 4 : i32
    %236 = vector.broadcast %c4_i32_115 : i32 to vector<32x64xi32>
    %237 = arith.cmpi sle, %211, %236 : vector<32x64xi32>
    %238 = arith.andi %235, %237 : vector<32x64xi1>
    %c0_i32_116 = arith.constant 0 : i32
    %239 = vector.broadcast %c0_i32_116 : i32 to vector<32x64xi32>
    %240 = arith.cmpi sge, %214, %239 : vector<32x64xi32>
    %241 = arith.andi %238, %240 : vector<32x64xi1>
    %c3_i32 = arith.constant 3 : i32
    %242 = vector.broadcast %c3_i32 : i32 to vector<32x64xi32>
    %243 = arith.cmpi sle, %214, %242 : vector<32x64xi32>
    %244 = arith.andi %241, %243 : vector<32x64xi1>
    %cst_117 = arith.constant 0.000000e+00 : bf16
    %245 = vector.broadcast %cst_117 : bf16 to vector<32x64xbf16>
    %246 = arith.select %244, %233, %245 : vector<32x64xi1>, vector<32x64xbf16>
    %c64 = arith.constant 64 : index
    %c0_118 = arith.constant 0 : index
    %247 = vector.load %arg8[%c64, %c0_118] : memref<576x64xbf16, #tpu.memory_space<vmem>>, vector<64x64xbf16>
    %cst_119 = arith.constant dense<0.000000e+00> : vector<32x64xf32>
    %248 = tpu.matmul %246, %247, %cst_119 {dimension_numbers = #tpu.dot_dimension_numbers<[1], [0], [0], [1], [0, 0, 1, 1], [], []>} : vector<32x64xbf16>, vector<64x64xbf16>, vector<32x64xf32> -> vector<32x64xf32>
    %249 = arith.addf %232, %248 : vector<32x64xf32>
    %c5 = arith.constant 5 : index
    %c0_120 = arith.constant 0 : index
    %250 = vector.load %arg18[%c5, %c0_120] : memref<48x64xbf16, #tpu.memory_space<vmem>>, vector<32x64xbf16>
    %c1_i32_121 = arith.constant 1 : i32
    %251 = vector.broadcast %c1_i32_121 : i32 to vector<32x64xi32>
    %252 = arith.cmpi sge, %211, %251 : vector<32x64xi32>
    %c4_i32_122 = arith.constant 4 : i32
    %253 = vector.broadcast %c4_i32_122 : i32 to vector<32x64xi32>
    %254 = arith.cmpi sle, %211, %253 : vector<32x64xi32>
    %255 = arith.andi %252, %254 : vector<32x64xi1>
    %c-1_i32_123 = arith.constant -1 : i32
    %256 = vector.broadcast %c-1_i32_123 : i32 to vector<32x64xi32>
    %257 = arith.cmpi sge, %214, %256 : vector<32x64xi32>
    %258 = arith.andi %255, %257 : vector<32x64xi1>
    %c2_i32 = arith.constant 2 : i32
    %259 = vector.broadcast %c2_i32 : i32 to vector<32x64xi32>
    %260 = arith.cmpi sle, %214, %259 : vector<32x64xi32>
    %261 = arith.andi %258, %260 : vector<32x64xi1>
    %cst_124 = arith.constant 0.000000e+00 : bf16
    %262 = vector.broadcast %cst_124 : bf16 to vector<32x64xbf16>
    %263 = arith.select %261, %250, %262 : vector<32x64xi1>, vector<32x64xbf16>
    %c128_125 = arith.constant 128 : index
    %c0_126 = arith.constant 0 : index
    %264 = vector.load %arg8[%c128_125, %c0_126] : memref<576x64xbf16, #tpu.memory_space<vmem>>, vector<64x64xbf16>
    %cst_127 = arith.constant dense<0.000000e+00> : vector<32x64xf32>
    %265 = tpu.matmul %263, %264, %cst_127 {dimension_numbers = #tpu.dot_dimension_numbers<[1], [0], [0], [1], [0, 0, 1, 1], [], []>} : vector<32x64xbf16>, vector<64x64xbf16>, vector<32x64xf32> -> vector<32x64xf32>
    %266 = arith.addf %249, %265 : vector<32x64xf32>
    %c7_128 = arith.constant 7 : index
    %c0_129 = arith.constant 0 : index
    %267 = vector.load %arg18[%c7_128, %c0_129] : memref<48x64xbf16, #tpu.memory_space<vmem>>, vector<32x64xbf16>
    %c0_i32_130 = arith.constant 0 : i32
    %268 = vector.broadcast %c0_i32_130 : i32 to vector<32x64xi32>
    %269 = arith.cmpi sge, %211, %268 : vector<32x64xi32>
    %c3_i32_131 = arith.constant 3 : i32
    %270 = vector.broadcast %c3_i32_131 : i32 to vector<32x64xi32>
    %271 = arith.cmpi sle, %211, %270 : vector<32x64xi32>
    %272 = arith.andi %269, %271 : vector<32x64xi1>
    %c1_i32_132 = arith.constant 1 : i32
    %273 = vector.broadcast %c1_i32_132 : i32 to vector<32x64xi32>
    %274 = arith.cmpi sge, %214, %273 : vector<32x64xi32>
    %275 = arith.andi %272, %274 : vector<32x64xi1>
    %c4_i32_133 = arith.constant 4 : i32
    %276 = vector.broadcast %c4_i32_133 : i32 to vector<32x64xi32>
    %277 = arith.cmpi sle, %214, %276 : vector<32x64xi32>
    %278 = arith.andi %275, %277 : vector<32x64xi1>
    %cst_134 = arith.constant 0.000000e+00 : bf16
    %279 = vector.broadcast %cst_134 : bf16 to vector<32x64xbf16>
    %280 = arith.select %278, %267, %279 : vector<32x64xi1>, vector<32x64xbf16>
    %c192 = arith.constant 192 : index
    %c0_135 = arith.constant 0 : index
    %281 = vector.load %arg8[%c192, %c0_135] : memref<576x64xbf16, #tpu.memory_space<vmem>>, vector<64x64xbf16>
    %cst_136 = arith.constant dense<0.000000e+00> : vector<32x64xf32>
    %282 = tpu.matmul %280, %281, %cst_136 {dimension_numbers = #tpu.dot_dimension_numbers<[1], [0], [0], [1], [0, 0, 1, 1], [], []>} : vector<32x64xbf16>, vector<64x64xbf16>, vector<32x64xf32> -> vector<32x64xf32>
    %283 = arith.addf %266, %282 : vector<32x64xf32>
    %c8_137 = arith.constant 8 : index
    %c0_138 = arith.constant 0 : index
    %284 = vector.load %arg18[%c8_137, %c0_138] : memref<48x64xbf16, #tpu.memory_space<vmem>>, vector<32x64xbf16>
    %c256_139 = arith.constant 256 : index
    %c0_140 = arith.constant 0 : index
    %285 = vector.load %arg8[%c256_139, %c0_140] : memref<576x64xbf16, #tpu.memory_space<vmem>>, vector<64x64xbf16>
    %cst_141 = arith.constant dense<0.000000e+00> : vector<32x64xf32>
    %286 = tpu.matmul %284, %285, %cst_141 {dimension_numbers = #tpu.dot_dimension_numbers<[1], [0], [0], [1], [0, 0, 1, 1], [], []>} : vector<32x64xbf16>, vector<64x64xbf16>, vector<32x64xf32> -> vector<32x64xf32>
    %287 = arith.addf %283, %286 : vector<32x64xf32>
    %c9_142 = arith.constant 9 : index
    %c0_143 = arith.constant 0 : index
    %288 = vector.load %arg18[%c9_142, %c0_143] : memref<48x64xbf16, #tpu.memory_space<vmem>>, vector<32x64xbf16>
    %c0_i32_144 = arith.constant 0 : i32
    %289 = vector.broadcast %c0_i32_144 : i32 to vector<32x64xi32>
    %290 = arith.cmpi sge, %211, %289 : vector<32x64xi32>
    %c3_i32_145 = arith.constant 3 : i32
    %291 = vector.broadcast %c3_i32_145 : i32 to vector<32x64xi32>
    %292 = arith.cmpi sle, %211, %291 : vector<32x64xi32>
    %293 = arith.andi %290, %292 : vector<32x64xi1>
    %c-1_i32_146 = arith.constant -1 : i32
    %294 = vector.broadcast %c-1_i32_146 : i32 to vector<32x64xi32>
    %295 = arith.cmpi sge, %214, %294 : vector<32x64xi32>
    %296 = arith.andi %293, %295 : vector<32x64xi1>
    %c2_i32_147 = arith.constant 2 : i32
    %297 = vector.broadcast %c2_i32_147 : i32 to vector<32x64xi32>
    %298 = arith.cmpi sle, %214, %297 : vector<32x64xi32>
    %299 = arith.andi %296, %298 : vector<32x64xi1>
    %cst_148 = arith.constant 0.000000e+00 : bf16
    %300 = vector.broadcast %cst_148 : bf16 to vector<32x64xbf16>
    %301 = arith.select %299, %288, %300 : vector<32x64xi1>, vector<32x64xbf16>
    %c320 = arith.constant 320 : index
    %c0_149 = arith.constant 0 : index
    %302 = vector.load %arg8[%c320, %c0_149] : memref<576x64xbf16, #tpu.memory_space<vmem>>, vector<64x64xbf16>
    %cst_150 = arith.constant dense<0.000000e+00> : vector<32x64xf32>
    %303 = tpu.matmul %301, %302, %cst_150 {dimension_numbers = #tpu.dot_dimension_numbers<[1], [0], [0], [1], [0, 0, 1, 1], [], []>} : vector<32x64xbf16>, vector<64x64xbf16>, vector<32x64xf32> -> vector<32x64xf32>
    %304 = arith.addf %287, %303 : vector<32x64xf32>
    %c11 = arith.constant 11 : index
    %c0_151 = arith.constant 0 : index
    %305 = vector.load %arg18[%c11, %c0_151] : memref<48x64xbf16, #tpu.memory_space<vmem>>, vector<32x64xbf16>
    %c-1_i32_152 = arith.constant -1 : i32
    %306 = vector.broadcast %c-1_i32_152 : i32 to vector<32x64xi32>
    %307 = arith.cmpi sge, %211, %306 : vector<32x64xi32>
    %c2_i32_153 = arith.constant 2 : i32
    %308 = vector.broadcast %c2_i32_153 : i32 to vector<32x64xi32>
    %309 = arith.cmpi sle, %211, %308 : vector<32x64xi32>
    %310 = arith.andi %307, %309 : vector<32x64xi1>
    %c1_i32_154 = arith.constant 1 : i32
    %311 = vector.broadcast %c1_i32_154 : i32 to vector<32x64xi32>
    %312 = arith.cmpi sge, %214, %311 : vector<32x64xi32>
    %313 = arith.andi %310, %312 : vector<32x64xi1>
    %c4_i32_155 = arith.constant 4 : i32
    %314 = vector.broadcast %c4_i32_155 : i32 to vector<32x64xi32>
    %315 = arith.cmpi sle, %214, %314 : vector<32x64xi32>
    %316 = arith.andi %313, %315 : vector<32x64xi1>
    %cst_156 = arith.constant 0.000000e+00 : bf16
    %317 = vector.broadcast %cst_156 : bf16 to vector<32x64xbf16>
    %318 = arith.select %316, %305, %317 : vector<32x64xi1>, vector<32x64xbf16>
    %c384_157 = arith.constant 384 : index
    %c0_158 = arith.constant 0 : index
    %319 = vector.load %arg8[%c384_157, %c0_158] : memref<576x64xbf16, #tpu.memory_space<vmem>>, vector<64x64xbf16>
    %cst_159 = arith.constant dense<0.000000e+00> : vector<32x64xf32>
    %320 = tpu.matmul %318, %319, %cst_159 {dimension_numbers = #tpu.dot_dimension_numbers<[1], [0], [0], [1], [0, 0, 1, 1], [], []>} : vector<32x64xbf16>, vector<64x64xbf16>, vector<32x64xf32> -> vector<32x64xf32>
    %321 = arith.addf %304, %320 : vector<32x64xf32>
    %c12_160 = arith.constant 12 : index
    %c0_161 = arith.constant 0 : index
    %322 = vector.load %arg18[%c12_160, %c0_161] : memref<48x64xbf16, #tpu.memory_space<vmem>>, vector<32x64xbf16>
    %c-1_i32_162 = arith.constant -1 : i32
    %323 = vector.broadcast %c-1_i32_162 : i32 to vector<32x64xi32>
    %324 = arith.cmpi sge, %211, %323 : vector<32x64xi32>
    %c2_i32_163 = arith.constant 2 : i32
    %325 = vector.broadcast %c2_i32_163 : i32 to vector<32x64xi32>
    %326 = arith.cmpi sle, %211, %325 : vector<32x64xi32>
    %327 = arith.andi %324, %326 : vector<32x64xi1>
    %c0_i32_164 = arith.constant 0 : i32
    %328 = vector.broadcast %c0_i32_164 : i32 to vector<32x64xi32>
    %329 = arith.cmpi sge, %214, %328 : vector<32x64xi32>
    %330 = arith.andi %327, %329 : vector<32x64xi1>
    %c3_i32_165 = arith.constant 3 : i32
    %331 = vector.broadcast %c3_i32_165 : i32 to vector<32x64xi32>
    %332 = arith.cmpi sle, %214, %331 : vector<32x64xi32>
    %333 = arith.andi %330, %332 : vector<32x64xi1>
    %cst_166 = arith.constant 0.000000e+00 : bf16
    %334 = vector.broadcast %cst_166 : bf16 to vector<32x64xbf16>
    %335 = arith.select %333, %322, %334 : vector<32x64xi1>, vector<32x64xbf16>
    %c448 = arith.constant 448 : index
    %c0_167 = arith.constant 0 : index
    %336 = vector.load %arg8[%c448, %c0_167] : memref<576x64xbf16, #tpu.memory_space<vmem>>, vector<64x64xbf16>
    %cst_168 = arith.constant dense<0.000000e+00> : vector<32x64xf32>
    %337 = tpu.matmul %335, %336, %cst_168 {dimension_numbers = #tpu.dot_dimension_numbers<[1], [0], [0], [1], [0, 0, 1, 1], [], []>} : vector<32x64xbf16>, vector<64x64xbf16>, vector<32x64xf32> -> vector<32x64xf32>
    %338 = arith.addf %321, %337 : vector<32x64xf32>
    %c13 = arith.constant 13 : index
    %c0_169 = arith.constant 0 : index
    %339 = vector.load %arg18[%c13, %c0_169] : memref<48x64xbf16, #tpu.memory_space<vmem>>, vector<32x64xbf16>
    %c-1_i32_170 = arith.constant -1 : i32
    %340 = vector.broadcast %c-1_i32_170 : i32 to vector<32x64xi32>
    %341 = arith.cmpi sge, %211, %340 : vector<32x64xi32>
    %c2_i32_171 = arith.constant 2 : i32
    %342 = vector.broadcast %c2_i32_171 : i32 to vector<32x64xi32>
    %343 = arith.cmpi sle, %211, %342 : vector<32x64xi32>
    %344 = arith.andi %341, %343 : vector<32x64xi1>
    %c-1_i32_172 = arith.constant -1 : i32
    %345 = vector.broadcast %c-1_i32_172 : i32 to vector<32x64xi32>
    %346 = arith.cmpi sge, %214, %345 : vector<32x64xi32>
    %347 = arith.andi %344, %346 : vector<32x64xi1>
    %c2_i32_173 = arith.constant 2 : i32
    %348 = vector.broadcast %c2_i32_173 : i32 to vector<32x64xi32>
    %349 = arith.cmpi sle, %214, %348 : vector<32x64xi32>
    %350 = arith.andi %347, %349 : vector<32x64xi1>
    %cst_174 = arith.constant 0.000000e+00 : bf16
    %351 = vector.broadcast %cst_174 : bf16 to vector<32x64xbf16>
    %352 = arith.select %350, %339, %351 : vector<32x64xi1>, vector<32x64xbf16>
    %c512_175 = arith.constant 512 : index
    %c0_176 = arith.constant 0 : index
    %353 = vector.load %arg8[%c512_175, %c0_176] : memref<576x64xbf16, #tpu.memory_space<vmem>>, vector<64x64xbf16>
    %cst_177 = arith.constant dense<0.000000e+00> : vector<32x64xf32>
    %354 = tpu.matmul %352, %353, %cst_177 {dimension_numbers = #tpu.dot_dimension_numbers<[1], [0], [0], [1], [0, 0, 1, 1], [], []>} : vector<32x64xbf16>, vector<64x64xbf16>, vector<32x64xf32> -> vector<32x64xf32>
    %355 = arith.addf %338, %354 : vector<32x64xf32>
    %c0_178 = arith.constant 0 : index
    %c0_179 = arith.constant 0 : index
    %356 = vector.load %arg9[%c0_178, %c0_179] : memref<1x64xf32, #tpu.memory_space<vmem>>, vector<1x64xf32>
    %357 = vector.broadcast %356 : vector<1x64xf32> to vector<32x64xf32>
    %358 = arith.mulf %355, %357 : vector<32x64xf32>
    %c0_180 = arith.constant 0 : index
    %c0_181 = arith.constant 0 : index
    %359 = vector.load %arg10[%c0_180, %c0_181] : memref<1x64xf32, #tpu.memory_space<vmem>>, vector<1x64xf32>
    %360 = vector.broadcast %359 : vector<1x64xf32> to vector<32x64xf32>
    %361 = arith.addf %358, %360 : vector<32x64xf32>
    %cst_182 = arith.constant 0.000000e+00 : f32
    %362 = vector.broadcast %cst_182 : f32 to vector<32x64xf32>
    %363 = arith.maximumf %361, %362 : vector<32x64xf32>
    %c0_183 = arith.constant 0 : index
    %c0_184 = arith.constant 0 : index
    %364 = vector.load %arg19[%c0_183, %c0_184] : memref<32x64xf32, #tpu.memory_space<vmem>>, vector<32x64xf32>
    tpu.vector_store %arg19[%c0_183, %c0_184], %363 {strides = array<i32>} : memref<32x64xf32, #tpu.memory_space<vmem>>, vector<32x64xf32>,
    %cst_185 = arith.constant 0.000000e+00 : f32
    %365 = vector.broadcast %cst_185 : f32 to vector<2x8xf32>
    %c0_186 = arith.constant 0 : index
    %c0_187 = arith.constant 0 : index
    %366 = vector.load %arg12[%c0_186, %c0_187] : memref<1x8xf32, #tpu.memory_space<vmem>>, vector<1x8xf32>
    %367 = vector.broadcast %366 : vector<1x8xf32> to vector<2x8xf32>
    %368 = arith.addf %365, %367 : vector<2x8xf32>
    %c0_188 = arith.constant 0 : index
    %c0_189 = arith.constant 0 : index
    %369 = tpu.strided_load %arg19[%c0_188, %c0_189] {strides = array<i32: 16, 1>} : memref<32x64xf32, #tpu.memory_space<vmem>>, vector<2x64xf32>
    %c1_190 = arith.constant 1 : index
    %c0_191 = arith.constant 0 : index
    %370 = tpu.strided_load %arg19[%c1_190, %c0_191] {strides = array<i32: 16, 1>} : memref<32x64xf32, #tpu.memory_space<vmem>>, vector<2x64xf32>
    %c4_192 = arith.constant 4 : index
    %c0_193 = arith.constant 0 : index
    %371 = tpu.strided_load %arg19[%c4_192, %c0_193] {strides = array<i32: 16, 1>} : memref<32x64xf32, #tpu.memory_space<vmem>>, vector<2x64xf32>
    %c5_194 = arith.constant 5 : index
    %c0_195 = arith.constant 0 : index
    %372 = tpu.strided_load %arg19[%c5_194, %c0_195] {strides = array<i32: 16, 1>} : memref<32x64xf32, #tpu.memory_space<vmem>>, vector<2x64xf32>
    %373 = arith.maximumf %369, %370 : vector<2x64xf32>
    %374 = arith.maximumf %371, %372 : vector<2x64xf32>
    %375 = arith.maximumf %373, %374 : vector<2x64xf32>
    %376 = arith.truncf %375 : vector<2x64xf32> to vector<2x64xbf16>
    %c0_196 = arith.constant 0 : index
    %c0_197 = arith.constant 0 : index
    %377 = vector.load %arg11[%c0_196, %c0_197] : memref<256x8xbf16, #tpu.memory_space<vmem>>, vector<64x8xbf16>
    %cst_198 = arith.constant dense<0.000000e+00> : vector<2x8xf32>
    %378 = tpu.matmul %376, %377, %cst_198 {dimension_numbers = #tpu.dot_dimension_numbers<[1], [0], [0], [1], [0, 0, 1, 1], [], []>} : vector<2x64xbf16>, vector<64x8xbf16>, vector<2x8xf32> -> vector<2x8xf32>
    %379 = arith.addf %368, %378 : vector<2x8xf32>
    %c2 = arith.constant 2 : index
    %c0_199 = arith.constant 0 : index
    %380 = tpu.strided_load %arg19[%c2, %c0_199] {strides = array<i32: 16, 1>} : memref<32x64xf32, #tpu.memory_space<vmem>>, vector<2x64xf32>
    %c3_200 = arith.constant 3 : index
    %c0_201 = arith.constant 0 : index
    %381 = tpu.strided_load %arg19[%c3_200, %c0_201] {strides = array<i32: 16, 1>} : memref<32x64xf32, #tpu.memory_space<vmem>>, vector<2x64xf32>
    %c6 = arith.constant 6 : index
    %c0_202 = arith.constant 0 : index
    %382 = tpu.strided_load %arg19[%c6, %c0_202] {strides = array<i32: 16, 1>} : memref<32x64xf32, #tpu.memory_space<vmem>>, vector<2x64xf32>
    %c7_203 = arith.constant 7 : index
    %c0_204 = arith.constant 0 : index
    %383 = tpu.strided_load %arg19[%c7_203, %c0_204] {strides = array<i32: 16, 1>} : memref<32x64xf32, #tpu.memory_space<vmem>>, vector<2x64xf32>
    %384 = arith.maximumf %380, %381 : vector<2x64xf32>
    %385 = arith.maximumf %382, %383 : vector<2x64xf32>
    %386 = arith.maximumf %384, %385 : vector<2x64xf32>
    %387 = arith.truncf %386 : vector<2x64xf32> to vector<2x64xbf16>
    %c64_205 = arith.constant 64 : index
    %c0_206 = arith.constant 0 : index
    %388 = vector.load %arg11[%c64_205, %c0_206] : memref<256x8xbf16, #tpu.memory_space<vmem>>, vector<64x8xbf16>
    %cst_207 = arith.constant dense<0.000000e+00> : vector<2x8xf32>
    %389 = tpu.matmul %387, %388, %cst_207 {dimension_numbers = #tpu.dot_dimension_numbers<[1], [0], [0], [1], [0, 0, 1, 1], [], []>} : vector<2x64xbf16>, vector<64x8xbf16>, vector<2x8xf32> -> vector<2x8xf32>
    %390 = arith.addf %379, %389 : vector<2x8xf32>
    %c8_208 = arith.constant 8 : index
    %c0_209 = arith.constant 0 : index
    %391 = tpu.strided_load %arg19[%c8_208, %c0_209] {strides = array<i32: 16, 1>} : memref<32x64xf32, #tpu.memory_space<vmem>>, vector<2x64xf32>
    %c9_210 = arith.constant 9 : index
    %c0_211 = arith.constant 0 : index
    %392 = tpu.strided_load %arg19[%c9_210, %c0_211] {strides = array<i32: 16, 1>} : memref<32x64xf32, #tpu.memory_space<vmem>>, vector<2x64xf32>
    %c12_212 = arith.constant 12 : index
    %c0_213 = arith.constant 0 : index
    %393 = tpu.strided_load %arg19[%c12_212, %c0_213] {strides = array<i32: 16, 1>} : memref<32x64xf32, #tpu.memory_space<vmem>>, vector<2x64xf32>
    %c13_214 = arith.constant 13 : index
    %c0_215 = arith.constant 0 : index
    %394 = tpu.strided_load %arg19[%c13_214, %c0_215] {strides = array<i32: 16, 1>} : memref<32x64xf32, #tpu.memory_space<vmem>>, vector<2x64xf32>
    %395 = arith.maximumf %391, %392 : vector<2x64xf32>
    %396 = arith.maximumf %393, %394 : vector<2x64xf32>
    %397 = arith.maximumf %395, %396 : vector<2x64xf32>
    %398 = arith.truncf %397 : vector<2x64xf32> to vector<2x64xbf16>
    %c128_216 = arith.constant 128 : index
    %c0_217 = arith.constant 0 : index
    %399 = vector.load %arg11[%c128_216, %c0_217] : memref<256x8xbf16, #tpu.memory_space<vmem>>, vector<64x8xbf16>
    %cst_218 = arith.constant dense<0.000000e+00> : vector<2x8xf32>
    %400 = tpu.matmul %398, %399, %cst_218 {dimension_numbers = #tpu.dot_dimension_numbers<[1], [0], [0], [1], [0, 0, 1, 1], [], []>} : vector<2x64xbf16>, vector<64x8xbf16>, vector<2x8xf32> -> vector<2x8xf32>
    %401 = arith.addf %390, %400 : vector<2x8xf32>
    %c10 = arith.constant 10 : index
    %c0_219 = arith.constant 0 : index
    %402 = tpu.strided_load %arg19[%c10, %c0_219] {strides = array<i32: 16, 1>} : memref<32x64xf32, #tpu.memory_space<vmem>>, vector<2x64xf32>
    %c11_220 = arith.constant 11 : index
    %c0_221 = arith.constant 0 : index
    %403 = tpu.strided_load %arg19[%c11_220, %c0_221] {strides = array<i32: 16, 1>} : memref<32x64xf32, #tpu.memory_space<vmem>>, vector<2x64xf32>
    %c14 = arith.constant 14 : index
    %c0_222 = arith.constant 0 : index
    %404 = tpu.strided_load %arg19[%c14, %c0_222] {strides = array<i32: 16, 1>} : memref<32x64xf32, #tpu.memory_space<vmem>>, vector<2x64xf32>
    %c15_223 = arith.constant 15 : index
    %c0_224 = arith.constant 0 : index
    %405 = tpu.strided_load %arg19[%c15_223, %c0_224] {strides = array<i32: 16, 1>} : memref<32x64xf32, #tpu.memory_space<vmem>>, vector<2x64xf32>
    %406 = arith.maximumf %402, %403 : vector<2x64xf32>
    %407 = arith.maximumf %404, %405 : vector<2x64xf32>
    %408 = arith.maximumf %406, %407 : vector<2x64xf32>
    %409 = arith.truncf %408 : vector<2x64xf32> to vector<2x64xbf16>
    %c192_225 = arith.constant 192 : index
    %c0_226 = arith.constant 0 : index
    %410 = vector.load %arg11[%c192_225, %c0_226] : memref<256x8xbf16, #tpu.memory_space<vmem>>, vector<64x8xbf16>
    %cst_227 = arith.constant dense<0.000000e+00> : vector<2x8xf32>
    %411 = tpu.matmul %409, %410, %cst_227 {dimension_numbers = #tpu.dot_dimension_numbers<[1], [0], [0], [1], [0, 0, 1, 1], [], []>} : vector<2x64xbf16>, vector<64x8xbf16>, vector<2x8xf32> -> vector<2x8xf32>
    %412 = arith.addf %401, %411 : vector<2x8xf32>
    %cst_228 = arith.constant 0.000000e+00 : f32
    %413 = vector.broadcast %cst_228 : f32 to vector<2x8xf32>
    %414 = arith.maximumf %412, %413 : vector<2x8xf32>
    %c0_229 = arith.constant 0 : index
    %c0_230 = arith.constant 0 : index
    %415 = vector.load %arg13[%c0_229, %c0_230] : memref<1x8xf32, #tpu.memory_space<vmem>>, vector<1x8xf32>
    %416 = vector.broadcast %415 : vector<1x8xf32> to vector<2x8xf32>
    %417 = arith.mulf %414, %416 : vector<2x8xf32>
    %cst_231 = arith.constant dense<0.000000e+00> : vector<2xf32>
    %418 = vector.multi_reduction <add>, %417, %cst_231 [1] : vector<2x8xf32> to vector<2xf32>
    %419 = vector.shape_cast %418 : vector<2xf32> to vector<2x1xf32>
    %c0_232 = arith.constant 0 : index
    %c0_233 = arith.constant 0 : index
    %420 = vector.load %arg14[%c0_232, %c0_233] : memref<1x1xf32, #tpu.memory_space<vmem>>, vector<1x1xf32>
    %421 = vector.broadcast %420 : vector<1x1xf32> to vector<2x1xf32>
    %422 = arith.addf %419, %421 : vector<2x1xf32>
    %cst_234 = arith.constant 0.000000e+00 : f32
    %423 = vector.broadcast %cst_234 : f32 to vector<2x1xf32>
    %424 = arith.subf %423, %422 : vector<2x1xf32>
    %425 = math.exp %424 : vector<2x1xf32>
    %cst_235 = arith.constant 1.000000e+00 : f32
    %426 = vector.broadcast %cst_235 : f32 to vector<2x1xf32>
    %427 = arith.addf %426, %425 : vector<2x1xf32>
    %428 = tpu.reciprocal %427 {approx = true} : vector<2x1xf32> -> vector<2x1xf32>
    %c0_236 = arith.constant 0 : index
    %c0_237 = arith.constant 0 : index
    %429 = vector.load %arg15[%c0_236, %c0_237] : memref<2x1xf32, #tpu.memory_space<vmem>>, vector<2x1xf32>
    tpu.vector_store %arg15[%c0_236, %c0_237], %428 {strides = array<i32>} : memref<2x1xf32, #tpu.memory_space<vmem>>, vector<2x1xf32>,
    return
  }
}

</mosaic_0001>

<bundles_post_ra>
// kernel: relation_network_forward.1
= control target key start
LH: loop header
LB: loop body
LE: loop exit
PB: predicated region body
PF: predicated region fallthrough
CT: control target
= control target key end

     0   :  { %v15143_v0 = vmov 0   ;;  %v15486_v61 = vmov 0  ;;  %s15057_s1 = inlined_call_operand.vmem [shape: s32[128,1], index: 1, kind: input, shape index: {}]   ;;  %s15058_s2 = inlined_call_operand.vmem [shape: s32[128,1], index: 2, kind: input, shape index: {}]   ;;  %s15059_s5 = inlined_call_operand.vmem [shape: bf16[1152,64], index: 5, kind: input, shape index: {}]   ;;  %s15060_s0 = inlined_call_operand.vmem [shape: bf16[128,128], index: 0, kind: input, shape index: {}]   ;;  %s15061_s3 = inlined_call_operand.vmem [shape: s32[32,1], index: 3, kind: input, shape index: {}]   ;;  %s15062_s4 = inlined_call_operand.vmem [shape: s32[32,1], index: 4, kind: input, shape index: {}]   ;;  %s15063_s8 = inlined_call_operand.vmem [shape: bf16[576,64], index: 8, kind: input, shape index: {}]   ;;  %s15064_s6 = inlined_call_operand.vmem [shape: f32[1,64], index: 6, kind: input, shape index: {}]   ;;  %s15065_s7 = inlined_call_operand.vmem [shape: f32[1,64], index: 7, kind: input, shape index: {}]   ;;  %s15066_s11 = inlined_call_operand.vmem [shape: bf16[256,8], index: 11, kind: input, shape index: {}]   ;;  %s15067_s9 = inlined_call_operand.vmem [shape: f32[1,64], index: 9, kind: input, shape index: {}]   ;;  %s15068_s10 = inlined_call_operand.vmem [shape: f32[1,64], index: 10, kind: input, shape index: {}]   ;;  %s15069_s14 = inlined_call_operand.<no memory space> [shape: f32[1,1], index: 14, kind: input, shape index: {}]   ;;  %s15070_s12 = inlined_call_operand.vmem [shape: f32[1,8], index: 12, kind: input, shape index: {}]   ;;  %s15071_s13 = inlined_call_operand.vmem [shape: f32[1,8], index: 13, kind: input, shape index: {}]   ;;  %s15072_s15 = inlined_call_operand.vmem [shape: f32[2,1], index: 15, kind: output, shape index: {}]  }
   0x1   :  { %7826 = vset.pattern.permute.xlu1 %v15143_v0  ;;  %55 = vst [vmem:[#allocation2] sm:$0xf] %v15143_v0  ;;  %56 = vst [vmem:[#allocation2 + $0x4] sm:$0xf] %v15143_v0  ;;  %7825 = vset.pattern.permute.xlu0 %v15143_v0  ;;  %v93_v1 = vld [vmem:[%s15057_s1 + $0x10] sm:$0xff]  ;;  %v91_v2 = vld [vmem:[%s15057_s1] sm:$0xff] }
   0x2   :  { %57 = vst [vmem:[#allocation2 + $0x48] sm:$0xf] %v15143_v0  ;;  %58 = vst [vmem:[#allocation2 + $0x4c] sm:$0xf] %v15143_v0  ;;  %114 = vperm.xlu1 %7826, %v93_v1   ;;  %108 = vperm.xlu0 %7825, %v91_v2   ;;  %v94_v3 = vld [vmem:[%s15057_s1 + $0x18] sm:$0xff]  ;;  %v92_v4 = vld [vmem:[%s15057_s1 + $0x8] sm:$0xff] }
   0x3   :  { %v156_v5 = vld [vmem:[%s15058_s2 + $0x8] sm:$0xff]  ;;  %v155_v6 = vld [vmem:[%s15058_s2] sm:$0xff]  ;;  %v158_v7 = vld [vmem:[%s15058_s2 + $0x18] sm:$0xff]  ;;  %v15490_v1 = vmov 0 }
   0x4   :  { %v157_v8 = vld [vmem:[%s15058_s2 + $0x10] sm:$0xff]  ;;  %v96_v9 = vld [vmem:[%s15057_s1 + $0x28] sm:$0xff]  ;;  %v95_v10 = vld [vmem:[%s15057_s1 + $0x20] sm:$0xff] }
   0x5   :  { %v7827_v11 = vld [vmem:[%s15059_s5 + $0x78] sm:$0xff]   ;;  %v7828_v12 = vld [vmem:[%s15059_s5 + $0x70] sm:$0xff]   ;;  %v7829_v15 = vld [vmem:[%s15059_s5 + $0x68] sm:$0xff]  }
   0x6   :  { %117 = vperm.xlu1 %7826, %v94_v3   ;;  %111 = vperm.xlu0 %7825, %v92_v4   ;;  %v98_v13 = vld [vmem:[%s15057_s1 + $0x38] sm:$0xff]  ;;  %v97_v14 = vld [vmem:[%s15057_s1 + $0x30] sm:$0xff]  ;;  %v160_v16 = vld [vmem:[%s15058_s2 + $0x28] sm:$0xff]  ;;  %v15541_v4 = vmov 0 }
   0x7   :  { %7378 = vmatprep.subr.bf16.mxu0 %v7827_v11  ;;  %v159_v17 = vld [vmem:[%s15058_s2 + $0x20] sm:$0xff]  ;;  %v162_v20 = vld [vmem:[%s15058_s2 + $0x38] sm:$0xff]  ;;  %v161_v21 = vld [vmem:[%s15058_s2 + $0x30] sm:$0xff] }
   0x8   :  { %7379 = vmatpush3.bf16.msra.mxu0 %v7827_v11  ;;  %v7830_v18 = vld [vmem:[%s15059_s5 + $0x60] sm:$0xff]   ;;  %v7831_v22 = vld [vmem:[%s15059_s5 + $0x58] sm:$0xff]   ;;  %v100_v23 = vld [vmem:[%s15057_s1 + $0x48] sm:$0xff] }
   0x9   :  { %7380 = vmatprep.subr.bf16.mxu0 %v7828_v12  ;;  %v59_v19 = vld [vmem:[%s15060_s0] sm:$0xff]   ;;  %v7832_v25 = vld [vmem:[%s15059_s5 + $0x50] sm:$0xff]   ;;  %v102_v26 = vld [vmem:[%s15057_s1 + $0x58] sm:$0xff] }
   0xa   :  { %175 = vperm.xlu1 %7826, %v156_v5   ;;  %172 = vperm.xlu0 %7825, %v155_v6   ;;  %75 = vst [vmem:[#allocation2 + $0x8] sm:$0xff] %v59_v19   ;;  %v99_v24 = vld [vmem:[%s15057_s1 + $0x40] sm:$0xff]  ;;  %v101_v27 = vld [vmem:[%s15057_s1 + $0x50] sm:$0xff]  ;;  %v7833_v28 = vld [vmem:[%s15059_s5 + $0x48] sm:$0xff]  }
   0xb   :  { %v164_v29 = vld [vmem:[%s15058_s2 + $0x48] sm:$0xff]  ;;  %v163_v30 = vld [vmem:[%s15058_s2 + $0x40] sm:$0xff]  ;;  %v166_v32 = vld [vmem:[%s15058_s2 + $0x58] sm:$0xff] }
   0xc   :  { %7381 = vmatpush3.bf16.msra.mxu0 %v7828_v12  ;;  %v7834_v31 = vld [vmem:[%s15059_s5 + $0x40] sm:$0xff]   ;;  %v165_v33 = vld [vmem:[%s15058_s2 + $0x50] sm:$0xff]  ;;  %v104_v34 = vld [vmem:[%s15057_s1 + $0x68] sm:$0xff] }
   0xd   :  { %7382 = vmatprep.subr.bf16.mxu0 %v7829_v15  ;;  %v103_v35 = vld [vmem:[%s15057_s1 + $0x60] sm:$0xff]  ;;  %v106_v36 = vld [vmem:[%s15057_s1 + $0x78] sm:$0xff]  ;;  %v105_v37 = vld [vmem:[%s15057_s1 + $0x70] sm:$0xff] }
   0xe   :  { %181 = vperm.xlu1 %7826, %v158_v7   ;;  %178 = vperm.xlu0 %7825, %v157_v8   ;;  %v168_v38 = vld [vmem:[%s15058_s2 + $0x68] sm:$0xff]  ;;  %v167_v39 = vld [vmem:[%s15058_s2 + $0x60] sm:$0xff]  ;;  %v170_v40 = vld [vmem:[%s15058_s2 + $0x78] sm:$0xff] }
   0xf   :  { %v169_v41 = vld [vmem:[%s15058_s2 + $0x70] sm:$0xff]  ;;  %v4808_v42 = vld [vmem:[%s15061_s3 + $0x8] sm:$0xff]  ;;  %v4807_v43 = vld [vmem:[%s15061_s3] sm:$0xff] }
  0x10   :  { %7383 = vmatpush3.bf16.msra.mxu0 %v7829_v15  ;;  %v4823_v44 = vld [vmem:[%s15062_s4] sm:$0xff]  ;;  %v4809_v45 = vld [vmem:[%s15061_s3 + $0x10] sm:$0xff]  ;;  %v4824_v47 = vld [vmem:[%s15062_s4 + $0x8] sm:$0xff] }
  0x11   :  { %7384 = vmatprep.subr.bf16.mxu0 %v7830_v18  ;;  %v4825_v46 = vld [vmem:[%s15062_s4 + $0x10] sm:$0xff]  ;;  %v4826_v48 = vld [vmem:[%s15062_s4 + $0x18] sm:$0xff]  ;;  %v61_v50 = vld [vmem:[%s15060_s0 + $0x8] sm:$0xff]  }
  0x12   :  { %123 = vperm.xlu1 %7826, %v96_v9   ;;  %120 = vperm.xlu0 %7825, %v95_v10   ;;  %v4810_v49 = vld [vmem:[%s15061_s3 + $0x18] sm:$0xff]  ;;  %77 = vst [vmem:[#allocation2 + $0x10] sm:$0xff] %v61_v50   ;;  %v63_v51 = vld [vmem:[%s15060_s0 + $0x10] sm:$0xf]  ;;  %v7837_v54 = vld [vmem:[%s15059_s5 + $0x28] sm:$0xff]  }
  0x13   :  { %79 = vst [vmem:[#allocation2 + $0x18] sm:$0xf] %v63_v51  ;;  %v7835_v52 = vld [vmem:[%s15059_s5 + $0x38] sm:$0xff]   ;;  %v7836_v53 = vld [vmem:[%s15059_s5 + $0x30] sm:$0xff]   ;;  %v7838_v7 = vld [vmem:[%s15059_s5 + $0x20] sm:$0xff]  }
  0x14   :  { %7385 = vmatpush3.bf16.msra.mxu0 %v7830_v18  ;;  %7410 = vmatprep.subr.bf16.mxu1 %v7835_v52  ;;  %v8350_v10 = vld [vmem:[#allocation2 + $0x4] sm:$0xf]  ;;  %v8354_v12 = vld [vmem:[#allocation2 + $0x8] sm:$0xf]  ;;  %v7839_v63 = vld [vmem:[%s15059_s5 + $0x18] sm:$0xff]  }
  0x15   :  { %7386 = vmatprep.subr.bf16.mxu0 %v7831_v22  ;;  %7411 = vmatpush3.bf16.msra.mxu1 %v7835_v52  ;;  %v219_v3 = vld [vmem:[#allocation2] sm:$0x8]  ;;  %v222_v6 = vld [vmem:[#allocation2 + $0xc] sm:$0xf] }
  0x16   :  { %129 = vperm.xlu1 %7826, %v98_v13   ;;  %126 = vperm.xlu0 %7825, %v97_v14  }
  0x17   :  { %7412 = vmatprep.subr.bf16.mxu1 %v7836_v53 }
  0x18   :  { %7387 = vmatpush3.bf16.msra.mxu0 %v7831_v22 }
  0x19   :  { %7388 = vmatprep.subr.bf16.mxu0 %v7832_v25  ;;  %7413 = vmatpush3.bf16.msra.mxu1 %v7836_v53 }
  0x1a   :  { %187 = vperm.xlu1 %7826, %v160_v16   ;;  %184 = vperm.xlu0 %7825, %v159_v17  }
  0x1b   :  { %7414 = vmatprep.subr.bf16.mxu1 %v7837_v54 }
  0x1c   :  { %7389 = vmatpush3.bf16.msra.mxu0 %v7832_v25  ;;  %v15505_v25 = vmov 0 }
  0x1d   :  { %7390 = vmatprep.subr.bf16.mxu0 %v7833_v28  ;;  %7415 = vmatpush3.bf16.msra.mxu1 %v7837_v54  ;;  %v66_v54 = vld [vmem:[%s15060_s0 + $0x1c] sm:$0xff]  }
  0x1e   :  { %193 = vperm.xlu1 %7826, %v162_v20   ;;  %190 = vperm.xlu0 %7825, %v161_v21   ;;  %82 = vst [vmem:[#allocation2 + $0x24] sm:$0xff] %v66_v54  }
  0x1f   :  { %7416 = vmatprep.subr.bf16.mxu1 %v7838_v7 }
  0x20   :  { %7391 = vmatpush3.bf16.msra.mxu0 %v7833_v28 }
  0x21   :  { %7392 = vmatprep.subr.bf16.mxu0 %v7834_v31  ;;  %7417 = vmatpush3.bf16.msra.mxu1 %v7838_v7 }
  0x22   :  { %135 = vperm.xlu1 %7826, %v100_v23   ;;  %132 = vperm.xlu0 %7825, %v99_v24   ;;  %v15502_v23 = vmov 0 }
  0x23   :  { %7418 = vmatprep.subr.bf16.mxu1 %v7839_v63 }
  0x24   :  { %7393 = vmatpush3.bf16.msra.mxu0 %v7834_v31 }
  0x25   :  { %7419 = vmatpush3.bf16.msra.mxu1 %v7839_v63  ;;  %v15574_v63 = vmov 0 }
  0x26   :  { %141 = vperm.xlu1 %7826, %v102_v26   ;;  %138 = vperm.xlu0 %7825, %v101_v27  }
  0x2a   :  { %199 = vperm.xlu1 %7826, %v164_v29   ;;  %196 = vperm.xlu0 %7825, %v163_v30  }
  0x2e   :  { %205 = vperm.xlu1 %7826, %v166_v32   ;;  %202 = vperm.xlu0 %7825, %v165_v33  }
  0x32   :  { %147 = vperm.xlu1 %7826, %v104_v34   ;;  %144 = vperm.xlu0 %7825, %v103_v35  }
  0x36   :  { %153 = vperm.xlu1 %7826, %v106_v36   ;;  %150 = vperm.xlu0 %7825, %v105_v37   ;;  %v15514_v36 = vmov 0  ;;  %v15517_v37 = vmov 0 }
  0x3a   :  { %211 = vperm.xlu1 %7826, %v168_v38   ;;  %208 = vperm.xlu0 %7825, %v167_v39  }
  0x3e   :  { %217 = vperm.xlu1 %7826, %v170_v40   ;;  %214 = vperm.xlu0 %7825, %v169_v41   ;;  %v64_v41 = vld [vmem:[%s15060_s0 + $0x14] sm:$0xff]  }
  0x3f   :  { %80 = vst [vmem:[#allocation2 + $0x1c] sm:$0xff] %v64_v41  }
  0x42   :  { %4815 = vperm.xlu1 %7826, %v4808_v42   ;;  %4812 = vperm.xlu0 %7825, %v4807_v43   ;;  %v15519_v42 = vmov 0 }
  0x46   :  { %4828 = vperm.xlu1 %7826, %v4823_v44   ;;  %4818 = vperm.xlu0 %7825, %v4809_v45  }
  0x4a   :  { %4834 = vperm.xlu1 %7826, %v4825_v46   ;;  %4831 = vperm.xlu0 %7825, %v4824_v47   ;;  %v15524_v46 = vmov 0  ;;  %v15527_v47 = vmov 0 }
  0x4e   :  { %4837 = vperm.xlu1 %7826, %v4826_v48   ;;  %4821 = vperm.xlu0 %7825, %v4810_v49  }
  0x7d   :  { %v8241_v55 = vpop.permute.xlu1 %114  ;;  %v8243_v56 = vpop.permute.xlu0 %108 }
  0x7e   :  { %vm238_vm0 = vcmp.ge.s32.totalorder %v8241_v55, 1  ;;  %vm254_vm1 = vcmp.le.s32.totalorder %v8241_v55, 8  ;;  %vm236_vm2 = vcmp.ge.s32.totalorder %v8243_v56, 1  ;;  %vm252_vm3 = vcmp.le.s32.totalorder %v8243_v56, 8 }
  0x7f   :  { %vm8259_vm6 = vmand %vm238_vm0, %vm254_vm1 }
  0x80   :  { %v15487_v61 = vsel %vm8259_vm6, 4294967295, %v15486_v61  ;;  %vm8268_vm10 = vmand %vm236_vm2, %vm252_vm3 }
  0x81   :  { %v8245_v57 = vpop.permute.xlu1 %117  ;;  %v8247_v58 = vpop.permute.xlu0 %111 }
  0x82   :  { %vm239_vm4 = vcmp.ge.s32.totalorder %v8245_v57, 1  ;;  %vm255_vm5 = vcmp.le.s32.totalorder %v8245_v57, 8  ;;  %vm237_vm8 = vcmp.ge.s32.totalorder %v8247_v58, 1  ;;  %vm253_vm9 = vcmp.le.s32.totalorder %v8247_v58, 8 }
  0x83   :  { %vm8272_vm11 = vmand %vm239_vm4, %vm255_vm5 }
  0x84   :  { %v15491_v1 = vsel %vm8272_vm11, 4294967295, %v15490_v1  ;;  %vm8285_vm0 = vmand %vm237_vm8, %vm253_vm9 }
  0x85   :  { %v8249_v59 = vpop.permute.xlu1 %175  ;;  %v8251_v60 = vpop.permute.xlu0 %172 }
  0x86   :  { %vm15080_vm7 = vcmp.ge.s32.totalorder %v8251_v60, 1  ;;  %vm15073_vm12 = vcmp.ge.s32.totalorder %v8249_v59, 1  ;;  %vm15074_vm14 = vcmp.le.s32.totalorder %v8251_v60, 8  ;;  %vm15079_vm3 = vcmp.le.s32.totalorder %v8249_v59, 8 }
  0x87   :  { %vm300_vm13 = vmand %vm8268_vm10, %vm15080_vm7 }
  0x88   :  { %vm301_vm2 = vmand %vm8285_vm0, %vm15073_vm12 }
  0x89   :  { %v8264_v62 = vpop.permute.xlu1 %181  ;;  %v8276_v2 = vpop.permute.xlu0 %178  ;;  %vm8297_vm4 = vmand %vm300_vm13, %vm15074_vm14 }
  0x8a   :  { %vm15075_vm15 = vcmp.ge.s32.totalorder %v8264_v62, 1  ;;  %vm15076_vm1 = vcmp.ge.s32.totalorder %v8276_v2, 1  ;;  %vm15077_vm8 = vcmp.le.s32.totalorder %v8276_v2, 8  ;;  %vm15078_vm9 = vcmp.le.s32.totalorder %v8264_v62, 8  ;;  %vm8313_vm13 = vmand %vm301_vm2, %vm15079_vm3 }
  0x8b   :  { %vm303_vm5 = vmand %vm8272_vm11, %vm15075_vm15  ;;  %vm15083_vm3 = vcmp.le.s32.totalorder %v8251_v60, 7  ;;  %vm15088_vm11 = vcmp.le.s32.totalorder %v8251_v60, 6 }
  0x8c   :  { %vm302_vm12 = vmand %vm8259_vm6, %vm15076_vm1  ;;  %vm15081_vm1 = vcmp.ge.s32.totalorder %v8251_v60, 0 }
  0x8d   :  { %vm8319_vm14 = vmand %vm302_vm12, %vm15077_vm8  ;;  %vm15086_vm12 = vcmp.le.s32.totalorder %v8249_v59, 7 }
  0x8e   :  { %vm335_vm15 = vmand %vm303_vm5, %vm15078_vm9  ;;  %vm15082_vm5 = vcmp.ge.s32.totalorder %v8249_v59, 0 }
  0x8f   :  { %vm351_vm9 = vmpackc.low %vm335_vm15, %vm335_vm15 }
  0x90   :  { %v367_v8 = vsel %vm351_vm9, 65537, %v15143_v0  ;;  %vm608_vm7 = vmand %vm8268_vm10, %vm15081_vm1  ;;  %vm15090_vm1 = vcmp.ge.s32.totalorder %v8251_v60, 4294967295 }
  0x91   :  { %v413_v9 = vshll.u32 %v367_v8, 16  ;;  %vm609_vm8 = vmand %vm8285_vm0, %vm15082_vm5  ;;  %v417_v11 = vshrl.u32 %v367_v8, 16  ;;  %vm15089_vm5 = vcmp.ge.s32.totalorder %v8249_v59, 4294967295 }
  0x92   :  { %vm640_vm15 = vmand %vm608_vm7, %vm15083_vm3 }
  0x93   :  { %v8356_v13 = vrot.slane %v413_v9, 5  ;;  %vm641_vm9 = vmand %vm609_vm8, %vm15086_vm12  ;;  %v8361_v14 = vrot.slane %v417_v11, 4 }
  0x94   :  { %vm656_vm2 = vmpackc.low %vm640_vm15, %vm640_vm15  ;;  %vm15087_vm15 = vcmp.le.s32.totalorder %v8249_v59, 6 }
  0x95   :  { %vm15500_vm7 = vmpackc.low %vm8297_vm4, %vm8297_vm4  ;;  %v672_v16 = vsel %vm656_vm2, %v8350_v10, 0  ;;  %v420_v17 = vor.u32 %v8361_v14, %v8356_v13  ;;  %vm1766_vm4 = vcmp.ge.s32.totalorder %v8243_v56, 0 }
  0x96   :  { %v364_v15 = vsel %vm15500_vm7, 65537, %v15143_v0  ;;  %vm657_vm3 = vmpackc.low %vm641_vm9, %vm641_vm9  ;;  %vm1782_vm9 = vcmp.le.s32.totalorder %v8243_v56, 7  ;;  %vm1783_vm7 = vcmp.le.s32.totalorder %v8247_v58, 7 }
  0x97   :  { %v673_v18 = vsel %vm657_vm3, %v8354_v12, 0  ;;  %vm1207_vm8 = vmand %vm8268_vm10, %vm15090_vm1  ;;  %vm1767_vm10 = vcmp.ge.s32.totalorder %v8247_v58, 0  ;;  %v384_v21 = vshll.u32 %v364_v15, 16  ;;  %v387_v22 = vshrl.u32 %v364_v15, 16 }
  0x98   :  { %vm15501_vm2 = vmpackc.low %vm8319_vm14, %vm8319_vm14  ;;  %v6895_v20 = vcombine.low %v672_v16, %v673_v18  ;;  %v15550_v16 = vmov 0 }
  0x99   :  { %v366_v19 = vsel %vm15501_vm2, 65537, %v15143_v0  ;;  %vm1208_vm3 = vmand %vm8285_vm0, %vm15089_vm5  ;;  %v386_v30 = vrot.slane %v384_v21, 5  ;;  %v389_v31 = vrot.slane %v387_v22, 4  ;;  %v15556_v21 = vmov 0 }
  0x9a   :  { %vm8396_vm12 = vmand %vm1207_vm8, %vm15088_vm11  ;;  %7394 = vmatprep.mubr.bf16.mxu0 %v6895_v20  ;;  %v403_v27 = vshll.u32 %v366_v19, 16  ;;  %v407_v28 = vshrl.u32 %v366_v19, 16  ;;  %vm15516_vm11 = vcmp.le.s32.totalorder %v8249_v59, 8  ;;  %v15559_v22 = vmov 0 }
  0x9b   :  { %v15503_v23 = vsel %vm8396_vm12, 4294967295, %v15502_v23  ;;  %vm15504_vm14 = vmpackc.low %vm8313_vm13, %vm8313_vm13  ;;  %vm15511_vm13 = vcmp.ge.s32.totalorder %v8251_v60, 1  ;;  %v390_v38 = vor.u32 %v389_v31, %v386_v30  ;;  %v8578_v31 = vld [vmem:[#allocation2 + $0x10] sm:$0xf] }
  0x9c   :  { %v365_v24 = vsel %vm15504_vm14, 65537, %v15143_v0  ;;  %vm8408_vm0 = vmand %vm1208_vm3, %vm15087_vm15  ;;  %vm380_vm14 = vsmask.f32 3328  ;;  %vm381_vm15 = vsmask.f32 7440  ;;  %v405_v34 = vrot.slane %v403_v27, 5 }
  0x9d   :  { %v15506_v25 = vsel %vm8408_vm0, 4294967295, %v15505_v25  ;;  %vm8412_vm2 = vmand %vm1766_vm4, %vm1782_vm9  ;;  %v393_v32 = vshll.u32 %v365_v24, 16  ;;  %v397_v33 = vshrl.u32 %v365_v24, 16  ;;  %vm15512_vm4 = vcmp.ge.s32.totalorder %v8249_v59, 1 }
  0x9e   :  { %vm8416_vm8 = vmand %vm1767_vm10, %vm1783_vm7  ;;  %v409_v35 = vrot.slane %v407_v28, 4  ;;  %vm15513_vm10 = vcmp.le.s32.totalorder %v8251_v60, 8  ;;  %v391_v44 = vrot.slane %v390_v38, 4  ;;  %v15562_v38 = vmov 0 }
  0x9f   :  { %vm1814_vm3 = vmand %vm8412_vm2, %vm15511_vm13  ;;  %v395_v39 = vrot.slane %v393_v32, 5  ;;  %v399_v40 = vrot.slane %v397_v33, 4 }
  0xa0   :  { %vm1815_vm9 = vmand %vm8416_vm8, %vm15512_vm4  ;;  %v410_v43 = vor.u32 %v409_v35, %v405_v34  ;;  %v8583_v35 = vpop.permute.xlu1 %123 }
  0xa1   :  { %vm8430_vm7 = vmand %vm1814_vm3, %vm15513_vm10  ;;  %vm15522_vm3 = vcmp.ge.s32.totalorder %v8249_v59, 4294967295  ;;  %v400_v45 = vor.u32 %v399_v40, %v395_v39  ;;  %v7841_v40 = vld [vmem:[%s15059_s5 + $0x8] sm:$0xff]  }
  0xa2   :  { %v15515_v36 = vsel %vm8430_vm7, 4294967295, %v15514_v36  ;;  %vm8436_vm5 = vmand %vm1815_vm9, %vm15516_vm11  ;;  %vm15523_vm9 = vcmp.le.s32.totalorder %v8251_v60, 6  ;;  %v411_v48 = vrot.slane %v410_v43, 4  ;;  %v7842_v43 = vld [vmem:[%s15059_s5 + $0xb8] sm:$0xff]  }
  0xa3   :  { %v15518_v37 = vsel %vm8436_vm5, 4294967295, %v15517_v37  ;;  %vm8443_vm13 = vmor %vm380_vm14, %vm381_vm15  ;;  %vm15526_vm14 = vcmp.le.s32.totalorder %v8249_v59, 6  ;;  %v401_v50 = vrot.slane %v400_v45, 4  ;;  %vm15540_vm5 = vcmp.le.s32.totalorder %v8249_v59, 8  ;;  %v2608_v45 = vld [vmem:[#allocation2 + $0x18] sm:$0xf]  ;;  %7442 = vmatprep.subr.bf16.mxu0 %v7842_v43 }
  0xa4   :  { %v15520_v42 = vsel %vm8443_vm13, 4294967295, %v15519_v42  ;;  %vm2621_vm11 = vmand %vm8412_vm2, %vm15090_vm1  ;;  %vm3160_vm2 = vcmp.ge.s32.totalorder %v8243_v56, 4294967295  ;;  %vm3176_vm1 = vcmp.le.s32.totalorder %v8243_v56, 6  ;;  %v396_v49 = vsel %vm8443_vm13, %v391_v44, %v395_v39  ;;  %v8600_v41 = vpop.permute.xlu1 %129  ;;  %v2607_v44 = vld [vmem:[#allocation2 + $0x14] sm:$0xf] }
  0xa5   :  { %15521 = vst [vmem:[#allocation7_spill] sm:$0xff] %v15520_v42  ;;  %vm2622_vm4 = vmand %vm8416_vm8, %vm15522_vm3  ;;  %vm3161_vm8 = vcmp.ge.s32.totalorder %v8247_v58, 4294967295  ;;  %vm3177_vm3 = vcmp.le.s32.totalorder %v8247_v58, 6  ;;  %v416_v53 = vsel %vm8443_vm13, %v411_v48, %v8356_v13  ;;  %v406_v56 = vsel %vm8443_vm13, %v401_v50, %v405_v34 }
  0xa6   :  { %vm8457_vm15 = vmand %vm2621_vm11, %vm15523_vm9  ;;  %vm15533_vm9 = vcmp.ge.s32.totalorder %v8251_v60, 1  ;;  %v15538_v58 = vmov 0  ;;  %v15564_v39 = vmov 0  ;;  %v15638_v13 = vmov 0  }
  0xa7   :  { %v15525_v46 = vsel %vm8457_vm15, 4294967295, %v15524_v46  ;;  %vm8463_vm10 = vmand %vm2622_vm4, %vm15526_vm14  ;;  %vm8488_vm15 = vcmp.ne.s16.totalorder %v396_v49, 0  ;;  %v8619_v49 = vpop.permute.xlu0 %120 }
  0xa8   :  { %v15528_v47 = vsel %vm8463_vm10, 4294967295, %v15527_v47  ;;  %vm8473_vm11 = vmand %vm3160_vm2, %vm3176_vm1  ;;  %vm15536_vm1 = vcmp.ge.s32.totalorder %v8249_v59, 1  ;;  %vm545_vm10 = vcmp.ne.s16.totalorder %v416_v53, 0  ;;  %v560_v5 = vsel %vm8488_vm15, %v8350_v10, 0  ;;  %v8623_v51 = vpop.permute.xlu1 %187 }
  0xa9   :  { %vm8477_vm4 = vmand %vm3161_vm8, %vm3177_vm3  ;;  %vm15537_vm8 = vcmp.le.s32.totalorder %v8251_v60, 8  ;;  %v562_v8 = vsel %vm545_vm10, %v222_v6, 0  ;;  %vm15545_vm15 = vcmp.le.s32.totalorder %v8251_v60, 7  ;;  %v15546_v10 = vmov 0  ;;  %15571 = vst [vmem:[#allocation12_spill] sm:$0xff] %v8623_v51 }
  0xaa   :  { %vm3208_vm14 = vmand %vm8473_vm11, %vm15533_vm9  ;;  %vm542_vm9 = vcmp.ne.s16.totalorder %v386_v30, 0  ;;  %vm15549_vm10 = vcmp.le.s32.totalorder %v8249_v59, 7  ;;  %v15572_v53 = vmov 0 }
  0xab   :  { %vm3209_vm2 = vmand %vm8477_vm4, %vm15536_vm1  ;;  %v559_v7 = vsel %vm542_vm9, %v219_v3, 0  ;;  %vm15543_vm1 = vcmp.ge.s32.totalorder %v8251_v60, 0  ;;  %v15576_v3 = vmov 0 }
  0xac   :  { %vm8500_vm3 = vmand %vm3208_vm14, %vm15537_vm8  ;;  %vm544_vm14 = vcmp.ne.s16.totalorder %v406_v56, 0  ;;  %v6911_v9 = vcombine.low %v559_v7, %v560_v5  ;;  %v8638_v56 = vpop.permute.xlu0 %126  ;;  %v15582_v7 = vmov 0 }
  0xad   :  { %v15539_v58 = vsel %vm8500_vm3, 4294967295, %v15538_v58  ;;  %vm8509_vm7 = vmand %vm3209_vm2, %vm15540_vm5  ;;  %vm15544_vm5 = vcmp.ge.s32.totalorder %v8249_v59, 0  ;;  %v561_v11 = vsel %vm544_vm14, %v8354_v12, 0 }
  0xae   :  { %v15542_v4 = vsel %vm8509_vm7, 4294967295, %v15541_v4  ;;  %vm3773_vm8 = vmand %vm8473_vm11, %vm15543_vm1  ;;  %v6912_v15 = vcombine.low %v561_v11, %v562_v8  ;;  %v942_v18 = vshrl.u32 %v6911_v9, 16  ;;  %v945_v19 = vshll.u32 %v6911_v9, 16  ;;  %v7843_v11 = vld [vmem:[%s15059_s5] sm:$0xff]  }
  0xaf   :  { %vm3774_vm2 = vmand %vm8477_vm4, %vm15544_vm5  ;;  %vm15553_vm1 = vcmp.ge.s32.totalorder %v8251_v60, 4294967295  ;;  %v15584_v8 = vmov 0  ;;  %v15586_v9 = vmov 0 }
  0xb0   :  { %vm8527_vm7 = vmand %vm3773_vm8, %vm15545_vm15  ;;  %v950_v12 = vshrl.u32 %v6912_v15, 16  ;;  %v953_v20 = vshll.u32 %v6912_v15, 16  ;;  %vm15554_vm8 = vcmp.ge.s32.totalorder %v8249_v59, 4294967295  ;;  %vm15555_vm15 = vcmp.le.s32.totalorder %v8251_v60, 6  ;;  %v7840_v60 = vld [vmem:[%s15059_s5 + $0x10] sm:$0xff]   ;;  %v8660_v5 = vpop.permute.xlu0 %184  ;;  %v8703_v15 = vpop.permute.xlu1 %193 }
  0xb1   :  { %v15547_v10 = vsel %vm8527_vm7, 4294967295, %v15546_v10  ;;  %vm8533_vm9 = vmand %vm3774_vm2, %vm15549_vm10  ;;  %vm15558_vm10 = vcmp.le.s32.totalorder %v8249_v59, 6  ;;  %v944_v24 = vrot.slane %v942_v18, 3  ;;  %v947_v26 = vrot.slane %v945_v19, 4  ;;  %7420 = vmatprep.subr.bf16.mxu1 %v7840_v60  ;;  %15579 = vst [vmem:[#allocation14_spill] sm:$0xff] %v8660_v5  ;;  %v7844_v19 = vld [vmem:[%s15059_s5 + $0xb0] sm:$0xff]  }
  0xb2   :  { %15548 = vst [vmem:[#allocation8_spill] sm:$0xff] %v15547_v10  ;;  %v15551_v16 = vsel %vm8533_vm9, 4294967295, %v15550_v16  ;;  %vm4079_vm14 = vmand %vm8473_vm11, %vm15553_vm1  ;;  %v952_v27 = vrot.slane %v950_v12, 3  ;;  %v955_v28 = vrot.slane %v953_v20, 4  ;;  %vm15101_vm11 = vcmp.ge.s32.totalorder %v8276_v2, 0  ;;  %7421 = vmatpush3.bf16.msra.mxu1 %v7840_v60 }
  0xb3   :  { %15552 = vst [vmem:[#allocation9_spill] sm:$0xff] %v15551_v16  ;;  %vm4080_vm5 = vmand %vm8477_vm4, %vm15554_vm8  ;;  %v948_v29 = vor.u32 %v947_v26, %v944_v24  ;;  %vm15097_vm4 = vsmask.f32 4352  ;;  %vm15102_vm1 = vcmp.ge.s32.totalorder %v8264_v62, 0  ;;  %7422 = vmatprep.subr.bf16.mxu1 %v7841_v40  ;;  %vm15118_vm12 = vcmp.ge.s32.totalorder %v8660_v5, 4294967295 }
  0xb4   :  { %vm8547_vm2 = vmand %vm4079_vm14, %vm15555_vm15  ;;  %v8557_v30 = vor.u32 %v955_v28, %v952_v27  ;;  %vm15103_vm14 = vcmp.le.s32.totalorder %v8276_v2, 7  ;;  %vm15561_vm15 = vnez %v15491_v1  ;;  %15590 = vst [vmem:[#allocation16_spill] sm:$0xff] %v8703_v15  ;;  %v15592_v18 = vmov 0  ;;  %v8758_v28 = vpop.permute.xlu0 %190 }
  0xb5   :  { %v15557_v21 = vsel %vm8547_vm2, 4294967295, %v15556_v21  ;;  %vm8553_vm9 = vmand %vm4080_vm5, %vm15558_vm10  ;;  %vm627_vm5 = vcmp.le.s32.totalorder %v8264_v62, 7  ;;  %v15594_v12 = vmov 0  ;;  %v15596_v20 = vmov 0  ;;  %15605 = vst [vmem:[#allocation18_spill] sm:$0xff] %v8758_v28 }
  0xb6   :  { %v15560_v22 = vsel %vm8553_vm9, 4294967295, %v15559_v22  ;;  %v957_v59 = vsel %vm15097_vm4, %v948_v29, %v8557_v30  ;;  %vm610_vm8 = vmand %vm8259_vm6, %vm15101_vm11  ;;  %vm3162_vm11 = vcmp.ge.s32.totalorder %v8241_v55, 4294967295  ;;  %7423 = vmatpush3.bf16.msra.mxu1 %v7841_v40  ;;  %v15598_v24 = vmov 0  ;;  %v68_v29 = vld [vmem:[%s15060_s0 + $0x24] sm:$0xff]  }
  0xb7   :  { %7426 = vmatprep.mubr.bf16.mxu1 %v957_v59  ;;  %vm611_vm10 = vmand %vm15561_vm15, %vm15102_vm1  ;;  %vm3178_vm1 = vcmp.le.s32.totalorder %v8241_v55, 6  ;;  %7424 = vmatprep.subr.bf16.mxu1 %v7843_v11  ;;  %v15600_v26 = vmov 0  ;;  %v15603_v27 = vmov 0  ;;  %v15606_v60 = vmov 0  ;;  %84 = vst [vmem:[#allocation2 + $0x2c] sm:$0xff] %v68_v29   ;;  %v7846_v29 = vld [vmem:[%s15059_s5 + $0xa0] sm:$0xff]  }
  0xb8   :  { %vm642_vm4 = vmand %vm610_vm8, %vm15103_vm14  ;;  %vm3163_vm8 = vcmp.ge.s32.totalorder %v8245_v57, 4294967295  ;;  %vm3179_vm14 = vcmp.le.s32.totalorder %v8245_v57, 6  ;;  %v15609_v59 = vmov 0  ;;  %vm15613_vm6 = vcmp.ge.s32.totalorder %v8758_v28, 4294967295 }
  0xb9   :  { %vm643_vm7 = vmand %vm611_vm10, %vm627_vm5  ;;  %v15620_v40 = vmov 0 }
  0xba   :  { %vm658_vm9 = vmpackc.low %vm642_vm4, %vm642_vm4  ;;  %7425 = vmatpush3.bf16.msra.mxu1 %v7843_v11 }
  0xbb   :  { %vm659_vm2 = vmpackc.low %vm643_vm7, %vm643_vm7  ;;  %v674_v32 = vsel %vm658_vm9, %v222_v6, 0  ;;  %vm15566_vm9 = vcmp.ge.s32.totalorder %v8276_v2, 0  ;;  %v15580_v6 = vmov 0 }
  0xbc   :  { %v675_v33 = vsel %vm659_vm2, %v8578_v31, 0  ;;  %vm8589_vm3 = vmand %vm3162_vm11, %vm3178_vm1  ;;  %vm15567_vm11 = vcmp.ge.s32.totalorder %v8264_v62, 0  ;;  %vm15568_vm1 = vcmp.le.s32.totalorder %v8276_v2, 7 }
  0xbd   :  { %v6896_v34 = vcombine.low %v674_v32, %v675_v33  ;;  %v15563_v38 = vsel %vm8589_vm3, 4294967295, %v15562_v38  ;;  %vm8593_vm7 = vmand %vm3163_vm8, %vm3179_vm14  ;;  %v15611_v32 = vmov 0  ;;  %v15614_v33 = vmov 0 }
  0xbe   :  { %v15565_v39 = vsel %vm8593_vm7, 4294967295, %v15564_v39  ;;  %vm3775_vm2 = vmand %vm8589_vm3, %vm15566_vm9  ;;  %vm3182_vm3 = vcmp.le.s32.totalorder %v8638_v56, 6 }
  0xbf   :  { %7395 = vmatmul.mubr.bf16.vlgmr.msra.gmra.mxu0 %v6896_v34  ;;  %vm3776_vm4 = vmand %vm8593_vm7, %vm15567_vm11  ;;  %vm1787_vm11 = vcmp.le.s32.totalorder %v8583_v35, 7  ;;  %v15617_v34 = vmov 0 }
  0xc0   :  { %vm3791_vm14 = vmand %vm3775_vm2, %vm15568_vm1  ;;  %7443 = vmatpush3.bf16.msra.mxu0 %v7842_v43  ;;  %vm1771_vm2 = vcmp.ge.s32.totalorder %v8583_v35, 0  ;;  %v7845_v43 = vld [vmem:[%s15059_s5 + $0xa8] sm:$0xff]  }
  0xc1   :  { %vm3792_vm10 = vmand %vm3776_vm4, %vm627_vm5  ;;  %vm15109_vm5 = vcmp.ge.s32.totalorder %v8623_v51, 1  ;;  %vm15112_vm4 = vcmp.le.s32.totalorder %v8623_v51, 8  ;;  %7444 = vmatprep.subr.bf16.mxu0 %v7844_v19 }
  0xc2   :  { %vm3807_vm8 = vmpackc.low %vm3791_vm14, %vm3791_vm14 }
  0xc3   :  { %vm3808_vm9 = vmpackc.low %vm3792_vm10, %vm3792_vm10  ;;  %v8617_v48 = vsel %vm3807_vm8, %v2607_v44, 0  ;;  %vm3165_vm8 = vcmp.ge.s32.totalorder %v8583_v35, 4294967295  ;;  %v15624_v44 = vmov 0 }
  0xc4   :  { %15569 = vst [vmem:[#allocation10_spill] sm:$0xff] %v8617_v48  ;;  %v8621_v50 = vsel %vm3808_vm9, %v2608_v45, 0  ;;  %vm8631_vm1 = vmand %vm1771_vm2, %vm1787_vm11  ;;  %vm3181_vm9 = vcmp.le.s32.totalorder %v8583_v35, 6  ;;  %7445 = vmatpush3.bf16.msra.mxu0 %v7844_v19  ;;  %v8889_v48 = vld [vmem:[#allocation2 + $0x18] sm:$0xf]  ;;  %v15642_v45 = vmov 0 }
  0xc5   :  { %15570 = vst [vmem:[#allocation11_spill] sm:$0xff] %v8621_v50  ;;  %v15573_v53 = vsel %vm8631_vm1, 4294967295, %v15572_v53  ;;  %vm1819_vm14 = vmand %vm8631_vm1, %vm15109_vm5  ;;  %vm15115_vm1 = vcmp.le.s32.totalorder %v8660_v5, 8  ;;  %7446 = vmatprep.subr.bf16.mxu0 %v7845_v43 }
  0xc6   :  { %vm8646_vm10 = vmand %vm1819_vm14, %vm15112_vm4 }
  0xc7   :  { %v15575_v63 = vsel %vm8646_vm10, 4294967295, %v15574_v63  ;;  %vm8652_vm2 = vmand %vm3165_vm8, %vm3181_vm9  ;;  %vm1770_vm10 = vcmp.ge.s32.totalorder %v8619_v49, 0  ;;  %vm1786_vm8 = vcmp.le.s32.totalorder %v8619_v49, 7  ;;  %vm15114_vm9 = vcmp.ge.s32.totalorder %v8660_v5, 1 }
  0xc8   :  { %v15577_v3 = vsel %vm8652_vm2, 4294967295, %v15576_v3  ;;  %vm3213_vm11 = vmand %vm8652_vm2, %vm15109_vm5  ;;  %vm15120_vm2 = vcmp.le.s32.totalorder %v8660_v5, 6  ;;  %7447 = vmatpush3.bf16.msra.mxu0 %v7845_v43  ;;  %v421_v43 = vrot.slane %v420_v17, 4 }
  0xc9   :  { %15578 = vst [vmem:[#allocation13_spill] sm:$0xff] %v15577_v3  ;;  %vm8664_vm14 = vmand %vm3213_vm11, %vm15112_vm4  ;;  %vm3164_vm4 = vcmp.ge.s32.totalorder %v8619_v49, 4294967295  ;;  %7448 = vmatprep.subr.bf16.mxu0 %v7846_v29 }
  0xca   :  { %v15581_v6 = vsel %vm8664_vm14, 4294967295, %v15580_v6  ;;  %vm1802_vm0 = vmand %vm1770_vm10, %vm1786_vm8  ;;  %vm3180_vm14 = vcmp.le.s32.totalorder %v8619_v49, 6 }
  0xcb   :  { %vm1818_vm5 = vmand %vm1802_vm0, %vm15114_vm9 }
  0xcc   :  { %vm8678_vm11 = vmand %vm1818_vm5, %vm15115_vm1  ;;  %vm15589_vm5 = vcmp.ge.s32.totalorder %v8660_v5, 1  ;;  %7449 = vmatpush3.bf16.msra.mxu0 %v7846_v29 }
  0xcd   :  { %v15583_v7 = vsel %vm8678_vm11, 4294967295, %v15582_v7  ;;  %vm2625_vm10 = vmand %vm1802_vm0, %vm15118_vm12  ;;  %vm15591_vm0 = vcmp.le.s32.totalorder %v8660_v5, 8 }
  0xce   :  { %vm8688_vm8 = vmand %vm2625_vm10, %vm15120_vm2 }
  0xcf   :  { %v15585_v8 = vsel %vm8688_vm8, 4294967295, %v15584_v8  ;;  %vm8692_vm9 = vmand %vm3164_vm4, %vm3180_vm14  ;;  %vm1773_vm4 = vcmp.ge.s32.totalorder %v8600_v41, 0  ;;  %vm1789_vm14 = vcmp.le.s32.totalorder %v8600_v41, 7 }
  0xd0   :  { %v15587_v9 = vsel %vm8692_vm9, 4294967295, %v15586_v9  ;;  %vm3212_vm1 = vmand %vm8692_vm9, %vm15589_vm5 }
  0xd1   :  { %15588 = vst [vmem:[#allocation15_spill] sm:$0xff] %v15587_v9  ;;  %vm8707_vm10 = vmand %vm3212_vm1, %vm15591_vm0  ;;  %vm15123_vm1 = vcmp.ge.s32.totalorder %v8703_v15, 1 }
  0xd2   :  { %v15593_v18 = vsel %vm8707_vm10, 4294967295, %v15592_v18  ;;  %vm4083_vm5 = vmand %vm8692_vm9, %vm15118_vm12  ;;  %vm15124_vm10 = vcmp.le.s32.totalorder %v8703_v15, 8 }
  0xd3   :  { %vm8723_vm0 = vmand %vm4083_vm5, %vm15120_vm2  ;;  %vm3167_vm5 = vcmp.ge.s32.totalorder %v8600_v41, 4294967295  ;;  %vm3183_vm2 = vcmp.le.s32.totalorder %v8600_v41, 6 }
  0xd4   :  { %v15595_v12 = vsel %vm8723_vm0, 4294967295, %v15594_v12  ;;  %vm8728_vm8 = vmand %vm1773_vm4, %vm1789_vm14 }
  0xd5   :  { %v15597_v20 = vsel %vm8728_vm8, 4294967295, %v15596_v20  ;;  %vm1821_vm12 = vmand %vm8728_vm8, %vm15123_vm1  ;;  %vm15608_vm8 = vcmp.le.s32.totalorder %v8758_v28, 6 }
  0xd6   :  { %vm8738_vm9 = vmand %vm1821_vm12, %vm15124_vm10  ;;  %vm242_vm12 = vcmp.ge.s32.totalorder %v8638_v56, 1 }
  0xd7   :  { %v15599_v24 = vsel %vm8738_vm9, 4294967295, %v15598_v24  ;;  %vm8744_vm0 = vmand %vm3167_vm5, %vm3183_vm2  ;;  %vm258_vm2 = vcmp.le.s32.totalorder %v8638_v56, 8  ;;  %vm15131_vm5 = vcmp.ge.s32.totalorder %v8758_v28, 4294967295 }
  0xd8   :  { %v15601_v26 = vsel %vm8744_vm0, 4294967295, %v15600_v26  ;;  %vm3215_vm4 = vmand %vm8744_vm0, %vm15123_vm1  ;;  %vm15136_vm0 = vcmp.le.s32.totalorder %v8758_v28, 8 }
  0xd9   :  { %15602 = vst [vmem:[#allocation17_spill] sm:$0xff] %v15601_v26  ;;  %vm8754_vm14 = vmand %vm3215_vm4, %vm15124_vm10  ;;  %vm1772_vm4 = vcmp.ge.s32.totalorder %v8638_v56, 0  ;;  %vm1788_vm10 = vcmp.le.s32.totalorder %v8638_v56, 7 }
  0xda   :  { %v15604_v27 = vsel %vm8754_vm14, 4294967295, %v15603_v27  ;;  %vm8767_vm1 = vmand %vm242_vm12, %vm258_vm2  ;;  %vm290_vm14 = vcmp.ge.s32.totalorder %v8758_v28, 1 }
  0xdb   :  { %v15607_v60 = vsel %vm8767_vm1, 4294967295, %v15606_v60  ;;  %vm1213_vm9 = vmand %vm8767_vm1, %vm15131_vm5  ;;  %vm3166_vm5 = vcmp.ge.s32.totalorder %v8638_v56, 4294967295  ;;  %v15632_v56 = vmov 0 }
  0xdc   :  { %vm8781_vm12 = vmand %vm1213_vm9, %vm15608_vm8 }
  0xdd   :  { %v15610_v59 = vsel %vm8781_vm12, 4294967295, %v15609_v59  ;;  %vm1804_vm2 = vmand %vm1772_vm4, %vm1788_vm10 }
  0xde   :  { %vm1820_vm11 = vmand %vm1804_vm2, %vm290_vm14 }
  0xdf   :  { %vm8789_vm7 = vmand %vm1820_vm11, %vm15136_vm0 }
  0xe0   :  { %v15612_v32 = vsel %vm8789_vm7, 4294967295, %v15611_v32  ;;  %vm2627_vm9 = vmand %vm1804_vm2, %vm15613_vm6  ;;  %vm15166_vm7 = vcmp.ge.s32.totalorder %v8660_v5, 0 }
  0xe1   :  { %vm8799_vm12 = vmand %vm2627_vm9, %vm15608_vm8 }
  0xe2   :  { %v15615_v33 = vsel %vm8799_vm12, 4294967295, %v15614_v33  ;;  %vm8803_vm10 = vmand %vm3166_vm5, %vm3182_vm3 }
  0xe3   :  { %15616 = vst [vmem:[#allocation19_spill] sm:$0xff] %v15615_v33  ;;  %v15618_v34 = vsel %vm8803_vm10, 4294967295, %v15617_v34  ;;  %vm3214_vm11 = vmand %vm8803_vm10, %vm290_vm14 }
  0xe4   :  { %15619 = vst [vmem:[#allocation20_spill] sm:$0xff] %v15618_v34  ;;  %vm8813_vm4 = vmand %vm3214_vm11, %vm15136_vm0  ;;  %vm256_vm11 = vcmp.le.s32.totalorder %v8619_v49, 8  ;;  %vm241_vm0 = vcmp.ge.s32.totalorder %v8583_v35, 1 }
  0xe5   :  { %v15621_v40 = vsel %vm8813_vm4, 4294967295, %v15620_v40  ;;  %vm4085_vm3 = vmand %vm8803_vm10, %vm15613_vm6  ;;  %vm257_vm6 = vcmp.le.s32.totalorder %v8583_v35, 8  ;;  %vm15627_vm10 = vcmp.le.s32.totalorder %v8758_v28, 8  ;;  %vm15634_vm4 = vcmp.ge.s32.totalorder %v8660_v5, 1 }
  0xe6   :  { %15622 = vst [vmem:[#allocation21_spill] sm:$0xff] %v15621_v40  ;;  %vm15623_vm5 = vmmov %vm15608_vm8  ;;  %vm240_vm8 = vcmp.ge.s32.totalorder %v8619_v49, 1 }
  0xe7   :  { %vm8826_vm2 = vmand %vm4085_vm3, %vm15623_vm5 }
  0xe8   :  { %v15625_v44 = vsel %vm8826_vm2, 4294967295, %v15624_v44  ;;  %vm306_vm9 = vmand %vm8767_vm1, %vm290_vm14  ;;  %vm15165_vm14 = vcmp.ge.s32.totalorder %v8623_v51, 0 }
  0xe9   :  { %15626 = vst [vmem:[#allocation22_spill] sm:$0xff] %v15625_v44  ;;  %vm8840_vm3 = vmand %vm306_vm9, %vm15627_vm10  ;;  %vm15635_vm9 = vcmp.ge.s32.totalorder %v8623_v51, 1 }
  0xea   :  { %vm8844_vm5 = vmand %vm240_vm8, %vm256_vm11  ;;  %vm15636_vm11 = vcmp.le.s32.totalorder %v8660_v5, 8 }
  0xeb   :  { %vm8848_vm2 = vmand %vm241_vm0, %vm257_vm6  ;;  %vm15637_vm6 = vcmp.le.s32.totalorder %v8623_v51, 8 }
  0xec   :  { %v15633_v56 = vsel %vm8848_vm2, 4294967295, %v15632_v56  ;;  %vm304_vm10 = vmand %vm8844_vm5, %vm15634_vm4  ;;  %vm15164_vm4 = vcmp.le.s32.totalorder %v8660_v5, 7 }
  0xed   :  { %vm305_vm8 = vmand %vm8848_vm2, %vm15635_vm9  ;;  %vm15159_vm9 = vcmp.le.s32.totalorder %v8623_v51, 7 }
  0xee   :  { %vm336_vm0 = vmand %vm304_vm10, %vm15636_vm11 }
  0xef   :  { %vm337_vm12 = vmand %vm305_vm8, %vm15637_vm6  ;;  %vm15640_vm6 = vcmp.ge.s32.totalorder %v8660_v5, 4294967295 }
  0xf0   :  { %vm352_vm15 = vmpackc.low %vm336_vm0, %vm336_vm0 }
  0xf1   :  { %vm353_vm1 = vmpackc.low %vm337_vm12, %vm337_vm12  ;;  %v368_v35 = vsel %vm352_vm15, 65537, %v15143_v0 }
  0xf2   :  { %v369_v49 = vsel %vm353_vm1, 65537, %v15143_v0  ;;  %v423_v11 = vshll.u32 %v368_v35, 16  ;;  %v427_v19 = vshrl.u32 %v368_v35, 16  ;;  %vm612_vm10 = vmand %vm8844_vm5, %vm15166_vm7  ;;  %v224_v35 = vld [vmem:[#allocation2 + $0x14] sm:$0xf] }
  0xf3   :  { %vm613_vm12 = vmand %vm8848_vm2, %vm15165_vm14  ;;  %v433_v50 = vshll.u32 %v369_v49, 16  ;;  %v437_v16 = vshrl.u32 %v369_v49, 16 }
  0xf4   :  { %v425_v52 = vrot.slane %v423_v11, 5  ;;  %v429_v0 = vrot.slane %v427_v19, 4  ;;  %vm644_vm15 = vmand %vm612_vm10, %vm15164_vm4 }
  0xf5   :  { %vm645_vm1 = vmand %vm613_vm12, %vm15159_vm9  ;;  %v435_v19 = vrot.slane %v433_v50, 5  ;;  %vm15161_vm9 = vcmp.le.s32.totalorder %v8758_v28, 7 }
  0xf6   :  { %v426_v34 = vsel %vm8443_vm13, %v421_v43, %v425_v52  ;;  %v430_v9 = vor.u32 %v429_v0, %v425_v52  ;;  %vm660_vm8 = vmpackc.low %vm644_vm15, %vm644_vm15 }
  0xf7   :  { %vm15639_vm11 = vmpackc.low %vm8840_vm3, %vm8840_vm3  ;;  %v676_v17 = vsel %vm660_vm8, %v224_v35, 0  ;;  %vm546_vm12 = vcmp.ne.s16.totalorder %v426_v34, 0  ;;  %vm15641_vm3 = vcmp.le.s32.totalorder %v8660_v5, 6  ;;  %v8915_v34 = vpop.permute.xlu1 %135  ;;  %vm259_vm8 = vcmp.le.s32.totalorder %v8600_v41, 8 }
  0xf8   :  { %v370_v14 = vsel %vm15639_vm11, 65537, %v15638_v13  ;;  %vm661_vm0 = vmpackc.low %vm645_vm1, %vm645_vm1  ;;  %v431_v11 = vrot.slane %v430_v9, 4  ;;  %v439_v9 = vrot.slane %v437_v16, 4  ;;  %v563_v29 = vsel %vm546_vm12, %v8578_v31, 0 }
  0xf9   :  { %v677_v10 = vsel %vm661_vm0, %v8889_v48, 0  ;;  %vm1211_vm10 = vmand %vm8844_vm5, %vm15640_vm6  ;;  %v443_v50 = vshll.u32 %v370_v14, 16  ;;  %v447_v49 = vshrl.u32 %v370_v14, 16  ;;  %vm243_vm5 = vcmp.ge.s32.totalorder %v8600_v41, 1 }
  0xfa   :  { %v6897_v0 = vcombine.low %v676_v17, %v677_v10  ;;  %v436_v52 = vsel %vm8443_vm13, %v431_v11, %v435_v19  ;;  %vm8910_vm15 = vmand %vm1211_vm10, %vm15641_vm3  ;;  %v440_v11 = vor.u32 %v439_v9, %v435_v19  ;;  %v15645_v16 = vmov 0 }
  0xfb   :  { %v15643_v45 = vsel %vm8910_vm15, 4294967295, %v15642_v45  ;;  %vm547_vm1 = vcmp.ne.s16.totalorder %v436_v52, 0  ;;  %v445_v5 = vrot.slane %v443_v50, 5  ;;  %v449_v44 = vrot.slane %v447_v49, 4  ;;  %vm8919_vm11 = vmand %vm243_vm5, %vm259_vm8  ;;  %v8925_v14 = vpop.permute.xlu1 %141  ;;  %v226_v49 = vld [vmem:[#allocation2 + $0x1c] sm:$0xf] }
  0xfc   :  { %15644 = vst [vmem:[#allocation23_spill] sm:$0xff] %v15643_v45  ;;  %7398 = vmatprep.mubr.bf16.mxu0 %v6897_v0  ;;  %v564_v54 = vsel %vm547_vm1, %v224_v35, 0  ;;  %v15646_v16 = vsel %vm8919_vm11, 4294967295, %v15645_v16  ;;  %v441_v35 = vrot.slane %v440_v11, 4  ;;  %vm15648_vm0 = vcmp.ge.s32.totalorder %v8703_v15, 1 }
  0xfd   :  { %v6913_v43 = vcombine.low %v563_v29, %v564_v54  ;;  %15647 = vst [vmem:[#allocation24_spill] sm:$0xff] %v15646_v16  ;;  %vm307_vm6 = vmand %vm8919_vm11, %vm15648_vm0  ;;  %v450_v19 = vor.u32 %v449_v44, %v445_v5  ;;  %vm15162_vm10 = vcmp.ge.s32.totalorder %v8758_v28, 0  ;;  %vm15649_vm12 = vcmp.le.s32.totalorder %v8703_v15, 8  ;;  %v8958_v29 = vld [vmem:[#allocation2 + $0x20] sm:$0xf] }
  0xfe   :  { %vm339_vm3 = vmand %vm307_vm6, %vm15649_vm12  ;;  %vm15160_vm1 = vcmp.ge.s32.totalorder %v8703_v15, 0  ;;  %vm15650_vm5 = vsmask.f32 4352  ;;  %vm15651_vm0 = vnez %v15607_v60  ;;  %vm15163_vm12 = vcmp.le.s32.totalorder %v8703_v15, 7  ;;  %v8956_v60 = vpop.permute.xlu0 %132 }
  0xff   :  { %v959_v10 = vshrl.u32 %v6913_v43, 16  ;;  %v962_v17 = vshll.u32 %v6913_v43, 16  ;;  %vm355_vm8 = vmpackc.low %vm339_vm3, %vm339_vm3  ;;  %v451_v0 = vrot.slane %v450_v19, 4  ;;  %v8966_v43 = vpop.permute.xlu1 %199  ;;  %v15707_v11 = vmov 0 }
 0x100   :  { %v371_v44 = vsel %vm355_vm8, 65537, %v15638_v13  ;;  %vm614_vm6 = vmand %vm15651_vm0, %vm15162_vm10  ;;  %15652 = vst [vmem:[#allocation25_spill] sm:$0xff] %v8966_v43  ;;  %vm1775_vm0 = vcmp.ge.s32.totalorder %v8915_v34, 0  ;;  %v15710_v28 = vmov 0  ;;  %v15811_v45 = vmov 0 }
 0x101   :  { %v961_v40 = vrot.slane %v959_v10, 3  ;;  %v964_v52 = vrot.slane %v962_v17, 4  ;;  %v453_v50 = vshll.u32 %v371_v44, 16  ;;  %v457_v9 = vshrl.u32 %v371_v44, 16  ;;  %vm615_vm3 = vmand %vm8919_vm11, %vm15160_vm1 }
 0x102   :  { %vm647_vm8 = vmand %vm615_vm3, %vm15163_vm12  ;;  %vm15168_vm12 = vcmp.ge.s32.totalorder %v8966_v43, 1  ;;  %v15655_v44 = vmov 0 }
 0x103   :  { %v8923_v31 = vor.u32 %v964_v52, %v961_v40  ;;  %v7847_v40 = vld [vmem:[%s15059_s5 + $0x98] sm:$0xff]   ;;  %v8960_v54 = vrot.slane %v453_v50, 5  ;;  %vm663_vm10 = vmpackc.low %vm647_vm8, %vm647_vm8  ;;  %vm3185_vm8 = vcmp.le.s32.totalorder %v8915_v34, 6 }
 0x104   :  { %7450 = vmatprep.subr.bf16.mxu0 %v7847_v40 }
 0x105   :  { %v966_v41 = vsel %vm15650_vm5, %v8557_v30, %v8923_v31  ;;  %v446_v30 = vsel %vm8443_vm13, %v441_v35, %v445_v5  ;;  %7451 = vmatpush3.bf16.msra.mxu0 %v7847_v40  ;;  %vm646_vm5 = vmand %vm614_vm6, %vm15161_vm9  ;;  %v8962_v5 = vrot.slane %v457_v9, 4  ;;  %vm1791_vm9 = vcmp.le.s32.totalorder %v8915_v34, 7 }
 0x106   :  { %7427 = vmatmul.mubr.bf16.vlgmr.msra.gmra.mxu1 %v966_v41  ;;  %vm8969_vm1 = vcmp.ne.s16.totalorder %v446_v30, 0  ;;  %vm662_vm6 = vmpackc.low %vm646_vm5, %vm646_vm5  ;;  %v456_v17 = vsel %vm8443_vm13, %v451_v0, %v8960_v54  ;;  %v679_v35 = vsel %vm663_vm10, %v8958_v29, 0  ;;  %vm15171_vm5 = vcmp.le.s32.totalorder %v8966_v43, 8  ;;  %v8991_v0 = vpop.permute.xlu0 %138 }
 0x107   :  { %v678_v52 = vsel %vm662_vm6, %v226_v49, 0  ;;  %vm549_vm3 = vcmp.ne.s16.totalorder %v456_v17, 0  ;;  %v565_v19 = vsel %vm8969_vm1, %v8889_v48, 0  ;;  %vm8987_vm4 = vmand %vm1775_vm0, %vm1791_vm9  ;;  %v15658_v48 = vmov 0 }
 0x108   :  { %v566_v41 = vsel %vm549_vm3, %v226_v49, 0  ;;  %v6898_v40 = vcombine.low %v678_v52, %v679_v35  ;;  %v15656_v44 = vsel %vm8987_vm4, 4294967295, %v15655_v44  ;;  %vm1823_vm10 = vmand %vm8987_vm4, %vm15168_vm12  ;;  %v70_v49 = vld [vmem:[%s15060_s0 + $0x2c] sm:$0xff]   ;;  %vm3169_vm9 = vcmp.ge.s32.totalorder %v8915_v34, 4294967295 }
 0x109   :  { %15657 = vst [vmem:[#allocation26_spill] sm:$0xff] %v15656_v44  ;;  %v6914_v30 = vcombine.low %v565_v19, %v566_v41  ;;  %vm8999_vm1 = vmand %vm1823_vm10, %vm15171_vm5  ;;  %vm1769_vm0 = vcmp.ge.s32.totalorder %v8245_v57, 0  ;;  %vm1785_vm6 = vcmp.le.s32.totalorder %v8245_v57, 7  ;;  %v15661_v52 = vmov 0 }
 0x10a   :  { %7399 = vmatmul.mubr.bf16.gmra.mxu0 %v6898_v40  ;;  %v15659_v48 = vsel %vm8999_vm1, 4294967295, %v15658_v48  ;;  %86 = vst [vmem:[#allocation2 + $0x34] sm:$0xff] %v70_v49   ;;  %vm9010_vm3 = vmand %vm3169_vm9, %vm3185_vm8  ;;  %v9021_v19 = vpop.permute.xlu0 %196  ;;  %v15665_v41 = vmov 0  ;;  %vm15668_vm9 = vsmask.f32 4352  ;;  %vm1768_vm8 = vcmp.ge.s32.totalorder %v8241_v55, 0 }
 0x10b   :  { %15660 = vst [vmem:[#allocation27_spill] sm:$0xff] %v15659_v48  ;;  %v968_v50 = vshrl.u32 %v6914_v30, 16  ;;  %v971_v9 = vshll.u32 %v6914_v30, 16  ;;  %v15662_v52 = vsel %vm9010_vm3, 4294967295, %v15661_v52  ;;  %vm3217_vm14 = vmand %vm9010_vm3, %vm15168_vm12  ;;  %vm1784_vm10 = vcmp.le.s32.totalorder %v8241_v55, 7 }
 0x10c   :  { %15663 = vst [vmem:[#allocation28_spill] sm:$0xff] %v15662_v52  ;;  %15664 = vst [vmem:[#allocation29_spill] sm:$0xff] %v9021_v19  ;;  %vm1774_vm12 = vcmp.ge.s32.totalorder %v8956_v60, 0  ;;  %vm1790_vm3 = vcmp.le.s32.totalorder %v8956_v60, 7  ;;  %vm15673_vm4 = vcmp.ge.s32.totalorder %v8264_v62, 1  ;;  %v15674_v55 = vmov 0 }
 0x10d   :  { %v970_v10 = vrot.slane %v968_v50, 3  ;;  %v973_v17 = vrot.slane %v971_v9, 4  ;;  %vm9025_vm7 = vmand %vm3217_vm14, %vm15171_vm5  ;;  %vm15671_vm14 = vcmp.ge.s32.totalorder %v8264_v62, 4294967295  ;;  %vm15672_vm5 = vnez %v15491_v1 }
 0x10e   :  { %v15666_v41 = vsel %vm9025_vm7, 4294967295, %v15665_v41  ;;  %vm9034_vm1 = vmand %vm1769_vm0, %vm1785_vm6  ;;  %vm15178_vm6 = vcmp.le.s32.totalorder %v9021_v19, 8  ;;  %v15679_v1 = vmov 0  ;;  %v15723_v50 = vmov 0  ;;  %v9211_v40 = vpop.permute.xlu0 %202 }
 0x10f   :  { %v9014_v35 = vor.u32 %v973_v17, %v970_v10  ;;  %15667 = vst [vmem:[#allocation30_spill] sm:$0xff] %v15666_v41  ;;  %vm1210_vm7 = vmand %vm15672_vm5, %vm15671_vm14  ;;  %vm15180_vm14 = vcmp.le.s32.totalorder %v8264_v62, 6  ;;  %v15694_v10 = vmov 0  ;;  %v9109_v17 = vpop.permute.xlu1 %205  ;;  %v15730_v49 = vmov 0 }
 0x110   :  { %vm1817_vm0 = vmand %vm9034_vm1, %vm15673_vm4  ;;  %15698 = vst [vmem:[#allocation34_spill] sm:$0xff] %v9109_v17  ;;  %v15785_v44 = vmov 0  ;;  %v15801_v52 = vmov 0 }
 0x111   :  { %v975_v57 = vsel %vm15668_vm9, %v8923_v31, %v9014_v35  ;;  %vm15177_vm9 = vcmp.ge.s32.totalorder %v9021_v19, 1  ;;  %vm9050_vm11 = vmand %vm1768_vm8, %vm1784_vm10  ;;  %v15676_v31 = vmov 0  ;;  %vm3168_vm10 = vcmp.ge.s32.totalorder %v8956_v60, 4294967295  ;;  %15735 = vst [vmem:[#allocation41_spill] sm:$0xff] %v9211_v40 }
 0x112   :  { %7430 = vmatprep.mubr.bf16.mxu1 %v975_v57  ;;  %v15675_v55 = vsel %vm9050_vm11, 4294967295, %v15674_v55  ;;  %vm9054_vm15 = vmand %vm1774_vm12, %vm1790_vm3  ;;  %vm15682_vm12 = vcmp.le.s32.totalorder %v8264_v62, 8  ;;  %vm3184_vm8 = vcmp.le.s32.totalorder %v8956_v60, 6  ;;  %v7848_v57 = vld [vmem:[%s15059_s5 + $0x90] sm:$0xff]  }
 0x113   :  { %v15677_v31 = vsel %vm9054_vm15, 4294967295, %v15676_v31  ;;  %vm1822_vm5 = vmand %vm9054_vm15, %vm15177_vm9  ;;  %vm15685_vm9 = vcmp.ge.s32.totalorder %v8264_v62, 4294967295  ;;  %7452 = vmatprep.subr.bf16.mxu0 %v7848_v57 }
 0x114   :  { %15678 = vst [vmem:[#allocation31_spill] sm:$0xff] %v15677_v31  ;;  %vm9066_vm4 = vmand %vm1822_vm5, %vm15178_vm6  ;;  %7453 = vmatpush3.bf16.msra.mxu0 %v7848_v57  ;;  %v15753_v31 = vmov 0 }
 0x115   :  { %v15680_v1 = vsel %vm9066_vm4, 4294967295, %v15679_v1  ;;  %vm9072_vm3 = vmand %vm1817_vm0, %vm15682_vm12  ;;  %vm15690_vm0 = vcmp.ge.s32.totalorder %v8276_v2, 4294967295  ;;  %vm15691_vm12 = vnez %v15487_v61  ;;  %v15700_v61 = vmov 0 }
 0x116   :  { %15681 = vst [vmem:[#allocation32_spill] sm:$0xff] %v15680_v1  ;;  %vm9082_vm2 = vmand %vm9034_vm1, %vm15685_vm9  ;;  %vm15188_vm1 = vcmp.ge.s32.totalorder %v9021_v19, 4294967295  ;;  %vm15697_vm9 = vcmp.ge.s32.totalorder %v9021_v19, 1 }
 0x117   :  { %vm9088_vm5 = vmand %vm1210_vm7, %vm15180_vm14  ;;  %vm1793_vm14 = vcmp.le.s32.totalorder %v8925_v14, 7 }
 0x118   :  { %vm9096_vm6 = vmand %vm15691_vm12, %vm15690_vm0  ;;  %vm15699_vm0 = vcmp.le.s32.totalorder %v9021_v19, 8 }
 0x119   :  { %vm9100_vm15 = vmand %vm3168_vm10, %vm3184_vm8  ;;  %vm15703_vm10 = vcmp.ge.s32.totalorder %v8276_v2, 1 }
 0x11a   :  { %v15695_v10 = vsel %vm9100_vm15, 4294967295, %v15694_v10  ;;  %vm3216_vm7 = vmand %vm9100_vm15, %vm15697_vm9  ;;  %vm1777_vm9 = vcmp.ge.s32.totalorder %v8925_v14, 0 }
 0x11b   :  { %15696 = vst [vmem:[#allocation33_spill] sm:$0xff] %v15695_v10  ;;  %vm9114_vm12 = vmand %vm3216_vm7, %vm15699_vm0  ;;  %vm15190_vm0 = vcmp.ge.s32.totalorder %v9109_v17, 1  ;;  %v15713_v10 = vmov 0 }
 0x11c   :  { %v15701_v61 = vsel %vm9114_vm12, 4294967295, %v15700_v61  ;;  %vm9125_vm8 = vmand %vm9050_vm11, %vm15703_vm10  ;;  %vm15706_vm12 = vcmp.le.s32.totalorder %v9021_v19, 6  ;;  %vm15191_vm10 = vcmp.le.s32.totalorder %v9109_v17, 8  ;;  %vm3187_vm11 = vcmp.le.s32.totalorder %v8925_v14, 6 }
 0x11d   :  { %15702 = vst [vmem:[#allocation35_spill] sm:$0xff] %v15701_v61  ;;  %vm4087_vm7 = vmand %vm9100_vm15, %vm15188_vm1 }
 0x11e   :  { %vm9138_vm4 = vmand %vm4087_vm7, %vm15706_vm12  ;;  %vm15728_vm12 = vcmp.ge.s32.totalorder %v9109_v17, 1 }
 0x11f   :  { %v15708_v11 = vsel %vm9138_vm4, 4294967295, %v15707_v11  ;;  %vm9143_vm13 = vmand %vm1777_vm9, %vm1793_vm14  ;;  %vm15716_vm14 = vcmp.le.s32.totalorder %v8264_v62, 6 }
 0x120   :  { %15709 = vst [vmem:[#allocation36_spill] sm:$0xff] %v15708_v11  ;;  %v15711_v28 = vsel %vm9143_vm13, 4294967295, %v15710_v28  ;;  %vm1825_vm1 = vmand %vm9143_vm13, %vm15190_vm0  ;;  %vm3171_vm0 = vcmp.ge.s32.totalorder %v8925_v14, 4294967295  ;;  %v15725_v11 = vmov 0 }
 0x121   :  { %15712 = vst [vmem:[#allocation37_spill] sm:$0xff] %v15711_v28  ;;  %vm9157_vm7 = vmand %vm1825_vm1, %vm15191_vm10  ;;  %vm15719_vm1 = vcmp.le.s32.totalorder %v8276_v2, 6  ;;  %v15751_v28 = vmov 0 }
 0x122   :  { %v15714_v10 = vsel %vm9157_vm7, 4294967295, %v15713_v10  ;;  %vm9165_vm9 = vmand %vm9082_vm2, %vm15716_vm14  ;;  %vm15722_vm2 = vcmp.le.s32.totalorder %v8276_v2, 8 }
 0x123   :  { %15715 = vst [vmem:[#allocation38_spill] sm:$0xff] %v15714_v10  ;;  %vm9178_vm10 = vmand %vm9096_vm6, %vm15719_vm1  ;;  %v15720_v10 = vmov 0  ;;  %vm15729_vm1 = vcmp.le.s32.totalorder %v9109_v17, 8 }
 0x124   :  { %v15721_v10 = vsel %vm9178_vm10, 4294967295, %v15720_v10  ;;  %vm9186_vm14 = vmand %vm9125_vm8, %vm15722_vm2  ;;  %vm15733_vm8 = vcmp.ge.s32.totalorder %v8276_v2, 4294967295  ;;  %vm15734_vm2 = vnez %v15675_v55  ;;  %vm15758_vm10 = vnez %v15539_v58 }
 0x125   :  { %v15724_v50 = vsel %vm9186_vm14, 4294967295, %v15723_v50  ;;  %vm9190_vm15 = vmand %vm3171_vm0, %vm3187_vm11  ;;  %vm15740_vm11 = vcmp.ge.s32.totalorder %v8276_v2, 1  ;;  %vm1792_vm14 = vcmp.le.s32.totalorder %v8991_v0, 7 }
 0x126   :  { %v15726_v11 = vsel %vm9190_vm15, 4294967295, %v15725_v11  ;;  %vm3219_vm6 = vmand %vm9190_vm15, %vm15728_vm12  ;;  %vm15741_vm12 = vnez %v15563_v38  ;;  %v15760_v38 = vmov 0 }
 0x127   :  { %15727 = vst [vmem:[#allocation39_spill] sm:$0xff] %v15726_v11  ;;  %vm9200_vm7 = vmand %vm3219_vm6, %vm15729_vm1  ;;  %vm15736_vm6 = vcmp.le.s32.totalorder %v8276_v2, 6  ;;  %v15737_v11 = vmov 0 }
 0x128   :  { %v15731_v49 = vsel %vm9200_vm7, 4294967295, %v15730_v49  ;;  %vm2623_vm4 = vmand %vm15734_vm2, %vm15733_vm8  ;;  %vm246_vm8 = vcmp.ge.s32.totalorder %v8991_v0, 1  ;;  %vm262_vm2 = vcmp.le.s32.totalorder %v8991_v0, 8  ;;  %vm15745_vm7 = vnez %v15565_v39 }
 0x129   :  { %15732 = vst [vmem:[#allocation40_spill] sm:$0xff] %v15731_v49  ;;  %vm9221_vm1 = vmand %vm2623_vm4, %vm15736_vm6  ;;  %vm15744_vm6 = vcmp.ge.s32.totalorder %v8264_v62, 1  ;;  %v15777_v49 = vmov 0 }
 0x12a   :  { %v15738_v11 = vsel %vm9221_vm1, 4294967295, %v15737_v11  ;;  %vm15739_vm0 = vmpackc.low %vm9072_vm3, %vm9072_vm3  ;;  %vm15757_vm3 = vcmp.ge.s32.totalorder %v9211_v40, 4294967295  ;;  %vm15759_vm1 = vcmp.le.s32.totalorder %v9211_v40, 6 }
 0x12b   :  { %v1865_v55 = vsel %vm15739_vm0, 65537, %v15638_v13  ;;  %vm9237_vm15 = vmand %vm15741_vm12, %vm15740_vm11  ;;  %vm15750_vm0 = vcmp.ge.s32.totalorder %v8276_v2, 4294967295 }
 0x12c   :  { %vm9246_vm13 = vmand %vm15745_vm7, %vm15744_vm6  ;;  %v1908_v9 = vshll.u32 %v1865_v55, 16  ;;  %v1912_v41 = vshrl.u32 %v1865_v55, 16 }
 0x12d   :  { %vm15748_vm11 = vmpackc.low %vm9088_vm5, %vm9088_vm5  ;;  %vm15766_vm5 = vcmp.ge.s32.totalorder %v8991_v0, 0 }
 0x12e   :  { %v9257_v30 = vsel %vm15748_vm11, 65537, %v15638_v13  ;;  %vm9263_vm4 = vmand %vm15741_vm12, %vm15750_vm0  ;;  %vm15755_vm11 = vnez %v15503_v23  ;;  %vm15756_vm0 = vnez %v15506_v25  ;;  %v9327_v57 = vrot.slane %v1908_v9, 5 }
 0x12f   :  { %15749 = vst [vmem:[#allocation42_spill] sm:$0xff] %v9257_v30  ;;  %v15752_v28 = vsel %vm9263_vm4, 4294967295, %v15751_v28  ;;  %vm9267_vm6 = vmand %vm246_vm8, %vm262_vm2  ;;  %v1317_v55 = vshrl.u32 %v9257_v30, 16  ;;  %v1914_v48 = vrot.slane %v1912_v41, 4  ;;  %v15780_v41 = vmov 0 }
 0x130   :  { %v15754_v31 = vsel %vm9267_vm6, 4294967295, %v15753_v31  ;;  %vm1217_vm4 = vmand %vm9267_vm6, %vm15757_vm3  ;;  %15773 = vst [vmem:[#allocation45_spill] sm:$0xff] %v9327_v57 }
 0x131   :  { %vm9293_vm12 = vmand %vm1217_vm4, %vm15759_vm1  ;;  %vm15769_vm4 = vcmp.le.s32.totalorder %v8276_v2, 8  ;;  %v9360_v61 = vrot.slane %v1317_v55, 7 }
 0x132   :  { %v15761_v38 = vsel %vm9293_vm12, 4294967295, %v15760_v38  ;;  %vm15763_vm3 = vmpackc.low %vm9165_vm9, %vm9165_vm9  ;;  %vm15772_vm9 = vcmp.ge.s32.totalorder %v9211_v40, 1  ;;  %vm15784_vm12 = vnez %v15565_v39 }
 0x133   :  { %15762 = vst [vmem:[#allocation43_spill] sm:$0xff] %v15761_v38  ;;  %v9304_v1 = vsel %vm15763_vm3, 65537, %v15638_v13  ;;  %vm9311_vm1 = vmand %vm15766_vm5, %vm1792_vm14  ;;  %v15770_v38 = vmov 0  ;;  %vm15783_vm5 = vcmp.ge.s32.totalorder %v8264_v62, 4294967295  ;;  %vm15794_vm14 = vnez %v15528_v47 }
 0x134   :  { %15764 = vst [vmem:[#allocation44_spill] sm:$0xff] %v9304_v1  ;;  %vm9319_vm2 = vmand %vm9237_vm15, %vm15769_vm4  ;;  %vm15776_vm15 = vcmp.le.s32.totalorder %v8264_v62, 8  ;;  %v2712_v9 = vshrl.u32 %v9304_v1, 16 }
 0x135   :  { %v15771_v38 = vsel %vm9319_vm2, 4294967295, %v15770_v38  ;;  %vm1824_vm3 = vmand %vm9311_vm1, %vm15772_vm9  ;;  %vm15779_vm9 = vcmp.le.s32.totalorder %v9211_v40, 8  ;;  %15787 = vst [vmem:[#allocation47_spill] sm:$0xff] %v9360_v61  ;;  %vm15796_vm2 = vcmp.le.s32.totalorder %v9211_v40, 6 }
 0x136   :  { %vm9339_vm4 = vmand %vm9246_vm13, %vm15776_vm15  ;;  %vm3170_vm13 = vcmp.ge.s32.totalorder %v8991_v0, 4294967295  ;;  %vm3186_vm15 = vcmp.le.s32.totalorder %v8991_v0, 6  ;;  %v15797_v0 = vmov 0 }
 0x137   :  { %v15778_v49 = vsel %vm9339_vm4, 4294967295, %v15777_v49  ;;  %vm9345_vm6 = vmand %vm1824_vm3, %vm15779_vm9  ;;  %vm15788_vm3 = vnez %v15721_v10  ;;  %v1915_v10 = vor.u32 %v1914_v48, %v9327_v57 }
 0x138   :  { %v15781_v41 = vsel %vm9345_vm6, 4294967295, %v15780_v41  ;;  %vm9354_vm8 = vmand %vm15784_vm12, %vm15783_vm5  ;;  %vm15791_vm12 = vnez %v15724_v50  ;;  %vm15793_vm6 = vcmp.ge.s32.totalorder %v9211_v40, 4294967295  ;;  %v9401_v50 = vrot.slane %v2712_v9, 7 }
 0x139   :  { %15782 = vst [vmem:[#allocation46_spill] sm:$0xff] %v15781_v41  ;;  %v15786_v44 = vsel %vm9354_vm8, 4294967295, %v15785_v44  ;;  %vm15789_vm9 = vmpackc.low %vm15788_vm3, %vm15788_vm3  ;;  %vm15795_vm3 = vnez %v15557_v21  ;;  %v9457_v23 = vrot.slane %v1915_v10, 4  ;;  %v7850_v10 = vld [vmem:[%s15059_s5 + $0x88] sm:$0xff]  }
 0x13a   :  { %v9368_v41 = vsel %vm15789_vm9, 65537, %v15638_v13  ;;  %vm15792_vm5 = vmpackc.low %vm15791_vm12, %vm15791_vm12  ;;  %vm15800_vm12 = vnez %v15560_v22  ;;  %15804 = vst [vmem:[#allocation51_spill] sm:$0xff] %v9401_v50  ;;  %vm15810_vm9 = vcmp.le.s32.totalorder %v9211_v40, 8  ;;  %7454 = vmatprep.subr.bf16.mxu0 %v7850_v10  ;;  %v15871_v22 = vmov 0 }
 0x13b   :  { %15790 = vst [vmem:[#allocation48_spill] sm:$0xff] %v9368_v41  ;;  %v1864_v39 = vsel %vm15792_vm5, 65537, %v15638_v13  ;;  %vm2631_vm4 = vmand %vm9311_vm1, %vm15793_vm6  ;;  %v1308_v55 = vshrl.u32 %v9368_v41, 16  ;;  %7455 = vmatpush3.bf16.msra.mxu0 %v7850_v10 }
 0x13c   :  { %vm9388_vm7 = vmand %vm2631_vm4, %vm15796_vm2  ;;  %v1898_v16 = vshll.u32 %v1864_v39, 16  ;;  %vm15805_vm2 = vcmp.ge.s32.totalorder %v9211_v40, 1  ;;  %v1902_v57 = vshrl.u32 %v1864_v39, 16 }
 0x13d   :  { %v15798_v0 = vsel %vm9388_vm7, 4294967295, %v15797_v0  ;;  %vm9397_vm5 = vmand %vm3170_vm13, %vm3186_vm15  ;;  %vm15806_vm13 = vcmp.le.s32.totalorder %v8276_v2, 6  ;;  %vm15807_vm15 = vnez %v15752_v28  ;;  %v9481_v58 = vrot.slane %v1308_v55, 7 }
 0x13e   :  { %15799 = vst [vmem:[#allocation49_spill] sm:$0xff] %v15798_v0  ;;  %v15802_v52 = vsel %vm9397_vm5, 4294967295, %v15801_v52  ;;  %vm3218_vm4 = vmand %vm9397_vm5, %vm15805_vm2  ;;  %vm15814_vm2 = vnez %v15738_v11  ;;  %v9483_v48 = vrot.slane %v1898_v16, 5  ;;  %v9497_v1 = vrot.slane %v1902_v57, 4  ;;  %v72_v11 = vld [vmem:[%s15060_s0 + $0x34] sm:$0xff]  }
 0x13f   :  { %15803 = vst [vmem:[#allocation50_spill] sm:$0xff] %v15802_v52  ;;  %vm9414_vm6 = vmand %vm15807_vm15, %vm15806_vm13  ;;  %v15831_v52 = vmov 0  ;;  %vm15845_vm7 = vnez %v15754_v31 }
 0x140   :  { %vm9420_vm8 = vmand %vm3218_vm4, %vm15810_vm9  ;;  %vm15820_vm4 = vcmp.ge.s32.totalorder %v8623_v51, 4294967295  ;;  %15827 = vst [vmem:[#allocation55_spill] sm:$0xff] %v9481_v58 }
 0x141   :  { %v15812_v45 = vsel %vm9420_vm8, 4294967295, %v15811_v45  ;;  %vm15815_vm1 = vmpackc.low %vm15814_vm2, %vm15814_vm2  ;;  %vm15834_vm2 = vnez %v15771_v38  ;;  %vm15844_vm8 = vcmp.ge.s32.totalorder %v9211_v40, 1  ;;  %88 = vst [vmem:[#allocation2 + $0x3c] sm:$0xff] %v72_v11  }
 0x142   :  { %15813 = vst [vmem:[#allocation52_spill] sm:$0xff] %v15812_v45  ;;  %v9431_v2 = vsel %vm15815_vm1, 65537, %v15638_v13  ;;  %vm15817_vm13 = vmpackc.low %vm15755_vm11, %vm15755_vm11  ;;  %vm15821_vm1 = vnez %v15573_v53  ;;  %vm15824_vm11 = vnez %v15525_v46  ;;  %v7849_v53 = vld [vmem:[%s15059_s5 + $0xf8] sm:$0xff]  }
 0x143   :  { %15816 = vst [vmem:[#allocation53_spill] sm:$0xff] %v9431_v2  ;;  %v9439_v28 = vsel %vm15817_vm13, 65537, %v15638_v13  ;;  %vm15819_vm9 = vmpackc.low %vm15756_vm0, %vm15756_vm0  ;;  %v2703_v55 = vshrl.u32 %v9431_v2, 16  ;;  %7474 = vmatprep.subr.bf16.mxu1 %v7849_v53  ;;  %vm15841_vm13 = vnez %v15518_v37 }
 0x144   :  { %15818 = vst [vmem:[#allocation54_spill] sm:$0xff] %v9439_v28  ;;  %v9447_v39 = vsel %vm15819_vm9, 65537, %v15638_v13  ;;  %vm9453_vm15 = vmand %vm15821_vm1, %vm15820_vm4  ;;  %vm15826_vm9 = vcmp.ge.s32.totalorder %v9211_v40, 4294967295  ;;  %v1291_v16 = vshrl.u32 %v9439_v28, 16  ;;  %7475 = vmatpush3.bf16.msra.mxu1 %v7849_v53 }
 0x145   :  { %vm15825_vm0 = vmpackc.low %vm15758_vm10, %vm15758_vm10  ;;  %vm15828_vm10 = vnez %v15542_v4  ;;  %v1299_v0 = vshrl.u32 %v9447_v39, 16  ;;  %v15837_v4 = vmov 0  ;;  %v1302_v41 = vshll.u32 %v9447_v39, 16 }
 0x146   :  { %v3256_v25 = vsel %vm15825_vm0, 65537, %v15638_v13  ;;  %vm4089_vm4 = vmand %vm9397_vm5, %vm15826_vm9  ;;  %vm15830_vm0 = vcmp.le.s32.totalorder %v9211_v40, 6  ;;  %v9563_v53 = vrot.slane %v1291_v16, 7 }
 0x147   :  { %vm15829_vm1 = vmpackc.low %vm15828_vm10, %vm15828_vm10  ;;  %vm15835_vm10 = vcmp.le.s32.totalorder %v8264_v62, 6  ;;  %v3276_v50 = vshrl.u32 %v3256_v25, 16  ;;  %v9565_v10 = vrot.slane %v1299_v0, 7 }
 0x148   :  { %v3257_v33 = vsel %vm15829_vm1, 65537, %v15638_v13  ;;  %vm9493_vm9 = vmand %vm4089_vm4, %vm15830_vm0  ;;  %vm15836_vm1 = vnez %v15786_v44  ;;  %vm15839_vm0 = vnez %v15515_v36  ;;  %v3273_v44 = vshll.u32 %v3256_v25, 16 }
 0x149   :  { %v15832_v52 = vsel %vm9493_vm9, 4294967295, %v15831_v52  ;;  %vm9509_vm4 = vmand %vm15836_vm1, %vm15835_vm10  ;;  %v3282_v30 = vshll.u32 %v3257_v33, 16  ;;  %v3286_v37 = vshrl.u32 %v3257_v33, 16  ;;  %vm260_vm1 = vcmp.le.s32.totalorder %v8956_v60, 8  ;;  %15855 = vst [vmem:[#allocation57_spill] sm:$0xff] %v9565_v10 }
 0x14a   :  { %15833 = vst [vmem:[#allocation56_spill] sm:$0xff] %v15832_v52  ;;  %v15838_v4 = vsel %vm9509_vm4, 4294967295, %v15837_v4  ;;  %vm15840_vm5 = vmpackc.low %vm15839_vm0, %vm15839_vm0  ;;  %v9608_v11 = vrot.slane %v3273_v44, 5  ;;  %v3278_v2 = vrot.slane %v3276_v50, 4  ;;  %v9620_v52 = vrot.slane %v2703_v55, 7 }
 0x14b   :  { %v9519_v57 = vsel %vm15840_vm5, 65537, %v15638_v13  ;;  %vm15842_vm9 = vmpackc.low %vm15841_vm13, %vm15841_vm13  ;;  %vm15848_vm5 = vcmp.le.s32.totalorder %v8623_v51, 6  ;;  %v3288_v58 = vrot.slane %v3286_v37, 4 }
 0x14c   :  { %v1863_v62 = vsel %vm15842_vm9, 65537, %v15638_v13  ;;  %vm9534_vm0 = vmand %vm15845_vm7, %vm15844_vm8  ;;  %vm15851_vm8 = vcmp.ge.s32.totalorder %v8623_v51, 4294967295  ;;  %vm15852_vm7 = vnez %v15577_v3  ;;  %v1882_v47 = vshrl.u32 %v9519_v57, 16  ;;  %15867 = vst [vmem:[#allocation60_spill] sm:$0xff] %v9608_v11 }
 0x14d   :  { %vm9542_vm13 = vmand %vm9453_vm15, %vm15848_vm5  ;;  %vm15860_vm5 = vcmp.le.s32.totalorder %v9211_v40, 8  ;;  %v1888_v16 = vshll.u32 %v1863_v62, 16  ;;  %v1892_v3 = vshrl.u32 %v1863_v62, 16  ;;  %v9610_v62 = vrot.slane %v3282_v30, 5  ;;  %15873 = vst [vmem:[#allocation62_spill] sm:$0xff] %v9620_v52 }
 0x14e   :  { %vm9554_vm10 = vmand %vm15852_vm7, %vm15851_vm8  ;;  %v9637_v30 = vor.u32 %v1302_v41, %v9565_v10  ;;  %v9648_v37 = vrot.slane %v1882_v47, 4  ;;  %vm15882_vm7 = vcmp.le.s32.totalorder %v9021_v19, 8  ;;  %v3279_v47 = vor.u32 %v3278_v2, %v9608_v11 }
 0x14f   :  { %vm15856_vm8 = vmpackc.low %vm15794_vm14, %vm15794_vm14  ;;  %15868 = vst [vmem:[#allocation61_spill] sm:$0xff] %v9610_v62  ;;  %v3289_v33 = vor.u32 %v3288_v58, %v9610_v62 }
 0x150   :  { %v9573_v39 = vsel %vm15856_vm8, 65537, %v15638_v13  ;;  %vm15858_vm15 = vmpackc.low %vm15795_vm3, %vm15795_vm3  ;;  %vm15864_vm3 = vcmp.ge.s32.totalorder %v8956_v60, 1  ;;  %15875 = vst [vmem:[#allocation63_spill] sm:$0xff] %v9637_v30  ;;  %v9650_v60 = vrot.slane %v1888_v16, 5 }
 0x151   :  { %15857 = vst [vmem:[#allocation58_spill] sm:$0xff] %v9573_v39  ;;  %v9581_v61 = vsel %vm15858_vm15, 65537, %v15638_v13  ;;  %vm9587_vm9 = vmand %vm9534_vm0, %vm15860_vm5  ;;  %vm15869_vm15 = vcmp.le.s32.totalorder %v8915_v34, 8  ;;  %v2694_v45 = vshrl.u32 %v9573_v39, 16 }
 0x152   :  { %15859 = vst [vmem:[#allocation59_spill] sm:$0xff] %v9581_v61  ;;  %vm15863_vm14 = vmpackc.low %vm15800_vm12, %vm15800_vm12  ;;  %vm15870_vm12 = vcmp.ge.s32.totalorder %v8915_v34, 1  ;;  %v4144_v44 = vshrl.u32 %v9581_v61, 16  ;;  %v9652_v34 = vrot.slane %v1892_v3, 4 }
 0x153   :  { %v9598_v21 = vsel %vm15863_vm14, 65537, %v15638_v13  ;;  %vm9604_vm0 = vmand %vm15864_vm3, %vm260_vm1  ;;  %vm15874_vm14 = vcmp.ge.s32.totalorder %v9021_v19, 1  ;;  %v9688_v16 = vrot.slane %v2694_v45, 7 }
 0x154   :  { %vm9616_vm5 = vmand %vm15870_vm12, %vm15869_vm15  ;;  %v4152_v55 = vshrl.u32 %v9598_v21, 16  ;;  %vm15876_vm12 = vcmp.ge.s32.totalorder %v8966_v43, 1  ;;  %vm15879_vm15 = vcmp.le.s32.totalorder %v8623_v51, 6  ;;  %v9690_v52 = vrot.slane %v4144_v44, 7 }
 0x155   :  { %v15872_v22 = vsel %vm9616_vm5, 4294967295, %v15871_v22  ;;  %vm308_vm3 = vmand %vm9604_vm0, %vm15874_vm14  ;;  %15887 = vst [vmem:[#allocation65_spill] sm:$0xff] %v9688_v16  ;;  %v4155_v10 = vshll.u32 %v9598_v21, 16 }
 0x156   :  { %vm309_vm8 = vmand %vm9616_vm5, %vm15876_vm12  ;;  %15888 = vst [vmem:[#allocation66_spill] sm:$0xff] %v9690_v52  ;;  %v9704_v58 = vrot.slane %v4152_v55, 7  ;;  %v9726_v55 = vrot.slane %v3289_v33, 4 }
 0x157   :  { %vm15877_vm14 = vmpackc.low %vm15824_vm11, %vm15824_vm11  ;;  %vm15885_vm11 = vnez %v15575_v63 }
 0x158   :  { %v9660_v41 = vsel %vm15877_vm14, 65537, %v15638_v13  ;;  %vm9666_vm1 = vmand %vm9554_vm10, %vm15879_vm15  ;;  %vm15886_vm15 = vcmp.le.s32.totalorder %v8966_v43, 8  ;;  %15891 = vst [vmem:[#allocation68_spill] sm:$0xff] %v9704_v58  ;;  %v9751_v62 = vor.u32 %v4155_v10, %v9704_v58 }
 0x159   :  { %15878 = vst [vmem:[#allocation64_spill] sm:$0xff] %v9660_v41  ;;  %vm9675_vm4 = vmand %vm308_vm3, %vm15882_vm7  ;;  %v16014_v41 = vmov 0 }
 0x15a   :  { %vm341_vm14 = vmand %vm309_vm8, %vm15886_vm15  ;;  %vm15892_vm15 = vnez %v15778_v49  ;;  %vm15273_vm8 = vcmp.le.s32.totalorder %v8966_v43, 7  ;;  %v9724_v49 = vrot.slane %v3279_v47, 4  ;;  %15897 = vst [vmem:[#allocation71_spill] sm:$0xff] %v9726_v55  ;;  %v15900_v47 = vor.u32 %v8962_v5, %v8960_v54  ;;  %v9754_v5 = vld [vmem:[#allocation2 + $0x28] sm:$0xf] }
 0x15b   :  { %vm15889_vm7 = vmpackc.low %vm15834_vm2, %vm15834_vm2  ;;  %vm15272_vm2 = vcmp.le.s32.totalorder %v9021_v19, 7  ;;  %15903 = vst [vmem:[#allocation72_spill] sm:$0xff] %v9751_v62 }
 0x15c   :  { %v9698_v2 = vsel %vm15889_vm7, 65537, %v15638_v13  ;;  %vm356_vm3 = vmpackc.low %vm9675_vm4, %vm9675_vm4  ;;  %vm15895_vm4 = vcmp.ge.s32.totalorder %v9021_v19, 0  ;;  %15896 = vst [vmem:[#allocation70_spill] sm:$0xff] %v9724_v49  ;;  %v461_v33 = vrot.slane %v15900_v47, 4 }
 0x15d   :  { %15890 = vst [vmem:[#allocation67_spill] sm:$0xff] %v9698_v2  ;;  %vm15893_vm10 = vmpackc.low %vm15892_vm15, %vm15892_vm15  ;;  %v372_v38 = vsel %vm356_vm3, 65537, %v15638_v13  ;;  %v3296_v30 = vshrl.u32 %v9698_v2, 16  ;;  %vm15899_vm3 = vnez %v15581_v6  ;;  %v16011_v2 = vld [vmem:[#allocation22_spill] sm:$0xff] }
 0x15e   :  { %v9712_v45 = vsel %vm15893_vm10, 65537, %v15638_v13  ;;  %vm357_vm12 = vmpackc.low %vm341_vm14, %vm341_vm14  ;;  %v463_v3 = vshll.u32 %v372_v38, 16  ;;  %v467_v46 = vshrl.u32 %v372_v38, 16  ;;  %vm15898_vm10 = vcmp.ge.s32.totalorder %v8966_v43, 0  ;;  %v228_v38 = vld [vmem:[#allocation2 + $0x24] sm:$0xf] }
 0x15f   :  { %15894 = vst [vmem:[#allocation69_spill] sm:$0xff] %v9712_v45  ;;  %v9717_v44 = vsel %vm357_vm12, 65537, %v15638_v13  ;;  %vm616_vm7 = vmand %vm9604_vm0, %vm15895_vm4  ;;  %vm15277_vm12 = vcmp.ge.s32.totalorder %v8703_v15, 4294967295  ;;  %v3306_v54 = vshrl.u32 %v9712_v45, 16  ;;  %v9770_v11 = vrot.slane %v3296_v30, 4 }
 0x160   :  { %vm617_vm14 = vmand %vm9616_vm5, %vm15898_vm10  ;;  %v465_v39 = vrot.slane %v463_v3, 5  ;;  %v469_v21 = vrot.slane %v467_v46, 4  ;;  %v473_v16 = vshll.u32 %v9717_v44, 16  ;;  %v477_v0 = vshrl.u32 %v9717_v44, 16 }
 0x161   :  { %vm9744_vm4 = vmand %vm616_vm7, %vm15272_vm2  ;;  %vm15906_vm2 = vnez %v15520_v42  ;;  %15907 = vst [vmem:[#allocation73_spill] sm:$0xff] %v9770_v11  ;;  %vm15911_vm7 = vnez %v15838_v4 }
 0x162   :  { %vm9758_vm10 = vmand %vm617_vm14, %vm15273_vm8  ;;  %v466_v10 = vsel %vm15906_vm2, %v461_v33, %v465_v39  ;;  %v470_v49 = vor.u32 %v469_v21, %v465_v39  ;;  %v9797_v33 = vrot.slane %v473_v16, 5  ;;  %v9804_v21 = vrot.slane %v3306_v54, 4 }
 0x163   :  { %vm664_vm15 = vmpackc.low %vm9744_vm4, %vm9744_vm4 }
 0x164   :  { %vm15908_vm14 = vmpackc.low %vm9414_vm6, %vm9414_vm6  ;;  %v680_v30 = vsel %vm664_vm15, %v228_v38, 0  ;;  %v471_v55 = vrot.slane %v470_v49, 4  ;;  %15915 = vst [vmem:[#allocation76_spill] sm:$0xff] %v9804_v21 }
 0x165   :  { %v9778_v3 = vsel %vm15908_vm14, 65537, %v15638_v13  ;;  %vm15910_vm8 = vmpackc.low %vm9542_vm13, %vm9542_vm13  ;;  %vm15914_vm13 = vcmp.ge.s32.totalorder %v9021_v19, 4294967295 }
 0x166   :  { %15909 = vst [vmem:[#allocation74_spill] sm:$0xff] %v9778_v3  ;;  %v2674_v39 = vsel %vm15910_vm8, 65537, %v15638_v13  ;;  %vm665_vm4 = vmpackc.low %vm9758_vm10, %vm9758_vm10  ;;  %v476_v46 = vsel %vm15906_vm2, %v471_v55, %v9797_v33 }
 0x167   :  { %vm15912_vm6 = vmpackc.low %vm15911_vm7, %vm15911_vm7  ;;  %v681_v25 = vsel %vm665_vm4, %v9754_v5, 0  ;;  %vm9815_vm7 = vcmp.ne.s16.totalorder %v466_v10, 0  ;;  %v2730_v54 = vshrl.u32 %v2674_v39, 16  ;;  %v15921_v10 = vmov 0 }
 0x168   :  { %v9795_v9 = vsel %vm15912_vm6, 65537, %v15638_v13  ;;  %vm1215_vm8 = vmand %vm9604_vm0, %vm15914_vm13  ;;  %v6899_v49 = vcombine.low %v680_v30, %v681_v25  ;;  %vm551_vm6 = vcmp.ne.s16.totalorder %v476_v46, 0  ;;  %vm15924_vm13 = vnez %v15585_v8 }
 0x169   :  { %15913 = vst [vmem:[#allocation75_spill] sm:$0xff] %v9795_v9  ;;  %vm4116_vm15 = vmpackc.low %vm9666_vm1, %vm9666_vm1  ;;  %v567_v30 = vsel %vm9815_vm7, %v8958_v29, 0  ;;  %v568_v47 = vsel %vm551_vm6, %v228_v38, 0  ;;  %v2733_v46 = vshll.u32 %v2674_v39, 16  ;;  %v9862_v38 = vpop.permute.xlu1 %147  ;;  %vm247_vm1 = vcmp.ge.s32.totalorder %v8925_v14, 1 }
 0x16a   :  { %vm15916_vm10 = vmpackc.low %vm9587_vm9, %vm9587_vm9  ;;  %vm15920_vm9 = vcmp.le.s32.totalorder %v9021_v19, 6  ;;  %7402 = vmatprep.mubr.bf16.mxu0 %v6899_v49  ;;  %v9851_v49 = vrot.slane %v2730_v54, 7 }
 0x16b   :  { %v374_v4 = vsel %vm15916_vm10, 65537, %v15638_v13  ;;  %vm15919_vm0 = vmpackc.low %vm15885_vm11, %vm15885_vm11  ;;  %vm15923_vm11 = vnez %v15583_v7  ;;  %v6915_v7 = vcombine.low %v567_v30, %v568_v47 }
 0x16c   :  { %v1867_v36 = vsel %vm15919_vm0, 65537, %v15638_v13  ;;  %vm9831_vm14 = vmand %vm1215_vm8, %vm15920_vm9  ;;  %v483_v44 = vshll.u32 %v374_v4, 16  ;;  %v487_v55 = vshrl.u32 %v374_v4, 16  ;;  %vm15925_vm8 = vnez %v15593_v18  ;;  %15926 = vst [vmem:[#allocation77_spill] sm:$0xff] %v9851_v49 }
 0x16d   :  { %v15922_v10 = vsel %vm9831_vm14, 4294967295, %v15921_v10  ;;  %vm1850_vm4 = vmpackc.low %vm15923_vm11, %vm15923_vm11  ;;  %v1928_v63 = vshll.u32 %v1867_v36, 16  ;;  %v1932_v3 = vshrl.u32 %v1867_v36, 16  ;;  %vm15927_vm9 = vnez %v15597_v20 }
 0x16e   :  { %vm2657_vm10 = vmpackc.low %vm15924_vm13, %vm15924_vm13  ;;  %v1866_v58 = vsel %vm1850_vm4, 65537, %v15638_v13  ;;  %v479_v4 = vrot.slane %v477_v0, 4  ;;  %v9876_v20 = vsel %vm4116_vm15, 65537, %v15638_v13  ;;  %vm15931_vm4 = vnez %v15601_v26 }
 0x16f   :  { %vm9858_vm7 = vmand %vm15927_vm9, %vm15277_vm12  ;;  %v977_v16 = vshrl.u32 %v6915_v7, 16  ;;  %v980_v6 = vshll.u32 %v6915_v7, 16  ;;  %v9889_v36 = vrot.slane %v483_v44, 5  ;;  %vm263_vm15 = vcmp.le.s32.totalorder %v8925_v14, 8  ;;  %v9945_v14 = vpop.permute.xlu1 %153 }
 0x170   :  { %vm15930_vm11 = vmpackc.low %vm15899_vm3, %vm15899_vm3  ;;  %vm15934_vm3 = vnez %v15595_v12  ;;  %v489_v50 = vrot.slane %v487_v55, 4  ;;  %v1918_v54 = vshll.u32 %v1866_v58, 16  ;;  %v1922_v0 = vshrl.u32 %v1866_v58, 16 }
 0x171   :  { %v3261_v47 = vsel %vm15930_vm11, 65537, %v15638_v13  ;;  %vm9882_vm6 = vmand %vm15931_vm4, %vm15277_vm12  ;;  %vm15935_vm11 = vcmp.le.s32.totalorder %v8703_v15, 6  ;;  %v979_v7 = vrot.slane %v977_v16, 3  ;;  %v982_v25 = vrot.slane %v980_v6, 4 }
 0x172   :  { %vm9897_vm12 = vmand %vm9858_vm7, %vm15935_vm11  ;;  %v9901_v9 = vrot.slane %v1928_v63, 5  ;;  %v9903_v44 = vrot.slane %v1932_v3, 4  ;;  %v3322_v62 = vshll.u32 %v3261_v47, 16  ;;  %v480_v55 = vor.u32 %v479_v4, %v9797_v33 }
 0x173   :  { %vm15938_vm9 = vmmov %vm15935_vm11  ;;  %v9915_v29 = vor.u32 %v2733_v46, %v9851_v49  ;;  %v3326_v16 = vshrl.u32 %v3261_v47, 16  ;;  %v9923_v3 = vsel %vm2657_vm10, 65537, %v15638_v13  ;;  %v15942_v63 = vmov 0  ;;  %v10026_v26 = vpop.permute.xlu1 %211 }
 0x174   :  { %vm9909_vm0 = vmand %vm9882_vm6, %vm15938_vm9  ;;  %v9933_v33 = vor.u32 %v982_v25, %v979_v7  ;;  %v4188_v46 = vshrl.u32 %v9876_v20, 16  ;;  %vm15945_vm10 = vnez %v15599_v24  ;;  %vm15946_vm9 = vcmp.ge.s32.totalorder %v9109_v17, 1 }
 0x175   :  { %15941 = vst [vmem:[#allocation78_spill] sm:$0xff] %v9915_v29  ;;  %vm9929_vm7 = vmand %vm247_vm1, %vm263_vm15  ;;  %v490_v25 = vor.u32 %v489_v50, %v9889_v36  ;;  %v9953_v4 = vrot.slane %v1918_v54, 5  ;;  %v1924_v18 = vrot.slane %v1922_v0, 4  ;;  %vm15948_vm6 = vsmask.f32 4352 }
 0x176   :  { %v15943_v63 = vsel %vm9929_vm7, 4294967295, %v15942_v63  ;;  %vm15944_vm13 = vmpackc.low %vm15925_vm8, %vm15925_vm8  ;;  %vm15947_vm8 = vcmp.le.s32.totalorder %v9109_v17, 8  ;;  %v984_v47 = vsel %vm15948_vm6, %v9014_v35, %v9933_v33  ;;  %v9961_v39 = vrot.slane %v3322_v62, 5 }
 0x177   :  { %v3260_v8 = vsel %vm15944_vm13, 65537, %v15638_v13  ;;  %vm311_vm1 = vmand %vm9929_vm7, %vm15946_vm9  ;;  %v2721_v6 = vshrl.u32 %v9923_v3, 16  ;;  %vm15950_vm15 = vnez %v15604_v27  ;;  %v481_v50 = vrot.slane %v480_v55, 4  ;;  %7431 = vmatmul.mubr.bf16.gmra.mxu1 %v984_v47 }
 0x178   :  { %vm343_vm11 = vmand %vm311_vm1, %vm15947_vm8  ;;  %15949 = vst [vmem:[#allocation79_spill] sm:$0xff] %v9961_v39  ;;  %vm15288_vm8 = vcmp.le.s32.totalorder %v9211_v40, 7  ;;  %v3312_v54 = vshll.u32 %v3260_v8, 16  ;;  %v3316_v0 = vshrl.u32 %v3260_v8, 16  ;;  %vm15951_vm6 = vcmp.ge.s32.totalorder %v9211_v40, 0 }
 0x179   :  { %vm359_vm1 = vmpackc.low %vm343_vm11, %vm343_vm11  ;;  %vm15952_vm13 = vnez %v15754_v31  ;;  %vm15289_vm9 = vcmp.le.s32.totalorder %v9109_v17, 7  ;;  %v9977_v62 = vrot.slane %v3326_v16, 4  ;;  %v491_v7 = vrot.slane %v490_v25, 4  ;;  %v230_v25 = vld [vmem:[#allocation2 + $0x2c] sm:$0xf] }
 0x17a   :  { %v375_v35 = vsel %vm359_vm1, 65537, %v15638_v13  ;;  %vm618_vm14 = vmand %vm15952_vm13, %vm15951_vm6  ;;  %vm15954_vm4 = vcmp.ge.s32.totalorder %v9109_v17, 0  ;;  %v9986_v8 = vrot.slane %v4188_v46, 7  ;;  %v4191_v31 = vshll.u32 %v9876_v20, 16  ;;  %v10009_v20 = vpop.permute.xlu0 %144 }
 0x17b   :  { %15953 = vst [vmem:[#allocation80_spill] sm:$0xff] %v9977_v62  ;;  %v493_v55 = vshll.u32 %v375_v35, 16  ;;  %v497_v47 = vshrl.u32 %v375_v35, 16  ;;  %vm619_vm1 = vmand %vm9929_vm7, %vm15954_vm4  ;;  %v1925_v61 = vor.u32 %v1924_v18, %v9953_v4  ;;  %v10004_v46 = vrot.slane %v2721_v6, 7  ;;  %v10014_v18 = vld [vmem:[#allocation2 + $0x30] sm:$0xf] }
 0x17c   :  { %15955 = vst [vmem:[#allocation81_spill] sm:$0xff] %v9986_v8  ;;  %vm15956_vm13 = vmpackc.low %vm15934_vm3, %vm15934_vm3  ;;  %vm15960_vm4 = vnez %v15610_v59  ;;  %v486_v12 = vsel %vm15906_vm2, %v481_v50, %v9889_v36  ;;  %v10028_v49 = vrot.slane %v3312_v54, 5  ;;  %v3318_v29 = vrot.slane %v3316_v0, 4  ;;  %v15993_v0 = vld [vmem:[#allocation23_spill] sm:$0xff]  ;;  %v15997_v62 = vld [vmem:[#allocation24_spill] sm:$0xff] }
 0x17d   :  { %v9996_v16 = vsel %vm15956_vm13, 65537, %v15638_v13  ;;  %vm10000_vm6 = vmand %vm618_vm14, %vm15288_vm8  ;;  %15959 = vst [vmem:[#allocation82_spill] sm:$0xff] %v10004_v46  ;;  %v10016_v52 = vrot.slane %v493_v55, 5  ;;  %v10018_v40 = vrot.slane %v497_v47, 4  ;;  %vm10047_vm3 = vcmp.ne.s16.totalorder %v486_v12, 0  ;;  %v7851_v59 = vld [vmem:[%s15059_s5 + $0xf0] sm:$0xff]  }
 0x17e   :  { %vm10022_vm14 = vmand %vm619_vm1, %vm15289_vm9  ;;  %15963 = vst [vmem:[#allocation83_spill] sm:$0xff] %v10028_v49  ;;  %v4179_v36 = vshrl.u32 %v9996_v16, 16  ;;  %vm15964_vm9 = vnez %v15612_v32  ;;  %vm15291_vm13 = vcmp.ge.s32.totalorder %v10026_v26, 1  ;;  %v10058_v35 = vor.u32 %v4191_v31, %v9986_v8  ;;  %v10096_v47 = vpop.permute.xlu0 %150  ;;  %7476 = vmatprep.subr.bf16.mxu1 %v7851_v59 }
 0x17f   :  { %vm666_vm8 = vmpackc.low %vm10000_vm6, %vm10000_vm6  ;;  %v496_v50 = vsel %vm15906_vm2, %v491_v7, %v10016_v52  ;;  %v10071_v55 = vrot.slane %v1925_v61, 4  ;;  %v15977_v61 = vmov 0  ;;  %v569_v24 = vsel %vm10047_vm3, %v9754_v5, 0  ;;  %7477 = vmatpush3.bf16.msra.mxu1 %v7851_v59 }
 0x180   :  { %vm667_vm1 = vmpackc.low %vm10022_vm14, %vm10022_vm14  ;;  %v682_v54 = vsel %vm666_vm8, %v230_v25, 0  ;;  %vm10051_vm6 = vcmp.ne.s16.totalorder %v496_v50, 0  ;;  %15969 = vst [vmem:[#allocation84_spill] sm:$0xff] %v10058_v35  ;;  %vm15970_vm8 = vcmp.ge.s32.totalorder %v8623_v51, 4294967295  ;;  %vm15971_vm14 = vnez %v15633_v56 }
 0x181   :  { %v683_v7 = vsel %vm667_vm1, %v10014_v18, 0  ;;  %vm10064_vm11 = vmand %vm15971_vm14, %vm15970_vm8  ;;  %v570_v6 = vsel %vm10051_vm6, %v230_v25, 0  ;;  %vm15975_vm6 = vcmp.le.s32.totalorder %v9862_v38, 7  ;;  %vm15976_vm14 = vcmp.ge.s32.totalorder %v9862_v38, 0 }
 0x182   :  { %v6900_v50 = vcombine.low %v682_v54, %v683_v7  ;;  %vm15974_vm1 = vmpackc.low %vm15945_vm10, %vm15945_vm10  ;;  %v3319_v25 = vor.u32 %v3318_v29, %v10028_v49  ;;  %v10091_v54 = vrot.slane %v4179_v36, 7  ;;  %v1879_v7 = vshll.u32 %v9519_v57, 16  ;;  %v15983_v36 = vld [vmem:[#allocation19_spill] sm:$0xff] }
 0x183   :  { %v1869_v56 = vsel %vm15974_vm1, 65537, %v15638_v13  ;;  %vm10086_vm7 = vmand %vm15976_vm14, %vm15975_vm6  ;;  %vm15984_vm6 = vnez %v15983_v36  ;;  %v6916_v57 = vcombine.low %v569_v24, %v570_v6  ;;  %v1764_v36 = vld [vmem:[#allocation2 + $0x4] sm:$0x8] }
 0x184   :  { %v15978_v61 = vsel %vm10086_vm7, 4294967295, %v15977_v61  ;;  %15979 = vst [vmem:[#allocation85_spill] sm:$0xff] %v10091_v54  ;;  %7403 = vmatmul.mubr.bf16.gmra.mxu0 %v6900_v50  ;;  %vm1827_vm10 = vmand %vm10086_vm7, %vm15291_vm13  ;;  %vm15985_vm13 = vcmp.le.s32.totalorder %v10026_v26, 8  ;;  %v1948_v50 = vshll.u32 %v1869_v56, 16  ;;  %v10137_v6 = vrot.slane %v1879_v7, 5 }
 0x185   :  { %vm15980_vm1 = vmpackc.low %vm9897_vm12, %vm9897_vm12  ;;  %vm15988_vm12 = vcmp.le.s32.totalorder %v8623_v51, 6  ;;  %v1952_v24 = vshrl.u32 %v1869_v56, 16  ;;  %v10153_v12 = vrot.slane %v3319_v25, 4  ;;  %v16003_v56 = vld [vmem:[#allocation21_spill] sm:$0xff]  ;;  %v989_v51 = vshll.u32 %v6916_v57, 16 }
 0x186   :  { %v10109_v29 = vsel %vm15980_vm1, 65537, %v15638_v13  ;;  %vm15982_vm3 = vmpackc.low %vm15950_vm15, %vm15950_vm15  ;;  %vm3189_vm1 = vcmp.le.s32.totalorder %v9862_v38, 6  ;;  %v10190_v39 = vrot.slane %v1948_v50, 5  ;;  %v1885_v21 = vor.u32 %v9648_v37, %v10137_v6 }
 0x187   :  { %15981 = vst [vmem:[#allocation86_spill] sm:$0xff] %v10109_v29  ;;  %v3263_v5 = vsel %vm15982_vm3, 65537, %v15638_v13  ;;  %vm10123_vm7 = vmand %vm1827_vm10, %vm15985_vm13  ;;  %vm15994_vm10 = vnez %v15993_v0  ;;  %v2748_v7 = vshrl.u32 %v10109_v29, 16  ;;  %v1895_v50 = vor.u32 %v9652_v34, %v9650_v60 }
 0x188   :  { %vm10132_vm15 = vmand %vm10064_vm11, %vm15988_vm12  ;;  %15995 = vst [vmem:[#allocation23_spill] sm:$0xff] %v10153_v12  ;;  %v3342_v58 = vshll.u32 %v3263_v5, 16  ;;  %v3346_v35 = vshrl.u32 %v3263_v5, 16  ;;  %vm16004_vm11 = vnez %v16003_v56  ;;  %v986_v5 = vshrl.u32 %v6916_v57, 16  ;;  %v7852_v12 = vld [vmem:[%s15059_s5 + $0x80] sm:$0xff]   ;;  %v10199_v57 = vpop.permute.xlu0 %208 }
 0x189   :  { %vm15991_vm13 = vmpackc.low %vm9909_vm0, %vm9909_vm0  ;;  %vm15996_vm0 = vcmp.ge.s32.totalorder %v8703_v15, 4294967295  ;;  %16010 = vst [vmem:[#allocation87_spill] sm:$0xff] %v10199_v57  ;;  %v10205_v11 = vrot.slane %v1952_v24, 4  ;;  %vm16013_vm12 = vcmp.le.s32.totalorder %v10026_v26, 8  ;;  %v991_v28 = vrot.slane %v989_v51, 4  ;;  %7456 = vmatprep.subr.bf16.mxu0 %v7852_v12 }
 0x18a   :  { %v10145_v31 = vsel %vm15991_vm13, 65537, %v15638_v13  ;;  %vm15998_vm13 = vnez %v15997_v62  ;;  %vm16001_vm3 = vmpackc.low %vm15960_vm4, %vm15960_vm4  ;;  %v16006_v62 = vmov 0  ;;  %vm16012_vm4 = vnez %v16011_v2  ;;  %7457 = vmatpush3.bf16.msra.mxu0 %v7852_v12 }
 0x18b   :  { %15992 = vst [vmem:[#allocation19_spill] sm:$0xff] %v10145_v31  ;;  %vm10161_vm8 = vmand %vm15998_vm13, %vm15996_vm0  ;;  %v10171_v25 = vsel %vm16001_vm3, 65537, %v15638_v13  ;;  %vm16005_vm0 = vcmp.ge.s32.totalorder %v9862_v38, 4294967295  ;;  %v4206_v49 = vshrl.u32 %v10145_v31, 16  ;;  %vm16009_vm3 = vcmp.ge.s32.totalorder %v10026_v26, 1 }
 0x18c   :  { %16002 = vst [vmem:[#allocation24_spill] sm:$0xff] %v10171_v25  ;;  %vm10180_vm13 = vmand %vm16005_vm0, %vm3189_vm1  ;;  %v10217_v37 = vrot.slane %v2748_v7, 7  ;;  %v10219_v34 = vrot.slane %v3342_v58, 5  ;;  %v1344_v24 = vshrl.u32 %v10171_v25, 16  ;;  %v10233_v51 = vrot.slane %v3346_v35, 4  ;;  %v16025_v35 = vld [vmem:[#allocation26_spill] sm:$0xff] }
 0x18d   :  { %v16007_v62 = vsel %vm10180_vm13, 4294967295, %v16006_v62  ;;  %vm3221_vm0 = vmand %vm10180_vm13, %vm16009_vm3  ;;  %v1886_v8 = vrot.slane %v1885_v21, 4  ;;  %v1896_v59 = vrot.slane %v1895_v50, 4  ;;  %v1905_v21 = vor.u32 %v9497_v1, %v9483_v48  ;;  %v16078_v58 = vld [vmem:[#allocation32_spill] sm:$0xff] }
 0x18e   :  { %16008 = vst [vmem:[#allocation21_spill] sm:$0xff] %v16007_v62  ;;  %vm10213_vm14 = vmand %vm3221_vm0, %vm16013_vm12  ;;  %v988_v62 = vrot.slane %v986_v5, 3  ;;  %vm16020_vm0 = vcmp.le.s32.totalorder %v8703_v15, 6  ;;  %v10247_v5 = vrot.slane %v4206_v49, 7  ;;  %vm16026_vm12 = vnez %v16025_v35 }
 0x18f   :  { %v16015_v41 = vsel %vm10213_vm14, 4294967295, %v16014_v41  ;;  %16016 = vst [vmem:[#allocation22_spill] sm:$0xff] %v10217_v37  ;;  %16017 = vst [vmem:[#allocation88_spill] sm:$0xff] %v10219_v34  ;;  %vm15309_vm14 = vcmp.le.s32.totalorder %v10199_v57, 8  ;;  %v1891_v1 = vsel %vm15906_vm2, %v1886_v8, %v9650_v60  ;;  %v1906_v60 = vrot.slane %v1905_v21, 4 }
 0x190   :  { %vm16018_vm3 = vmpackc.low %vm15964_vm9, %vm15964_vm9  ;;  %16019 = vst [vmem:[#allocation89_spill] sm:$0xff] %v10233_v51  ;;  %v10245_v32 = vor.u32 %v991_v28, %v988_v62  ;;  %v16031_v28 = vmov 0  ;;  %v10273_v62 = vrot.slane %v1344_v24, 7  ;;  %v1901_v24 = vsel %vm15906_vm2, %v1896_v59, %v9483_v48  ;;  %v1175_v48 = vld [vmem:[#allocation2 + $0x8] sm:$0xf] }
 0x191   :  { %v10228_v45 = vsel %vm16018_vm3, 65537, %v15638_v13  ;;  %vm10240_vm1 = vmand %vm10161_vm8, %vm16020_vm0  ;;  %16023 = vst [vmem:[#allocation90_spill] sm:$0xff] %v10247_v5  ;;  %vm16024_vm3 = vcmp.ge.s32.totalorder %v8966_v43, 4294967295  ;;  %vm16029_vm8 = vcmp.le.s32.totalorder %v10009_v20, 7  ;;  %vm16030_vm0 = vcmp.ge.s32.totalorder %v10009_v20, 0  ;;  %v16081_v51 = vld [vmem:[#allocation30_spill] sm:$0xff]  ;;  %v10527_v5 = vpop.permute.xlu0 %214 }
 0x192   :  { %vm10253_vm13 = vmand %vm16026_vm12, %vm16024_vm3  ;;  %v1938_v31 = vshll.u32 %v10228_v45, 16  ;;  %vm16033_vm12 = vsmask.f32 4352  ;;  %v1942_v50 = vshrl.u32 %v10228_v45, 16  ;;  %v16040_v0 = vshll.u32 %v9923_v3, 16 }
 0x193   :  { %vm10264_vm9 = vmand %vm16030_vm0, %vm16029_vm8  ;;  %v993_v49 = vsel %vm16033_vm12, %v9933_v33, %v10245_v32  ;;  %vm16036_vm8 = vcmp.ge.s32.totalorder %v10199_v57, 1  ;;  %v16038_v33 = vmov 0  ;;  %v1176_v59 = vld [vmem:[#allocation2 + $0xc] sm:$0xf]  ;;  %v16058_v56 = vmov 0 }
 0x194   :  { %v16032_v28 = vsel %vm10264_vm9, 4294967295, %v16031_v28  ;;  %vm16034_vm3 = vmpackc.low %vm15984_vm6, %vm15984_vm6  ;;  %7434 = vmatprep.mubr.bf16.mxu1 %v993_v49  ;;  %v10312_v8 = vor.u32 %v16040_v0, %v10004_v46  ;;  %v16042_v49 = vshll.u32 %v9996_v16, 16  ;;  %v10335_v16 = vrot.slane %v1938_v31, 5 }
 0x195   :  { %v10282_v35 = vsel %vm16034_vm3, 65537, %v15638_v13  ;;  %vm1826_vm0 = vmand %vm10264_vm9, %vm16036_vm8  ;;  %vm2037_vm3 = vcmp.ne.s16.totalorder %v10137_v6, 0  ;;  %vm16056_vm9 = vcmp.le.s32.totalorder %v10009_v20, 6  ;;  %v16065_v2 = vmov 0 }
 0x196   :  { %16035 = vst [vmem:[#allocation26_spill] sm:$0xff] %v10282_v35  ;;  %vm16037_vm12 = vmpackc.low %vm15994_vm10, %vm15994_vm10  ;;  %v10317_v7 = vor.u32 %v16042_v49, %v10091_v54  ;;  %vm16044_vm10 = vcmp.le.s32.totalorder %v8966_v43, 6  ;;  %v2739_v31 = vshrl.u32 %v10282_v35, 16  ;;  %v16054_v49 = vld [vmem:[#allocation27_spill] sm:$0xff]  ;;  %v16068_v54 = vld [vmem:[#allocation28_spill] sm:$0xff]  ;;  %v1921_v29 = vsel %vm15906_vm2, %v9457_v23, %v9953_v4 }
 0x197   :  { %v10297_v45 = vsel %vm16037_vm12, 65537, %v15638_v13  ;;  %vm10301_vm6 = vmand %vm1826_vm0, %vm15309_vm14  ;;  %16041 = vst [vmem:[#allocation91_spill] sm:$0xff] %v10312_v8  ;;  %vm10327_vm0 = vcmp.ne.s16.totalorder %v1891_v1, 0  ;;  %vm10331_vm12 = vcmp.ne.s16.totalorder %v1901_v24, 0  ;;  %v16052_v1 = vld [vmem:[#allocation45_spill] sm:$0xff]  ;;  %v10410_v37 = vrot.slane %v1942_v50, 4 }
 0x198   :  { %v16039_v33 = vsel %vm10301_vm6, 4294967295, %v16038_v33  ;;  %16043 = vst [vmem:[#allocation92_spill] sm:$0xff] %v10317_v7  ;;  %vm10323_vm8 = vmand %vm10253_vm13, %vm16044_vm10  ;;  %v1911_v24 = vsel %vm15906_vm2, %v1906_v60, %v16052_v1  ;;  %v2055_v0 = vsel %vm10327_vm0, %v1175_v48, 0  ;;  %v1177_v7 = vld [vmem:[#allocation2 + $0x10] sm:$0xf]  ;;  %v2054_v60 = vsel %vm2037_vm3, %v1764_v36, 0 }
 0x199   :  { %vm16051_vm13 = vmpackc.low %vm10132_vm15, %vm10132_vm15  ;;  %vm2040_vm14 = vcmp.ne.s16.totalorder %v1911_v24, 0  ;;  %v1326_v48 = vshrl.u32 %v10297_v45, 16  ;;  %v2056_v21 = vsel %vm10331_vm12, %v1176_v59, 0  ;;  %v6945_v6 = vcombine.low %v2054_v60, %v2055_v0 }
 0x19a   :  { %v1276_v12 = vsel %vm16051_vm13, 65537, %v15638_v13  ;;  %vm16053_vm15 = vmpackc.low %vm16004_vm11, %vm16004_vm11  ;;  %vm16055_vm13 = vnez %v16054_v49  ;;  %vm16057_vm11 = vcmp.ge.s32.totalorder %v10009_v20, 4294967295  ;;  %v2057_v1 = vsel %vm2040_vm14, %v1177_v7, 0 }
 0x19b   :  { %v3262_v27 = vsel %vm16053_vm15, 65537, %v15638_v13  ;;  %vm10371_vm15 = vmand %vm16057_vm11, %vm16056_vm9  ;;  %v1335_v24 = vshrl.u32 %v1276_v12, 16  ;;  %vm15318_vm0 = vcmp.ge.s32.totalorder %v10199_v57, 4294967295  ;;  %vm16063_vm9 = vcmp.ge.s32.totalorder %v10199_v57, 1 }
 0x19c   :  { %v16059_v56 = vsel %vm10371_vm15, 4294967295, %v16058_v56  ;;  %vm16061_vm3 = vmpackc.low %vm16012_vm4, %vm16012_vm4  ;;  %v6946_v3 = vcombine.low %v2056_v21, %v2057_v1  ;;  %v3332_v59 = vshll.u32 %v3262_v27, 16  ;;  %vm15323_vm12 = vcmp.le.s32.totalorder %v10199_v57, 6 }
 0x19d   :  { %16060 = vst [vmem:[#allocation45_spill] sm:$0xff] %v16059_v56  ;;  %v10383_v36 = vsel %vm16061_vm3, 65537, %v15638_v13  ;;  %vm3220_vm11 = vmand %vm10371_vm15, %vm16063_vm9  ;;  %vm16064_vm10 = vcmp.le.s32.totalorder %v10199_v57, 8  ;;  %v2131_v7 = vshrl.u32 %v6945_v6, 16  ;;  %v2134_v0 = vshll.u32 %v6945_v6, 16 }
 0x19e   :  { %16062 = vst [vmem:[#allocation27_spill] sm:$0xff] %v10383_v36  ;;  %vm10394_vm5 = vmand %vm3220_vm11, %vm16064_vm10  ;;  %v3336_v60 = vshrl.u32 %v3262_v27, 16  ;;  %vm16067_vm4 = vcmp.ge.s32.totalorder %v8966_v43, 4294967295  ;;  %vm16069_vm3 = vnez %v16068_v54  ;;  %v2139_v1 = vshrl.u32 %v6946_v3, 16 }
 0x19f   :  { %v16066_v2 = vsel %vm10394_vm5, 4294967295, %v16065_v2  ;;  %vm10402_vm9 = vmand %vm16069_vm3, %vm16067_vm4  ;;  %v2142_v15 = vshll.u32 %v6946_v3, 16  ;;  %v4197_v27 = vshrl.u32 %v10383_v36, 16  ;;  %v10414_v46 = vrot.slane %v1326_v48, 7 }
 0x1a0   :  { %vm4091_vm10 = vmand %vm10371_vm15, %vm15318_vm0  ;;  %v1329_v3 = vshll.u32 %v10297_v45, 16  ;;  %v10421_v54 = vrot.slane %v1335_v24, 7  ;;  %v16076_v50 = vmov 0  ;;  %v2133_v45 = vrot.slane %v2131_v7, 3 }
 0x1a1   :  { %16072 = vst [vmem:[#allocation93_spill] sm:$0xff] %v10414_v46  ;;  %vm16073_vm11 = vmpackc.low %vm10240_vm1, %vm10240_vm1  ;;  %vm16079_vm1 = vnez %v16078_v58  ;;  %v2136_v48 = vrot.slane %v2134_v0, 4  ;;  %v2141_v24 = vrot.slane %v2139_v1, 3  ;;  %v2144_v6 = vrot.slane %v2142_v15, 4 }
 0x1a2   :  { %v10429_v23 = vsel %vm16073_vm11, 65537, %v15638_v13  ;;  %vm16075_vm4 = vmpackc.low %vm16055_vm13, %vm16055_vm13  ;;  %v10449_v49 = vrot.slane %v2739_v31, 7  ;;  %v10451_v56 = vrot.slane %v3332_v59, 5  ;;  %v10453_v35 = vrot.slane %v3336_v60, 4  ;;  %v16086_v31 = vld [vmem:[#allocation31_spill] sm:$0xff] }
 0x1a3   :  { %16074 = vst [vmem:[#allocation94_spill] sm:$0xff] %v10429_v23  ;;  %v10437_v4 = vsel %vm16075_vm4, 65537, %v15638_v13  ;;  %vm10442_vm14 = vmand %vm4091_vm10, %vm15323_vm12  ;;  %v1338_v8 = vshll.u32 %v1276_v12, 16  ;;  %vm16082_vm13 = vnez %v16081_v51  ;;  %v10458_v34 = vrot.slane %v4197_v27, 7 }
 0x1a4   :  { %v16077_v50 = vsel %vm10442_vm14, 4294967295, %v16076_v50  ;;  %16080 = vst [vmem:[#allocation32_spill] sm:$0xff] %v10449_v49  ;;  %v10462_v7 = vor.u32 %v1329_v3, %v10414_v46  ;;  %vm16085_vm4 = vcmp.ge.s32.totalorder %v9021_v19, 4294967295  ;;  %vm16087_vm12 = vnez %v16086_v31  ;;  %v1178_v3 = vld [vmem:[#allocation2 + $0x14] sm:$0xf]  ;;  %v16110_v49 = vld [vmem:[#allocation35_spill] sm:$0xff] }
 0x1a5   :  { %16083 = vst [vmem:[#allocation30_spill] sm:$0xff] %v10458_v34  ;;  %vm10469_vm0 = vmand %vm16087_vm12, %vm16085_vm4  ;;  %v10474_v12 = vor.u32 %v1338_v8, %v10421_v54  ;;  %v1353_v0 = vshrl.u32 %v10429_v23, 16  ;;  %v1968_v60 = vshll.u32 %v10437_v4, 16  ;;  %vm16091_vm10 = vcmp.le.s32.totalorder %v8966_v43, 6 }
 0x1a6   :  { %16084 = vst [vmem:[#allocation95_spill] sm:$0xff] %v10462_v7  ;;  %vm10482_vm11 = vmand %vm10402_vm9, %vm16091_vm10  ;;  %v1972_v27 = vshrl.u32 %v10437_v4, 16  ;;  %v2137_v31 = vor.u32 %v2136_v48, %v2133_v45  ;;  %v10495_v21 = vor.u32 %v2144_v6, %v2141_v24  ;;  %vm10497_vm9 = vcmp.ne.s16.totalorder %v1921_v29, 0  ;;  %v1179_v48 = vld [vmem:[#allocation2 + $0x18] sm:$0xf] }
 0x1a7   :  { %16090 = vst [vmem:[#allocation31_spill] sm:$0xff] %v10474_v12  ;;  %vm16094_vm12 = vmpackc.low %vm16079_vm1, %vm16079_vm1  ;;  %v1931_v51 = vsel %vm15906_vm2, %v10071_v55, %v9901_v9  ;;  %v1935_v4 = vor.u32 %v9903_v44, %v9901_v9  ;;  %v1945_v59 = vor.u32 %v10410_v37, %v10335_v16  ;;  %v16106_v55 = vld [vmem:[#allocation37_spill] sm:$0xff]  ;;  %v10552_v44 = vpop.permute.xlu1 %217  ;;  %v2058_v36 = vsel %vm10497_vm9, %v1178_v3, 0 }
 0x1a8   :  { %v1870_v8 = vsel %vm16094_vm12, 65537, %v15638_v13  ;;  %vm16097_vm1 = vmpackc.low %vm10323_vm8, %vm10323_vm8  ;;  %vm16100_vm12 = vcmp.le.s32.totalorder %v9021_v19, 6  ;;  %vm16107_vm8 = vnez %v16106_v55  ;;  %v10563_v19 = vrot.slane %v1968_v60, 5  ;;  %v74_v12 = vld [vmem:[%s15060_s0 + $0x3c] sm:$0xf] }
 0x1a9   :  { %v10507_v58 = vsel %vm16097_vm1, 65537, %v15638_v13  ;;  %vm16099_vm10 = vmpackc.low %vm16082_vm13, %vm16082_vm13  ;;  %v1958_v45 = vshll.u32 %v1870_v8, 16  ;;  %vm16103_vm13 = vsmask.f32 4352  ;;  %v1962_v15 = vshrl.u32 %v1870_v8, 16 }
 0x1aa   :  { %16098 = vst [vmem:[#allocation96_spill] sm:$0xff] %v10507_v58  ;;  %v10515_v6 = vsel %vm16099_vm10, 65537, %v15638_v13  ;;  %vm10521_vm4 = vmand %vm10469_vm0, %vm16100_vm12  ;;  %v10540_v24 = vsel %vm16103_vm13, %v2137_v31, %v10495_v21  ;;  %vm2042_vm10 = vcmp.ne.s16.totalorder %v1931_v51, 0  ;;  %vm16105_vm12 = vcmp.ge.s32.totalorder %v9109_v17, 4294967295 }
 0x1ab   :  { %16104 = vst [vmem:[#allocation97_spill] sm:$0xff] %v10540_v24  ;;  %vm10548_vm1 = vmand %vm16107_vm8, %vm16105_vm12  ;;  %v2059_v31 = vsel %vm2042_vm10, %v1179_v48, 0  ;;  %v1936_v34 = vrot.slane %v1935_v4, 4  ;;  %v10556_v51 = vrot.slane %v1353_v0, 7  ;;  %v1946_v55 = vrot.slane %v1945_v59, 4  ;;  %v16115_v59 = vld [vmem:[#allocation46_spill] sm:$0xff] }
 0x1ac   :  { %v6947_v8 = vcombine.low %v2058_v36, %v2059_v31  ;;  %vm16111_vm12 = vnez %v16110_v49  ;;  %v1955_v0 = vor.u32 %v10205_v11, %v10190_v39  ;;  %v2766_v3 = vshrl.u32 %v10507_v58, 16  ;;  %v16117_v31 = vld [vmem:[#allocation36_spill] sm:$0xff]  ;;  %vm16123_vm10 = vmpackc.low %vm10482_vm11, %vm10482_vm11  ;;  %90 = vst [vmem:[#allocation2 + $0x44] sm:$0xf] %v74_v12  ;;  %v7853_v12 = vld [vmem:[%s15059_s5 + $0xe8] sm:$0xff]  }
 0x1ad   :  { %v1941_v25 = vsel %vm15906_vm2, %v1936_v34, %v10335_v16  ;;  %v3362_v36 = vshll.u32 %v10515_v6, 16  ;;  %vm16112_vm8 = vcmp.le.s32.totalorder %v9109_v17, 6  ;;  %v10585_v34 = vrot.slane %v1972_v27, 4  ;;  %v1180_v27 = vld [vmem:[#allocation2 + $0x1c] sm:$0xf]  ;;  %vm16128_vm11 = vmpackc.low %vm10521_vm4, %vm10521_vm4  ;;  %7478 = vmatprep.subr.bf16.mxu1 %v7853_v12 }
 0x1ae   :  { %vm10580_vm15 = vmand %vm10548_vm1, %vm16112_vm8  ;;  %v2148_v4 = vshrl.u32 %v6947_v8, 16  ;;  %v2151_v48 = vshll.u32 %v6947_v8, 16  ;;  %v10587_v16 = vrot.slane %v1958_v45, 5  ;;  %v1964_v11 = vrot.slane %v1962_v15, 4  ;;  %7479 = vmatpush3.bf16.msra.mxu1 %v7853_v12 }
 0x1af   :  { %vm16116_vm9 = vnez %v16115_v59  ;;  %v1951_v9 = vsel %vm15906_vm2, %v1946_v55, %v10190_v39  ;;  %vm16118_vm1 = vnez %v16117_v31  ;;  %vm10600_vm3 = vcmp.ne.s16.totalorder %v1941_v25, 0  ;;  %v16125_v25 = vld [vmem:[#allocation38_spill] sm:$0xff]  ;;  %v16145_v31 = vld [vmem:[#allocation40_spill] sm:$0xff] }
 0x1b0   :  { %v2150_v45 = vrot.slane %v2148_v4, 3  ;;  %v2153_v8 = vrot.slane %v2151_v48, 4  ;;  %vm10604_vm13 = vcmp.ne.s16.totalorder %v1951_v9, 0  ;;  %v3366_v55 = vshrl.u32 %v10515_v6, 16  ;;  %vm16130_vm14 = vmpackc.low %vm16116_vm9, %vm16116_vm9 }
 0x1b1   :  { %v10616_v4 = vsel %vm16123_vm10, 65537, %v15638_v13  ;;  %vm16126_vm0 = vnez %v16125_v25  ;;  %v10622_v48 = vrot.slane %v1955_v0, 4  ;;  %v10624_v9 = vrot.slane %v2766_v3, 7  ;;  %vm2664_vm10 = vmpackc.low %vm10580_vm15, %vm10580_vm15  ;;  %v1181_v0 = vld [vmem:[#allocation2 + $0x20] sm:$0xf] }
 0x1b2   :  { %16124 = vst [vmem:[#allocation37_spill] sm:$0xff] %v10616_v4  ;;  %v10626_v39 = vrot.slane %v3362_v36, 5  ;;  %v10634_v1 = vsel %vm16128_vm11, 65537, %v15638_v13  ;;  %v1872_v6 = vsel %vm16130_vm14, 65537, %v15638_v13  ;;  %vm16131_vm8 = vcmp.le.s32.totalorder %v9945_v14, 7 }
 0x1b3   :  { %16127 = vst [vmem:[#allocation35_spill] sm:$0xff] %v10624_v9  ;;  %16129 = vst [vmem:[#allocation46_spill] sm:$0xff] %v10634_v1  ;;  %vm16132_vm5 = vcmp.ge.s32.totalorder %v9945_v14, 0  ;;  %v16133_v29 = vmov 0  ;;  %v10653_v3 = vor.u32 %v2153_v8, %v2150_v45  ;;  %v2060_v36 = vsel %vm10600_vm3, %v1180_v27, 0 }
 0x1b4   :  { %vm10649_vm6 = vmand %vm16132_vm5, %vm16131_vm8  ;;  %v2061_v58 = vsel %vm10604_vm13, %v1181_v0, 0  ;;  %v4224_v9 = vshrl.u32 %v10616_v4, 16  ;;  %vm16136_vm14 = vcmp.le.s32.totalorder %v10096_v47, 7  ;;  %vm16137_vm3 = vcmp.ge.s32.totalorder %v10096_v47, 0  ;;  %v10824_v25 = vld [vmem:[#allocation2 + $0x24] sm:$0xf] }
 0x1b5   :  { %v16134_v29 = vsel %vm10649_vm6, 4294967295, %v16133_v29  ;;  %vm16135_vm5 = vmpackc.low %vm16111_vm12, %vm16111_vm12  ;;  %v16138_v37 = vmov 0  ;;  %v6948_v27 = vcombine.low %v2060_v36, %v2061_v58  ;;  %v1965_v8 = vor.u32 %v1964_v11, %v10587_v16 }
 0x1b6   :  { %v3264_v45 = vsel %vm16135_vm5, 65537, %v15638_v13  ;;  %vm10674_vm4 = vmand %vm16137_vm3, %vm16136_vm14  ;;  %v10679_v15 = vrot.slane %v3366_v55, 4  ;;  %v1978_v0 = vshll.u32 %v1872_v6, 16  ;;  %v1982_v59 = vshrl.u32 %v1872_v6, 16 }
 0x1b7   :  { %v16139_v37 = vsel %vm10674_vm4, 4294967295, %v16138_v37  ;;  %vm16142_vm13 = vmpackc.low %vm16118_vm1, %vm16118_vm1  ;;  %v2757_v58 = vshrl.u32 %v10634_v1, 16  ;;  %vm16146_vm1 = vnez %v16145_v31  ;;  %vm16147_vm5 = vnez %v16039_v33  ;;  %v16186_v1 = vld [vmem:[#allocation39_spill] sm:$0xff] }
 0x1b8   :  { %16140 = vst [vmem:[#allocation36_spill] sm:$0xff] %v16139_v37  ;;  %16141 = vst [vmem:[#allocation38_spill] sm:$0xff] %v10679_v15  ;;  %v10687_v49 = vsel %vm16142_vm13, 65537, %v15638_v13  ;;  %vm16148_vm13 = vsmask.f32 4352  ;;  %v2157_v6 = vshrl.u32 %v6948_v27, 16  ;;  %v1975_v60 = vor.u32 %v10585_v34, %v10563_v19 }
 0x1b9   :  { %16143 = vst [vmem:[#allocation98_spill] sm:$0xff] %v10687_v49  ;;  %vm1859_vm12 = vmpackc.low %vm10123_vm7, %vm10123_vm7  ;;  %v10710_v55 = vsel %vm16148_vm13, %v10495_v21, %v10653_v3  ;;  %v3352_v36 = vshll.u32 %v3264_v45, 16  ;;  %v3356_v24 = vshrl.u32 %v3264_v45, 16  ;;  %v2160_v46 = vshll.u32 %v6948_v27, 16 }
 0x1ba   :  { %vm16144_vm8 = vmpackc.low %vm16126_vm0, %vm16126_vm0  ;;  %16149 = vst [vmem:[#allocation40_spill] sm:$0xff] %v10710_v55  ;;  %vm16150_vm0 = vcmp.ge.s32.totalorder %v10527_v5, 1  ;;  %v10720_v7 = vrot.slane %v4224_v9, 7  ;;  %v4215_v21 = vshrl.u32 %v10687_v49, 16  ;;  %vm16152_vm13 = vcmp.le.s32.totalorder %v10527_v5, 8 }
 0x1bb   :  { %v1873_v11 = vsel %vm16144_vm8, 65537, %v15638_v13  ;;  %vm1858_vm14 = vmpackc.low %vm16147_vm5, %vm16147_vm5  ;;  %v2159_v45 = vrot.slane %v2157_v6, 3  ;;  %v1966_v4 = vrot.slane %v1965_v8, 4  ;;  %v10729_v37 = vrot.slane %v1978_v0, 5 }
 0x1bc   :  { %vm1828_vm8 = vmand %vm10674_vm4, %vm16150_vm0  ;;  %16151 = vst [vmem:[#allocation99_spill] sm:$0xff] %v10720_v7  ;;  %v1988_v55 = vshll.u32 %v1873_v11, 16  ;;  %v1984_v27 = vrot.slane %v1982_v59, 4  ;;  %vm16155_vm0 = vcmp.ge.s32.totalorder %v10552_v44, 1  ;;  %v2162_v7 = vrot.slane %v2160_v46, 4 }
 0x1bd   :  { %vm10725_vm3 = vmand %vm1828_vm8, %vm16152_vm13  ;;  %v10739_v23 = vrot.slane %v2757_v58, 7  ;;  %v1992_v6 = vshrl.u32 %v1873_v11, 16  ;;  %v1971_v59 = vsel %vm15906_vm2, %v1966_v4, %v10563_v19  ;;  %v10751_v8 = vrot.slane %v3352_v36, 5 }
 0x1be   :  { %vm10735_vm11 = vmand %vm10649_vm6, %vm16155_vm0  ;;  %v10753_v46 = vrot.slane %v3356_v24, 4  ;;  %vm16159_vm13 = vcmp.le.s32.totalorder %v10096_v47, 6  ;;  %vm16160_vm0 = vcmp.ge.s32.totalorder %v10096_v47, 4294967295  ;;  %v16161_v0 = vmov 0  ;;  %v7854_v24 = vld [vmem:[%s15059_s5 + $0x138] sm:$0xff]  }
 0x1bf   :  { %16158 = vst [vmem:[#allocation100_spill] sm:$0xff] %v10739_v23  ;;  %vm1860_vm8 = vmpackc.low %vm10725_vm3, %vm10725_vm3  ;;  %v1875_v58 = vsel %vm1859_vm12, 65537, %v15638_v13  ;;  %v10772_v4 = vor.u32 %v2162_v7, %v2159_v45  ;;  %v10781_v36 = vsel %vm2664_vm10, 65537, %v15638_v13  ;;  %v1874_v30 = vsel %vm1858_vm14, 65537, %v15638_v13  ;;  %7506 = vmatprep.subr.bf16.mxu0 %v7854_v24 }
 0x1c0   :  { %vm10759_vm9 = vmand %vm16160_vm0, %vm16159_vm13  ;;  %16164 = vst [vmem:[#allocation102_spill] sm:$0xff] %v10781_v36  ;;  %vm16165_vm7 = vcmp.le.s32.totalorder %v10552_v44, 8  ;;  %v10799_v45 = vrot.slane %v4215_v21, 7  ;;  %v10801_v11 = vrot.slane %v1988_v55, 5  ;;  %v1876_v33 = vsel %vm1860_vm8, 65537, %v15638_v13 }
 0x1c1   :  { %v16162_v0 = vsel %vm10759_vm9, 4294967295, %v16161_v0  ;;  %vm10793_vm12 = vmand %vm10735_vm11, %vm16165_vm7  ;;  %vm16169_vm15 = vcmp.ge.s32.totalorder %v10527_v5, 1  ;;  %v1985_v19 = vor.u32 %v1984_v27, %v10729_v37  ;;  %v10814_v34 = vrot.slane %v1992_v6, 4 }
 0x1c2   :  { %16163 = vst [vmem:[#allocation101_spill] sm:$0xff] %v16162_v0  ;;  %16168 = vst [vmem:[#allocation103_spill] sm:$0xff] %v10799_v45  ;;  %v2008_v55 = vshll.u32 %v1875_v58, 16  ;;  %v2012_v21 = vshrl.u32 %v1875_v58, 16  ;;  %vm16170_vm11 = vcmp.le.s32.totalorder %v10527_v5, 8  ;;  %v16171_v9 = vmov 0 }
 0x1c3   :  { %vm3222_vm10 = vmand %vm10759_vm9, %vm16169_vm15  ;;  %vm264_vm3 = vcmp.le.s32.totalorder %v10009_v20, 8  ;;  %v16174_v27 = vsel %vm15906_vm2, %v10622_v48, %v10587_v16  ;;  %v1998_v58 = vshll.u32 %v1874_v30, 16  ;;  %v2002_v24 = vshrl.u32 %v1874_v30, 16  ;;  %v10850_v30 = vld [vmem:[#allocation2 + $0x28] sm:$0xf] }
 0x1c4   :  { %vm10818_vm5 = vmand %vm3222_vm10, %vm16170_vm11  ;;  %vm10831_vm8 = vcmp.ne.s16.totalorder %v16174_v27, 0  ;;  %vm16177_vm15 = vsmask.f32 4352  ;;  %v2018_v48 = vshll.u32 %v1876_v33, 16  ;;  %v2022_v27 = vshrl.u32 %v1876_v33, 16 }
 0x1c5   :  { %v16172_v9 = vsel %vm10818_vm5, 4294967295, %v16171_v9  ;;  %vm1861_vm13 = vmpackc.low %vm10793_vm12, %vm10793_vm12  ;;  %v10844_v16 = vsel %vm16177_vm15, %v10653_v3, %v10772_v4  ;;  %vm16179_vm10 = vcmp.ge.s32.totalorder %v10527_v5, 4294967295  ;;  %vm2046_vm14 = vcmp.ne.s16.totalorder %v1971_v59, 0 }
 0x1c6   :  { %16173 = vst [vmem:[#allocation104_spill] sm:$0xff] %v16172_v9  ;;  %16178 = vst [vmem:[#allocation105_spill] sm:$0xff] %v10844_v16  ;;  %v1976_v15 = vrot.slane %v1975_v60, 4  ;;  %vm16181_vm15 = vcmp.le.s32.totalorder %v10527_v5, 6  ;;  %v16182_v3 = vmov 0  ;;  %v2062_v33 = vsel %vm10831_vm8, %v10824_v25, 0 }
 0x1c7   :  { %vm4093_vm11 = vmand %vm10759_vm9, %vm16179_vm10  ;;  %v2063_v59 = vsel %vm2046_vm14, %v10850_v30, 0  ;;  %v1986_v60 = vrot.slane %v1985_v19, 4  ;;  %v2010_v49 = vrot.slane %v2008_v55, 5  ;;  %v2014_v45 = vrot.slane %v2012_v21, 4  ;;  %v10889_v55 = vld [vmem:[#allocation2 + $0x2c] sm:$0xf] }
 0x1c8   :  { %vm16180_vm0 = vmpackc.low %vm16146_vm1, %vm16146_vm1  ;;  %v6949_v0 = vcombine.low %v2062_v33, %v2063_v59  ;;  %v1981_v31 = vsel %vm15906_vm2, %v1976_v15, %v10729_v37  ;;  %vm16185_vm1 = vcmp.ge.s32.totalorder %v9109_v17, 4294967295  ;;  %v2000_v6 = vrot.slane %v1998_v58, 5  ;;  %v16216_v9 = vld [vmem:[#allocation52_spill] sm:$0xff] }
 0x1c9   :  { %v10858_v12 = vsel %vm16180_vm0, 65537, %v15638_v13  ;;  %vm10862_vm7 = vmand %vm4093_vm11, %vm16181_vm15  ;;  %vm16187_vm0 = vnez %v16186_v1  ;;  %v2004_v23 = vrot.slane %v2002_v24, 4  ;;  %v10887_v19 = vsel %vm1861_vm13, 65537, %v15638_v13 }
 0x1ca   :  { %v16183_v3 = vsel %vm10862_vm7, 4294967295, %v16182_v3  ;;  %vm10877_vm10 = vmand %vm16187_vm0, %vm16185_vm1  ;;  %v1991_v37 = vsel %vm15906_vm2, %v1986_v60, %v10801_v11  ;;  %v2020_v15 = vrot.slane %v2018_v48, 5  ;;  %v2024_v21 = vrot.slane %v2022_v27, 4  ;;  %v10910_v48 = vld [vmem:[#allocation2 + $0x30] sm:$0xf] }
 0x1cb   :  { %16184 = vst [vmem:[#allocation106_spill] sm:$0xff] %v16183_v3  ;;  %v2166_v58 = vshrl.u32 %v6949_v0, 16  ;;  %v2169_v24 = vshll.u32 %v6949_v0, 16  ;;  %vm16190_vm12 = vcmp.ge.s32.totalorder %v8966_v43, 4294967295  ;;  %vm16191_vm8 = vnez %v15872_v22  ;;  %16195 = vst [vmem:[#allocation107_spill] sm:$0xff] %v10910_v48  ;;  %v16208_v3 = vld [vmem:[#allocation43_spill] sm:$0xff] }
 0x1cc   :  { %vm1216_vm13 = vmand %vm16191_vm8, %vm16190_vm12  ;;  %vm2047_vm11 = vcmp.ne.s16.totalorder %v1981_v31, 0  ;;  %vm2048_vm15 = vcmp.ne.s16.totalorder %v1991_v37, 0  ;;  %vm16192_vm1 = vcmp.le.s32.totalorder %v9109_v17, 6  ;;  %v16193_v7 = vmov 0 }
 0x1cd   :  { %vm10905_vm14 = vmand %vm10877_vm10, %vm16192_vm1  ;;  %v2028_v0 = vshll.u32 %v10887_v19, 16  ;;  %v2168_v27 = vrot.slane %v2166_v58, 3  ;;  %v2171_v60 = vrot.slane %v2169_v24, 4  ;;  %v2064_v33 = vsel %vm2047_vm11, %v10889_v55, 0 }
 0x1ce   :  { %v16194_v7 = vsel %vm10905_vm14, 4294967295, %v16193_v7  ;;  %v2065_v22 = vsel %vm2048_vm15, %v10910_v48, 0  ;;  %v1995_v31 = vor.u32 %v10814_v34, %v10801_v11  ;;  %v2005_v37 = vor.u32 %v2004_v23, %v2000_v6 }
 0x1cf   :  { %v2015_v59 = vor.u32 %v2014_v45, %v2010_v49  ;;  %vm16196_vm10 = vcmp.le.s32.totalorder %v8966_v43, 6  ;;  %v2172_v16 = vor.u32 %v2171_v60, %v2168_v27  ;;  %v6950_v58 = vcombine.low %v2064_v33, %v2065_v22  ;;  %v1186_v33 = vld [vmem:[#allocation2 + $0x34] sm:$0xf] }
 0x1d0   :  { %vm10919_vm12 = vmand %vm1216_vm13, %vm16196_vm10  ;;  %v2025_v24 = vor.u32 %v2024_v21, %v2020_v15  ;;  %vm16199_vm11 = vcmp.ge.s32.totalorder %v10009_v20, 1  ;;  %v1996_v11 = vrot.slane %v1995_v31, 4  ;;  %v2006_v45 = vrot.slane %v2005_v37, 4  ;;  %v10962_v31 = vld [vmem:[#allocation2 + $0x38] sm:$0xf] }
 0x1d1   :  { %vm10930_vm15 = vmand %vm16199_vm11, %vm264_vm3  ;;  %v2016_v34 = vrot.slane %v2015_v59, 4  ;;  %vm16202_vm1 = vcmp.le.s32.totalorder %v9862_v38, 8  ;;  %vm16203_vm10 = vcmp.ge.s32.totalorder %v9862_v38, 1  ;;  %vm16206_vm8 = vsmask.f32 4352  ;;  %v16210_v59 = vld [vmem:[#allocation49_spill] sm:$0xff] }
 0x1d2   :  { %vm10939_vm9 = vmand %vm16203_vm10, %vm16202_vm1  ;;  %v10945_v20 = vsel %vm16206_vm8, %v10772_v4, %v2172_v16  ;;  %v2175_v27 = vshrl.u32 %v6950_v58, 16  ;;  %v2178_v60 = vshll.u32 %v6950_v58, 16  ;;  %v2026_v22 = vrot.slane %v2025_v24, 4  ;;  %v7855_v4 = vld [vmem:[%s15059_s5 + $0xe0] sm:$0xff]   ;;  %16214 = vst [vmem:[#allocation49_spill] sm:$0xff] %v10962_v31 }
 0x1d3   :  { %16207 = vst [vmem:[#allocation108_spill] sm:$0xff] %v10945_v20  ;;  %v10953_v38 = vrot.slane %v2028_v0, 5  ;;  %vm16213_vm1 = vcmp.ge.s32.totalorder %v10199_v57, 1  ;;  %v2001_v37 = vsel %vm15906_vm2, %v1996_v11, %v2000_v6  ;;  %v2011_v58 = vsel %vm15906_vm2, %v2006_v45, %v2010_v49  ;;  %v1188_v24 = vld [vmem:[#allocation2 + $0x3c] sm:$0xf]  ;;  %7480 = vmatprep.subr.bf16.mxu1 %v7855_v4 }
 0x1d4   :  { %vm312_vm10 = vmand %vm10930_vm15, %vm16213_vm1  ;;  %v2021_v0 = vsel %vm15906_vm2, %v2016_v34, %v2020_v15  ;;  %vm16215_vm8 = vcmp.ge.s32.totalorder %v10026_v26, 1  ;;  %v2177_v43 = vrot.slane %v2175_v27, 3  ;;  %v2180_v20 = vrot.slane %v2178_v60, 4  ;;  %7481 = vmatpush3.bf16.msra.mxu1 %v7855_v4  ;;  %v11059_v34 = vld [vmem:[#allocation2 + $0x38] sm:$0xf] }
 0x1d5   :  { %16212 = vst [vmem:[#allocation43_spill] sm:$0xff] %v10953_v38  ;;  %vm313_vm1 = vmand %vm10939_vm9, %vm16215_vm8  ;;  %vm2049_vm0 = vcmp.ne.s16.totalorder %v2001_v37, 0  ;;  %vm2050_vm11 = vcmp.ne.s16.totalorder %v2011_v58, 0  ;;  %vm16218_vm4 = vcmp.ge.s32.totalorder %v9109_v17, 4294967295  ;;  %vm16219_vm6 = vnez %v15943_v63  ;;  %v11206_v4 = vld [vmem:[%s15059_s5 + $0x178] sm:$0xff]  }
 0x1d6   :  { %vm10981_vm13 = vmand %vm16219_vm6, %vm16218_vm4  ;;  %v16220_v49 = vmov 0  ;;  %vm16222_vm3 = vcmp.le.s32.totalorder %v10199_v57, 8  ;;  %v2066_v15 = vsel %vm2049_vm0, %v1186_v33, 0  ;;  %v2067_v11 = vsel %vm2050_vm11, %v10962_v31, 0  ;;  %v1189_v33 = vld [vmem:[#allocation2 + $0x40] sm:$0xf] }
 0x1d7   :  { %v16221_v49 = vsel %vm10981_vm13, 4294967295, %v16220_v49  ;;  %vm10987_vm8 = vmand %vm312_vm10, %vm16222_vm3  ;;  %v2031_v45 = vsel %vm15906_vm2, %v2026_v22, %v10953_v38  ;;  %vm10995_vm5 = vcmp.ne.s16.totalorder %v2021_v0, 0  ;;  %vm16227_vm6 = vcmp.le.s32.totalorder %v10026_v26, 8  ;;  %v16232_v22 = vld [vmem:[#allocation56_spill] sm:$0xff]  ;;  %16284 = vst [vmem:[#allocation117_spill] sm:$0xff] %v11206_v4 }
 0x1d8   :  { %vm11001_vm4 = vmand %vm313_vm1, %vm16227_vm6  ;;  %v11006_v27 = vor.u32 %v2180_v20, %v2177_v43  ;;  %v6951_v60 = vcombine.low %v2066_v15, %v2067_v11  ;;  %vm11008_vm0 = vcmp.ne.s16.totalorder %v2031_v45, 0  ;;  %vm16233_vm11 = vnez %v16232_v22  ;;  %v7857_v43 = vld [vmem:[%s15059_s5 + $0xd8] sm:$0xff]  }
 0x1d9   :  { %vm4121_vm10 = vmpackc.low %vm16233_vm11, %vm16233_vm11  ;;  %vm16234_vm6 = vcmp.ge.s32.totalorder %v10026_v26, 4294967295  ;;  %vm16235_vm13 = vnez %v15978_v61  ;;  %vm15360_vm2 = vcmp.le.s32.totalorder %v10199_v57, 7  ;;  %vm15361_vm14 = vcmp.le.s32.totalorder %v10026_v26, 7  ;;  %7482 = vmatprep.subr.bf16.mxu1 %v7857_v43 }
 0x1da   :  { %vm11020_vm3 = vmand %vm16235_vm13, %vm16234_vm6  ;;  %v2068_v20 = vsel %vm10995_vm5, %v1188_v24, 0  ;;  %v2069_v61 = vsel %vm11008_vm0, %v1189_v33, 0  ;;  %v2184_v6 = vshrl.u32 %v6951_v60, 16  ;;  %v2187_v15 = vshll.u32 %v6951_v60, 16  ;;  %v11050_v24 = vld [vmem:[#allocation2 + $0x34] sm:$0xf]  ;;  %7483 = vmatpush3.bf16.msra.mxu1 %v7857_v43 }
 0x1db   :  { %vm360_vm7 = vmpackc.low %vm10987_vm8, %vm10987_vm8  ;;  %vm16238_vm8 = vsmask.f32 4352  ;;  %vm16240_vm6 = vnez %v15922_v10  ;;  %v16242_v33 = vor.u32 %v10018_v40, %v10016_v52  ;;  %vm16243_vm0 = vcmp.ge.s32.totalorder %v10026_v26, 0  ;;  %v7859_v40 = vld [vmem:[%s15059_s5 + $0xd0] sm:$0xff]  }
 0x1dc   :  { %vm361_vm13 = vmpackc.low %vm11001_vm4, %vm11001_vm4  ;;  %v376_v58 = vsel %vm360_vm7, 65537, %v15638_v13  ;;  %v11042_v0 = vsel %vm16238_vm8, %v2172_v16, %v11006_v27  ;;  %vm16241_vm7 = vcmp.ge.s32.totalorder %v10199_v57, 0  ;;  %v6952_v16 = vcombine.low %v2068_v20, %v2069_v61  ;;  %7484 = vmatprep.subr.bf16.mxu1 %v7859_v40 }
 0x1dd   :  { %16239 = vst [vmem:[#allocation52_spill] sm:$0xff] %v11042_v0  ;;  %vm1263_vm1 = vmpackc.low %vm16240_vm6, %vm16240_vm6  ;;  %v11053_v11 = vsel %vm361_vm13, 65537, %v15638_v13  ;;  %v503_v45 = vshll.u32 %v376_v58, 16  ;;  %v507_v63 = vshrl.u32 %v376_v58, 16  ;;  %v501_v60 = vrot.slane %v16242_v33, 4 }
 0x1de   :  { %vm620_vm4 = vmand %vm10930_vm15, %vm16241_vm7  ;;  %v513_v37 = vshll.u32 %v11053_v11, 16  ;;  %v2186_v58 = vrot.slane %v2184_v6, 3  ;;  %v2189_v0 = vrot.slane %v2187_v15, 4  ;;  %v2193_v52 = vshrl.u32 %v6952_v16, 16  ;;  %7485 = vmatpush3.bf16.msra.mxu1 %v7859_v40 }
 0x1df   :  { %vm621_vm13 = vmand %vm10939_vm9, %vm16243_vm0  ;;  %v505_v31 = vrot.slane %v503_v45, 5  ;;  %v509_v38 = vrot.slane %v507_v63, 4  ;;  %v2196_v61 = vshll.u32 %v6952_v16, 16  ;;  %v16246_v33 = vshrl.u32 %v10781_v36, 16  ;;  %v16320_v36 = vld [vmem:[#allocation67_spill] sm:$0xff] }
 0x1e0   :  { %vm11071_vm8 = vmand %vm620_vm4, %vm15360_vm2  ;;  %v16248_v43 = vshll.u32 %v10858_v12, 16  ;;  %v16250_v15 = vshrl.u32 %v10858_v12, 16  ;;  %vm16252_vm7 = vnez %v16194_v7  ;;  %v7861_v12 = vld [vmem:[%s15059_s5 + $0xc8] sm:$0xff]   ;;  %vm16257_vm2 = vnez %v15520_v42 }
 0x1e1   :  { %v11080_v48 = vrot.slane %v16246_v33, 7  ;;  %vm16253_vm4 = vmpackc.low %vm16252_vm7, %vm16252_vm7  ;;  %v506_v33 = vsel %vm16257_vm2, %v501_v60, %v505_v31  ;;  %v2190_v7 = vor.u32 %v2189_v0, %v2186_v58  ;;  %v2198_v0 = vrot.slane %v2196_v61, 4  ;;  %7486 = vmatprep.subr.bf16.mxu1 %v7861_v12 }
 0x1e2   :  { %v11084_v6 = vrot.slane %v16248_v43, 5  ;;  %v11088_v45 = vrot.slane %v16250_v15, 4  ;;  %v11096_v63 = vsel %vm16253_vm4, 65537, %v15638_v13  ;;  %vm11100_vm0 = vmand %vm621_vm13, %vm15361_vm14  ;;  %v510_v43 = vor.u32 %v509_v38, %v505_v31  ;;  %7487 = vmatpush3.bf16.msra.mxu1 %v7861_v12 }
 0x1e3   :  { %16247 = vst [vmem:[#allocation56_spill] sm:$0xff] %v11080_v48  ;;  %16254 = vst [vmem:[#allocation111_spill] sm:$0xff] %v11096_v63  ;;  %v2195_v15 = vrot.slane %v2193_v52, 3  ;;  %vm16258_vm13 = vnez %v16208_v3  ;;  %vm16260_vm14 = vnez %v16210_v59  ;;  %v11132_v60 = vrot.slane %v513_v37, 5  ;;  %v7863_v59 = vld [vmem:[%s15059_s5 + $0xc0] sm:$0xff]  }
 0x1e4   :  { %16249 = vst [vmem:[#allocation109_spill] sm:$0xff] %v11084_v6  ;;  %16251 = vst [vmem:[#allocation110_spill] sm:$0xff] %v11088_v45  ;;  %v511_v3 = vrot.slane %v510_v43, 4  ;;  %v4242_v61 = vshrl.u32 %v11096_v63, 16  ;;  %7488 = vmatprep.subr.bf16.mxu1 %v7863_v59  ;;  %v11214_v12 = vsel %vm1263_vm1, 65537, %v15638_v13  ;;  %vm16290_vm1 = vnez %v16015_v41 }
 0x1e5   :  { %vm668_vm7 = vmpackc.low %vm11071_vm8, %vm11071_vm8  ;;  %v11164_v52 = vor.u32 %v2198_v0, %v2195_v15  ;;  %v11185_v15 = vsel %vm4121_vm10, 65537, %v15638_v13  ;;  %v16321_v48 = vshll.u32 %v16320_v36, 16  ;;  %v2032_v21 = vshrl.u32 %v10887_v19, 16 }
 0x1e6   :  { %vm16259_vm4 = vmpackc.low %vm16258_vm13, %vm16258_vm13  ;;  %v684_v31 = vsel %vm668_vm7, %v11050_v24, 0  ;;  %vm16263_vm13 = vcmp.ge.s32.totalorder %v10199_v57, 4294967295  ;;  %16278 = vst [vmem:[#allocation115_spill] sm:$0xff] %v11185_v15  ;;  %v11230_v40 = vrot.slane %v4242_v61, 7  ;;  %v4233_v1 = vshrl.u32 %v11185_v15, 16  ;;  %7489 = vmatpush3.bf16.msra.mxu1 %v7863_v59  ;;  %v16292_v59 = vld [vmem:[#allocation21_spill] sm:$0xff] }
 0x1e7   :  { %v11118_v45 = vsel %vm16259_vm4, 65537, %v15638_v13  ;;  %vm16261_vm5 = vmpackc.low %vm16260_vm14, %vm16260_vm14  ;;  %vm16268_vm4 = vcmp.le.s32.totalorder %v9109_v17, 6  ;;  %16274 = vst [vmem:[#allocation114_spill] sm:$0xff] %v11164_v52  ;;  %7538 = vmatprep.subr.bf16.mxu1 %v11206_v4  ;;  %v16314_v15 = vld [vmem:[#allocation42_spill] sm:$0xff]  ;;  %v16824_v42 = vmov 0 }
 0x1e8   :  { %v11126_v38 = vsel %vm16261_vm5, 65537, %v15638_v13  ;;  %vm669_vm8 = vmpackc.low %vm11100_vm0, %vm11100_vm0  ;;  %vm16264_vm5 = vsmask.f32 4352  ;;  %vm16266_vm0 = vnez %v16216_v9  ;;  %v1380_v16 = vshrl.u32 %v11118_v45, 16 }
 0x1e9   :  { %16262 = vst [vmem:[#allocation112_spill] sm:$0xff] %v11126_v38  ;;  %v685_v58 = vsel %vm669_vm8, %v11059_v34, 0  ;;  %vm1219_vm14 = vmand %vm10930_vm15, %vm16263_vm13  ;;  %v11144_v20 = vsel %vm16264_vm5, %v11006_v27, %v2190_v7  ;;  %vm16269_vm15 = vnez %v16221_v49  ;;  %vm11160_vm13 = vcmp.ne.s16.totalorder %v506_v33, 0 }
 0x1ea   :  { %16265 = vst [vmem:[#allocation113_spill] sm:$0xff] %v11144_v20  ;;  %vm16267_vm7 = vmpackc.low %vm16266_vm0, %vm16266_vm0  ;;  %v6901_v27 = vcombine.low %v684_v31, %v685_v58  ;;  %v516_v49 = vsel %vm16257_vm2, %v511_v3, %v11132_v60  ;;  %vm16275_vm5 = vcmp.le.s32.totalorder %v10199_v57, 6  ;;  %v16276_v33 = vmov 0  ;;  %v16325_v20 = vld [vmem:[#allocation60_spill] sm:$0xff] }
 0x1eb   :  { %v3266_v37 = vsel %vm16267_vm7, 65537, %v15638_v13  ;;  %vm11156_vm8 = vmand %vm16269_vm15, %vm16268_vm4  ;;  %v2775_v43 = vshrl.u32 %v11126_v38, 16  ;;  %vm16279_vm7 = vcmp.le.s32.totalorder %v10026_v26, 6  ;;  %vm16282_vm15 = vsmask.f32 4352 }
 0x1ec   :  { %vm11174_vm0 = vmand %vm1219_vm14, %vm16275_vm5  ;;  %vm555_vm14 = vcmp.ne.s16.totalorder %v516_v49, 0  ;;  %7406 = vmatprep.mubr.bf16.mxu0 %v6901_v27  ;;  %v11197_v0 = vsel %vm16282_vm15, %v2190_v7, %v11164_v52  ;;  %v3372_v3 = vshll.u32 %v3266_v37, 16  ;;  %v3376_v22 = vshrl.u32 %v3266_v37, 16  ;;  %v16286_v7 = vld [vmem:[#allocation54_spill] sm:$0xff]  ;;  %v16313_v52 = vld [vmem:[#allocation47_spill] sm:$0xff] }
 0x1ed   :  { %v16277_v33 = vsel %vm11174_vm0, 4294967295, %v16276_v33  ;;  %vm11191_vm4 = vmand %vm11020_vm3, %vm16279_vm7  ;;  %16283 = vst [vmem:[#allocation116_spill] sm:$0xff] %v11197_v0  ;;  %v571_v58 = vsel %vm11160_vm13, %v10014_v18, 0  ;;  %v572_v9 = vsel %vm555_vm14, %v11050_v24, 0  ;;  %v16287_v37 = vshll.u32 %v16286_v7, 16 }
 0x1ee   :  { %vm16285_vm3 = vmpackc.low %vm10919_vm12, %vm10919_vm12  ;;  %v6917_v24 = vcombine.low %v571_v58, %v572_v9  ;;  %16288 = vst [vmem:[#allocation54_spill] sm:$0xff] %v11230_v40  ;;  %v11232_v27 = vrot.slane %v1380_v16, 7  ;;  %v11240_v63 = vrot.slane %v2775_v43, 7  ;;  %v11246_v58 = vrot.slane %v3372_v3, 5  ;;  %v1174_v9 = vld [vmem:[#allocation2 + $0x4] sm:$0xf] }
 0x1ef   :  { %v11222_v18 = vsel %vm16285_vm3, 65537, %v15638_v13  ;;  %vm1266_vm11 = vmpackc.low %vm11156_vm8, %vm11156_vm8  ;;  %v1296_v10 = vor.u32 %v16287_v37, %v9563_v53  ;;  %v1362_v7 = vshrl.u32 %v11214_v12, 16  ;;  %vm16291_vm7 = vcmp.ge.s32.totalorder %v10026_v26, 4294967295 }
 0x1f0   :  { %vm2666_vm12 = vmpackc.low %vm11191_vm4, %vm11191_vm4  ;;  %16289 = vst [vmem:[#allocation118_spill] sm:$0xff] %v11240_v63  ;;  %v995_v61 = vshrl.u32 %v6917_v24, 16  ;;  %v998_v16 = vshll.u32 %v6917_v24, 16  ;;  %v1371_v37 = vshrl.u32 %v11222_v18, 16  ;;  %v11258_v43 = vsel %vm1266_vm11, 65537, %v15638_v13 }
 0x1f1   :  { %vm3253_vm6 = vmpackc.low %vm16290_vm1, %vm16290_vm1  ;;  %vm16293_vm14 = vnez %v16292_v59  ;;  %v11269_v24 = vrot.slane %v3376_v22, 4  ;;  %vm16297_vm3 = vcmp.ge.s32.totalorder %v10199_v57, 4294967295  ;;  %vm16298_vm13 = vnez %v16032_v28  ;;  %v16302_v28 = vld [vmem:[#allocation64_spill] sm:$0xff] }
 0x1f2   :  { %vm11264_vm15 = vmand %vm16293_vm14, %vm16291_vm7  ;;  %vm15394_vm8 = vcmp.le.s32.totalorder %v10552_v44, 6  ;;  %vm1433_vm11 = vcmp.ne.s16.totalorder %v1296_v10, 0  ;;  %v997_v49 = vrot.slane %v995_v61, 3  ;;  %v1000_v40 = vrot.slane %v998_v16, 4 }
 0x1f3   :  { %16296 = vst [vmem:[#allocation119_spill] sm:$0xff] %v11269_v24  ;;  %vm11275_vm5 = vmand %vm16298_vm13, %vm16297_vm3  ;;  %v11280_v59 = vrot.slane %v4233_v1, 7  ;;  %v2686_v6 = vshrl.u32 %v16302_v28, 16  ;;  %v1389_v24 = vshrl.u32 %v11258_v43, 16  ;;  %v11294_v1 = vsel %vm2666_vm12, 65537, %v15638_v13  ;;  %v16352_v28 = vld [vmem:[#allocation58_spill] sm:$0xff] }
 0x1f4   :  { %16303 = vst [vmem:[#allocation121_spill] sm:$0xff] %v11294_v1  ;;  %v3269_v61 = vsel %vm3253_vm6, 65537, %v15638_v13  ;;  %vm16304_vm13 = vcmp.le.s32.totalorder %v10026_v26, 6  ;;  %v11310_v17 = vor.u32 %v1000_v40, %v997_v49  ;;  %v11312_v31 = vrot.slane %v1362_v7, 7  ;;  %v16311_v40 = vld [vmem:[#allocation48_spill] sm:$0xff] }
 0x1f5   :  { %16301 = vst [vmem:[#allocation120_spill] sm:$0xff] %v11280_v59  ;;  %vm11306_vm3 = vmand %vm11264_vm15, %vm16304_vm13  ;;  %v11314_v22 = vrot.slane %v1371_v37, 7  ;;  %vm16307_vm4 = vcmp.le.s32.totalorder %v10199_v57, 6  ;;  %v11326_v3 = vsel %vm1433_vm11, %v1174_v9, 0  ;;  %v16310_v59 = vld [vmem:[#allocation55_spill] sm:$0xff]  ;;  %v16312_v49 = vshll.u32 %v16311_v40, 16 }
 0x1f6   :  { %vm11321_vm12 = vmand %vm11275_vm5, %vm16307_vm4  ;;  %v16315_v0 = vshll.u32 %v16314_v15, 16  ;;  %vm16316_vm1 = vsmask.f32 4352  ;;  %v2802_v10 = vshrl.u32 %v11294_v1, 16  ;;  %v3402_v9 = vshll.u32 %v3269_v61, 16  ;;  %v16319_v37 = vld [vmem:[#allocation70_spill] sm:$0xff] }
 0x1f7   :  { %v11331_v7 = vor.u32 %v16312_v49, %v16310_v59  ;;  %v1002_v23 = vsel %vm16316_vm1, %v10245_v32, %v11310_v17  ;;  %vm4124_vm6 = vmpackc.low %vm11306_vm3, %vm11306_vm3  ;;  %v11346_v40 = vrot.slane %v2686_v6, 7  ;;  %v16318_v49 = vld [vmem:[#allocation61_spill] sm:$0xff]  ;;  %vm16322_vm15 = vnez %v16066_v2 }
 0x1f8   :  { %v11337_v57 = vor.u32 %v16315_v0, %v16313_v52  ;;  %7435 = vmatmul.mubr.bf16.gmra.mxu1 %v1002_v23  ;;  %v3285_v15 = vsel %vm16257_vm2, %v16319_v37, %v16318_v49  ;;  %v11352_v0 = vrot.slane %v1389_v24, 7  ;;  %vm2665_vm5 = vmpackc.low %vm11321_vm12, %vm11321_vm12  ;;  %v3294_v23 = vrot.slane %v16321_v48, 5  ;;  %v3158_v37 = vld [vmem:[#allocation2 + $0x8] sm:$0x8]  ;;  %v16323_v24 = vld [vmem:[#allocation69_spill] sm:$0xff] }
 0x1f9   :  { %16317 = vst [vmem:[#allocation55_spill] sm:$0xff] %v11346_v40  ;;  %vm3252_vm11 = vmpackc.low %vm16322_vm15, %vm16322_vm15  ;;  %v16324_v49 = vshll.u32 %v16323_v24, 16  ;;  %vm3431_vm13 = vcmp.ne.s16.totalorder %v16325_v20, 0  ;;  %vm11368_vm4 = vcmp.ne.s16.totalorder %v3285_v15, 0  ;;  %v3406_v32 = vshrl.u32 %v3269_v61, 16  ;;  %v16331_v15 = vld [vmem:[#allocation71_spill] sm:$0xff] }
 0x1fa   :  { %v11378_v36 = vsel %vm4124_vm6, 65537, %v15638_v13  ;;  %vm16329_vm1 = vcmp.ge.s32.totalorder %v10552_v44, 4294967295  ;;  %vm16330_vm7 = vnez %v16134_v29  ;;  %v11384_v48 = vld [vmem:[#allocation2 + $0xc] sm:$0xf]  ;;  %v3295_v24 = vsel %vm16257_vm2, %v16331_v15, %v3294_v23  ;;  %v16332_v61 = vld [vmem:[#allocation73_spill] sm:$0xff] }
 0x1fb   :  { %v3304_v38 = vrot.slane %v16324_v49, 5  ;;  %16328 = vst [vmem:[#allocation48_spill] sm:$0xff] %v11378_v36  ;;  %vm2636_vm10 = vmand %vm16330_vm7, %vm16329_vm1  ;;  %v3299_v49 = vor.u32 %v16332_v61, %v3294_v23  ;;  %v11390_v6 = vrot.slane %v2802_v10, 7  ;;  %v11392_v1 = vrot.slane %v3402_v9, 5  ;;  %v16343_v61 = vld [vmem:[#allocation76_spill] sm:$0xff] }
 0x1fc   :  { %v3449_v4 = vsel %vm11368_vm4, %v11384_v48, 0  ;;  %vm16335_vm7 = vcmp.le.s32.totalorder %v9945_v14, 6  ;;  %vm16336_vm3 = vcmp.ge.s32.totalorder %v9945_v14, 4294967295  ;;  %v16337_v29 = vmov 0  ;;  %vm11425_vm4 = vmand %vm2636_vm10, %vm15394_vm8 }
 0x1fd   :  { %16333 = vst [vmem:[#allocation47_spill] sm:$0xff] %v11390_v6  ;;  %16334 = vst [vmem:[#allocation42_spill] sm:$0xff] %v11392_v1  ;;  %v11412_v10 = vsel %vm2665_vm5, 65537, %v15638_v13  ;;  %v3268_v63 = vsel %vm3252_vm11, 65537, %v15638_v13  ;;  %v3300_v9 = vrot.slane %v3299_v49, 4  ;;  %v3448_v23 = vsel %vm3431_vm13, %v3158_v37, 0 }
 0x1fe   :  { %vm11402_vm6 = vmand %vm16336_vm3, %vm16335_vm7  ;;  %16340 = vst [vmem:[#allocation70_spill] sm:$0xff] %v11412_v10  ;;  %v4260_v15 = vshrl.u32 %v11378_v36, 16  ;;  %v3309_v16 = vor.u32 %v16343_v61, %v3304_v38  ;;  %vm11430_vm12 = vcmp.ne.s16.totalorder %v3295_v24, 0  ;;  %v6995_v2 = vcombine.low %v3448_v23, %v3449_v4  ;;  %v16351_v6 = vld [vmem:[#allocation65_spill] sm:$0xff] }
 0x1ff   :  { %v16338_v29 = vsel %vm11402_vm6, 4294967295, %v16337_v29  ;;  %vm16346_vm5 = vcmp.le.s32.totalorder %v10096_v47, 8  ;;  %vm16347_vm15 = vcmp.ge.s32.totalorder %v10096_v47, 1  ;;  %v11442_v37 = vrot.slane %v3406_v32, 4  ;;  %v11458_v47 = vld [vmem:[#allocation2 + $0x10] sm:$0xf] }
 0x200   :  { %16339 = vst [vmem:[#allocation61_spill] sm:$0xff] %v16338_v29  ;;  %vm11438_vm11 = vmand %vm16347_vm15, %vm16346_vm5  ;;  %v16353_v61 = vshll.u32 %v16352_v28, 16  ;;  %v3305_v4 = vsel %vm16257_vm2, %v3300_v9, %v3304_v38  ;;  %v2793_v23 = vshrl.u32 %v11412_v10, 16  ;;  %v3392_v40 = vshll.u32 %v3268_v63, 16  ;;  %v11466_v9 = vld [vmem:[#allocation2 + $0x14] sm:$0xf] }
 0x201   :  { %16350 = vst [vmem:[#allocation67_spill] sm:$0xff] %v11442_v37  ;;  %vm16355_vm10 = vnez %v16077_v50  ;;  %16356 = vst [vmem:[#allocation60_spill] sm:$0xff] %v11458_v47  ;;  %vm3434_vm3 = vcmp.ne.s16.totalorder %v3305_v4, 0  ;;  %v3525_v28 = vshrl.u32 %v6995_v2, 16  ;;  %v3396_v32 = vshrl.u32 %v3268_v63, 16  ;;  %v16369_v29 = vld [vmem:[#allocation83_spill] sm:$0xff] }
 0x202   :  { %v11448_v24 = vor.u32 %v16353_v61, %v16351_v6  ;;  %vm4123_vm13 = vmpackc.low %vm16355_vm10, %vm16355_vm10  ;;  %v3450_v38 = vsel %vm11430_vm12, %v11458_v47, 0  ;;  %16357 = vst [vmem:[#allocation71_spill] sm:$0xff] %v11466_v9  ;;  %v3451_v61 = vsel %vm3434_vm3, %v11466_v9, 0  ;;  %v3528_v49 = vshll.u32 %v6995_v2, 16  ;;  %v16370_v9 = vld [vmem:[#allocation79_spill] sm:$0xff] }
 0x203   :  { %v11469_v36 = vrot.slane %v4260_v15, 7  ;;  %vm16359_vm15 = vcmp.ge.s32.totalorder %v10552_v44, 1  ;;  %v3310_v4 = vrot.slane %v3309_v16, 4  ;;  %v6996_v1 = vcombine.low %v3450_v38, %v3451_v61  ;;  %v16371_v37 = vld [vmem:[#allocation23_spill] sm:$0xff] }
 0x204   :  { %16354 = vst [vmem:[#allocation69_spill] sm:$0xff] %v11448_v24  ;;  %vm11476_vm1 = vmand %vm11402_vm6, %vm16359_vm15  ;;  %v11486_v15 = vsel %vm4123_vm13, 65537, %v15638_v13  ;;  %vm16363_vm12 = vcmp.ge.s32.totalorder %v10552_v44, 4294967295  ;;  %v3527_v16 = vrot.slane %v3525_v28, 3  ;;  %v3530_v38 = vrot.slane %v3528_v49, 4 }
 0x205   :  { %16358 = vst [vmem:[#allocation73_spill] sm:$0xff] %v11469_v36  ;;  %16362 = vst [vmem:[#allocation76_spill] sm:$0xff] %v11486_v15  ;;  %vm16366_vm15 = vcmp.ge.s32.totalorder %v10527_v5, 1  ;;  %v3533_v61 = vshrl.u32 %v6996_v1, 16  ;;  %v3536_v36 = vshll.u32 %v6996_v1, 16  ;;  %v3315_v10 = vsel %vm16257_vm2, %v3310_v4, %v16369_v29 }
 0x206   :  { %vm11492_vm3 = vmand %vm11402_vm6, %vm16363_vm12  ;;  %v3325_v49 = vsel %vm16257_vm2, %v16371_v37, %v16370_v9  ;;  %v11513_v28 = vrot.slane %v2793_v23, 7  ;;  %v11515_v47 = vrot.slane %v3392_v40, 5  ;;  %v11517_v24 = vrot.slane %v3396_v32, 4  ;;  %v11542_v23 = vld [vmem:[#allocation2 + $0x1c] sm:$0xf] }
 0x207   :  { %vm11501_vm7 = vmand %vm11438_vm11, %vm16366_vm15  ;;  %vm16375_vm13 = vcmp.le.s32.totalorder %v10552_v44, 8  ;;  %vm11528_vm10 = vcmp.ne.s16.totalorder %v3315_v10, 0  ;;  %v4251_v37 = vshrl.u32 %v11486_v15, 16  ;;  %16382 = vst [vmem:[#allocation23_spill] sm:$0xff] %v11542_v23  ;;  %v3535_v32 = vrot.slane %v3533_v61, 3 }
 0x208   :  { %16372 = vst [vmem:[#allocation58_spill] sm:$0xff] %v11513_v28  ;;  %16373 = vst [vmem:[#allocation83_spill] sm:$0xff] %v11515_v47  ;;  %v3538_v63 = vrot.slane %v3536_v36, 4  ;;  %vm16383_vm15 = vcmp.le.s32.totalorder %v10527_v5, 8  ;;  %v11553_v4 = vld [vmem:[#allocation2 + $0x18] sm:$0xf]  ;;  %v3339_v50 = vor.u32 %v10453_v35, %v10451_v56  ;;  %v3531_v29 = vor.u32 %v3530_v38, %v3527_v16 }
 0x209   :  { %16374 = vst [vmem:[#allocation79_spill] sm:$0xff] %v11517_v24  ;;  %vm11523_vm12 = vmand %vm11476_vm1, %vm16375_vm13  ;;  %vm3436_vm13 = vcmp.ne.s16.totalorder %v3325_v49, 0  ;;  %v3452_v2 = vsel %vm11528_vm10, %v11553_v4, 0  ;;  %v16387_v36 = vld [vmem:[#allocation80_spill] sm:$0xff]  ;;  %vm1288_vm0 = vsmask.f32 4368 }
 0x20a   :  { %vm11537_vm5 = vmand %vm11492_vm3, %vm15394_vm8  ;;  %16386 = vst [vmem:[#allocation122_spill] sm:$0xff] %v11553_v4  ;;  %v3453_v61 = vsel %vm3436_vm13, %v11542_v23, 0  ;;  %v3329_v49 = vor.u32 %v16387_v36, %v16370_v9  ;;  %v3539_v47 = vor.u32 %v3538_v63, %v3535_v32  ;;  %v16390_v35 = vld [vmem:[#allocation24_spill] sm:$0xff]  ;;  %v3340_v4 = vrot.slane %v3339_v50, 4  ;;  %v11601_v50 = vld [vmem:[#allocation2 + $0x20] sm:$0xf] }
 0x20b   :  { %vm11548_vm6 = vmand %vm11501_vm7, %vm16383_vm15  ;;  %v6997_v28 = vcombine.low %v3452_v2, %v3453_v61  ;;  %v16391_v36 = vshll.u32 %v16390_v35, 16  ;;  %vm16392_vm13 = vsmask.f32 4352  ;;  %v11590_v2 = vrot.slane %v4251_v37, 7  ;;  %16399 = vst [vmem:[#allocation124_spill] sm:$0xff] %v11601_v50  ;;  %v16400_v35 = vld [vmem:[#allocation88_spill] sm:$0xff] }
 0x20c   :  { %vm16388_vm7 = vmpackc.low %vm11425_vm4, %vm11425_vm4  ;;  %v3330_v23 = vrot.slane %v3329_v49, 4  ;;  %v11588_v38 = vsel %vm16392_vm13, %v3531_v29, %v3539_v47  ;;  %vm16396_vm8 = vcmp.ge.s32.totalorder %v9945_v14, 1  ;;  %vm16401_vm13 = vcmp.ge.s32.totalorder %v10527_v5, 4294967295  ;;  %v11621_v37 = vld [vmem:[#allocation2 + $0x24] sm:$0xf] }
 0x20d   :  { %v11569_v24 = vsel %vm16388_vm7, 65537, %v15638_v13  ;;  %v11581_v41 = vor.u32 %v16391_v36, %v10273_v62  ;;  %vm362_vm4 = vmpackc.low %vm11548_vm6, %vm11548_vm6  ;;  %16393 = vst [vmem:[#allocation24_spill] sm:$0xff] %v11588_v38  ;;  %v3542_v32 = vshrl.u32 %v6997_v28, 16  ;;  %v3545_v63 = vshll.u32 %v6997_v28, 16  ;;  %v11733_v6 = vld [vmem:[#allocation2 + $0x2c] sm:$0xf] }
 0x20e   :  { %16389 = vst [vmem:[#allocation80_spill] sm:$0xff] %v11569_v24  ;;  %16394 = vst [vmem:[#allocation123_spill] sm:$0xff] %v11590_v2  ;;  %v2820_v61 = vshrl.u32 %v11569_v24, 16  ;;  %vm16395_vm7 = vcmp.le.s32.totalorder %v9945_v14, 8  ;;  %v3335_v29 = vsel %vm16257_vm2, %v3330_v23, %v10451_v56  ;;  %v3345_v28 = vsel %vm16257_vm2, %v3340_v4, %v16400_v35 }
 0x20f   :  { %vm11597_vm3 = vmand %vm16396_vm8, %vm16395_vm7  ;;  %vm16404_vm8 = vcmp.ge.s32.totalorder %v10552_v44, 1  ;;  %16405 = vst [vmem:[#allocation88_spill] sm:$0xff] %v11621_v37  ;;  %v3544_v56 = vrot.slane %v3542_v32, 3  ;;  %v3547_v23 = vrot.slane %v3545_v63, 4  ;;  %vm3437_vm1 = vcmp.ne.s16.totalorder %v3335_v29, 0 }
 0x210   :  { %vm11613_vm15 = vmand %vm11438_vm11, %vm16401_vm13  ;;  %vm3438_vm10 = vcmp.ne.s16.totalorder %v3345_v28, 0  ;;  %v378_v4 = vsel %vm362_vm4, 65537, %v15638_v13  ;;  %vm16406_vm13 = vcmp.le.s32.totalorder %v10552_v44, 8  ;;  %v3454_v63 = vsel %vm3437_vm1, %v11601_v50, 0  ;;  %v16412_v28 = vld [vmem:[#allocation89_spill] sm:$0xff] }
 0x211   :  { %vm315_vm7 = vmand %vm11597_vm3, %vm16404_vm8  ;;  %vm1287_vm8 = vsmask.f32 256  ;;  %v3455_v29 = vsel %vm3438_vm10, %v11621_v37, 0  ;;  %v3548_v9 = vor.u32 %v3547_v23, %v3544_v56  ;;  %v11643_v15 = vrot.slane %v2820_v61, 7  ;;  %v11731_v50 = vld [vmem:[#allocation2 + $0x28] sm:$0xf] }
 0x212   :  { %vm11631_vm14 = vmand %vm315_vm7, %vm16406_vm13  ;;  %v6998_v16 = vcombine.low %v3454_v63, %v3455_v29  ;;  %vm16411_vm10 = vcmp.ge.s32.totalorder %v10527_v5, 0  ;;  %v3349_v10 = vor.u32 %v16412_v28, %v16400_v35  ;;  %v3359_v61 = vor.u32 %v10753_v46, %v10751_v8  ;;  %v11668_v29 = vld [vmem:[#allocation2 + $0x3c] sm:$0xf]  ;;  %v16419_v28 = vld [vmem:[#allocation38_spill] sm:$0xff] }
 0x213   :  { %vm363_vm6 = vmpackc.low %vm11631_vm14, %vm11631_vm14  ;;  %16409 = vst [vmem:[#allocation125_spill] sm:$0xff] %v11643_v15  ;;  %v523_v56 = vshll.u32 %v378_v4, 16  ;;  %v527_v23 = vshrl.u32 %v378_v4, 16  ;;  %vm16413_vm7 = vcmp.ge.s32.totalorder %v10552_v44, 0  ;;  %vm16414_vm13 = vsmask.f32 4352 }
 0x214   :  { %vm16410_vm1 = vmpackc.low %vm11523_vm12, %vm11523_vm12  ;;  %v11666_v1 = vsel %vm16414_vm13, %v3539_v47, %v3548_v9  ;;  %v3551_v63 = vshrl.u32 %v6998_v16, 16  ;;  %v3554_v46 = vshll.u32 %v6998_v16, 16  ;;  %v3350_v35 = vrot.slane %v3349_v10, 4 }
 0x215   :  { %v11651_v32 = vsel %vm16410_vm1, 65537, %v15638_v13  ;;  %vm622_vm4 = vmand %vm11438_vm11, %vm16411_vm10  ;;  %16415 = vst [vmem:[#allocation89_spill] sm:$0xff] %v11666_v1  ;;  %vm16416_vm11 = vcmp.le.s32.totalorder %v10527_v5, 7  ;;  %v3360_v4 = vrot.slane %v3359_v61, 4  ;;  %v3369_v2 = vor.u32 %v16419_v28, %v10626_v39  ;;  %v11687_v1 = vld [vmem:[#allocation2 + $0x40] sm:$0xf] }
 0x216   :  { %vm623_vm12 = vmand %vm11597_vm3, %vm16413_vm7  ;;  %v379_v16 = vsel %vm363_vm6, 65537, %v15638_v13  ;;  %v3553_v10 = vrot.slane %v3551_v63, 3  ;;  %v3556_v40 = vrot.slane %v3554_v46, 4  ;;  %v3355_v61 = vsel %vm16257_vm2, %v3350_v35, %v10751_v8  ;;  %v16424_v46 = vld [vmem:[#allocation8_spill] sm:$0xff] }
 0x217   :  { %vm11672_vm1 = vmand %vm622_vm4, %vm16416_vm11  ;;  %vm16421_vm4 = vcmp.le.s32.totalorder %v10552_v44, 7  ;;  %v3365_v28 = vsel %vm16257_vm2, %v3360_v4, %v10626_v39  ;;  %v11706_v36 = vrot.slane %v3369_v2, 4  ;;  %v11708_v38 = vrot.slane %v523_v56, 5  ;;  %v11804_v56 = vld [vmem:[#allocation2 + $0xc] sm:$0xf] }
 0x218   :  { %vm16420_vm10 = vmpackc.low %vm11537_vm5, %vm11537_vm5  ;;  %v529_v24 = vrot.slane %v527_v23, 4  ;;  %vm11711_vm5 = vcmp.ne.s16.totalorder %v3355_v61, 0  ;;  %vm16425_vm6 = vnez %v16424_v46  ;;  %v517_v8 = vshrl.u32 %v11053_v11, 16  ;;  %v16429_v61 = vld [vmem:[#allocation94_spill] sm:$0xff] }
 0x219   :  { %v11685_v47 = vsel %vm16420_vm10, 65537, %v15638_v13  ;;  %vm655_vm7 = vmand %vm623_vm12, %vm16421_vm4  ;;  %v11720_v2 = vor.u32 %v3556_v40, %v3553_v10  ;;  %vm11722_vm11 = vcmp.ne.s16.totalorder %v3365_v28, 0  ;;  %v533_v23 = vshll.u32 %v379_v16, 16 }
 0x21a   :  { %vm670_vm13 = vmpackc.low %vm11672_vm1, %vm11672_vm1  ;;  %v537_v35 = vshrl.u32 %v379_v16, 16  ;;  %v16430_v15 = vshll.u32 %v16429_v61, 16  ;;  %vm16431_vm1 = vcmp.le.s32.totalorder %v10527_v5, 6  ;;  %vm16434_vm4 = vsmask.f32 4352 }
 0x21b   :  { %vm671_vm14 = vmpackc.low %vm655_vm7, %vm655_vm7  ;;  %v686_v63 = vsel %vm670_vm13, %v11668_v29, 0  ;;  %16426 = vst [vmem:[#allocation38_spill] sm:$0xff] %v11720_v2  ;;  %v11745_v16 = vsel %vm16434_vm4, %v3548_v9, %v11720_v2  ;;  %v3457_v10 = vsel %vm11722_vm11, %v11733_v6, 0  ;;  %v16436_v40 = vmov 0 }
 0x21c   :  { %vm3805_vm12 = vmpackc.low %vm16425_vm6, %vm16425_vm6  ;;  %v687_v39 = vsel %vm671_vm14, %v11687_v1, 0  ;;  %v11729_v37 = vor.u32 %v16430_v15, %v10556_v51  ;;  %16435 = vst [vmem:[#allocation8_spill] sm:$0xff] %v11745_v16  ;;  %v3456_v15 = vsel %vm11711_vm5, %v11731_v50, 0  ;;  %v16439_v9 = vshll.u32 %v11214_v12, 16  ;;  %v16441_v12 = vld [vmem:[#allocation63_spill] sm:$0xff]  ;;  %v16450_v16 = vld [vmem:[#allocation93_spill] sm:$0xff] }
 0x21d   :  { %v6902_v4 = vcombine.low %v686_v63, %v687_v39  ;;  %vm11739_vm10 = vmand %vm11613_vm15, %vm16431_vm1  ;;  %v11769_v20 = vcombine.low %v3456_v15, %v3457_v10  ;;  %v11777_v39 = vsel %vm3805_vm12, %v11384_v48, 0  ;;  %v530_v61 = vor.u32 %v529_v24, %v11708_v38  ;;  %v16443_v10 = vld [vmem:[#allocation57_spill] sm:$0xff]  ;;  %v11807_v63 = vld [vmem:[#allocation2 + $0x10] sm:$0xf] }
 0x21e   :  { %vm11759_vm15 = vmor %vm1287_vm8, %vm1288_vm0  ;;  %v11766_v28 = vor.u32 %v16439_v9, %v11312_v31  ;;  %16440 = vst [vmem:[#allocation126_spill] sm:$0xff] %v11777_v39  ;;  %v16442_v9 = vrot.slane %v9563_v53, 4  ;;  %vm15405_vm0 = vsmask.f32 7424  ;;  %v11789_v46 = vrot.slane %v533_v23, 5 }
 0x21f   :  { %7407 = vmatmul.mubr.bf16.gmra.mxu0 %v6902_v4  ;;  %v16437_v40 = vsel %vm11759_vm15, 4294967295, %v16436_v40  ;;  %v519_v4 = vrot.slane %v517_v8, 4  ;;  %vm1269_vm8 = vmpackc.low %vm11739_vm10, %vm11739_vm10  ;;  %v16444_v14 = vrot.slane %v16443_v10, 4  ;;  %v16445_v24 = vrot.slane %v16310_v59, 4 }
 0x220   :  { %16438 = vst [vmem:[#allocation94_spill] sm:$0xff] %v16437_v40  ;;  %v1305_v15 = vsel %vm11759_vm15, %v16442_v9, %v16441_v12  ;;  %v539_v12 = vrot.slane %v537_v35, 4  ;;  %v11801_v9 = vld [vmem:[#allocation2 + $0x8] sm:$0xf]  ;;  %v16451_v2 = vrot.slane %v16450_v16, 4  ;;  %v531_v39 = vrot.slane %v530_v61, 4 }
 0x221   :  { %v1314_v8 = vsel %vm11759_vm15, %v16444_v14, %v11331_v7  ;;  %v1323_v53 = vsel %vm11759_vm15, %v16445_v24, %v11337_v57  ;;  %vm1434_vm7 = vcmp.ne.s16.totalorder %v1305_v15, 0  ;;  %v16446_v57 = vshll.u32 %v11222_v18, 16  ;;  %v7908_v40 = vld [vmem:[%s15063_s8 + $0x28] sm:$0xff]  }
 0x222   :  { %vm1435_vm13 = vcmp.ne.s16.totalorder %v1314_v8, 0  ;;  %vm1436_vm14 = vcmp.ne.s16.totalorder %v1323_v53, 0  ;;  %v1451_v23 = vsel %vm1434_vm7, %v11801_v9, 0  ;;  %v11822_v14 = vsel %vm1269_vm8, 65537, %v15638_v13  ;;  %v16447_v8 = vld [vmem:[#allocation95_spill] sm:$0xff] }
 0x223   :  { %v1452_v10 = vsel %vm1435_vm13, %v11804_v56, 0  ;;  %v1453_v7 = vsel %vm1436_vm14, %v11807_v63, 0  ;;  %v6928_v59 = vcombine.low %v11326_v3, %v1451_v23  ;;  %v11814_v35 = vor.u32 %v16446_v57, %v11314_v22  ;;  %v16449_v57 = vld [vmem:[#allocation31_spill] sm:$0xff] }
 0x224   :  { %v6929_v15 = vcombine.low %v1452_v10, %v1453_v7  ;;  %v16448_v24 = vrot.slane %v16313_v52, 4  ;;  %v520_v18 = vor.u32 %v519_v4, %v11132_v60  ;;  %v1341_v11 = vsel %vm11759_vm15, %v16451_v2, %v16449_v57  ;;  %v11850_v4 = vld [vmem:[#allocation2 + $0x14] sm:$0xf] }
 0x225   :  { %v1530_v23 = vshll.u32 %v6928_v59, 16  ;;  %v540_v10 = vor.u32 %v539_v12, %v11789_v46  ;;  %v16452_v52 = vshll.u32 %v11118_v45, 16  ;;  %vm16453_vm6 = vcmp.ge.s32.totalorder %v10026_v26, 4294967295 }
 0x226   :  { %v1332_v3 = vsel %vm11759_vm15, %v16448_v24, %v16447_v8  ;;  %v1535_v7 = vshll.u32 %v6929_v15, 16  ;;  %vm11846_vm12 = vmand %vm10939_vm9, %vm16453_vm6  ;;  %v1528_v16 = vshrl.u32 %v6928_v59, 16  ;;  %vm1438_vm11 = vcmp.ne.s16.totalorder %v1341_v11, 0  ;;  %v11854_v24 = vld [vmem:[#allocation2 + $0x18] sm:$0xf] }
 0x227   :  { %vm1437_vm5 = vcmp.ne.s16.totalorder %v1332_v3, 0  ;;  %v11840_v8 = vor.u32 %v16452_v52, %v11232_v27  ;;  %v1532_v2 = vrot.slane %v1530_v23, 1  ;;  %v1416_v12 = vshrl.u32 %v11822_v14, 16  ;;  %v7973_v11 = vld [vmem:[%s15059_s5 + $0x138] sm:$0xff]  }
 0x228   :  { %v1454_v61 = vsel %vm1437_vm5, %v11850_v4, 0  ;;  %v1537_v45 = vrot.slane %v1535_v7, 1  ;;  %v1455_v3 = vsel %vm1438_vm11, %v11854_v24, 0  ;;  %v521_v57 = vrot.slane %v520_v18, 4 }
 0x229   :  { %v1533_v52 = vor.u32 %v1532_v2, %v1528_v16  ;;  %v6930_v53 = vcombine.low %v1454_v61, %v1455_v3  ;;  %v16456_v59 = vrot.slane %v10421_v54, 4  ;;  %vm16457_vm9 = vcmp.le.s32.totalorder %v10026_v26, 6  ;;  %v11883_v2 = vld [vmem:[#allocation2 + $0x1c] sm:$0xf] }
 0x22a   :  { %vm11867_vm1 = vmand %vm11846_vm12, %vm16457_vm9  ;;  %v536_v19 = vsel %vm16257_vm2, %v531_v39, %v11789_v46  ;;  %v541_v18 = vrot.slane %v540_v10, 4  ;;  %v1539_v7 = vshrl.u32 %v6929_v15, 16  ;;  %v16460_v54 = vrot.slane %v10273_v62, 4 }
 0x22b   :  { %v1350_v23 = vsel %vm11759_vm15, %v16456_v59, %v11581_v41  ;;  %vm16461_vm10 = vnez %v16277_v33  ;;  %v1538_v60 = vsel %vm15405_vm0, %v1533_v52, %v1537_v45  ;;  %v1543_v16 = vshll.u32 %v6930_v53, 16  ;;  %vm1268_vm13 = vmpackc.low %vm11867_vm1, %vm11867_vm1  ;;  %v11897_v52 = vld [vmem:[#allocation2 + $0x20] sm:$0xf]  ;;  %v7856_v33 = vld [vmem:[%s15059_s5 + $0x130] sm:$0xff]  }
 0x22c   :  { %v1359_v41 = vsel %vm11759_vm15, %v16460_v54, %v11729_v37  ;;  %vm1267_vm4 = vmpackc.low %vm16461_vm10, %vm16461_vm10  ;;  %vm1439_vm8 = vcmp.ne.s16.totalorder %v1350_v23, 0  ;;  %7458 = vmatprep.mubr.bf16.mxu0 %v1538_v60  ;;  %v1387_v46 = vrot.slane %v11232_v27, 4  ;;  %v16462_v62 = vshll.u32 %v11258_v43, 16  ;;  %v7860_v54 = vld [vmem:[%s15059_s5 + $0x120] sm:$0xff]  }
 0x22d   :  { %vm1440_vm7 = vcmp.ne.s16.totalorder %v1359_v41, 0  ;;  %v1456_v39 = vsel %vm1439_vm8, %v11883_v2, 0  ;;  %v1396_v15 = vrot.slane %v11352_v0, 4  ;;  %v526_v10 = vsel %vm16257_vm2, %v521_v57, %v11708_v38 }
 0x22e   :  { %v1394_v37 = vor.u32 %v16462_v62, %v11352_v0  ;;  %v1541_v61 = vor.u32 %v1539_v7, %v1537_v45  ;;  %v1545_v3 = vrot.slane %v1543_v16, 1  ;;  %v1457_v27 = vsel %vm1440_vm7, %v11897_v52, 0  ;;  %v7858_v62 = vld [vmem:[%s15059_s5 + $0x128] sm:$0xff]   ;;  %v16477_v45 = vld [vmem:[#allocation36_spill] sm:$0xff] }
 0x22f   :  { %v11906_v43 = vsel %vm1267_vm4, 65537, %v15638_v13  ;;  %vm11908_vm14 = vcmp.ne.s16.totalorder %v536_v19, 0  ;;  %vm16465_vm5 = vcmp.ge.s32.totalorder %v10552_v44, 4294967295  ;;  %v6931_v57 = vcombine.low %v1456_v39, %v1457_v27 }
 0x230   :  { %vm11916_vm6 = vmand %vm11597_vm3, %vm16465_vm5  ;;  %v16468_v59 = vrot.slane %v10556_v51, 4  ;;  %v11928_v19 = vrot.slane %v1416_v12, 7  ;;  %vm558_vm12 = vcmp.ne.s16.totalorder %v541_v18, 0  ;;  %v1546_v49 = vsel %vm15405_vm0, %v1541_v61, %v1545_v3 }
 0x231   :  { %v11931_v7 = vrot.slane %v2032_v21, 4  ;;  %vm11933_vm3 = vcmp.ne.s16.totalorder %v526_v10, 0  ;;  %v11943_v51 = vsel %vm1268_vm13, 65537, %v15638_v13  ;;  %7459 = vmatmul.mubr.bf16.vlgmr.msra.gmra.mxu0 %v1546_v49  ;;  %v1551_v12 = vshll.u32 %v6931_v57, 16 }
 0x232   :  { %v1368_v23 = vsel %vm11759_vm15, %v16468_v59, %v11766_v28  ;;  %v1547_v28 = vshrl.u32 %v6930_v53, 16  ;;  %v1398_v18 = vshrl.u32 %v11906_v43, 16  ;;  %v574_v21 = vsel %vm11908_vm14, %v11668_v29, 0  ;;  %7507 = vmatpush3.bf16.msra.mxu0 %v7973_v11 }
 0x233   :  { %vm16471_vm11 = vcmp.le.s32.totalorder %v10552_v44, 6  ;;  %v16474_v53 = vrot.slane %v11312_v31, 4  ;;  %vm1441_vm1 = vcmp.ne.s16.totalorder %v1368_v23, 0  ;;  %v575_v29 = vsel %vm558_vm12, %v11687_v1, 0  ;;  %7508 = vmatprep.subr.bf16.mxu0 %v7856_v33 }
 0x234   :  { %vm11953_vm9 = vmand %vm11916_vm6, %vm16471_vm11  ;;  %v1549_v16 = vor.u32 %v1547_v28, %v1545_v3  ;;  %v1553_v39 = vrot.slane %v1551_v12, 1  ;;  %v573_v10 = vsel %vm11933_vm3, %v11059_v34, 0  ;;  %v1407_v31 = vshrl.u32 %v11943_v51, 16 }
 0x235   :  { %v1377_v60 = vsel %vm11759_vm15, %v16474_v53, %v11814_v35  ;;  %v1458_v61 = vsel %vm1441_vm1, %v10824_v25, 0  ;;  %v6918_v27 = vcombine.low %v573_v10, %v574_v21  ;;  %vm1270_vm4 = vmpackc.low %vm11953_vm9, %vm11953_vm9  ;;  %v16475_v38 = vrot.slane %v11314_v22, 4 }
 0x236   :  { %vm1442_vm10 = vcmp.ne.s16.totalorder %v1377_v60, 0  ;;  %v1554_v1 = vsel %vm15405_vm0, %v1549_v16, %v1553_v39  ;;  %vm16476_vm8 = vcmp.ge.s32.totalorder %v10527_v5, 4294967295  ;;  %vm16478_vm7 = vnez %v16477_v45  ;;  %7509 = vmatpush3.bf16.msra.mxu0 %v7856_v33  ;;  %v12053_v33 = vld [vmem:[#allocation2 + $0x34] sm:$0xf] }
 0x237   :  { %v1459_v35 = vsel %vm1442_vm10, %v10850_v30, 0  ;;  %v1386_v34 = vsel %vm11759_vm15, %v16475_v38, %v11840_v8  ;;  %vm11988_vm13 = vmand %vm16478_vm7, %vm16476_vm8  ;;  %v1400_v30 = vrot.slane %v1398_v18, 7  ;;  %v1401_v59 = vshll.u32 %v11906_v43, 16  ;;  %7462 = vmatprep.mubr.bf16.mxu0 %v1554_v1  ;;  %7510 = vmatprep.subr.bf16.mxu0 %v7858_v62  ;;  %v16485_v38 = vld [vmem:[#allocation43_spill] sm:$0xff] }
 0x238   :  { %v6932_v3 = vcombine.low %v1458_v61, %v1459_v35  ;;  %v6919_v23 = vcombine.low %v575_v29, %v575_v29  ;;  %v1395_v22 = vsel %vm11759_vm15, %v1387_v46, %v1394_v37  ;;  %v1555_v49 = vshrl.u32 %v6931_v57, 16  ;;  %v16481_v37 = vld [vmem:[#allocation107_spill] sm:$0xff] }
 0x239   :  { %vm1443_vm14 = vcmp.ne.s16.totalorder %v1386_v34, 0  ;;  %vm1444_vm5 = vcmp.ne.s16.totalorder %v1395_v22, 0  ;;  %v11998_v28 = vrot.slane %v1407_v31, 7  ;;  %v12006_v43 = vsel %vm1270_vm4, 65537, %v15638_v13 }
 0x23a   :  { %v1559_v8 = vshll.u32 %v6932_v3, 16  ;;  %v1460_v46 = vsel %vm1443_vm14, %v10889_v55, 0  ;;  %v1461_v57 = vsel %vm1444_vm5, %v16481_v37, 0  ;;  %vm16482_vm6 = vcmp.le.s32.totalorder %v10527_v5, 6  ;;  %7511 = vmatpush3.bf16.msra.mxu0 %v7858_v62 }
 0x23b   :  { %vm12014_vm12 = vmand %vm11988_vm13, %vm16482_vm6  ;;  %v1557_v12 = vor.u32 %v1555_v49, %v1553_v39  ;;  %v12018_v21 = vcombine.low %v1460_v46, %v1461_v57  ;;  %v1004_v41 = vshrl.u32 %v6918_v27, 16  ;;  %v1410_v11 = vshll.u32 %v11943_v51, 16  ;;  %7512 = vmatprep.subr.bf16.mxu0 %v7860_v54  ;;  %v7862_v39 = vld [vmem:[%s15059_s5 + $0x118] sm:$0xff]  }
 0x23c   :  { %v1561_v18 = vrot.slane %v1559_v8, 1  ;;  %v1007_v53 = vshll.u32 %v6918_v27, 16  ;;  %v1013_v55 = vshrl.u32 %v6919_v23, 16  ;;  %v1403_v60 = vor.u32 %v1401_v59, %v1400_v30  ;;  %vm2667_vm3 = vmpackc.low %vm12014_vm12, %vm12014_vm12 }
 0x23d   :  { %v1563_v16 = vshrl.u32 %v6932_v3, 16  ;;  %v1567_v10 = vshll.u32 %v12018_v21, 16  ;;  %v1006_v31 = vrot.slane %v1004_v41, 3  ;;  %v1425_v51 = vshrl.u32 %v12006_v43, 16 }
 0x23e   :  { %v1562_v29 = vsel %vm15405_vm0, %v1557_v12, %v1561_v18  ;;  %v1009_v62 = vrot.slane %v1007_v53, 4  ;;  %v1405_v61 = vrot.slane %v1400_v30, 4  ;;  %v1412_v35 = vor.u32 %v1410_v11, %v11998_v28  ;;  %7513 = vmatpush3.bf16.msra.mxu0 %v7860_v54 }
 0x23f   :  { %7463 = vmatmul.mubr.bf16.gmra.mxu0 %v1562_v29  ;;  %v1419_v27 = vshll.u32 %v11822_v14, 16  ;;  %v1565_v1 = vor.u32 %v1563_v16, %v1561_v18  ;;  %v1569_v3 = vrot.slane %v1567_v10, 1  ;;  %v2035_v34 = vor.u32 %v11931_v7, %v16485_v38  ;;  %7514 = vmatprep.subr.bf16.mxu0 %v7862_v39  ;;  %v7864_v7 = vld [vmem:[%s15059_s5 + $0x110] sm:$0xff]   ;;  %v16487_v18 = vld [vmem:[#allocation49_spill] sm:$0xff]  ;;  %v7866_v29 = vld [vmem:[%s15059_s5 + $0x108] sm:$0xff]  }
 0x240   :  { %v1010_v45 = vor.u32 %v1009_v62, %v1006_v31  ;;  %v1015_v25 = vrot.slane %v1013_v55, 3  ;;  %v1016_v59 = vshll.u32 %v6919_v23, 16  ;;  %v1404_v22 = vsel %vm11759_vm15, %v1396_v15, %v1403_v60  ;;  %v16490_v60 = vld [vmem:[#allocation104_spill] sm:$0xff] }
 0x241   :  { %v12039_v30 = vsel %vm2667_vm3, 65537, %v15638_v13  ;;  %v1570_v49 = vsel %vm15405_vm0, %v1565_v1, %v1569_v3  ;;  %v1421_v14 = vor.u32 %v1419_v27, %v11928_v19  ;;  %v1423_v8 = vrot.slane %v11928_v19, 4  ;;  %v16493_v1 = vld [vmem:[#allocation97_spill] sm:$0xff] }
 0x242   :  { %v1427_v23 = vrot.slane %v1425_v51, 7  ;;  %7466 = vmatprep.mubr.bf16.mxu0 %v1570_v49  ;;  %vm16486_vm11 = vsmask.f32 4352  ;;  %v1018_v15 = vrot.slane %v1016_v59, 4  ;;  %v1413_v54 = vsel %vm11759_vm15, %v1405_v61, %v1412_v35  ;;  %7515 = vmatpush3.bf16.msra.mxu0 %v7862_v39  ;;  %v12078_v35 = vld [vmem:[#allocation2 + $0x44] sm:$0xf] }
 0x243   :  { %v1011_v0 = vsel %vm16486_vm11, %v11310_v17, %v1010_v45  ;;  %vm1445_vm9 = vcmp.ne.s16.totalorder %v1404_v22, 0  ;;  %vm1446_vm1 = vcmp.ne.s16.totalorder %v1413_v54, 0  ;;  %v1414_v46 = vrot.slane %v11998_v28, 4  ;;  %7516 = vmatprep.subr.bf16.mxu0 %v7864_v7  ;;  %vm16492_vm8 = vmmov %vm16486_vm11  ;;  %v12086_v59 = vld [vmem:[#allocation2 + $0x3c] sm:$0xf] }
 0x244   :  { %7438 = vmatprep.mubr.bf16.mxu1 %v1011_v0  ;;  %v2036_v37 = vrot.slane %v2035_v34, 4  ;;  %v1428_v19 = vshll.u32 %v12006_v43, 16  ;;  %v1019_v57 = vor.u32 %v1018_v15, %v1015_v25  ;;  %v1462_v12 = vsel %vm1445_vm9, %v12053_v33, 0  ;;  %v12091_v49 = vld [vmem:[#allocation2 + $0x40] sm:$0xf] }
 0x245   :  { %v1463_v41 = vsel %vm1446_vm1, %v16487_v18, 0  ;;  %v16488_v17 = vshll.u32 %v11651_v32, 16  ;;  %v16489_v53 = vshrl.u32 %v11685_v47, 16  ;;  %vm16491_vm10 = vnez %v16490_v60  ;;  %v1190_v0 = vld [vmem:[#allocation2 + $0x44] sm:$0x1]  ;;  %v16498_v18 = vld [vmem:[#allocation53_spill] sm:$0xff] }
 0x246   :  { %vm3254_vm4 = vmpackc.low %vm16491_vm10, %vm16491_vm10  ;;  %v6934_v43 = vcombine.low %v1462_v12, %v1463_v41  ;;  %v2811_v16 = vshrl.u32 %v12039_v30, 16  ;;  %v1020_v10 = vsel %vm16492_vm8, %v1010_v45, %v1019_v57  ;;  %v1422_v31 = vsel %vm11759_vm15, %v1414_v46, %v1421_v14  ;;  %7517 = vmatpush3.bf16.msra.mxu0 %v7864_v7  ;;  %v16494_v7 = vld [vmem:[#allocation55_spill] sm:$0xff]  ;;  %v16497_v12 = vld [vmem:[#allocation62_spill] sm:$0xff] }
 0x247   :  { %v12059_v11 = vrot.slane %v16488_v17, 5  ;;  %v12063_v55 = vrot.slane %v16489_v53, 7  ;;  %v1430_v39 = vor.u32 %v1428_v19, %v1427_v23  ;;  %7439 = vmatmul.mubr.bf16.gmra.mxu1 %v1020_v10  ;;  %v1571_v62 = vshrl.u32 %v12018_v21, 16  ;;  %7518 = vmatprep.subr.bf16.mxu0 %v7866_v29  ;;  %v16500_v53 = vld [vmem:[#allocation69_spill] sm:$0xff]  ;;  %v16502_v10 = vld [vmem:[#allocation51_spill] sm:$0xff] }
 0x248   :  { %v1575_v61 = vshll.u32 %v6934_v43, 16  ;;  %vm2053_vm7 = vcmp.ne.s16.totalorder %v2036_v37, 0  ;;  %v12081_v27 = vsel %vm3254_vm4, 65537, %v15638_v13  ;;  %7490 = vmatprep.mubr.bf16.mxu1 %v16493_v1  ;;  %vm1447_vm13 = vcmp.ne.s16.totalorder %v1422_v31, 0  ;;  %v16503_v31 = vld [vmem:[#allocation44_spill] sm:$0xff] }
 0x249   :  { %v1431_v38 = vsel %vm11759_vm15, %v1423_v8, %v1430_v39  ;;  %v1432_v34 = vrot.slane %v1427_v23, 4  ;;  %v1573_v45 = vor.u32 %v1571_v62, %v1569_v3  ;;  %v1464_v21 = vsel %vm1447_vm13, %v12086_v59, 0  ;;  %v7868_v8 = vld [vmem:[%s15059_s5 + $0x100] sm:$0xff]   ;;  %v16495_v23 = vld [vmem:[#allocation64_spill] sm:$0xff] }
 0x24a   :  { %v1577_v25 = vrot.slane %v1575_v61, 1  ;;  %vm1448_vm14 = vcmp.ne.s16.totalorder %v1431_v38, 0  ;;  %v12089_v22 = vrot.slane %v2811_v16, 7  ;;  %v2070_v3 = vsel %vm2053_vm7, %v12078_v35, 0  ;;  %7519 = vmatpush3.bf16.msra.mxu0 %v7866_v29 }
 0x24b   :  { %v1465_v14 = vsel %vm1448_vm14, %v12091_v49, 0  ;;  %v16496_v15 = vshll.u32 %v16495_v23, 16  ;;  %v16499_v41 = vshll.u32 %v16498_v18, 16  ;;  %vm1449_vm5 = vcmp.ne.s16.totalorder %v1432_v34, 0  ;;  %v7867_v34 = vld [vmem:[%s15059_s5 + $0x170] sm:$0xff]   ;;  %7520 = vmatprep.subr.bf16.mxu0 %v7868_v8 }
 0x24c   :  { %v1578_v19 = vsel %vm15405_vm0, %v1573_v45, %v1577_v25  ;;  %v6935_v57 = vcombine.low %v1464_v21, %v1465_v14  ;;  %v16501_v60 = vrot.slane %v16494_v7, 4  ;;  %v2710_v16 = vrot.slane %v16497_v12, 4  ;;  %v16505_v23 = vld [vmem:[#allocation40_spill] sm:$0xff] }
 0x24d   :  { %v2691_v54 = vor.u32 %v16496_v15, %v16494_v7  ;;  %v2708_v17 = vor.u32 %v16499_v41, %v16497_v12  ;;  %7467 = vmatmul.mubr.bf16.gmra.mxu0 %v1578_v19  ;;  %v16504_v39 = vshll.u32 %v16503_v31, 16  ;;  %v1579_v61 = vshrl.u32 %v6934_v43, 16  ;;  %v12127_v43 = vld [vmem:[%s15059_s5 + $0x1b8] sm:$0xff]  }
 0x24e   :  { %v2700_v37 = vsel %vm11759_vm15, %v16501_v60, %v16500_v53  ;;  %v1583_v1 = vshll.u32 %v6935_v57, 16  ;;  %v1466_v38 = vsel %vm1449_vm5, %v1190_v0, 0  ;;  %v12119_v45 = vcombine.low %v2070_v3, %v2070_v3  ;;  %v2604_v3 = vld [vmem:[#allocation2 + $0x8] sm:$0xf]  ;;  %v16506_v19 = vld [vmem:[#allocation65_spill] sm:$0xff]  ;;  %7521 = vmatpush3.bf16.msra.mxu0 %v7868_v8 }
 0x24f   :  { %v2717_v62 = vor.u32 %v16504_v39, %v16502_v10  ;;  %v6936_v14 = vcombine.low %v1466_v38, %v1466_v38  ;;  %v6962_v7 = vcombine.low %v11801_v9, %v11804_v56  ;;  %vm2828_vm6 = vcmp.ne.s16.totalorder %v2691_v54, 0  ;;  %7491 = vmatmul.mubr.bf16.vlgmr.msra.gmra.mxu1 %v16505_v23  ;;  %v16508_v41 = vld [vmem:[#allocation105_spill] sm:$0xff]  ;;  %v12140_v60 = vld [vmem:[#allocation2 + $0x24] sm:$0xf]  ;;  %7570 = vmatprep.subr.bf16.mxu0 %v12127_v43  ;;  %v12155_v8 = vld [vmem:[#allocation2 + $0x2c] sm:$0xf] }
 0x250   :  { %v1581_v29 = vor.u32 %v1579_v61, %v1577_v25  ;;  %v1585_v0 = vrot.slane %v1583_v1, 1  ;;  %v1587_v15 = vshrl.u32 %v6935_v57, 16  ;;  %v16507_v12 = vrot.slane %v16506_v19, 4  ;;  %7494 = vmatprep.mubr.bf16.mxu1 %v16508_v41  ;;  %v16509_v56 = vld [vmem:[#allocation117_spill] sm:$0xff]  ;;  %v16511_v19 = vld [vmem:[#allocation71_spill] sm:$0xff] }
 0x251   :  { %7539 = vmatpush3.bf16.msra.mxu1 %v16509_v56  ;;  %v1591_v9 = vshll.u32 %v6936_v14, 16  ;;  %v6963_v53 = vcombine.low %v11807_v63, %v11850_v4  ;;  %v2202_v61 = vshrl.u32 %v12119_v45, 16  ;;  %v2718_v1 = vsel %vm11759_vm15, %v2710_v16, %v2717_v62 }
 0x252   :  { %v2709_v18 = vsel %vm11759_vm15, %v16507_v12, %v2708_v17  ;;  %v1586_v31 = vsel %vm15405_vm0, %v1581_v29, %v1585_v0  ;;  %v1589_v39 = vor.u32 %v1587_v15, %v1585_v0  ;;  %7540 = vmatprep.subr.bf16.mxu1 %v7867_v34  ;;  %v7869_v17 = vld [vmem:[%s15059_s5 + $0x168] sm:$0xff]   ;;  %vm2829_vm12 = vcmp.ne.s16.totalorder %v2700_v37, 0  ;;  %v16510_v15 = vld [vmem:[#allocation60_spill] sm:$0xff] }
 0x253   :  { %7470 = vmatprep.mubr.bf16.mxu0 %v1586_v31  ;;  %v1593_v38 = vrot.slane %v1591_v9, 1  ;;  %vm2830_vm3 = vcmp.ne.s16.totalorder %v2709_v18, 0  ;;  %v2845_v14 = vsel %vm2828_vm6, %v2604_v3, 0  ;;  %v12153_v29 = vld [vmem:[#allocation2 + $0x28] sm:$0xf]  ;;  %vm2831_vm11 = vcmp.ne.s16.totalorder %v2718_v1, 0 }
 0x254   :  { %v2846_v23 = vsel %vm2829_vm12, %v11384_v48, 0  ;;  %v2847_v16 = vsel %vm2830_vm3, %v16510_v15, 0  ;;  %v2205_v37 = vshll.u32 %v12119_v45, 16  ;;  %v2848_v54 = vsel %vm2831_vm11, %v16511_v19, 0  ;;  %v12164_v3 = vld [vmem:[#allocation2 + $0x30] sm:$0xf] }
 0x255   :  { %v1594_v62 = vsel %vm15405_vm0, %v1589_v39, %v1593_v38  ;;  %7541 = vmatpush3.bf16.msra.mxu1 %v7867_v34  ;;  %v7873_v48 = vld [vmem:[%s15059_s5 + $0x160] sm:$0xff]   ;;  %v12171_v18 = vrot.slane %v2202_v61, 3  ;;  %v6978_v41 = vcombine.low %v2845_v14, %v2846_v23  ;;  %v6979_v56 = vcombine.low %v2847_v16, %v2848_v54  ;;  %v16512_v34 = vld [vmem:[#allocation91_spill] sm:$0xff]  ;;  %v16518_v61 = vld [vmem:[#allocation32_spill] sm:$0xff] }
 0x256   :  { %7471 = vmatmul.mubr.bf16.gmra.mxu0 %v1594_v62  ;;  %7542 = vmatprep.subr.bf16.mxu1 %v7869_v17  ;;  %v16513_v45 = vrot.slane %v16502_v10, 4  ;;  %v16514_v31 = vld [vmem:[#allocation78_spill] sm:$0xff]  ;;  %v16517_v15 = vld [vmem:[#allocation77_spill] sm:$0xff]  ;;  %v16521_v16 = vld [vmem:[#allocation108_spill] sm:$0xff]  ;;  %v16538_v63 = vcombine.low %v11854_v24, %v11883_v2  ;;  %vm16552_vm13 = vsmask.f32 4352 }
 0x257   :  { %7522 = vmatprep.mubr.bf16.mxu0 %v6962_v7  ;;  %v16515_v39 = vld [vmem:[#allocation82_spill] sm:$0xff]  ;;  %v2737_v62 = vrot.slane %v16517_v15, 4  ;;  %7495 = vmatmul.mubr.bf16.gmra.mxu1 %v16521_v16  ;;  %v2924_v10 = vshll.u32 %v6978_v41, 16  ;;  %v2929_v54 = vshll.u32 %v6979_v56, 16  ;;  %v16525_v12 = vld [vmem:[#allocation52_spill] sm:$0xff]  ;;  %v2933_v25 = vshrl.u32 %v6979_v56, 16 }
 0x258   :  { %v2727_v9 = vsel %vm11759_vm15, %v16513_v45, %v16512_v34  ;;  %v16516_v1 = vrot.slane %v16515_v39, 4  ;;  %v16519_v19 = vld [vmem:[#allocation26_spill] sm:$0xff]  ;;  %v2746_v34 = vrot.slane %v16518_v61, 4  ;;  %7498 = vmatprep.mubr.bf16.mxu1 %v16525_v12  ;;  %v16530_v16 = vld [vmem:[#allocation96_spill] sm:$0xff] }
 0x259   :  { %vm2832_vm9 = vcmp.ne.s16.totalorder %v2727_v9, 0  ;;  %v16520_v14 = vshll.u32 %v16519_v19, 16  ;;  %v16522_v7 = vld [vmem:[#allocation22_spill] sm:$0xff]  ;;  %7543 = vmatpush3.bf16.msra.mxu1 %v7869_v17  ;;  %v16531_v51 = vshll.u32 %v16530_v16, 16  ;;  %v7879_v56 = vld [vmem:[%s15059_s5 + $0x150] sm:$0xff]  }
 0x25a   :  { %v2736_v38 = vsel %vm11759_vm15, %v16516_v1, %v16514_v31  ;;  %v16523_v45 = vld [vmem:[#allocation86_spill] sm:$0xff]  ;;  %v2922_v31 = vshrl.u32 %v6978_v41, 16  ;;  %v16526_v1 = vld [vmem:[#allocation100_spill] sm:$0xff]  ;;  %7544 = vmatprep.subr.bf16.mxu1 %v7873_v48  ;;  %v2207_v41 = vrot.slane %v2205_v37, 4  ;;  %v2755_v16 = vrot.slane %v16522_v7, 4 }
 0x25b   :  { %v2744_v23 = vor.u32 %v16520_v14, %v16518_v61  ;;  %v16524_v28 = vshll.u32 %v16523_v45, 16  ;;  %v16527_v15 = vld [vmem:[#allocation46_spill] sm:$0xff]  ;;  %v2764_v19 = vrot.slane %v16526_v1, 4  ;;  %v16529_v14 = vld [vmem:[#allocation35_spill] sm:$0xff]  ;;  %v7875_v61 = vld [vmem:[%s15059_s5 + $0x158] sm:$0xff]   ;;  %v2931_v45 = vrot.slane %v2929_v54, 1 }
 0x25c   :  { %v16528_v21 = vshll.u32 %v16527_v15, 16  ;;  %v2771_v57 = vor.u32 %v16531_v51, %v16529_v14  ;;  %vm2833_vm1 = vcmp.ne.s16.totalorder %v2736_v38, 0  ;;  %v16532_v17 = vld [vmem:[#allocation122_spill] sm:$0xff]  ;;  %v16533_v15 = vld [vmem:[#allocation23_spill] sm:$0xff]  ;;  %v16544_v24 = vld [vmem:[#allocation116_spill] sm:$0xff]  ;;  %v2208_v2 = vor.u32 %v2207_v41, %v12171_v18 }
 0x25d   :  { %v2753_v39 = vor.u32 %v16524_v28, %v16522_v7  ;;  %v2926_v28 = vrot.slane %v2924_v10, 1  ;;  %v2849_v12 = vsel %vm2832_vm9, %v16532_v17, 0  ;;  %v7874_v51 = vld [vmem:[%s15059_s5 + $0x1b0] sm:$0xff]   ;;  %7545 = vmatpush3.bf16.msra.mxu1 %v7873_v48  ;;  %v2935_v4 = vor.u32 %v2933_v25, %v2931_v45 }
 0x25e   :  { %v2762_v0 = vor.u32 %v16528_v21, %v16526_v1  ;;  %v2850_v21 = vsel %vm2833_vm1, %v16533_v15, 0  ;;  %v2745_v1 = vsel %vm11759_vm15, %v2737_v62, %v2744_v23  ;;  %v2772_v9 = vsel %vm11759_vm15, %v2764_v19, %v2771_v57  ;;  %7523 = vmatmul.mubr.bf16.vlgmr.msra.gmra.mxu0 %v6963_v53  ;;  %7546 = vmatprep.subr.bf16.mxu1 %v7875_v61  ;;  %v16534_v23 = vld [vmem:[#allocation124_spill] sm:$0xff]  ;;  %v16541_v19 = vld [vmem:[#allocation102_spill] sm:$0xff]  ;;  %v16548_v41 = vld [vmem:[#allocation47_spill] sm:$0xff] }
 0x25f   :  { %v2927_v46 = vor.u32 %v2926_v28, %v2922_v31  ;;  %v6980_v10 = vcombine.low %v2849_v12, %v2850_v21  ;;  %v2754_v38 = vsel %vm11759_vm15, %v2746_v34, %v2753_v39  ;;  %vm2834_vm10 = vcmp.ne.s16.totalorder %v2745_v1, 0  ;;  %v16535_v34 = vld [vmem:[#allocation118_spill] sm:$0xff]  ;;  %7571 = vmatpush3.bf16.msra.mxu0 %v12127_v43  ;;  %7526 = vmatprep.mubr.bf16.mxu0 %v16538_v63  ;;  %v16539_v53 = vld [vmem:[#allocation88_spill] sm:$0xff]  ;;  %v16543_v12 = vld [vmem:[#allocation113_spill] sm:$0xff] }
 0x260   :  { %vm2835_vm4 = vcmp.ne.s16.totalorder %v2754_v38, 0  ;;  %v2763_v37 = vsel %vm11759_vm15, %v2755_v16, %v2762_v0  ;;  %v2851_v54 = vsel %vm2834_vm10, %v16534_v23, 0  ;;  %v16536_v0 = vld [vmem:[#allocation112_spill] sm:$0xff]  ;;  %v2782_v31 = vrot.slane %v16535_v34, 4  ;;  %7572 = vmatprep.subr.bf16.mxu0 %v7874_v51  ;;  %7499 = vmatmul.mubr.bf16.gmra.mxu1 %v16543_v12  ;;  %v7877_v43 = vld [vmem:[%s15059_s5 + $0x1a8] sm:$0xff]  }
 0x261   :  { %v12225_v62 = vsel %vm15405_vm0, %v2927_v46, %v2931_v45  ;;  %v2937_v48 = vshll.u32 %v6980_v10, 16  ;;  %v16537_v7 = vshll.u32 %v16536_v0, 16  ;;  %v2852_v57 = vsel %vm2835_vm4, %v16539_v53, 0  ;;  %v16540_v46 = vld [vmem:[#allocation56_spill] sm:$0xff]  ;;  %7502 = vmatprep.mubr.bf16.mxu1 %v16544_v24  ;;  %7547 = vmatpush3.bf16.msra.mxu1 %v7875_v61  ;;  %v7881_v16 = vld [vmem:[%s15059_s5 + $0x148] sm:$0xff]  }
 0x262   :  { %v16542_v28 = vshll.u32 %v16541_v19, 16  ;;  %v6981_v21 = vcombine.low %v2851_v54, %v2852_v57  ;;  %vm2836_vm8 = vcmp.ne.s16.totalorder %v2763_v37, 0  ;;  %vm2837_vm7 = vcmp.ne.s16.totalorder %v2772_v9, 0  ;;  %7548 = vmatprep.subr.bf16.mxu1 %v7879_v56  ;;  %v16546_v61 = vld [vmem:[#allocation70_spill] sm:$0xff]  ;;  %v16549_v54 = vld [vmem:[#allocation121_spill] sm:$0xff] }
 0x263   :  { %v2780_v39 = vor.u32 %v16537_v7, %v16535_v34  ;;  %v2939_v15 = vrot.slane %v2937_v48, 1  ;;  %v2853_v25 = vsel %vm2836_vm8, %v11731_v50, 0  ;;  %v2854_v45 = vsel %vm2837_vm7, %v11733_v6, 0  ;;  %v16545_v48 = vld [vmem:[#allocation58_spill] sm:$0xff]  ;;  %7573 = vmatpush3.bf16.msra.mxu0 %v7874_v51 }
 0x264   :  { %v2789_v17 = vor.u32 %v16542_v28, %v16540_v46  ;;  %v2773_v1 = vrot.slane %v16529_v14, 4  ;;  %v2941_v37 = vshrl.u32 %v6980_v10, 16  ;;  %v2945_v9 = vshll.u32 %v6981_v21, 16  ;;  %7574 = vmatprep.subr.bf16.mxu0 %v7877_v43  ;;  %v7880_v10 = vld [vmem:[%s15059_s5 + $0x1a0] sm:$0xff]  }
 0x265   :  { %v12253_v38 = vsel %vm15405_vm0, %v2935_v4, %v2939_v15  ;;  %v16547_v23 = vshll.u32 %v16546_v61, 16  ;;  %v12258_v50 = vcombine.low %v2853_v25, %v2854_v45  ;;  %v2791_v6 = vrot.slane %v16540_v46, 4  ;;  %7549 = vmatpush3.bf16.msra.mxu1 %v7879_v56  ;;  %v16551_v53 = vld [vmem:[#allocation114_spill] sm:$0xff]  ;;  %v12274_v46 = vld [vmem:[#allocation2 + $0x38] sm:$0xf] }
 0x266   :  { %v2800_v14 = vrot.slane %v16545_v48, 4  ;;  %v16550_v34 = vshll.u32 %v16549_v54, 16  ;;  %v2943_v7 = vor.u32 %v2941_v37, %v2939_v15  ;;  %v2947_v63 = vrot.slane %v2945_v9, 1  ;;  %7550 = vmatprep.subr.bf16.mxu1 %v7881_v16  ;;  %v7885_v56 = vld [vmem:[%s15059_s5 + $0x140] sm:$0xff]   ;;  %v7883_v37 = vld [vmem:[%s15059_s5 + $0x198] sm:$0xff]  }
 0x267   :  { %v2798_v18 = vor.u32 %v16547_v23, %v16545_v48  ;;  %v2781_v51 = vsel %vm11759_vm15, %v2773_v1, %v2780_v39  ;;  %v2790_v4 = vsel %vm11759_vm15, %v2782_v31, %v2789_v17  ;;  %v2209_v57 = vsel %vm16552_vm13, %v16551_v53, %v2208_v2  ;;  %v12292_v17 = vld [vmem:[#allocation2 + $0x30] sm:$0xf]  ;;  %7575 = vmatpush3.bf16.msra.mxu0 %v7877_v43  ;;  %v12302_v1 = vld [vmem:[#allocation2 + $0x34] sm:$0xf]  ;;  %v7887_v48 = vld [vmem:[%s15059_s5 + $0x1f8] sm:$0xff]  }
 0x268   :  { %v2807_v0 = vor.u32 %v16550_v34, %v16548_v41  ;;  %v6968_v19 = vcombine.low %v12274_v46, %v12086_v59  ;;  %v2949_v28 = vshrl.u32 %v6981_v21, 16  ;;  %v2953_v12 = vshll.u32 %v12258_v50, 16  ;;  %7576 = vmatprep.subr.bf16.mxu0 %v7880_v10  ;;  %7503 = vmatmul.mubr.bf16.gmra.mxu1 %v2209_v57  ;;  %v16558_v54 = vld [vmem:[#allocation125_spill] sm:$0xff]  ;;  %v7889_v59 = vld [vmem:[%s15059_s5 + $0x188] sm:$0xff]  }
 0x269   :  { %v16553_v15 = vshll.u32 %v12081_v27, 16  ;;  %v16554_v39 = vcombine.low %v11897_v52, %v12140_v60  ;;  %v12290_v31 = vsel %vm15405_vm0, %v2943_v7, %v2947_v63  ;;  %v2799_v21 = vsel %vm11759_vm15, %v2791_v6, %v2798_v18  ;;  %7551 = vmatpush3.bf16.msra.mxu1 %v7881_v16  ;;  %7554 = vmatprep.mubr.bf16.mxu1 %v12225_v62  ;;  %v12320_v18 = vld [vmem:[#allocation2 + $0x38] sm:$0xf]  ;;  %v12326_v16 = vld [vmem:[#allocation2 + $0x3c] sm:$0xf] }
 0x26a   :  { %v16555_v2 = vshll.u32 %v12039_v30, 16  ;;  %v16556_v52 = vcombine.low %v12153_v29, %v12155_v8  ;;  %v2951_v60 = vor.u32 %v2949_v28, %v2947_v63  ;;  %v2955_v45 = vrot.slane %v2953_v12, 1  ;;  %v16557_v8 = vld [vmem:[#allocation119_spill] sm:$0xff]  ;;  %7552 = vmatprep.subr.bf16.mxu1 %v7885_v56  ;;  %v16562_v28 = vld [vmem:[#allocation106_spill] sm:$0xff] }
 0x26b   :  { %v12281_v24 = vrot.slane %v16553_v15, 5  ;;  %7527 = vmatmul.mubr.bf16.gmra.mxu0 %v16554_v39  ;;  %vm2838_vm14 = vcmp.ne.s16.totalorder %v2781_v51, 0  ;;  %vm2839_vm5 = vcmp.ne.s16.totalorder %v2790_v4, 0  ;;  %v2808_v29 = vsel %vm11759_vm15, %v2800_v14, %v2807_v0  ;;  %v16559_v14 = vld [vmem:[#allocation80_spill] sm:$0xff] }
 0x26c   :  { %v2816_v25 = vor.u32 %v16555_v2, %v12089_v22  ;;  %7530 = vmatprep.mubr.bf16.mxu0 %v16556_v52  ;;  %v2855_v30 = vsel %vm2838_vm14, %v12292_v17, 0  ;;  %v2856_v43 = vsel %vm2839_vm5, %v12302_v1, 0  ;;  %v3379_v9 = vor.u32 %v16557_v8, %v11246_v58  ;;  %7577 = vmatpush3.bf16.msra.mxu0 %v7880_v10  ;;  %v16564_v52 = vld [vmem:[#allocation9_spill] sm:$0xff]  ;;  %v16567_v8 = vld [vmem:[#allocation14_spill] sm:$0xff] }
 0x26d   :  { %v12318_v61 = vsel %vm15405_vm0, %v2951_v60, %v2955_v45  ;;  %v6983_v23 = vcombine.low %v2855_v30, %v2856_v43  ;;  %v2818_v6 = vrot.slane %v12089_v22, 4  ;;  %v16560_v34 = vshll.u32 %v16559_v14, 16  ;;  %7578 = vmatprep.subr.bf16.mxu0 %v7883_v37  ;;  %7553 = vmatpush3.bf16.msra.mxu1 %v7885_v56  ;;  %v12358_v30 = vld [vmem:[#allocation2 + $0x44] sm:$0xf]  ;;  %v16573_v14 = vld [vmem:[#allocation12_spill] sm:$0xff] }
 0x26e   :  { %vm2840_vm6 = vcmp.ne.s16.totalorder %v2799_v21, 0  ;;  %vm2841_vm12 = vcmp.ne.s16.totalorder %v2808_v29, 0  ;;  %v2809_v62 = vrot.slane %v16548_v41, 4  ;;  %v3560_v7 = vshrl.u32 %v11769_v20, 16  ;;  %v7886_v41 = vld [vmem:[%s15059_s5 + $0x190] sm:$0xff]   ;;  %7602 = vmatprep.subr.bf16.mxu1 %v7887_v48 }
 0x26f   :  { %v2825_v0 = vor.u32 %v16560_v34, %v16558_v54  ;;  %v2957_v63 = vshrl.u32 %v12258_v50, 16  ;;  %v2961_v51 = vshll.u32 %v6983_v23, 16  ;;  %v2857_v4 = vsel %vm2840_vm6, %v12320_v18, 0  ;;  %v12348_v21 = vld [vmem:[#allocation2 + $0x40] sm:$0xf] }
 0x270   :  { %v2858_v22 = vsel %vm2841_vm12, %v12326_v16, 0  ;;  %v16561_v53 = vshrl.u32 %v12081_v27, 16  ;;  %vm16563_vm3 = vnez %v16562_v28  ;;  %v2817_v50 = vsel %vm11759_vm15, %v2809_v62, %v2816_v25  ;;  %v7890_v27 = vld [vmem:[%s15059_s5 + $0x1f0] sm:$0xff]   ;;  %7579 = vmatpush3.bf16.msra.mxu0 %v7883_v37  ;;  %7555 = vmatmul.mubr.bf16.vlgmr.msra.gmra.mxu1 %v12253_v38  ;;  %v16575_v34 = vld [vmem:[#allocation13_spill] sm:$0xff] }
 0x271   :  { %vm4125_vm11 = vmpackc.low %vm16563_vm3, %vm16563_vm3  ;;  %v6984_v10 = vcombine.low %v2857_v4, %v2858_v22  ;;  %v3380_v12 = vrot.slane %v3379_v9, 4  ;;  %v2959_v15 = vor.u32 %v2957_v63, %v2955_v45  ;;  %v2963_v39 = vrot.slane %v2961_v51, 1  ;;  %v16569_v9 = vld [vmem:[#allocation15_spill] sm:$0xff]  ;;  %7580 = vmatprep.subr.bf16.mxu0 %v7886_v41  ;;  %7558 = vmatprep.mubr.bf16.mxu1 %v12290_v31  ;;  %v16579_v62 = vld [vmem:[#allocation109_spill] sm:$0xff] }
 0x272   :  { %v12335_v57 = vrot.slane %v16561_v53, 4  ;;  %v2826_v2 = vsel %vm11759_vm15, %v2818_v6, %v2825_v0  ;;  %vm2842_vm9 = vcmp.ne.s16.totalorder %v2817_v50, 0  ;;  %vm16565_vm1 = vnez %v16564_v52  ;;  %7603 = vmatpush3.bf16.msra.mxu1 %v7887_v48  ;;  %v2620_v22 = vld [vmem:[#allocation2 + $0x48] sm:$0x1]  ;;  %v7982_v50 = vld [vmem:[#allocation2 + $0x10] sm:$0xf] }
 0x273   :  { %vm3806_vm10 = vmpackc.low %vm16565_vm1, %vm16565_vm1  ;;  %v16566_v25 = vcombine.low %v12164_v3, %v12053_v33  ;;  %v2965_v56 = vshrl.u32 %v6983_v23, 16  ;;  %v2969_v60 = vshll.u32 %v6984_v10, 16  ;;  %vm2843_vm4 = vcmp.ne.s16.totalorder %v2826_v2, 0  ;;  %7604 = vmatprep.subr.bf16.mxu1 %v7890_v27  ;;  %v7894_v52 = vld [vmem:[%s15059_s5 + $0x1e0] sm:$0xff]   ;;  %v7983_v23 = vld [vmem:[#allocation2 + $0x1c] sm:$0xf] }
 0x274   :  { %v2859_v45 = vsel %vm2842_vm9, %v12348_v21, 0  ;;  %v12367_v43 = vsel %vm4125_vm11, 65537, %v15638_v13  ;;  %v12373_v33 = vsel %vm15405_vm0, %v2959_v15, %v2963_v39  ;;  %v2860_v3 = vsel %vm2843_vm4, %v12358_v30, 0  ;;  %7581 = vmatpush3.bf16.msra.mxu0 %v7886_v41 }
 0x275   :  { %7531 = vmatmul.mubr.bf16.gmra.mxu0 %v16566_v25  ;;  %v3562_v29 = vrot.slane %v3560_v7, 3  ;;  %vm16568_vm8 = vcmp.ge.s32.totalorder %v16567_v8, 0  ;;  %vm16570_vm7 = vnez %v16569_v9  ;;  %v2967_v46 = vor.u32 %v2965_v56, %v2963_v39  ;;  %7582 = vmatprep.subr.bf16.mxu0 %v7889_v59 }
 0x276   :  { %7534 = vmatprep.mubr.bf16.mxu0 %v6968_v19  ;;  %vm12380_vm13 = vmand %vm16570_vm7, %vm16568_vm8  ;;  %v2971_v19 = vrot.slane %v2969_v60, 1  ;;  %v6985_v37 = vcombine.low %v2859_v45, %v2860_v3  ;;  %v2973_v6 = vshrl.u32 %v6984_v10, 16  ;;  %vm16574_vm14 = vcmp.ge.s32.totalorder %v16573_v14, 0  ;;  %7605 = vmatpush3.bf16.msra.mxu1 %v7890_v27  ;;  %v16589_v45 = vld [vmem:[#allocation126_spill] sm:$0xff] }
 0x277   :  { %vm16576_vm5 = vnez %v16575_v34  ;;  %v3563_v38 = vshll.u32 %v11769_v20, 16  ;;  %v3385_v7 = vsel %vm16257_vm2, %v3380_v12, %v16579_v62  ;;  %v16580_v63 = vsel %vm16257_vm2, %v11706_v36, %v11246_v58  ;;  %v7892_v58 = vld [vmem:[%s15059_s5 + $0x1e8] sm:$0xff]  }
 0x278   :  { %vm12392_vm6 = vmand %vm16576_vm5, %vm16574_vm14  ;;  %vm12406_vm12 = vcmp.ne.s16.totalorder %v16580_v63, 0  ;;  %v2827_v4 = vrot.slane %v16558_v54, 4  ;;  %vm16583_vm3 = vcmp.le.s32.totalorder %v16567_v8, 7  ;;  %v4269_v31 = vshrl.u32 %v12367_v43, 16  ;;  %7606 = vmatprep.subr.bf16.mxu1 %v7892_v58  ;;  %v16590_v8 = vld [vmem:[#allocation110_spill] sm:$0xff]  ;;  %7583 = vmatpush3.bf16.msra.mxu0 %v7889_v59  ;;  %v7893_v59 = vld [vmem:[%s15059_s5 + $0x238] sm:$0xff]  }
 0x279   :  { %vm12415_vm11 = vmand %vm12380_vm13, %vm16583_vm3  ;;  %v6969_v48 = vcombine.low %v12091_v49, %v12078_v35  ;;  %v12426_v36 = vsel %vm15405_vm0, %v2967_v46, %v2971_v19  ;;  %v2975_v54 = vor.u32 %v2973_v6, %v2971_v19  ;;  %v2977_v53 = vshll.u32 %v6985_v37, 16  ;;  %v7891_v35 = vld [vmem:[%s15059_s5 + $0x180] sm:$0xff]   ;;  %7559 = vmatmul.mubr.bf16.gmra.mxu1 %v12318_v61 }
 0x27a   :  { %v3565_v28 = vrot.slane %v3563_v38, 4  ;;  %vm3442_vm9 = vcmp.ne.s16.totalorder %v3385_v7, 0  ;;  %v3458_v10 = vsel %vm12406_vm12, %v12292_v17, 0  ;;  %vm3809_vm4 = vmpackc.low %vm12415_vm11, %vm12415_vm11  ;;  %vm2844_vm8 = vcmp.ne.s16.totalorder %v2827_v4, 0  ;;  %v16592_v19 = vld [vmem:[#allocation38_spill] sm:$0xff]  ;;  %7584 = vmatprep.subr.bf16.mxu0 %v7891_v35  ;;  %v16595_v7 = vld [vmem:[#allocation79_spill] sm:$0xff]  ;;  %7562 = vmatprep.mubr.bf16.mxu1 %v12373_v33 }
 0x27b   :  { %v3459_v49 = vsel %vm3442_vm9, %v12302_v1, 0  ;;  %v2981_v41 = vshrl.u32 %v6985_v37, 16  ;;  %v12443_v12 = vsel %vm3806_vm10, %v7982_v50, 0  ;;  %vm16586_vm7 = vcmp.le.s32.totalorder %v16573_v14, 7  ;;  %7607 = vmatpush3.bf16.msra.mxu1 %v7892_v58  ;;  %v16596_v20 = vld [vmem:[#allocation42_spill] sm:$0xff]  ;;  %v7896_v33 = vld [vmem:[%s15059_s5 + $0x1d8] sm:$0xff]  }
 0x27c   :  { %vm12449_vm13 = vmand %vm12392_vm6, %vm16586_vm7  ;;  %v2979_v39 = vrot.slane %v2977_v53, 1  ;;  %v3566_v2 = vor.u32 %v3565_v28, %v3562_v29  ;;  %v7000_v25 = vcombine.low %v3458_v10, %v3459_v49  ;;  %v2861_v56 = vsel %vm2844_vm8, %v2620_v22, 0  ;;  %v16591_v29 = vld [vmem:[#allocation24_spill] sm:$0xff]  ;;  %v16598_v22 = vld [vmem:[#allocation18_spill] sm:$0xff]  ;;  %7608 = vmatprep.subr.bf16.mxu1 %v7894_v52  ;;  %7585 = vmatpush3.bf16.msra.mxu0 %v7891_v35 }
 0x27d   :  { %7535 = vmatmul.mubr.bf16.gmra.mxu0 %v6969_v48  ;;  %v6986_v60 = vcombine.low %v2861_v56, %v2861_v56  ;;  %v7012_v3 = vcombine.low %v16589_v45, %v12443_v12  ;;  %v3389_v9 = vor.u32 %v16590_v8, %v16579_v62  ;;  %v12465_v27 = vsel %vm3809_vm4, %v7983_v23, 0  ;;  %vm3810_vm10 = vmpackc.low %vm12449_vm13, %vm12449_vm13  ;;  %v16594_v62 = vld [vmem:[#allocation83_spill] sm:$0xff]  ;;  %v16600_v53 = vld [vmem:[#allocation20_spill] sm:$0xff]  ;;  %7634 = vmatprep.subr.bf16.mxu0 %v7893_v59 }
 0x27e   :  { %7586 = vmatprep.mubr.bf16.mxu0 %v16591_v29  ;;  %v12469_v46 = vsel %vm15405_vm0, %v2975_v54, %v2979_v39  ;;  %vm16593_vm1 = vsmask.f32 4352  ;;  %v3569_v6 = vshrl.u32 %v7000_v25, 16  ;;  %v3572_v14 = vshll.u32 %v7000_v25, 16  ;;  %v16597_v48 = vld [vmem:[#allocation67_spill] sm:$0xff]  ;;  %v16604_v50 = vld [vmem:[#allocation16_spill] sm:$0xff] }
 0x27f   :  { %v12473_v37 = vsel %vm16593_vm1, %v16592_v19, %v3566_v2  ;;  %v2983_v34 = vor.u32 %v2981_v41, %v2979_v39  ;;  %v2985_v0 = vshll.u32 %v6986_v60, 16  ;;  %v3390_v38 = vrot.slane %v3389_v9, 4  ;;  %v16606_v39 = vld [vmem:[#allocation17_spill] sm:$0xff]  ;;  %v7895_v9 = vld [vmem:[%s15059_s5 + $0x230] sm:$0xff]   ;;  %7609 = vmatpush3.bf16.msra.mxu1 %v7894_v52  ;;  %vm16615_vm7 = vmmov %vm16593_vm1 }
 0x280   :  { %v3399_v63 = vor.u32 %v16595_v7, %v16594_v62  ;;  %v3571_v51 = vrot.slane %v3569_v6, 3  ;;  %v3574_v4 = vrot.slane %v3572_v14, 4  ;;  %v3409_v54 = vor.u32 %v16597_v48, %v16596_v20  ;;  %v16619_v52 = vld [vmem:[#allocation89_spill] sm:$0xff]  ;;  %7610 = vmatprep.subr.bf16.mxu1 %v7896_v33  ;;  %v16635_v60 = vld [vmem:[#allocation28_spill] sm:$0xff] }
 0x281   :  { %v3419_v61 = vor.u32 %v12335_v57, %v12281_v24  ;;  %vm16599_vm14 = vcmp.ge.s32.totalorder %v16598_v22, 0  ;;  %vm16601_vm5 = vnez %v16600_v53  ;;  %v2987_v58 = vrot.slane %v2985_v0, 1  ;;  %v7984_v57 = vld [vmem:[#allocation2 + $0x20] sm:$0xf]  ;;  %7563 = vmatmul.mubr.bf16.gmra.mxu1 %v12426_v36 }
 0x282   :  { %vm12493_vm6 = vmand %vm16601_vm5, %vm16599_vm14  ;;  %v3395_v10 = vsel %vm16257_vm2, %v3390_v38, %v16594_v62  ;;  %v3400_v49 = vrot.slane %v3399_v63, 4  ;;  %v12508_v41 = vsel %vm3810_vm10, %v7984_v57, 0  ;;  %vm16605_vm12 = vcmp.ge.s32.totalorder %v16604_v50, 0  ;;  %v16620_v7 = vld [vmem:[#allocation29_spill] sm:$0xff]  ;;  %7566 = vmatprep.mubr.bf16.mxu1 %v12469_v46  ;;  %v7900_v46 = vld [vmem:[%s15059_s5 + $0x1c8] sm:$0xff]  }
 0x283   :  { %vm16607_vm3 = vnez %v16606_v39  ;;  %v12518_v56 = vor.u32 %v3574_v4, %v3571_v51  ;;  %vm12520_vm9 = vcmp.ne.s16.totalorder %v3395_v10, 0  ;;  %v3410_v8 = vrot.slane %v3409_v54, 4  ;;  %v16622_v63 = vld [vmem:[#allocation33_spill] sm:$0xff]  ;;  %v16626_v4 = vld [vmem:[#allocation8_spill] sm:$0xff]  ;;  %7611 = vmatpush3.bf16.msra.mxu1 %v7896_v33  ;;  %v16673_v38 = vld [vmem:[#allocation87_spill] sm:$0xff] }
 0x284   :  { %vm12514_vm11 = vmand %vm16607_vm3, %vm16605_vm12  ;;  %v3420_v15 = vrot.slane %v3419_v61, 4  ;;  %v12528_v23 = vsel %vm15405_vm0, %v2983_v34, %v2987_v58  ;;  %v3405_v35 = vsel %vm16257_vm2, %v3400_v49, %v16596_v20  ;;  %v3460_v29 = vsel %vm12520_vm9, %v12320_v18, 0  ;;  %v16627_v61 = vld [vmem:[#allocation66_spill] sm:$0xff]  ;;  %v16630_v10 = vld [vmem:[#allocation72_spill] sm:$0xff] }
 0x285   :  { %v7014_v19 = vcombine.low %v12465_v27, %v12508_v41  ;;  %vm16612_vm4 = vcmp.le.s32.totalorder %v16598_v22, 7  ;;  %v12548_v14 = vsel %vm16615_vm7, %v3566_v2, %v12518_v56  ;;  %vm3444_vm13 = vcmp.ne.s16.totalorder %v3405_v35, 0  ;;  %7587 = vmatmul.mubr.bf16.vlgmr.msra.gmra.mxu0 %v16619_v52  ;;  %v7898_v2 = vld [vmem:[%s15059_s5 + $0x1d0] sm:$0xff]   ;;  %v16633_v25 = vld [vmem:[#allocation25_spill] sm:$0xff]  ;;  %v16639_v35 = vld [vmem:[#allocation74_spill] sm:$0xff] }
 0x286   :  { %vm12542_vm8 = vmand %vm12493_vm6, %vm16612_vm4  ;;  %v3415_v34 = vsel %vm16257_vm2, %v3410_v8, %v12281_v24  ;;  %v3425_v0 = vsel %vm16257_vm2, %v3420_v15, %v12059_v11  ;;  %vm16616_vm1 = vcmp.le.s32.totalorder %v16604_v50, 7  ;;  %v3461_v24 = vsel %vm3444_vm13, %v12326_v16, 0  ;;  %7635 = vmatpush3.bf16.msra.mxu0 %v7893_v59  ;;  %7590 = vmatprep.mubr.bf16.mxu0 %v16626_v4  ;;  %v16628_v22 = vld [vmem:[#allocation59_spill] sm:$0xff]  ;;  %v16632_v50 = vld [vmem:[#allocation68_spill] sm:$0xff] }
 0x287   :  { %vm12560_vm10 = vmand %vm12514_vm11, %vm16616_vm1  ;;  %vm3445_vm14 = vcmp.ne.s16.totalorder %v3415_v34, 0  ;;  %vm3446_vm5 = vcmp.ne.s16.totalorder %v3425_v0, 0  ;;  %v3426_v62 = vshrl.u32 %v11651_v32, 16  ;;  %vm16621_vm6 = vcmp.ge.s32.totalorder %v16620_v7, 0  ;;  %7636 = vmatprep.subr.bf16.mxu0 %v7895_v9  ;;  %v7897_v59 = vld [vmem:[%s15059_s5 + $0x228] sm:$0xff]   ;;  %7612 = vmatprep.subr.bf16.mxu1 %v7898_v2  ;;  %v16713_v12 = vld [vmem:[#allocation61_spill] sm:$0xff] }
 0x288   :  { %vm16623_vm12 = vnez %v16622_v63  ;;  %v7001_v20 = vcombine.low %v3460_v29, %v3461_v24  ;;  %v3462_v48 = vsel %vm3445_vm14, %v12348_v21, 0  ;;  %v3463_v54 = vsel %vm3446_vm5, %v12358_v30, 0  ;;  %v16641_v0 = vld [vmem:[#allocation75_spill] sm:$0xff]  ;;  %7613 = vmatpush3.bf16.msra.mxu1 %v7898_v2 }
 0x289   :  { %vm12574_vm3 = vmand %vm16623_vm12, %vm16621_vm6  ;;  %v16629_v53 = vshll.u32 %v16628_v22, 16  ;;  %v7002_v28 = vcombine.low %v3462_v48, %v3463_v54  ;;  %v3428_v58 = vrot.slane %v3426_v62, 4  ;;  %v16631_v49 = vrot.slane %v16627_v61, 4  ;;  %7614 = vmatprep.subr.bf16.mxu1 %v7900_v46  ;;  %7567 = vmatmul.mubr.bf16.gmra.mxu1 %v12528_v23 }
 0x28a   :  { %v4159_v39 = vrot.slane %v16632_v50, 4  ;;  %vm16634_vm9 = vcmp.ge.s32.totalorder %v16633_v25, 0  ;;  %vm16636_vm4 = vnez %v16635_v60  ;;  %v3578_v8 = vshrl.u32 %v7001_v20, 16  ;;  %7637 = vmatpush3.bf16.msra.mxu0 %v7895_v9  ;;  %v4065_v60 = vld [vmem:[#allocation2 + $0x18] sm:$0xf]  ;;  %7618 = vmatprep.mubr.bf16.mxu1 %v7012_v3 }
 0x28b   :  { %v4149_v32 = vor.u32 %v16629_v53, %v16627_v61  ;;  %v4158_v57 = vsel %vm11759_vm15, %v16631_v49, %v16630_v10  ;;  %vm12601_vm7 = vmand %vm16636_vm4, %vm16634_vm9  ;;  %v3581_v15 = vshll.u32 %v7001_v20, 16  ;;  %v16640_v29 = vshrl.u32 %v16639_v35, 16  ;;  %v4062_v20 = vld [vmem:[#allocation2 + $0xc] sm:$0xf]  ;;  %7638 = vmatprep.subr.bf16.mxu0 %v7897_v59 }
 0x28c   :  { %v16642_v52 = vshrl.u32 %v16641_v0, 16  ;;  %vm16643_vm13 = vcmp.le.s32.totalorder %v16620_v7, 7  ;;  %v3587_v33 = vshrl.u32 %v7002_v28, 16  ;;  %v3590_v63 = vshll.u32 %v7002_v28, 16  ;;  %7615 = vmatpush3.bf16.msra.mxu1 %v7900_v46 }
 0x28d   :  { %v4163_v34 = vrot.slane %v16640_v29, 7  ;;  %vm12616_vm1 = vmand %vm12574_vm3, %vm16643_vm13  ;;  %v3429_v4 = vor.u32 %v3428_v58, %v12059_v11  ;;  %vm4286_vm14 = vcmp.ne.s16.totalorder %v4149_v32, 0  ;;  %v3580_v7 = vrot.slane %v3578_v8, 3  ;;  %v7899_v11 = vld [vmem:[%s15059_s5 + $0x220] sm:$0xff]   ;;  %v4063_v58 = vld [vmem:[#allocation2 + $0x10] sm:$0xf]  ;;  %7591 = vmatmul.mubr.bf16.gmra.mxu0 %v12473_v37  ;;  %v12767_v29 = vpop.f32.mrf.mxu1 }
 0x28e   :  { %v12610_v24 = vrot.slane %v16642_v52, 7  ;;  %v3583_v51 = vrot.slane %v3581_v15, 4  ;;  %v16646_v48 = vshll.u32 %v16639_v35, 16  ;;  %vm16647_vm6 = vcmp.le.s32.totalorder %v16633_v25, 7  ;;  %v4064_v25 = vld [vmem:[#allocation2 + $0x14] sm:$0xf]  ;;  %7639 = vmatpush3.bf16.msra.mxu0 %v7897_v59  ;;  %7594 = vmatprep.mubr.bf16.mxu0 %v12548_v14 }
 0x28f   :  { %v4168_v61 = vrot.slane %v4163_v34, 4  ;;  %vm12633_vm12 = vmand %vm12601_vm7, %vm16647_vm6  ;;  %v3589_v9 = vrot.slane %v3587_v33, 3  ;;  %v3592_v53 = vrot.slane %v3590_v63, 4  ;;  %v3430_v28 = vrot.slane %v3429_v4, 4  ;;  %v16651_v15 = vld [vmem:[#allocation41_spill] sm:$0xff]  ;;  %v16653_v35 = vld [vmem:[#allocation50_spill] sm:$0xff]  ;;  %7640 = vmatprep.subr.bf16.mxu0 %v7899_v11 }
 0x290   :  { %v4166_v54 = vor.u32 %v16646_v48, %v4163_v34  ;;  %v16650_v10 = vshll.u32 %v16641_v0, 16  ;;  %v3584_v50 = vor.u32 %v3583_v51, %v3580_v7  ;;  %vm4287_vm9 = vcmp.ne.s16.totalorder %v4158_v57, 0  ;;  %v12663_v34 = vld [vmem:[#allocation2 + $0x48] sm:$0xf]  ;;  %vm3814_vm11 = vmpackc.low %vm12633_vm12, %vm12633_vm12  ;;  %v7901_v59 = vld [vmem:[%s15059_s5 + $0x218] sm:$0xff]  }
 0x291   :  { %v4303_v8 = vsel %vm4286_vm14, %v4062_v20, 0  ;;  %vm16652_vm4 = vcmp.ge.s32.totalorder %v16651_v15, 0  ;;  %vm16654_vm7 = vnez %v16653_v35  ;;  %v12658_v2 = vor.u32 %v3592_v53, %v3589_v9  ;;  %v16657_v0 = vld [vmem:[#allocation34_spill] sm:$0xff]  ;;  %v16659_v52 = vld [vmem:[#allocation39_spill] sm:$0xff]  ;;  %v16675_v53 = vld [vmem:[#allocation45_spill] sm:$0xff] }
 0x292   :  { %v4175_v49 = vor.u32 %v16650_v10, %v12610_v24  ;;  %v4167_v36 = vsel %vm11759_vm15, %v4159_v39, %v4166_v54  ;;  %vm12653_vm13 = vmand %vm16654_vm7, %vm16652_vm4  ;;  %v7902_v39 = vld [vmem:[%s15059_s5 + $0x1c0] sm:$0xff]   ;;  %vm3447_vm14 = vcmp.ne.s16.totalorder %v3430_v28, 0  ;;  %vm16658_vm4 = vcmp.ge.s32.totalorder %v16657_v0, 0  ;;  %7641 = vmatpush3.bf16.msra.mxu0 %v7899_v11  ;;  %v7903_v10 = vld [vmem:[%s15059_s5 + $0x210] sm:$0xff]  }
 0x293   :  { %vm4288_vm6 = vcmp.ne.s16.totalorder %v4167_v36, 0  ;;  %vm16660_vm7 = vnez %v16659_v52  ;;  %vm16663_vm3 = vsmask.f32 4352  ;;  %v3464_v63 = vsel %vm3447_vm14, %v12663_v34, 0  ;;  %v7985_v48 = vld [vmem:[#allocation2 + $0x24] sm:$0xf]  ;;  %7616 = vmatprep.subr.bf16.mxu1 %v7902_v39  ;;  %7642 = vmatprep.subr.bf16.mxu0 %v7901_v59 }
 0x294   :  { %v4176_v32 = vsel %vm11759_vm15, %v4168_v61, %v4175_v49  ;;  %vm12671_vm0 = vmand %vm16660_vm7, %vm16658_vm4  ;;  %v3585_v33 = vsel %vm16663_vm3, %v12518_v56, %v3584_v50  ;;  %v4304_v4 = vsel %vm4287_vm9, %v4063_v58, 0  ;;  %v7003_v56 = vcombine.low %v3464_v63, %v3464_v63  ;;  %v7986_v61 = vld [vmem:[#allocation2 + $0x28] sm:$0xf]  ;;  %v16681_v36 = vld [vmem:[#allocation21_spill] sm:$0xff]  ;;  %7617 = vmatpush3.bf16.msra.mxu1 %v7902_v39 }
 0x295   :  { %vm4289_vm5 = vcmp.ne.s16.totalorder %v4176_v32, 0  ;;  %vm16664_vm4 = vmmov %vm16663_vm3  ;;  %v4305_v20 = vsel %vm4288_vm6, %v4064_v25, 0  ;;  %vm16665_vm3 = vcmp.le.s32.totalorder %v16651_v15, 7  ;;  %v7028_v23 = vcombine.low %v4303_v8, %v4304_v4  ;;  %v7987_v25 = vld [vmem:[#allocation2 + $0x2c] sm:$0xf]  ;;  %v16685_v63 = vld [vmem:[#allocation84_spill] sm:$0xff]  ;;  %7595 = vmatmul.mubr.bf16.gmra.mxu0 %v3585_v33 }
 0x296   :  { %v3594_v14 = vsel %vm16664_vm4, %v3584_v50, %v12658_v2  ;;  %v4306_v7 = vsel %vm4289_vm5, %v4065_v60, 0  ;;  %vm12693_vm9 = vmand %vm12653_vm13, %vm16665_vm3  ;;  %vm16670_vm14 = vcmp.le.s32.totalorder %v16657_v0, 7  ;;  %v4272_v45 = vshll.u32 %v12367_v43, 16  ;;  %v4067_v15 = vld [vmem:[#allocation2 + $0x20] sm:$0xf]  ;;  %7643 = vmatpush3.bf16.msra.mxu0 %v7901_v59  ;;  %v7904_v59 = vld [vmem:[%s15059_s5 + $0x208] sm:$0xff]  }
 0x297   :  { %v7029_v51 = vcombine.low %v4305_v20, %v4306_v7  ;;  %vm16668_vm5 = vmpackc.low %vm12542_vm8, %vm12542_vm8  ;;  %v3596_v3 = vshrl.u32 %v7003_v56, 16  ;;  %v3599_v6 = vshll.u32 %v7003_v56, 16  ;;  %vm16674_vm8 = vcmp.ge.s32.totalorder %v16673_v38, 0  ;;  %v4066_v37 = vld [vmem:[#allocation2 + $0x1c] sm:$0xf]  ;;  %v16691_v20 = vld [vmem:[#allocation92_spill] sm:$0xff]  ;;  %7598 = vmatprep.mubr.bf16.mxu0 %v3594_v14  ;;  %7644 = vmatprep.subr.bf16.mxu0 %v7903_v10 }
 0x298   :  { %v12705_v54 = vsel %vm16668_vm5, %v7985_v48, 0  ;;  %vm16669_vm13 = vmpackc.low %vm12560_vm10, %vm12560_vm10  ;;  %vm16676_vm10 = vnez %v16675_v53  ;;  %v12735_v58 = vrot.slane %v4269_v31, 7  ;;  %v4382_v49 = vshll.u32 %v7028_v23, 16  ;;  %v16686_v4 = vld [vmem:[#allocation85_spill] sm:$0xff]  ;;  %v12793_v48 = vpop.f32.mrf.mxu0  ;;  %v16699_v28 = vld [vmem:[#allocation30_spill] sm:$0xff]  ;;  %v12814_v31 = vpop.f32.mrf.mxu1 }
 0x299   :  { %v12712_v46 = vsel %vm16669_vm13, %v7986_v61, 0  ;;  %vm12718_vm6 = vmand %vm12671_vm0, %vm16670_vm14  ;;  %v4387_v50 = vshll.u32 %v7029_v51, 16  ;;  %vm16680_vm4 = vcmp.ge.s32.totalorder %v10026_v26, 0  ;;  %vm16682_vm3 = vnez %v16681_v36 }
 0x29a   :  { %v7015_v9 = vcombine.low %v12705_v54, %v12712_v46  ;;  %vm12729_vm7 = vmand %vm16676_vm10, %vm16674_vm8  ;;  %v3598_v11 = vrot.slane %v3596_v3, 3  ;;  %v3601_v8 = vrot.slane %v3599_v6, 4  ;;  %v12761_v62 = vsel %vm3814_vm11, %v12292_v17, 0  ;;  %v16696_v3 = vld [vmem:[#allocation11_spill] sm:$0xff]  ;;  %v12854_v57 = vpop.f32.mrf.mxu0  ;;  %7645 = vmatpush3.bf16.msra.mxu0 %v7903_v10  ;;  %v7905_v10 = vld [vmem:[%s15059_s5 + $0x200] sm:$0xff]  }
 0x29b   :  { %vm16679_vm0 = vmpackc.low %vm12616_vm1, %vm12616_vm1  ;;  %v4177_v35 = vrot.slane %v12610_v24, 4  ;;  %v4380_v32 = vshrl.u32 %v7028_v23, 16  ;;  %v4384_v0 = vrot.slane %v4382_v49, 1  ;;  %v4389_v52 = vrot.slane %v4387_v50, 1  ;;  %v16700_v49 = vld [vmem:[#allocation27_spill] sm:$0xff]  ;;  %7646 = vmatprep.subr.bf16.mxu0 %v7904_v59  ;;  %v12885_v24 = vpop.f32.mrf.mxu1 }
 0x29c   :  { %v12745_v60 = vsel %vm16679_vm0, %v7987_v25, 0  ;;  %vm12751_vm5 = vmand %vm16682_vm3, %vm16680_vm4  ;;  %v16687_v22 = vrot.slane %v16686_v4, 4  ;;  %vm16688_vm11 = vcmp.le.s32.totalorder %v16673_v38, 7  ;;  %v3602_v39 = vor.u32 %v3601_v8, %v3598_v11  ;;  %v16698_v38 = vld [vmem:[#allocation81_spill] sm:$0xff]  ;;  %v4072_v46 = vld [vmem:[#allocation2 + $0x34] sm:$0xf] }
 0x29d   :  { %vm3815_vm1 = vmpackc.low %vm12693_vm9, %vm12693_vm9  ;;  %v4391_v56 = vshrl.u32 %v7029_v51, 16  ;;  %v4185_v7 = vsel %vm11759_vm15, %v4177_v35, %v16691_v20  ;;  %vm16692_vm14 = vcmp.le.s32.totalorder %v10026_v26, 7  ;;  %v4385_v33 = vor.u32 %v4384_v0, %v4380_v32  ;;  %v16695_v26 = vld [vmem:[#allocation10_spill] sm:$0xff]  ;;  %v16704_v0 = vld [vmem:[#allocation19_spill] sm:$0xff] }
 0x29e   :  { %v4194_v17 = vsel %vm11759_vm15, %v16687_v22, %v16685_v63  ;;  %vm12778_vm12 = vmand %vm12729_vm7, %vm16688_vm11  ;;  %v7016_v51 = vcombine.low %v12745_v60, %v12761_v62  ;;  %vm4290_vm10 = vcmp.ne.s16.totalorder %v4185_v7, 0  ;;  %v16697_v6 = vcombine.low %v16695_v26, %v16696_v3  ;;  %v4068_v35 = vld [vmem:[#allocation2 + $0x24] sm:$0xf]  ;;  %v4069_v22 = vld [vmem:[#allocation2 + $0x28] sm:$0xf]  ;;  %7647 = vmatpush3.bf16.msra.mxu0 %v7904_v59 }
 0x29f   :  { %vm4291_vm13 = vcmp.ne.s16.totalorder %v4194_v17, 0  ;;  %vm12789_vm8 = vmand %vm12751_vm5, %vm16692_vm14  ;;  %v4307_v14 = vsel %vm4290_vm10, %v4066_v37, 0  ;;  %v4195_v53 = vrot.slane %v16698_v38, 4  ;;  %v16701_v50 = vshll.u32 %v16700_v49, 16  ;;  %v16703_v32 = vld [vmem:[#allocation90_spill] sm:$0xff]  ;;  %v16717_v26 = vld [vmem:[#allocation103_spill] sm:$0xff]  ;;  %7648 = vmatprep.subr.bf16.mxu0 %v7905_v10 }
 0x2a0   :  { %v4308_v61 = vsel %vm4291_vm13, %v4067_v15, 0  ;;  %vm3816_vm7 = vmpackc.low %vm12718_vm6, %vm12718_vm6  ;;  %7619 = vmatmul.mubr.bf16.vlgmr.msra.gmra.mxu1 %v16697_v6  ;;  %v4204_v36 = vrot.slane %v16699_v28, 4  ;;  %vm16702_vm4 = vsmask.f32 7424  ;;  %v4393_v8 = vor.u32 %v4391_v56, %v4389_v52  ;;  %v16718_v3 = vld [vmem:[#allocation98_spill] sm:$0xff]  ;;  %v16723_v49 = vld [vmem:[#allocation99_spill] sm:$0xff] }
 0x2a1   :  { %v4202_v25 = vor.u32 %v16701_v50, %v16699_v28  ;;  %vm3817_vm0 = vmpackc.low %vm12778_vm12, %vm12778_vm12  ;;  %7622 = vmatprep.mubr.bf16.mxu1 %v7014_v19  ;;  %v4390_v11 = vsel %vm16702_vm4, %v4385_v33, %v4389_v52  ;;  %v7030_v15 = vcombine.low %v4307_v14, %v4308_v61  ;;  %v16705_v37 = vshll.u32 %v16704_v0, 16  ;;  %v16724_v50 = vld [vmem:[#allocation37_spill] sm:$0xff]  ;;  %v4071_v0 = vld [vmem:[#allocation2 + $0x30] sm:$0xf] }
 0x2a2   :  { %vm3818_vm3 = vmpackc.low %vm12789_vm8, %vm12789_vm8  ;;  %vm16706_vm5 = vsmask.f32 4352  ;;  %v12836_v41 = vsel %vm3815_vm1, %v12302_v1, 0  ;;  %v12844_v19 = vsel %vm3816_vm7, %v12320_v18, 0  ;;  %vm16707_vm11 = vcmp.ge.s32.totalorder %v10527_v5, 0  ;;  %7649 = vmatpush3.bf16.msra.mxu0 %v7905_v10  ;;  %v16737_v38 = vld [vmem:[#allocation123_spill] sm:$0xff] }
 0x2a3   :  { %v4211_v63 = vor.u32 %v16705_v37, %v16703_v32  ;;  %v3603_v4 = vsel %vm16706_vm5, %v12658_v2, %v3602_v39  ;;  %v4203_v27 = vsel %vm11759_vm15, %v4195_v53, %v4202_v25  ;;  %v16708_v2 = vld [vmem:[#allocation101_spill] sm:$0xff]  ;;  %v4395_v1 = vshll.u32 %v7030_v15, 16  ;;  %v4070_v53 = vld [vmem:[#allocation2 + $0x2c] sm:$0xf] }
 0x2a4   :  { %vm16709_vm13 = vnez %v16708_v2  ;;  %vm4292_vm9 = vcmp.ne.s16.totalorder %v4203_v27, 0  ;;  %v12864_v18 = vsel %vm3817_vm0, %v12326_v16, 0  ;;  %vm16712_vm6 = vcmp.ge.s32.totalorder %v10552_v44, 0  ;;  %7599 = vmatmul.mubr.bf16.gmra.mxu0 %v3603_v4  ;;  %v4073_v62 = vld [vmem:[#allocation2 + $0x38] sm:$0xf] }
 0x2a5   :  { %vm12850_vm14 = vmand %vm16709_vm13, %vm16707_vm11  ;;  %v4212_v17 = vsel %vm11759_vm15, %v4204_v36, %v4211_v63  ;;  %vm16714_vm1 = vnez %v16713_v12  ;;  %v4309_v56 = vsel %vm4292_vm9, %v4068_v35, 0  ;;  %v4399_v20 = vshrl.u32 %v7030_v15, 16  ;;  %v12913_v15 = vpop.f32.mrf.mxu0  ;;  %7650 = vmatprep.mubr.bf16.mxu0 %v4390_v11 }
 0x2a6   :  { %vm12870_vm10 = vmand %vm16714_vm1, %vm16712_vm6  ;;  %vm4293_vm7 = vcmp.ne.s16.totalorder %v4212_v17, 0  ;;  %v12883_v16 = vsel %vm3818_vm3, %v12348_v21, 0  ;;  %v4397_v7 = vrot.slane %v4395_v1, 1  ;;  %v4213_v61 = vrot.slane %v16703_v32, 4 }
 0x2a7   :  { %v4310_v33 = vsel %vm4293_vm7, %v4069_v22, 0  ;;  %v16719_v6 = vshll.u32 %v16718_v3, 16  ;;  %vm16720_vm12 = vcmp.le.s32.totalorder %v10527_v5, 7  ;;  %v7017_v23 = vcombine.low %v12836_v41, %v12844_v19  ;;  %v16733_v41 = vld [vmem:[#allocation54_spill] sm:$0xff]  ;;  %v16734_v19 = vld [vmem:[#allocation111_spill] sm:$0xff]  ;;  %v16740_v5 = vld [vmem:[#allocation73_spill] sm:$0xff] }
 0x2a8   :  { %vm12895_vm0 = vmand %vm12850_vm14, %vm16720_vm12  ;;  %v7031_v21 = vcombine.low %v4309_v56, %v4310_v33  ;;  %v4222_v28 = vrot.slane %v16717_v26, 4  ;;  %v16725_v25 = vshll.u32 %v16724_v50, 16  ;;  %vm16726_vm8 = vcmp.le.s32.totalorder %v10552_v44, 7  ;;  %v16730_v44 = vld [vmem:[#allocation120_spill] sm:$0xff]  ;;  %7623 = vmatmul.mubr.bf16.gmra.mxu1 %v7015_v9  ;;  %v16731_v9 = vld [vmem:[#allocation115_spill] sm:$0xff] }
 0x2a9   :  { %v4220_v14 = vor.u32 %v16719_v6, %v16717_v26  ;;  %vm12909_vm4 = vmand %vm12870_vm10, %vm16726_vm8  ;;  %vm16729_vm3 = vsmask.f32 7424  ;;  %v7018_v32 = vcombine.low %v12864_v18, %v12883_v16  ;;  %v4240_v63 = vrot.slane %v16730_v44, 4  ;;  %7626 = vmatprep.mubr.bf16.mxu1 %v7016_v51  ;;  %v12944_v51 = vpop.f32.mrf.mxu0 }
 0x2aa   :  { %v4229_v36 = vor.u32 %v16725_v25, %v16723_v49  ;;  %v4398_v35 = vsel %vm16729_vm3, %v4393_v8, %v4397_v7  ;;  %v4403_v4 = vshll.u32 %v7031_v21, 16  ;;  %v4231_v11 = vrot.slane %v16723_v49, 4  ;;  %vm3819_vm11 = vmpackc.low %vm12895_vm0, %vm12895_vm0  ;;  %v12930_v8 = vpop.f32.mrf.mxu1 }
 0x2ab   :  { %v4221_v37 = vsel %vm11759_vm15, %v4213_v61, %v4220_v14  ;;  %v16732_v22 = vshll.u32 %v16731_v9, 16  ;;  %v16735_v2 = vshll.u32 %v16734_v19, 16  ;;  %vm3820_vm14 = vmpackc.low %vm12909_vm4, %vm12909_vm4  ;;  %v4401_v1 = vor.u32 %v4399_v20, %v4397_v7  ;;  %v12965_v33 = vpop.f32.mrf.mxu0 }
 0x2ac   :  { %v4230_v59 = vsel %vm11759_vm15, %v4222_v28, %v4229_v36  ;;  %vm4294_vm5 = vcmp.ne.s16.totalorder %v4221_v37, 0  ;;  %v4405_v17 = vrot.slane %v4403_v4, 1  ;;  %v4407_v60 = vshrl.u32 %v7031_v21, 16  ;;  %v12946_v12 = vpop.f32.mrf.mxu1  ;;  %vm16736_vm9 = vmmov %vm16729_vm3  ;;  %7651 = vmatmul.mubr.bf16.vlgmr.msra.gmra.mxu0 %v4398_v35  ;;  %v16738_v21 = vld [vmem:[#allocation76_spill] sm:$0xff]  ;;  %v4074_v36 = vld [vmem:[#allocation2 + $0x3c] sm:$0xf] }
 0x2ad   :  { %vm4295_vm13 = vcmp.ne.s16.totalorder %v4230_v59, 0  ;;  %v4311_v54 = vsel %vm4294_vm5, %v4070_v53, 0  ;;  %v4238_v27 = vor.u32 %v16732_v22, %v16730_v44  ;;  %v4247_v52 = vor.u32 %v16735_v2, %v16733_v41  ;;  %v4075_v4 = vld [vmem:[#allocation2 + $0x40] sm:$0xf]  ;;  %vm16743_vm10 = vmmov %vm16729_vm3 }
 0x2ae   :  { %v4312_v18 = vsel %vm4295_vm13, %v4071_v0, 0  ;;  %v3835_v20 = vsel %vm3819_vm11, %v12358_v30, 0  ;;  %v4406_v7 = vsel %vm16736_vm9, %v4401_v1, %v4405_v17  ;;  %v3836_v10 = vsel %vm3820_vm14, %v12663_v34, 0  ;;  %v12972_v50 = vpop.f32.mrf.mxu1  ;;  %v16741_v0 = vld [vmem:[#allocation48_spill] sm:$0xff]  ;;  %vm16745_vm8 = vmmov %vm16729_vm3 }
 0x2af   :  { %v7032_v39 = vcombine.low %v4311_v54, %v4312_v18  ;;  %v4239_v56 = vsel %vm11759_vm15, %v4231_v11, %v4238_v27  ;;  %v4248_v16 = vsel %vm11759_vm15, %v4240_v63, %v4247_v52  ;;  %v4409_v61 = vor.u32 %v4407_v60, %v4405_v17  ;;  %7654 = vmatprep.mubr.bf16.mxu0 %v4406_v7  ;;  %v4076_v27 = vld [vmem:[#allocation2 + $0x44] sm:$0xf]  ;;  %v4077_v18 = vld [vmem:[#allocation2 + $0x48] sm:$0xf]  ;;  %vm16746_vm11 = vmmov %vm16745_vm8 }
 0x2b0   :  { %vm4296_vm6 = vcmp.ne.s16.totalorder %v4239_v56, 0  ;;  %vm4297_vm1 = vcmp.ne.s16.totalorder %v4248_v16, 0  ;;  %v4249_v30 = vrot.slane %v16733_v41, 4  ;;  %v16739_v53 = vshll.u32 %v16738_v21, 16  ;;  %7627 = vmatmul.mubr.bf16.gmra.mxu1 %v7017_v23  ;;  %v12991_v19 = vpop.f32.mrf.mxu1  ;;  %v4078_v56 = vld [vmem:[#allocation2 + $0x4c] sm:$0x1]  ;;  %vm16747_vm13 = vmmov %vm16745_vm8 }
 0x2b1   :  { %v4411_v26 = vshll.u32 %v7032_v39, 16  ;;  %v4313_v3 = vsel %vm4296_vm6, %v4072_v46, 0  ;;  %v4314_v6 = vsel %vm4297_vm1, %v4073_v62, 0  ;;  %v4258_v49 = vrot.slane %v16737_v38, 4  ;;  %v12984_v46 = vpop.f32.mrf.mxu0  ;;  %7630 = vmatprep.mubr.bf16.mxu1 %v7018_v32  ;;  %vm16748_vm14 = vmmov %vm16745_vm8 }
 0x2b2   :  { %v7033_v14 = vcombine.low %v4313_v3, %v4314_v6  ;;  %v4256_v28 = vor.u32 %v16739_v53, %v16737_v38  ;;  %v4415_v25 = vshrl.u32 %v7032_v39, 16  ;;  %v16742_v37 = vshll.u32 %v16741_v0, 16 }
 0x2b3   :  { %v4413_v34 = vrot.slane %v4411_v26, 1  ;;  %v4274_v35 = vor.u32 %v4272_v45, %v12735_v58  ;;  %v4267_v11 = vrot.slane %v16740_v5, 4  ;;  %v4276_v54 = vrot.slane %v12735_v58, 4  ;;  %v12998_v60 = vpop.f32.mrf.mxu0 }
 0x2b4   :  { %v4265_v44 = vor.u32 %v16742_v37, %v16740_v5  ;;  %v4419_v63 = vshll.u32 %v7033_v14, 16  ;;  %v4257_v59 = vsel %vm11759_vm15, %v4249_v30, %v4256_v28  ;;  %v16744_v32 = vshll.u32 %v11685_v47, 16 }
 0x2b5   :  { %v4414_v9 = vsel %vm16743_vm10, %v4409_v61, %v4413_v34  ;;  %v4417_v22 = vor.u32 %v4415_v25, %v4413_v34  ;;  %vm4298_vm7 = vcmp.ne.s16.totalorder %v4257_v59, 0  ;;  %v4275_v41 = vsel %vm11759_vm15, %v4267_v11, %v4274_v35  ;;  %v1130_v61 = vpop.f32.mrf.mxu1  ;;  %v853_v38 = vpop.f32.mrf.mxu0 }
 0x2b6   :  { %v4266_v43 = vsel %vm11759_vm15, %v4258_v49, %v4265_v44  ;;  %v4421_v45 = vrot.slane %v4419_v63, 1  ;;  %v4315_v23 = vsel %vm4298_vm7, %v4074_v36, 0  ;;  %v4283_v2 = vor.u32 %v16744_v32, %v12063_v55  ;;  %7655 = vmatmul.mubr.bf16.gmra.mxu0 %v4414_v9 }
 0x2b7   :  { %vm4299_vm12 = vcmp.ne.s16.totalorder %v4266_v43, 0  ;;  %vm4300_vm0 = vcmp.ne.s16.totalorder %v4275_v41, 0  ;;  %v4285_v52 = vrot.slane %v12063_v55, 4  ;;  %v7019_v16 = vcombine.low %v3835_v20, %v3836_v10  ;;  %v7404_v44 = vpop.f32.mrf.mxu0 }
 0x2b8   :  { %v4316_v58 = vsel %vm4299_vm12, %v4075_v4, 0  ;;  %v4422_v1 = vsel %vm16745_vm8, %v4417_v22, %v4421_v45  ;;  %v4284_v62 = vsel %vm11759_vm15, %v4276_v54, %v4283_v2  ;;  %v4317_v39 = vsel %vm4300_vm0, %v4076_v27, 0  ;;  %v7436_v63 = vpop.f32.mrf.mxu1 }
 0x2b9   :  { %v7034_v17 = vcombine.low %v4315_v23, %v4316_v58  ;;  %vm4302_vm4 = vcmp.ne.s16.totalorder %v4285_v52, 0  ;;  %v4423_v7 = vshrl.u32 %v7033_v14, 16  ;;  %vm4301_vm3 = vcmp.ne.s16.totalorder %v4284_v62, 0  ;;  %7658 = vmatprep.mubr.bf16.mxu0 %v4422_v1  ;;  %7631 = vmatmul.mubr.bf16.gmra.mxu1 %v7019_v16  ;;  %v866_v35 = vpop.f32.mrf.mxu0 }
 0x2ba   :  { %v4318_v55 = vsel %vm4301_vm3, %v4077_v18, 0  ;;  %v4319_v30 = vsel %vm4302_vm4, %v4078_v56, 0  ;;  %v1131_v21 = vadd.f32 %v1130_v61, %v853_v38  ;;  %vm4734_vm5 = vcmask 519168   ;;  %v1143_v59 = vpop.f32.mrf.mxu1 }
 0x2bb   :  { %v4427_v47 = vshll.u32 %v7034_v17, 16  ;;  %v4425_v26 = vor.u32 %v4423_v7, %v4421_v45  ;;  %v7035_v6 = vcombine.low %v4317_v39, %v4318_v55  ;;  %v4431_v28 = vshrl.u32 %v7034_v17, 16  ;;  %4735 = vst.msk [vmem:[#allocation4] sm:$0xf] %vm4734_vm5, %v15638_v13  ;;  %4736 = vst.msk [vmem:[#allocation4 + $0x14] sm:$0xf] %vm4734_vm5, %v15638_v13  ;;  %v7405_v4 = vpop.f32.mrf.mxu0  ;;  %v13021_v17 = vpop.permute.xlu1 %4815 }
 0x2bc   :  { %v7036_v20 = vcombine.low %v4319_v30, %v4319_v30  ;;  %v7437_v11 = vpop.f32.mrf.mxu1  ;;  %v4813_v39 = vpop.permute.xlu0 %4812  ;;  %v16751_v30 = vmov 0  ;;  %vm4849_vm5 = vcmp.le.s32.totalorder %v13021_v17, 4  ;;  %vm16770_vm15 = vcmp.ge.s32.totalorder %v13021_v17, 1 }
 0x2bd   :  { %v4429_v3 = vrot.slane %v4427_v47, 1  ;;  %v4435_v49 = vshll.u32 %v7035_v6, 16  ;;  %v4439_v25 = vshrl.u32 %v7035_v6, 16  ;;  %v869_v54 = vpop.f32.mrf.mxu0  ;;  %vm4844_vm9 = vcmp.ge.s32.totalorder %v4813_v39, 1 }
 0x2be   :  { %v4443_v36 = vshll.u32 %v7036_v20, 16  ;;  %v1146_v9 = vpop.f32.mrf.mxu1  ;;  %vm4848_vm6 = vcmp.le.s32.totalorder %v4813_v39, 4  ;;  %vm5424_vm1 = vcmp.ge.s32.totalorder %v4813_v39, 0  ;;  %vm5428_vm10 = vcmp.le.s32.totalorder %v4813_v39, 3 }
 0x2bf   :  { %v4430_v53 = vsel %vm16746_vm11, %v4425_v26, %v4429_v3  ;;  %v4433_v10 = vor.u32 %v4431_v28, %v4429_v3  ;;  %v4437_v14 = vrot.slane %v4435_v49, 1  ;;  %v13007_v22 = vadd.f32 %v1146_v9, %v869_v54  ;;  %v13027_v7 = vpop.permute.xlu1 %4828  ;;  %vm13033_vm0 = vmand %vm4844_vm9, %vm4848_vm6  ;;  %v7912_v9 = vld [vmem:[%s15063_s8 + $0x48] sm:$0xff]  }
 0x2c0   :  { %7659 = vmatmul.mubr.bf16.gmra.mxu0 %v4430_v53  ;;  %v4445_v0 = vrot.slane %v4443_v36, 1  ;;  %16750 = vst [vmem:[#allocation57_spill] sm:$0xff] %v13027_v7  ;;  %vm5924_vm7 = vcmp.ge.s32.totalorder %v4813_v39, 4294967295  ;;  %vm5928_vm12 = vcmp.le.s32.totalorder %v4813_v39, 2  ;;  %v4819_v26 = vpop.permute.xlu0 %4818  ;;  %v1152_v3 = vadd.f32 %v7436_v63, %v7404_v44  ;;  %vm13041_vm3 = vmand %vm5424_vm1, %vm5428_vm10 }
 0x2c1   :  { %v4438_v34 = vsel %vm16747_vm13, %v4433_v10, %v4437_v14  ;;  %v4441_v5 = vor.u32 %v4439_v25, %v4437_v14  ;;  %v16752_v30 = vsel %vm13033_vm0, 4294967295, %v16751_v30  ;;  %vm4856_vm8 = vcmp.ge.s32.totalorder %v13027_v7, 1  ;;  %vm13049_vm11 = vmand %vm5924_vm7, %vm5928_vm12 }
 0x2c2   :  { %7662 = vmatprep.mubr.bf16.mxu0 %v4438_v34  ;;  %v1144_v28 = vadd.f32 %v1143_v59, %v866_v35  ;;  %v16756_v10 = vmov 0  ;;  %vm4846_vm13 = vcmp.ge.s32.totalorder %v4819_v26, 1  ;;  %vm13061_vm9 = vmand %vm13033_vm0, %vm4856_vm8  ;;  %v16763_v44 = vmov 0 }
 0x2c3   :  { %v4446_v37 = vsel %vm16748_vm14, %v4441_v5, %v4445_v0  ;;  %v16757_v10 = vsel %vm13049_vm11, 4294967295, %v16756_v10  ;;  %vm4850_vm14 = vcmp.le.s32.totalorder %v4819_v26, 4  ;;  %v13053_v14 = vpop.permute.xlu1 %4834  ;;  %v1155_v5 = vadd.f32 %v7437_v11, %v7405_v4  ;;  %vm13075_vm12 = vmand %vm13041_vm3, %vm4856_vm8  ;;  %v7911_v4 = vld [vmem:[%s15063_s8 + $0x50] sm:$0xff]  }
 0x2c4   :  { %16758 = vst [vmem:[#allocation31_spill] sm:$0xff] %v16757_v10  ;;  %16759 = vst [vmem:[#allocation93_spill] sm:$0xff] %v13053_v14  ;;  %v16764_v44 = vsel %vm13075_vm12, 4294967295, %v16763_v44  ;;  %vm5926_vm4 = vcmp.ge.s32.totalorder %v4819_v26, 4294967295  ;;  %vm5930_vm6 = vcmp.le.s32.totalorder %v4819_v26, 2  ;;  %v16765_v63 = vmov 0 }
 0x2c5   :  { %vm13083_vm1 = vmand %vm13049_vm11, %vm4856_vm8  ;;  %vm16773_vm2 = vcmp.le.s32.totalorder %v4819_v26, 3  ;;  %vm16777_vm10 = vcmp.le.s32.totalorder %v13027_v7, 4  ;;  %v16803_v53 = vmov 0  ;;  %v16881_v54 = vmov 0 }
 0x2c6   :  { %v16766_v63 = vsel %vm13083_vm1, 4294967295, %v16765_v63  ;;  %vm13089_vm7 = vmand %vm4846_vm13, %vm4850_vm14  ;;  %vm16774_vm1 = vcmp.ge.s32.totalorder %v4819_v26, 0  ;;  %vm15410_vm14 = vcmp.ge.s32.totalorder %v13053_v14, 4294967295  ;;  %v16869_v26 = vmov 0 }
 0x2c7   :  { %vm13102_vm8 = vmand %vm16770_vm15, %vm4849_vm5  ;;  %vm16780_vm15 = vcmp.ge.s32.totalorder %v13027_v7, 4294967295 }
 0x2c8   :  { %7663 = vmatmul.mubr.bf16.gmra.mxu0 %v4446_v37  ;;  %vm13108_vm13 = vmand %vm16774_vm1, %vm16773_vm2 }
 0x2c9   :  { %vm13117_vm12 = vmand %vm13061_vm9, %vm16777_vm10  ;;  %vm16788_vm9 = vcmp.ge.s32.totalorder %v13053_v14, 1 }
 0x2ca   :  { %vm13125_vm5 = vmand %vm13033_vm0, %vm16780_vm15 }
 0x2cb   :  { %vm13129_vm2 = vmand %vm5926_vm4, %vm5930_vm6 }
 0x2cc   :  { %vm13142_vm1 = vmand %vm13089_vm7, %vm16788_vm9 }
 0x2cd   :  { %vm16792_vm6 = vmmov %vm16780_vm15 }
 0x2ce   :  { %vm13153_vm10 = vmand %vm13041_vm3, %vm16792_vm6 }
 0x2cf   :  { %vm16795_vm15 = vmmov %vm16792_vm6  ;;  %vm16801_vm6 = vcmp.le.s32.totalorder %v13027_v7, 4 }
 0x2d0   :  { %vm13161_vm9 = vmand %vm13049_vm11, %vm16795_vm15  ;;  %vm16802_vm15 = vnez %v16764_v44 }
 0x2d1   :  { %vm13169_vm4 = vmand %vm13089_vm7, %vm15410_vm14  ;;  %vm16816_vm14 = vcmp.ge.s32.totalorder %v13021_v17, 0 }
 0x2d2   :  { %vm13180_vm11 = vmand %vm16802_vm15, %vm16801_vm6  ;;  %vm16807_vm15 = vcmp.ge.s32.totalorder %v13053_v14, 1 }
 0x2d3   :  { %v16804_v53 = vsel %vm13180_vm11, 4294967295, %v16803_v53  ;;  %vm13201_vm3 = vmand %vm13108_vm13, %vm16807_vm15 }
 0x2d4   :  { %vm16811_vm11 = vmmov %vm16807_vm15  ;;  %vm16815_vm15 = vcmp.le.s32.totalorder %v13021_v17, 3 }
 0x2d5   :  { %vm13214_vm6 = vmand %vm13129_vm2, %vm16811_vm11 }
 0x2d6   :  { %vm13227_vm0 = vmand %vm16816_vm14, %vm16815_vm15  ;;  %vm16823_vm14 = vcmp.ge.s32.totalorder %v13053_v14, 0 }
 0x2d7   :  { %vm13250_vm15 = vmand %vm13089_vm7, %vm16823_vm14  ;;  %vm16830_vm7 = vcmp.le.s32.totalorder %v13027_v7, 4  ;;  %vm16831_vm14 = vnez %v16766_v63 }
 0x2d8   :  { %v16825_v42 = vsel %vm13250_vm15, 4294967295, %v16824_v42  ;;  %vm16837_vm15 = vcmp.ge.s32.totalorder %v13053_v14, 4294967295 }
 0x2df   :  { %v7408_v43 = vpop.f32.mrf.mxu0 }
 0x2e1   :  { %v882_v45 = vpop.f32.mrf.mxu0 }
 0x2e3   :  { %v7409_v23 = vpop.f32.mrf.mxu0 }
 0x2e5   :  { %v885_v27 = vpop.f32.mrf.mxu0 }
 0x2f1   :  { %v13009_v41 = vpop.f32.mrf.mxu0 }
 0x2f3   :  { %v13011_v58 = vpop.f32.mrf.mxu0 }
 0x2f5   :  { %v13013_v32 = vpop.f32.mrf.mxu0 }
 0x2f7   :  { %v13015_v2 = vpop.f32.mrf.mxu0 }
 0x2ff   :  { %v13017_v52 = vpop.f32.mrf.mxu0 }
 0x301   :  { %v13019_v1 = vpop.f32.mrf.mxu0 }
 0x303   :  { %v13023_v18 = vpop.f32.mrf.mxu0 }
 0x305   :  { %v1704_v62 = vpop.f32.mrf.mxu0 }
 0x306   :  { %v13025_v56 = vadd.f32 %v1704_v62, %v1131_v21 }
 0x307   :  { %v7440_v16 = vpop.f32.mrf.mxu1 }
 0x308   :  { %16749 = vst [vmem:[#allocation63_spill] sm:$0xff] %v13025_v56  ;;  %v13029_v47 = vadd.f32 %v7440_v16, %v7408_v43  ;;  %v7910_v16 = vld [vmem:[%s15063_s8 + $0x20] sm:$0xff]  }
 0x309   :  { %v1159_v61 = vpop.f32.mrf.mxu1 }
 0x30a   :  { %v13031_v55 = vadd.f32 %v1159_v61, %v882_v45  ;;  %v16778_v45 = vmov 0  ;;  %v13146_v61 = vpop.permute.xlu0 %4831 }
 0x30b   :  { %v7441_v6 = vpop.f32.mrf.mxu1  ;;  %v16779_v45 = vsel %vm13117_vm12, 4294967295, %v16778_v45  ;;  %16791 = vst [vmem:[#allocation97_spill] sm:$0xff] %v13146_v61  ;;  %vm16826_vm11 = vcmp.ge.s32.totalorder %v13146_v61, 1 }
 0x30c   :  { %v13038_v21 = vadd.f32 %v7441_v6, %v7409_v23  ;;  %v16849_v23 = vmov 0 }
 0x30d   :  { %v7468_v38 = vpop.f32.mrf.mxu0  ;;  %v1162_v20 = vpop.f32.mrf.mxu1 }
 0x30e   :  { %v13045_v49 = vadd.f32 %v7468_v38, %v1152_v3  ;;  %v13055_v25 = vadd.f32 %v1162_v20, %v885_v27  ;;  %v16783_v27 = vmov 0  ;;  %v7906_v20 = vld [vmem:[%s15063_s8 + $0x38] sm:$0xff]   ;;  %v7914_v3 = vld [vmem:[%s15063_s8 + $0x40] sm:$0xff]  }
 0x30f   :  { %v1717_v34 = vpop.f32.mrf.mxu0  ;;  %v13067_v37 = vpop.f32.mrf.mxu1  ;;  %v16784_v27 = vsel %vm13129_vm2, 4294967295, %v16783_v27  ;;  %7666 = vmatprep.subr.bf16.mxu1 %v7906_v20 }
 0x310   :  { %16755 = vst [vmem:[#allocation95_spill] sm:$0xff] %v13045_v49  ;;  %v13065_v0 = vadd.f32 %v1717_v34, %v1144_v28  ;;  %16785 = vst [vmem:[#allocation43_spill] sm:$0xff] %v16784_v27  ;;  %7667 = vmatpush3.bf16.msra.mxu1 %v7906_v20  ;;  %v16820_v20 = vmov 0 }
 0x311   :  { %v7469_v35 = vpop.f32.mrf.mxu0  ;;  %v13096_v11 = vpop.f32.mrf.mxu1 }
 0x312   :  { %16762 = vst [vmem:[#allocation36_spill] sm:$0xff] %v13065_v0  ;;  %v13094_v59 = vadd.f32 %v7469_v35, %v1155_v5  ;;  %v7907_v5 = vld [vmem:[%s15063_s8 + $0x30] sm:$0xff]   ;;  %v16812_v35 = vmov 0  ;;  %v16859_v0 = vmov 0 }
 0x313   :  { %v1720_v43 = vpop.f32.mrf.mxu0  ;;  %v13136_v39 = vpop.f32.mrf.mxu1  ;;  %v16813_v35 = vsel %vm13214_vm6, 4294967295, %v16812_v35  ;;  %vm16819_vm6 = vcmp.ge.s32.totalorder %v13053_v14, 4294967295  ;;  %7668 = vmatprep.subr.bf16.mxu1 %v7907_v5 }
 0x314   :  { %16769 = vst [vmem:[#allocation107_spill] sm:$0xff] %v13094_v59  ;;  %v13134_v62 = vadd.f32 %v1720_v43, %v13007_v22  ;;  %16787 = vst [vmem:[#allocation104_spill] sm:$0xff] %v13136_v39  ;;  %7669 = vmatpush3.bf16.msra.mxu1 %v7907_v5  ;;  %v16846_v5 = vmov 0 }
 0x315   :  { %v13173_v38 = vpop.f32.mrf.mxu1  ;;  %7670 = vmatprep.subr.bf16.mxu1 %v7908_v40 }
 0x316   :  { %16786 = vst [vmem:[#allocation49_spill] sm:$0xff] %v13134_v62  ;;  %v7472_v6 = vpop.f32.mrf.mxu0  ;;  %16800 = vst [vmem:[#allocation55_spill] sm:$0xff] %v13173_v38 }
 0x317   :  { %v13185_v28 = vadd.f32 %v7472_v6, %v13029_v47  ;;  %v13191_v36 = vpop.f32.mrf.mxu1  ;;  %v16808_v47 = vmov 0 }
 0x318   :  { %v1733_v34 = vpop.f32.mrf.mxu0  ;;  %16806 = vst [vmem:[#allocation62_spill] sm:$0xff] %v13191_v36  ;;  %v16809_v47 = vsel %vm13201_vm3, 4294967295, %v16808_v47  ;;  %vm13236_vm3 = vmand %vm13129_vm2, %vm16819_vm6  ;;  %7671 = vmatpush3.bf16.msra.mxu1 %v7908_v40  ;;  %v16872_v40 = vmov 0 }
 0x319   :  { %16805 = vst [vmem:[#allocation64_spill] sm:$0xff] %v13185_v28  ;;  %v13207_v44 = vadd.f32 %v1733_v34, %v13031_v55  ;;  %v13218_v6 = vpop.f32.mrf.mxu1  ;;  %v7909_v55 = vld [vmem:[%s15063_s8 + $0x58] sm:$0xff]   ;;  %v16821_v20 = vsel %vm13236_vm3, 4294967295, %v16820_v20  ;;  %vm13259_vm2 = vmand %vm13102_vm8, %vm16826_vm11  ;;  %vm16834_vm11 = vcmp.le.s32.totalorder %v13053_v14, 4  ;;  %7672 = vmatprep.subr.bf16.mxu1 %v7910_v16  ;;  %v16909_v34 = vmov 0 }
 0x31a   :  { %v7473_v43 = vpop.f32.mrf.mxu0  ;;  %16814 = vst [vmem:[#allocation69_spill] sm:$0xff] %v13218_v6  ;;  %7690 = vmatprep.subr.bf16.mxu0 %v7909_v55  ;;  %vm13272_vm6 = vmand %vm16831_vm14, %vm16830_vm7 }
 0x31b   :  { %16810 = vst [vmem:[#allocation53_spill] sm:$0xff] %v13207_v44  ;;  %v13241_v10 = vadd.f32 %v7473_v43, %v13038_v21  ;;  %v16827_v21 = vmov 0  ;;  %v13263_v27 = vpop.f32.mrf.mxu1  ;;  %vm13288_vm3 = vmand %vm13108_vm13, %vm16837_vm15  ;;  %7691 = vmatpush3.bf16.msra.mxu0 %v7909_v55  ;;  %vm16842_vm15 = vcmp.le.s32.totalorder %v13027_v7, 2  ;;  %vm16848_vm13 = vcmp.ge.s32.totalorder %v13146_v61, 4294967295 }
 0x31c   :  { %v16828_v21 = vsel %vm13259_vm2, 4294967295, %v16827_v21  ;;  %v1736_v43 = vpop.f32.mrf.mxu0  ;;  %16829 = vst [vmem:[#allocation44_spill] sm:$0xff] %v13263_v27  ;;  %vm13280_vm2 = vmand %vm13142_vm1, %vm16834_vm11  ;;  %7692 = vmatprep.subr.bf16.mxu0 %v7911_v4  ;;  %vm16845_vm11 = vcmp.le.s32.totalorder %v13053_v14, 2  ;;  %7673 = vmatpush3.bf16.msra.mxu1 %v7910_v16 }
 0x31d   :  { %16822 = vst [vmem:[#allocation51_spill] sm:$0xff] %v13241_v10  ;;  %v13294_v63 = vadd.f32 %v1736_v43, %v13055_v25  ;;  %v13302_v59 = vpop.f32.mrf.mxu1  ;;  %vm13314_vm14 = vmand %vm13125_vm5, %vm16842_vm15  ;;  %v16843_v25 = vmov 0  ;;  %vm16853_vm5 = vcmp.le.s32.totalorder %v13021_v17, 2  ;;  %v16951_v10 = vmov 0 }
 0x31e   :  { %v13300_v62 = vpop.f32.mrf.mxu0  ;;  %16841 = vst [vmem:[#allocation65_spill] sm:$0xff] %v13302_v59  ;;  %v16844_v25 = vsel %vm13314_vm14, 4294967295, %v16843_v25  ;;  %vm13322_vm1 = vmand %vm13169_vm4, %vm16845_vm11  ;;  %vm16854_vm4 = vcmp.ge.s32.totalorder %v13021_v17, 4294967295  ;;  %v7913_v17 = vld [vmem:[%s15063_s8 + $0x18] sm:$0xff]  }
 0x31f   :  { %16840 = vst [vmem:[#allocation40_spill] sm:$0xff] %v13294_v63  ;;  %v16847_v5 = vsel %vm13322_vm1, 4294967295, %v16846_v5  ;;  %vm13331_vm12 = vmand %vm13102_vm8, %vm16848_vm13  ;;  %v16855_v63 = vmov 0  ;;  %vm16858_vm13 = vcmp.le.s32.totalorder %v13027_v7, 2  ;;  %7693 = vmatpush3.bf16.msra.mxu0 %v7911_v4  ;;  %v7916_v59 = vld [vmem:[%s15063_s8 + $0x98] sm:$0xff]   ;;  %7678 = vmatprep.subr.bf16.mxu1 %v7913_v17  ;;  %vm16919_vm1 = vcmp.le.s32.totalorder %v13146_v61, 4 }
 0x320   :  { %v16850_v23 = vsel %vm13331_vm12, 4294967295, %v16849_v23  ;;  %v13335_v55 = vpop.f32.mrf.mxu0  ;;  %v13337_v43 = vpop.f32.mrf.mxu1  ;;  %vm13346_vm15 = vmand %vm16854_vm4, %vm16853_vm5  ;;  %7694 = vmatprep.subr.bf16.mxu0 %v7912_v9 }
 0x321   :  { %16851 = vst [vmem:[#allocation105_spill] sm:$0xff] %v13335_v55  ;;  %16852 = vst [vmem:[#allocation117_spill] sm:$0xff] %v13337_v43  ;;  %v16856_v63 = vsel %vm13346_vm15, 4294967295, %v16855_v63  ;;  %v16862_v43 = vmov 0 }
 0x322   :  { %16857 = vst [vmem:[#allocation60_spill] sm:$0xff] %v16856_v63  ;;  %vm13354_vm11 = vmand %vm13153_vm10, %vm16858_vm13  ;;  %v13372_v22 = vpop.f32.mrf.mxu0  ;;  %v13374_v49 = vpop.f32.mrf.mxu1  ;;  %vm16871_vm10 = vcmp.ge.s32.totalorder %v13146_v61, 0 }
 0x323   :  { %v16860_v0 = vsel %vm13354_vm11, 4294967295, %v16859_v0  ;;  %vm16861_vm7 = vmmov %vm16858_vm13  ;;  %16865 = vst [vmem:[#allocation71_spill] sm:$0xff] %v13372_v22  ;;  %vm16874_vm11 = vcmp.ge.s32.totalorder %v13146_v61, 1  ;;  %7695 = vmatpush3.bf16.msra.mxu0 %v7912_v9  ;;  %vm16884_vm13 = vnez %v16821_v20  ;;  %v16891_v9 = vmov 0 }
 0x324   :  { %vm13362_vm12 = vmand %vm13161_vm9, %vm16861_vm7  ;;  %16866 = vst [vmem:[#allocation91_spill] sm:$0xff] %v13374_v49  ;;  %vm16867_vm9 = vcmp.le.s32.totalorder %v13053_v14, 4  ;;  %vm16868_vm7 = vnez %v16809_v47  ;;  %v13402_v4 = vpop.f32.mrf.mxu0  ;;  %v13404_v49 = vpop.f32.mrf.mxu1  ;;  %7696 = vmatprep.subr.bf16.mxu0 %v7914_v3  ;;  %v16895_v20 = vmov 0  ;;  %v16928_v47 = vmov 0 }
 0x325   :  { %v16863_v43 = vsel %vm13362_vm12, 4294967295, %v16862_v43  ;;  %vm13380_vm4 = vmand %vm16868_vm7, %vm16867_vm9  ;;  %16877 = vst [vmem:[#allocation78_spill] sm:$0xff] %v13402_v4  ;;  %vm16879_vm7 = vcmp.le.s32.totalorder %v13053_v14, 4  ;;  %vm16880_vm12 = vnez %v16813_v35 }
 0x326   :  { %v16870_v26 = vsel %vm13380_vm4, 4294967295, %v16869_v26  ;;  %vm13390_vm5 = vmand %vm13102_vm8, %vm16871_vm10  ;;  %16878 = vst [vmem:[#allocation82_spill] sm:$0xff] %v13404_v49  ;;  %v16885_v49 = vmov 0  ;;  %v13428_v4 = vpop.f32.mrf.mxu1 }
 0x327   :  { %v16873_v40 = vsel %vm13390_vm5, 4294967295, %v16872_v40  ;;  %vm13398_vm9 = vmand %vm13227_vm0, %vm16874_vm11  ;;  %vm16883_vm11 = vcmp.le.s32.totalorder %v13053_v14, 2  ;;  %16888 = vst [vmem:[#allocation32_spill] sm:$0xff] %v13428_v4  ;;  %7697 = vmatpush3.bf16.msra.mxu0 %v7914_v3 }
 0x328   :  { %vm13410_vm8 = vmand %vm16880_vm12, %vm16879_vm7  ;;  %vm16889_vm12 = vcmp.le.s32.totalorder %v13053_v14, 3  ;;  %vm16890_vm7 = vnez %v16825_v42  ;;  %v16898_v42 = vmov 0  ;;  %v13464_v16 = vpop.f32.mrf.mxu1  ;;  %7714 = vmatprep.subr.bf16.mxu0 %v7916_v59  ;;  %v16920_v59 = vmov 0 }
 0x329   :  { %v16882_v54 = vsel %vm13410_vm8, 4294967295, %v16881_v54  ;;  %vm13422_vm5 = vmand %vm16884_vm13, %vm16883_vm11  ;;  %vm16893_vm8 = vcmp.le.s32.totalorder %v13146_v61, 4  ;;  %vm16894_vm13 = vnez %v16828_v21  ;;  %16901 = vst [vmem:[#allocation108_spill] sm:$0xff] %v13464_v16 }
 0x32a   :  { %v16886_v49 = vsel %vm13422_vm5, 4294967295, %v16885_v49  ;;  %vm13434_vm10 = vmand %vm16890_vm7, %vm16889_vm12  ;;  %vm16897_vm7 = vcmp.le.s32.totalorder %v13053_v14, 2  ;;  %v13475_v14 = vpop.permute.xlu1 %4837  ;;  %v13500_v3 = vpop.f32.mrf.mxu1 }
 0x32b   :  { %v13426_v35 = vpop.f32.mrf.mxu0  ;;  %v16892_v9 = vsel %vm13434_vm10, 4294967295, %v16891_v9  ;;  %vm13442_vm11 = vmand %vm16894_vm13, %vm16893_vm8  ;;  %vm16902_vm13 = vcmp.ge.s32.totalorder %v13146_v61, 4294967295  ;;  %16905 = vst [vmem:[#allocation22_spill] sm:$0xff] %v13475_v14 }
 0x32c   :  { %16887 = vst [vmem:[#allocation77_spill] sm:$0xff] %v13426_v35  ;;  %v16896_v20 = vsel %vm13442_vm11, 4294967295, %v16895_v20  ;;  %v13446_v35 = vpop.permute.xlu0 %4821  ;;  %vm13458_vm10 = vmand %vm13288_vm3, %vm16897_vm7  ;;  %vm16906_vm3 = vnez %v16779_v45 }
 0x32d   :  { %v16899_v42 = vsel %vm13458_vm10, 4294967295, %v16898_v42  ;;  %v13462_v21 = vpop.f32.mrf.mxu0  ;;  %vm13471_vm5 = vmand %vm13227_vm0, %vm16902_vm13  ;;  %vm16908_vm13 = vcmp.ge.s32.totalorder %v13146_v61, 1  ;;  %16912 = vst [vmem:[#allocation52_spill] sm:$0xff] %v13500_v3  ;;  %v13527_v3 = vpop.f32.mrf.mxu1  ;;  %vm16949_vm11 = vcmp.le.s32.totalorder %v13446_v35, 4 }
 0x32e   :  { %16900 = vst [vmem:[#allocation26_spill] sm:$0xff] %v13462_v21  ;;  %vm16907_vm7 = vmpackc.low %vm16906_vm3, %vm16906_vm3  ;;  %vm16913_vm3 = vcmp.le.s32.totalorder %v13146_v61, 2 }
 0x32f   :  { %v4876_v28 = vsel %vm16907_vm7, 65537, %v15638_v13  ;;  %vm13493_vm8 = vmand %vm13346_vm15, %vm16908_vm13  ;;  %v13498_v45 = vpop.f32.mrf.mxu0  ;;  %vm16914_vm7 = vnez %v16850_v23  ;;  %vm16917_vm13 = vnez %v16860_v0  ;;  %16923 = vst [vmem:[#allocation46_spill] sm:$0xff] %v13527_v3  ;;  %v13560_v17 = vpop.f32.mrf.mxu1 }
 0x330   :  { %v16910_v34 = vsel %vm13493_vm8, 4294967295, %v16909_v34  ;;  %16911 = vst [vmem:[#allocation86_spill] sm:$0xff] %v13498_v45  ;;  %vm13506_vm0 = vmand %vm16914_vm7, %vm16913_vm3  ;;  %vm16918_vm8 = vnez %v16863_v43  ;;  %v4884_v45 = vshrl.u32 %v4876_v28, 16  ;;  %v4887_v4 = vshll.u32 %v4876_v28, 16 }
 0x331   :  { %vm13520_vm14 = vmand %vm13398_vm9, %vm16919_vm1  ;;  %v13525_v23 = vpop.f32.mrf.mxu0  ;;  %vm16924_vm7 = vnez %v16804_v53  ;;  %16934 = vst [vmem:[#allocation122_spill] sm:$0xff] %v13560_v17  ;;  %vm16960_vm4 = vnez %v16910_v34 }
 0x332   :  { %v16921_v59 = vsel %vm13520_vm14, 4294967295, %v16920_v59  ;;  %16922 = vst [vmem:[#allocation100_spill] sm:$0xff] %v13525_v23  ;;  %vm16925_vm10 = vmpackc.low %vm16924_vm7, %vm16924_vm7  ;;  %vm16939_vm7 = vnez %v16882_v54  ;;  %v13575_v23 = vpop.f32.mrf.mxu1  ;;  %vm5431_vm14 = vcmp.le.s32.totalorder %v13446_v35, 3  ;;  %v17002_v54 = vmov 0 }
 0x333   :  { %v13535_v21 = vsel %vm16925_vm10, 65537, %v15638_v13  ;;  %vm16927_vm1 = vmmov %vm16913_vm3  ;;  %vm16930_vm3 = vcmp.ge.s32.totalorder %v13146_v61, 4294967295  ;;  %16941 = vst [vmem:[#allocation124_spill] sm:$0xff] %v13575_v23 }
 0x334   :  { %16926 = vst [vmem:[#allocation35_spill] sm:$0xff] %v13535_v21  ;;  %vm13541_vm9 = vmand %vm13471_vm5, %vm16927_vm1  ;;  %vm16935_vm5 = vcmp.le.s32.totalorder %v13146_v61, 3  ;;  %vm16936_vm1 = vnez %v16873_v40  ;;  %v13589_v17 = vpop.f32.mrf.mxu1 }
 0x335   :  { %v16929_v47 = vsel %vm13541_vm9, 4294967295, %v16928_v47  ;;  %vm13549_vm12 = vmand %vm13346_vm15, %vm16930_vm3  ;;  %v13558_v53 = vpop.f32.mrf.mxu0  ;;  %16945 = vst [vmem:[#allocation112_spill] sm:$0xff] %v13589_v17  ;;  %vm16950_vm9 = vcmp.ge.s32.totalorder %v13446_v35, 1  ;;  %v5456_v17 = vshrl.u32 %v13535_v21, 16  ;;  %vm16959_vm15 = vcmp.le.s32.totalorder %v13146_v61, 4 }
 0x336   :  { %16933 = vst [vmem:[#allocation96_spill] sm:$0xff] %v13558_v53  ;;  %vm13566_vm3 = vmand %vm16936_vm1, %vm16935_vm5  ;;  %vm16948_vm1 = vnez %v16899_v42 }
 0x337   :  { %v13573_v3 = vpop.f32.mrf.mxu0  ;;  %vm16946_vm10 = vmpackc.low %vm13272_vm6, %vm13272_vm6  ;;  %v13715_v6 = vrot.slane %v5456_v17, 4 }
 0x338   :  { %16940 = vst [vmem:[#allocation23_spill] sm:$0xff] %v13573_v3  ;;  %v13597_v3 = vsel %vm16946_vm10, 65537, %v15638_v13  ;;  %vm16947_vm5 = vmpackc.low %vm13280_vm2, %vm13280_vm2  ;;  %vm16955_vm2 = vnez %v16844_v25  ;;  %v13647_v25 = vrot.slane %v4884_v45, 6 }
 0x339   :  { %v13587_v40 = vpop.f32.mrf.mxu0  ;;  %v4878_v53 = vsel %vm16947_vm5, 65537, %v15638_v13  ;;  %vm13613_vm6 = vmand %vm16950_vm9, %vm16949_vm11  ;;  %vm16957_vm11 = vnez %v16847_v5  ;;  %v5953_v5 = vshrl.u32 %v13597_v3, 16  ;;  %16983 = vst [vmem:[#allocation114_spill] sm:$0xff] %v13715_v6  ;;  %v5956_v36 = vshll.u32 %v13597_v3, 16 }
 0x33a   :  { %16944 = vst [vmem:[#allocation118_spill] sm:$0xff] %v13587_v40  ;;  %v16952_v10 = vsel %vm13613_vm6, 4294967295, %v16951_v10  ;;  %v13621_v40 = vpop.f32.mrf.mxu1  ;;  %vm16956_vm5 = vmpackc.low %vm16955_vm2, %vm16955_vm2  ;;  %vm16974_vm2 = vcmp.ge.s32.totalorder %v13475_v14, 1 }
 0x33b   :  { %v13619_v44 = vpop.f32.mrf.mxu0  ;;  %16954 = vst [vmem:[#allocation56_spill] sm:$0xff] %v13621_v40  ;;  %v13629_v56 = vsel %vm16956_vm5, 65537, %v15638_v13  ;;  %vm16958_vm9 = vmpackc.low %vm16957_vm11, %vm16957_vm11  ;;  %v13649_v40 = vrot.slane %v4887_v4, 7  ;;  %v13734_v3 = vrot.slane %v5953_v5, 6 }
 0x33c   :  { %16953 = vst [vmem:[#allocation88_spill] sm:$0xff] %v13619_v44  ;;  %v5237_v22 = vsel %vm16958_vm9, 65537, %v15638_v13  ;;  %vm13642_vm10 = vmand %vm16960_vm4, %vm16959_vm15  ;;  %vm16965_vm9 = vcmp.le.s32.totalorder %v13146_v61, 2  ;;  %v13667_v45 = vpop.f32.mrf.mxu1  ;;  %v4903_v61 = vshrl.u32 %v4878_v53, 16 }
 0x33d   :  { %16963 = vst [vmem:[#allocation102_spill] sm:$0xff] %v13647_v25  ;;  %16964 = vst [vmem:[#allocation113_spill] sm:$0xff] %v13649_v40  ;;  %v13665_v4 = vpop.f32.mrf.mxu0  ;;  %v4906_v25 = vshll.u32 %v4878_v53, 16  ;;  %v5265_v27 = vshll.u32 %v5237_v22, 16 }
 0x33e   :  { %vm13660_vm15 = vmand %vm13549_vm12, %vm16965_vm9  ;;  %16968 = vst [vmem:[#allocation116_spill] sm:$0xff] %v13665_v4  ;;  %vm16973_vm9 = vnez %v16921_v59  ;;  %v13712_v43 = vpop.f32.mrf.mxu1  ;;  %v4905_v5 = vrot.slane %v4903_v61, 6 }
 0x33f   :  { %16969 = vst [vmem:[#allocation58_spill] sm:$0xff] %v13667_v45  ;;  %vm16970_vm11 = vmpackc.low %vm16917_vm13, %vm16917_vm13  ;;  %v5262_v45 = vshrl.u32 %v5237_v22, 16  ;;  %v13710_v4 = vpop.f32.mrf.mxu0 }
 0x340   :  { %v13675_v40 = vsel %vm16970_vm11, 65537, %v15638_v13  ;;  %vm16972_vm12 = vmpackc.low %vm16918_vm8, %vm16918_vm8  ;;  %vm16977_vm8 = vnez %v16929_v47  ;;  %16981 = vst [vmem:[#allocation47_spill] sm:$0xff] %v13710_v4  ;;  %v13749_v17 = vpop.f32.mrf.mxu1 }
 0x341   :  { %16971 = vst [vmem:[#allocation70_spill] sm:$0xff] %v13675_v40  ;;  %v6291_v28 = vsel %vm16972_vm12, 65537, %v15638_v13  ;;  %vm13690_vm13 = vmand %vm13613_vm6, %vm16974_vm2  ;;  %vm16978_vm2 = vcmp.ge.s32.totalorder %v13446_v35, 0  ;;  %vm16984_vm12 = vnez %v16870_v26  ;;  %v13747_v21 = vpop.f32.mrf.mxu0  ;;  %v4908_v40 = vrot.slane %v4906_v25, 7 }
 0x342   :  { %vm13706_vm5 = vmand %vm16978_vm2, %vm5431_vm14  ;;  %16982 = vst [vmem:[#allocation121_spill] sm:$0xff] %v13712_v43  ;;  %vm16986_vm14 = vcmp.ge.s32.totalorder %v13475_v14, 4294967295  ;;  %v6296_v6 = vshrl.u32 %v6291_v28, 16  ;;  %v6299_v22 = vshll.u32 %v6291_v28, 16 }
 0x343   :  { %vm16985_vm11 = vmpackc.low %vm16984_vm12, %vm16984_vm12  ;;  %16989 = vst [vmem:[#allocation119_spill] sm:$0xff] %v13734_v3  ;;  %vm16996_vm12 = vcmp.ge.s32.totalorder %v13475_v14, 1  ;;  %v13779_v25 = vpop.f32.mrf.mxu0 }
 0x344   :  { %v5450_v38 = vsel %vm16985_vm11, 65537, %v15638_v13  ;;  %vm13728_vm2 = vmand %vm13613_vm6, %vm16986_vm14  ;;  %vm16990_vm11 = vcmp.le.s32.totalorder %v13475_v14, 4  ;;  %16993 = vst [vmem:[#allocation125_spill] sm:$0xff] %v13747_v21  ;;  %v5264_v21 = vrot.slane %v5262_v45, 5  ;;  %v13781_v45 = vpop.f32.mrf.mxu1 }
 0x345   :  { %vm13743_vm4 = vmand %vm13690_vm13, %vm16990_vm11  ;;  %16994 = vst [vmem:[#allocation80_spill] sm:$0xff] %v13749_v17  ;;  %v5267_v17 = vrot.slane %v5265_v27, 6  ;;  %v5472_v28 = vshll.u32 %v5450_v38, 16  ;;  %vm16999_vm11 = vnez %v16886_v49  ;;  %v13783_v27 = vrot.slane %v5956_v36, 7 }
 0x346   :  { %vm16995_vm14 = vmpackc.low %vm16939_vm7, %vm16939_vm7  ;;  %vm17001_vm7 = vcmp.le.s32.totalorder %v13475_v14, 2  ;;  %17004 = vst [vmem:[#allocation106_spill] sm:$0xff] %v13779_v25  ;;  %v5476_v43 = vshrl.u32 %v5450_v38, 16  ;;  %v13802_v36 = vrot.slane %v6296_v6, 5  ;;  %v13825_v42 = vpop.f32.mrf.mxu1  ;;  %v13829_v25 = vor.u32 %v4908_v40, %v4905_v5 }
 0x347   :  { %v5950_v3 = vsel %vm16995_vm14, 65537, %v15638_v13  ;;  %vm13761_vm13 = vmand %vm13706_vm5, %vm16996_vm12  ;;  %17005 = vst [vmem:[#allocation9_spill] sm:$0xff] %v13781_v45  ;;  %vm17007_vm12 = vnez %v16892_v9  ;;  %v13835_v23 = vor.u32 %v5267_v17, %v5264_v21  ;;  %v13837_v55 = vrot.slane %v5472_v28, 5 }
 0x348   :  { %vm17000_vm6 = vmpackc.low %vm16999_vm11, %vm16999_vm11  ;;  %17006 = vst [vmem:[#allocation14_spill] sm:$0xff] %v13783_v27  ;;  %v5972_v9 = vshrl.u32 %v5950_v3, 16  ;;  %v5975_v27 = vshll.u32 %v5950_v3, 16  ;;  %v17025_v40 = vmov 0  ;;  %v13849_v5 = vpop.f32.mrf.mxu1  ;;  %v13860_v17 = vrot.slane %v5476_v43, 4 }
 0x349   :  { %v6293_v61 = vsel %vm17000_vm6, 65537, %v15638_v13  ;;  %vm13775_vm14 = vmand %vm13728_vm2, %vm17001_vm7  ;;  %vm17010_vm2 = vnez %v16896_v20  ;;  %17012 = vst [vmem:[#allocation12_spill] sm:$0xff] %v13802_v36  ;;  %v13823_v20 = vpop.f32.mrf.mxu0  ;;  %v13827_v36 = vrot.slane %v6299_v22, 6 }
 0x34a   :  { %v17003_v54 = vsel %vm13775_vm14, 4294967295, %v17002_v54  ;;  %vm17008_vm6 = vmpackc.low %vm17007_vm12, %vm17007_vm12  ;;  %17018 = vst [vmem:[#allocation109_spill] sm:$0xff] %v13825_v42  ;;  %v6315_v3 = vshrl.u32 %v6293_v61, 16  ;;  %v6318_v45 = vshll.u32 %v6293_v61, 16  ;;  %vm15481_vm14 = vcmp.le.s32.totalorder %v13027_v7, 3 }
 0x34b   :  { %v13791_v49 = vsel %vm17008_vm6, 65537, %v15638_v13  ;;  %vm17011_vm11 = vmpackc.low %vm17010_vm2, %vm17010_vm2  ;;  %vm17015_vm2 = vcmp.le.s32.totalorder %v13475_v14, 4  ;;  %17019 = vst [vmem:[#allocation126_spill] sm:$0xff] %v13827_v36  ;;  %v13847_v22 = vpop.f32.mrf.mxu0  ;;  %vm17030_vm6 = vnez %v16752_v30  ;;  %v5974_v0 = vrot.slane %v5972_v9, 6 }
 0x34c   :  { %17009 = vst [vmem:[#allocation15_spill] sm:$0xff] %v13791_v49  ;;  %v4877_v4 = vsel %vm17011_vm11, 65537, %v15638_v13  ;;  %vm17013_vm12 = vmpackc.low %vm16948_vm1, %vm16948_vm1  ;;  %vm17029_vm1 = vcmp.ge.s32.totalorder %v13027_v7, 0  ;;  %v5977_v36 = vrot.slane %v5975_v27, 7  ;;  %v13890_v27 = vpop.f32.mrf.mxu1  ;;  %v6317_v9 = vrot.slane %v6315_v3, 5 }
 0x34d   :  { %v13810_v38 = vsel %vm17013_vm12, 65537, %v15638_v13  ;;  %vm13819_vm11 = vmand %vm13761_vm13, %vm17015_vm2  ;;  %17020 = vst [vmem:[#allocation110_spill] sm:$0xff] %v13829_v25  ;;  %v4893_v39 = vshrl.u32 %v4877_v4, 16  ;;  %vm17023_vm13 = vcmp.le.s32.totalorder %v13446_v35, 2  ;;  %vm17024_vm12 = vcmp.ge.s32.totalorder %v13446_v35, 4294967295 }
 0x34e   :  { %17014 = vst [vmem:[#allocation13_spill] sm:$0xff] %v13810_v38  ;;  %17021 = vst [vmem:[#allocation24_spill] sm:$0xff] %v13835_v23  ;;  %v5771_v35 = vshrl.u32 %v13810_v38, 16  ;;  %v4896_v28 = vshll.u32 %v4877_v4, 16  ;;  %v13888_v4 = vpop.f32.mrf.mxu0  ;;  %v6320_v30 = vrot.slane %v6318_v45, 6 }
 0x34f   :  { %17022 = vst [vmem:[#allocation38_spill] sm:$0xff] %v13837_v55  ;;  %vm13843_vm2 = vmand %vm17024_vm12, %vm17023_vm13  ;;  %vm15480_vm12 = vcmp.ge.s32.totalorder %v13475_v14, 0  ;;  %v4895_v3 = vrot.slane %v4893_v39, 6  ;;  %v13930_v39 = vpop.f32.mrf.mxu1 }
 0x350   :  { %v17026_v40 = vsel %vm13843_vm2, 4294967295, %v17025_v40  ;;  %17028 = vst [vmem:[#allocation79_spill] sm:$0xff] %v13849_v5  ;;  %vm13855_vm7 = vmand %vm17030_vm6, %vm17029_vm1  ;;  %v13928_v23 = vpop.f32.mrf.mxu0  ;;  %v13976_v45 = vor.u32 %v6320_v30, %v6317_v9 }
 0x351   :  { %17027 = vst [vmem:[#allocation83_spill] sm:$0xff] %v17026_v40  ;;  %17033 = vst [vmem:[#allocation42_spill] sm:$0xff] %v13860_v17  ;;  %v13961_v42 = vpop.f32.mrf.mxu1 }
 0x352   :  { %vm17034_vm13 = vmpackc.low %vm13506_vm0, %vm13506_vm0  ;;  %vm17036_vm0 = vcmp.ge.s32.totalorder %v13475_v14, 4294967295  ;;  %17039 = vst [vmem:[#allocation67_spill] sm:$0xff] %v13888_v4  ;;  %v13959_v16 = vpop.f32.mrf.mxu0  ;;  %v13965_v4 = vor.u32 %v5977_v36, %v5974_v0 }
 0x353   :  { %v5236_v61 = vsel %vm17034_vm13, 65537, %v15638_v13  ;;  %vm5447_vm6 = vmpackc.low %vm13819_vm11, %vm13819_vm11  ;;  %17040 = vst [vmem:[#allocation18_spill] sm:$0xff] %v13890_v27  ;;  %v13984_v0 = vpop.f32.mrf.mxu1 }
 0x354   :  { %vm17035_vm1 = vmpackc.low %vm16973_vm9, %vm16973_vm9  ;;  %v5252_v47 = vshrl.u32 %v5236_v61, 16  ;;  %v5255_v38 = vshll.u32 %v5236_v61, 16  ;;  %17050 = vst [vmem:[#allocation20_spill] sm:$0xff] %v13928_v23  ;;  %v4898_v61 = vrot.slane %v4896_v28, 7  ;;  %v13963_v23 = vrot.slane %v5771_v35, 7  ;;  %v13982_v36 = vpop.f32.mrf.mxu0 }
 0x355   :  { %v5449_v43 = vsel %vm17035_vm1, 65537, %v15638_v13  ;;  %vm13884_vm13 = vmand %vm13706_vm5, %vm17036_vm0  ;;  %vm17043_vm1 = vcmp.ge.s32.totalorder %v13475_v14, 1  ;;  %17051 = vst [vmem:[#allocation16_spill] sm:$0xff] %v13930_v39 }
 0x356   :  { %vm17041_vm9 = vmpackc.low %vm16977_vm8, %vm16977_vm8  ;;  %v5462_v49 = vshll.u32 %v5449_v43, 16  ;;  %v5466_v27 = vshrl.u32 %v5449_v43, 16  ;;  %17059 = vst [vmem:[#allocation17_spill] sm:$0xff] %v13963_v23  ;;  %v5254_v35 = vrot.slane %v5252_v47, 5  ;;  %v5257_v23 = vrot.slane %v5255_v38, 6  ;;  %v14012_v26 = vpop.f32.mrf.mxu0 }
 0x357   :  { %v13898_v59 = vsel %vm17041_vm9, 65537, %v15638_v13  ;;  %vm17042_vm5 = vmpackc.low %vm13642_vm10, %vm13642_vm10  ;;  %vm17047_vm10 = vcmp.ge.s32.totalorder %v13475_v14, 4294967295  ;;  %17060 = vst [vmem:[#allocation89_spill] sm:$0xff] %v13965_v4 }
 0x358   :  { %v5949_v53 = vsel %vm17042_vm5, 65537, %v15638_v13  ;;  %vm13910_vm0 = vmand %vm13843_vm2, %vm17043_vm1  ;;  %vm17053_vm5 = vcmp.le.s32.totalorder %v13475_v14, 2  ;;  %v5762_v39 = vshrl.u32 %v13898_v59, 16  ;;  %17064 = vst [vmem:[#allocation29_spill] sm:$0xff] %v13976_v45  ;;  %v13988_v25 = vrot.slane %v5462_v49, 5 }
 0x359   :  { %vm17046_vm8 = vmpackc.low %vm13660_vm15, %vm13660_vm15  ;;  %v5962_v5 = vshrl.u32 %v5949_v53, 16  ;;  %v5965_v63 = vshll.u32 %v5949_v53, 16  ;;  %v13990_v4 = vrot.slane %v5466_v27, 4  ;;  %v14014_v27 = vpop.f32.mrf.mxu1  ;;  %v5765_v6 = vshll.u32 %v13898_v59, 16 }
 0x35a   :  { %v6292_v44 = vsel %vm17046_vm8, 65537, %v15638_v13  ;;  %vm13924_vm9 = vmand %vm13843_vm2, %vm17047_vm10  ;;  %17066 = vst [vmem:[#allocation8_spill] sm:$0xff] %v13988_v25  ;;  %v14001_v30 = vrot.slane %v5762_v39, 7 }
 0x35b   :  { %vm17052_vm15 = vmpackc.low %vm13566_vm3, %vm13566_vm3  ;;  %vm17056_vm3 = vcmp.le.s32.totalorder %v13475_v14, 4  ;;  %v6305_v28 = vshrl.u32 %v6292_v44, 16  ;;  %v6308_v55 = vshll.u32 %v6292_v44, 16  ;;  %v13986_v44 = vor.u32 %v4898_v61, %v4895_v3  ;;  %17067 = vst [vmem:[#allocation66_spill] sm:$0xff] %v13990_v4  ;;  %v14049_v17 = vpop.f32.mrf.mxu1 }
 0x35c   :  { %v13938_v34 = vsel %vm17052_vm15, 65537, %v15638_v13  ;;  %vm13944_vm1 = vmand %vm13884_vm13, %vm17053_vm5  ;;  %vm15479_vm13 = vcmp.le.s32.totalorder %v13475_v14, 3  ;;  %17069 = vst [vmem:[#allocation59_spill] sm:$0xff] %v14001_v30  ;;  %v5964_v9 = vrot.slane %v5962_v5, 6  ;;  %v5967_v3 = vrot.slane %v5965_v63, 7  ;;  %v14047_v63 = vpop.f32.mrf.mxu0 }
 0x35d   :  { %vm13955_vm8 = vmand %vm13910_vm0, %vm17056_vm3  ;;  %17065 = vst [vmem:[#allocation33_spill] sm:$0xff] %v13986_v44  ;;  %vm17070_vm3 = vnez %v17003_v54  ;;  %v6307_v47 = vrot.slane %v6305_v28, 5  ;;  %v6310_v39 = vrot.slane %v6308_v55, 6  ;;  %v5451_v5 = vsel %vm5447_vm6, 65537, %v15638_v13 }
 0x35e   :  { %vm17061_vm10 = vmmov %vm17053_vm5  ;;  %17072 = vst [vmem:[#allocation72_spill] sm:$0xff] %v14014_v27  ;;  %v14038_v61 = vor.u32 %v5257_v23, %v5254_v35  ;;  %v5482_v45 = vshll.u32 %v5451_v5, 16  ;;  %v5486_v7 = vshrl.u32 %v5451_v5, 16  ;;  %v14068_v44 = vpop.f32.mrf.mxu0  ;;  %v14078_v53 = vor.u32 %v5967_v3, %v5964_v9 }
 0x35f   :  { %vm13972_vm0 = vmand %vm13924_vm9, %vm17061_vm10  ;;  %17077 = vst [vmem:[#allocation28_spill] sm:$0xff] %v14049_v17  ;;  %v14080_v17 = vor.u32 %v6310_v39, %v6307_v47  ;;  %v1136_v55 = vadd.f32 %v12946_v12, %v12965_v33 }
 0x360   :  { %vm5748_vm15 = vmpackc.low %vm13944_vm1, %vm13944_vm1  ;;  %17076 = vst [vmem:[#allocation25_spill] sm:$0xff] %v14038_v61  ;;  %v14070_v61 = vpop.f32.mrf.mxu1  ;;  %v14104_v23 = vrot.slane %v5482_v45, 5  ;;  %v14106_v14 = vrot.slane %v5486_v7, 4 }
 0x361   :  { %vm17068_vm9 = vmpackc.low %vm13743_vm4, %vm13743_vm4  ;;  %v14028_v54 = vsel %vm5748_vm15, 65537, %v15638_v13  ;;  %17081 = vst [vmem:[#allocation74_spill] sm:$0xff] %v14070_v61  ;;  %vm4754_vm15 = vcmask 519170  }
 0x362   :  { %v4879_v38 = vsel %vm17068_vm9, 65537, %v15638_v13  ;;  %vm5947_vm5 = vmpackc.low %vm13955_vm8, %vm13955_vm8  ;;  %17073 = vst [vmem:[#allocation68_spill] sm:$0xff] %v14028_v54  ;;  %v14094_v9 = vpop.f32.mrf.mxu1 }
 0x363   :  { %vm17071_vm10 = vmpackc.low %vm17070_vm3, %vm17070_vm3  ;;  %v4913_v28 = vshrl.u32 %v4879_v38, 16  ;;  %v5951_v40 = vsel %vm5947_vm5, 65537, %v15638_v13  ;;  %v4916_v21 = vshll.u32 %v4879_v38, 16  ;;  %17083 = vst [vmem:[#allocation41_spill] sm:$0xff] %v14078_v53  ;;  %v14241_v53 = vld [vmem:[%s15065_s7] ss:$0 sm:$0xff] }
 0x364   :  { %v5238_v49 = vsel %vm17071_vm10, 65537, %v15638_v13  ;;  %vm6290_vm4 = vmpackc.low %vm13972_vm0, %vm13972_vm0  ;;  %17084 = vst [vmem:[#allocation50_spill] sm:$0xff] %v14080_v17  ;;  %v5982_v38 = vshrl.u32 %v5951_v40, 16  ;;  %v5985_v4 = vshll.u32 %v5951_v40, 16  ;;  %vm15482_vm0 = vcmask 523264  }
 0x365   :  { %vm14034_vm9 = vmand %vm13855_vm7, %vm15481_vm14  ;;  %vm17078_vm7 = vnez %v16952_v10  ;;  %v5272_v59 = vshrl.u32 %v5238_v49, 16  ;;  %v5275_v35 = vshll.u32 %v5238_v49, 16  ;;  %v6294_v43 = vsel %vm6290_vm4, 65537, %v15638_v13  ;;  %17087 = vst [vmem:[#allocation34_spill] sm:$0xff] %v14104_v23 }
 0x366   :  { %vm14055_vm11 = vmand %vm17078_vm7, %vm15480_vm12  ;;  %v5780_v10 = vshrl.u32 %v14028_v54, 16  ;;  %v14076_v49 = vor.u32 %v5765_v6, %v14001_v30  ;;  %v14082_v25 = vrot.slane %v4913_v28, 6  ;;  %v6325_v61 = vshrl.u32 %v6294_v43, 16  ;;  %v14092_v6 = vpop.f32.mrf.mxu0  ;;  %17088 = vst [vmem:[#allocation39_spill] sm:$0xff] %v14106_v14 }
 0x367   :  { %vm4957_vm6 = vmpackc.low %vm14034_vm9, %vm14034_vm9  ;;  %v6328_v27 = vshll.u32 %v6294_v43, 16  ;;  %v14096_v3 = vrot.slane %v4916_v21, 7  ;;  %v14098_v47 = vrot.slane %v5272_v59, 5  ;;  %v14100_v39 = vrot.slane %v5275_v35, 6 }
 0x368   :  { %17082 = vst [vmem:[#allocation75_spill] sm:$0xff] %v14076_v49  ;;  %vm14088_vm1 = vmand %vm14055_vm11, %vm15479_vm13  ;;  %v1120_v28 = vadd.f32 %v12767_v29, %v12793_v48  ;;  %v14108_v40 = vrot.slane %v5780_v10, 7  ;;  %v14111_v17 = vpop.f32.mrf.mxu0  ;;  %v14113_v49 = vpop.f32.mrf.mxu1  ;;  %v14118_v21 = vrot.slane %v5982_v38, 6  ;;  %v1112_v29 = vadd.f32 %v12814_v31, %v12854_v57 }
 0x369   :  { %vm4960_vm8 = vmpackc.low %vm14088_vm1, %vm14088_vm1  ;;  %v14129_v7 = vsel %vm4957_vm6, 65537, %v15638_v13  ;;  %v14131_v45 = vrot.slane %v5985_v4, 7  ;;  %v14133_v59 = vrot.slane %v6325_v61, 5  ;;  %v14135_v35 = vrot.slane %v6328_v27, 6 }
 0x36a   :  { %17089 = vst [vmem:[#allocation87_spill] sm:$0xff] %v14108_v40  ;;  %17090 = vst [vmem:[#allocation45_spill] sm:$0xff] %v14118_v21  ;;  %v1750_v48 = vadd.f32 %v13009_v41, %v1120_v28  ;;  %v1123_v38 = vadd.f32 %v12885_v24, %v12913_v15  ;;  %v14139_v31 = vpop.f32.mrf.mxu0  ;;  %v14141_v57 = vpop.f32.mrf.mxu1  ;;  %v1115_v41 = vadd.f32 %v12930_v8, %v12944_v51  ;;  %v14163_v8 = vsel %vm4960_vm8, 65537, %v15638_v13  ;;  %v17121_v40 = vld [vmem:[#allocation108_spill] sm:$0xff] }
 0x36b   :  { %17091 = vst [vmem:[#allocation21_spill] sm:$0xff] %v14131_v45  ;;  %17092 = vst [vmem:[#allocation84_spill] sm:$0xff] %v14133_v59  ;;  %v1748_v4 = vadd.f32 %v13011_v58, %v1112_v29  ;;  %v1128_v27 = vadd.f32 %v12972_v50, %v12984_v46  ;;  %v1139_v24 = vadd.f32 %v12991_v19, %v12998_v60  ;;  %v17094_v46 = vrot.slane %v13938_v34, 6  ;;  %v17111_v59 = vld [vmem:[#allocation36_spill] sm:$0xff] }
 0x36c   :  { %17093 = vst [vmem:[#allocation85_spill] sm:$0xff] %v14135_v35  ;;  %v2365_v61 = vadd.f32 %v13067_v37, %v1750_v48  ;;  %v14153_v15 = vpop.f32.mrf.mxu0  ;;  %v14155_v10 = vpop.f32.mrf.mxu1  ;;  %v1751_v12 = vadd.f32 %v13013_v32, %v1123_v38  ;;  %v1749_v60 = vadd.f32 %v13015_v2, %v1115_v41  ;;  %v1754_v58 = vadd.f32 %v13017_v52, %v1136_v55  ;;  %v17097_v38 = vld [vmem:[#allocation105_spill] sm:$0xff]  ;;  %v17099_v41 = vld [vmem:[#allocation55_spill] sm:$0xff]  ;;  %v17100_v55 = vld [vmem:[#allocation62_spill] sm:$0xff] }
 0x36d   :  { %v2363_v33 = vadd.f32 %v13096_v11, %v1748_v4  ;;  %v14171_v19 = vrot.slane %v17094_v46, 4  ;;  %v1752_v37 = vadd.f32 %v13019_v1, %v1128_v27  ;;  %v17095_v32 = vshrl.u32 %v13629_v56, 16  ;;  %v17101_v27 = vld [vmem:[#allocation69_spill] sm:$0xff] }
 0x36e   :  { %v2590_v50 = vadd.f32 %v13300_v62, %v2365_v61  ;;  %v14176_v5 = vpop.f32.mrf.mxu0  ;;  %v14178_v28 = vpop.f32.mrf.mxu1  ;;  %v1755_v11 = vadd.f32 %v13023_v18, %v1139_v24  ;;  %v17096_v62 = vld [vmem:[#allocation104_spill] sm:$0xff]  ;;  %v2364_v52 = vadd.f32 %v17099_v41, %v1749_v60  ;;  %v2369_v1 = vadd.f32 %v17100_v55, %v1754_v58  ;;  %v17107_v58 = vld [vmem:[#allocation65_spill] sm:$0xff] }
 0x36f   :  { %v14182_v29 = vrot.slane %v17095_v32, 5  ;;  %v2366_v48 = vadd.f32 %v17096_v62, %v1751_v12  ;;  %v2588_v4 = vadd.f32 %v17097_v38, %v2363_v33  ;;  %v17098_v61 = vld [vmem:[#allocation124_spill] sm:$0xff]  ;;  %v2367_v46 = vadd.f32 %v17101_v27, %v1752_v37  ;;  %v17104_v12 = vld [vmem:[#allocation71_spill] sm:$0xff]  ;;  %v17109_v41 = vld [vmem:[#allocation117_spill] sm:$0xff] }
 0x370   :  { %v3144_v2 = vadd.f32 %v17098_v61, %v2590_v50  ;;  %v14191_v43 = vpop.f32.mrf.mxu0  ;;  %v14193_v51 = vpop.f32.mrf.mxu1  ;;  %v17102_v32 = vshll.u32 %v13629_v56, 16  ;;  %v17103_v18 = vld [vmem:[#allocation44_spill] sm:$0xff]  ;;  %v17106_v38 = vld [vmem:[#allocation63_spill] sm:$0xff]  ;;  %v17110_v27 = vld [vmem:[#allocation78_spill] sm:$0xff]  ;;  %vm4742_vm5 = vcmask 517120   ;;  %vm4965_vm3 = vcmask 1041408  }
 0x371   :  { %v2370_v24 = vadd.f32 %v17103_v18, %v1755_v11  ;;  %v2591_v33 = vadd.f32 %v17104_v12, %v2366_v48  ;;  %v17105_v62 = vld [vmem:[#allocation112_spill] sm:$0xff]  ;;  %v2368_v61 = vadd.f32 %v17107_v58, %v17106_v38  ;;  %v17108_v37 = vld [vmem:[#allocation95_spill] sm:$0xff]  ;;  %v2589_v35 = vadd.f32 %v17110_v27, %v2364_v52  ;;  %v17114_v18 = vld [vmem:[#allocation82_spill] sm:$0xff] }
 0x372   :  { %v14197_v13 = vrot.slane %v17102_v32, 6  ;;  %v3142_v50 = vadd.f32 %v17105_v62, %v2588_v4  ;;  %v3759_v60 = vadd.f32 %v13823_v20, %v3144_v2  ;;  %v2373_v55 = vadd.f32 %v17109_v41, %v17108_v37  ;;  %v17112_v56 = vld [vmem:[#allocation91_spill] sm:$0xff]  ;;  %v14210_v54 = vpop.f32.mrf.mxu0  ;;  %v7625_v11 = vpop.f32.mrf.mxu1  ;;  %v17115_v12 = vld [vmem:[#allocation56_spill] sm:$0xff]  ;;  %v17116_v38 = vld [vmem:[#allocation77_spill] sm:$0xff] }
 0x373   :  { %v2371_v32 = vadd.f32 %v17112_v56, %v17111_v59  ;;  %v17113_v48 = vld [vmem:[#allocation107_spill] sm:$0xff]  ;;  %v3145_v20 = vadd.f32 %v17115_v12, %v2591_v33  ;;  %v2594_v58 = vadd.f32 %v17116_v38, %v2369_v1  ;;  %v17117_v37 = vld [vmem:[#allocation26_spill] sm:$0xff]  ;;  %v17118_v41 = vld [vmem:[#allocation49_spill] sm:$0xff]  ;;  %vm4966_vm10 = vcmask 1045508  }
 0x374   :  { %v2374_v4 = vadd.f32 %v17114_v18, %v17113_v48  ;;  %v3757_v2 = vadd.f32 %v13847_v22, %v3142_v50  ;;  %v4048_v62 = vadd.f32 %v14094_v9, %v3759_v60  ;;  %v2592_v52 = vadd.f32 %v17117_v37, %v2367_v46  ;;  %v17119_v27 = vld [vmem:[#allocation32_spill] sm:$0xff]  ;;  %v7652_v45 = vpop.f32.mrf.mxu0  ;;  %v14228_v33 = vld [vmem:[%s15064_s6] ss:$0 sm:$0xff]  ;;  %v4002_v22 = vpop.f32.mrf.mxu1  ;;  %v17122_v50 = vld [vmem:[#allocation58_spill] sm:$0xff] }
 0x375   :  { %v2372_v59 = vadd.f32 %v17119_v27, %v17118_v41  ;;  %v17120_v56 = vld [vmem:[#allocation64_spill] sm:$0xff]  ;;  %v3143_v9 = vadd.f32 %v17122_v50, %v2589_v35  ;;  %v17123_v60 = vld [vmem:[#allocation67_spill] sm:$0xff]  ;;  %v17124_v18 = vld [vmem:[#allocation86_spill] sm:$0xff]  ;;  %vm5239_vm9 = vsmask.f32 2304 }
 0x376   :  { %v14223_v30 = vadd.f32 %v17121_v40, %v17120_v56  ;;  %v3760_v1 = vadd.f32 %v17123_v60, %v3145_v20  ;;  %v4046_v46 = vadd.f32 %v14113_v49, %v3757_v2  ;;  %v4602_v48 = vadd.f32 %v7652_v45, %v4048_v62  ;;  %v17125_v38 = vld [vmem:[#allocation100_spill] sm:$0xff]  ;;  %v17126_v40 = vld [vmem:[#allocation53_spill] sm:$0xff]  ;;  %v4537_v35 = vpop.f32.mrf.mxu0  ;;  %v7628_v50 = vpop.f32.mrf.mxu1  ;;  %v17131_v62 = vld [vmem:[#allocation51_spill] sm:$0xff] }
 0x377   :  { %v2595_v12 = vadd.f32 %v17124_v18, %v2370_v24  ;;  %v2593_v37 = vadd.f32 %v17125_v38, %v2368_v61  ;;  %v17127_v41 = vld [vmem:[#allocation52_spill] sm:$0xff]  ;;  %v17128_v56 = vld [vmem:[#allocation121_spill] sm:$0xff]  ;;  %v17132_v18 = vld [vmem:[#allocation46_spill] sm:$0xff]  ;;  %vm5240_vm7 = vsmask.f32 6416 }
 0x378   :  { %v2375_v27 = vadd.f32 %v17127_v41, %v17126_v40  ;;  %v3148_v21 = vadd.f32 %v17128_v56, %v2594_v58  ;;  %v17129_v20 = vld [vmem:[#allocation20_spill] sm:$0xff]  ;;  %v4049_v49 = vadd.f32 %v14141_v57, %v3760_v1  ;;  %v4625_v45 = vmul.f32 %v14228_v33, %v4602_v48  ;;  %v7653_v56 = vpop.f32.mrf.mxu0  ;;  %v4015_v14 = vpop.f32.mrf.mxu1  ;;  %vm14345_vm4 = vmor %vm4965_vm3, %vm4966_vm10 }
 0x379   :  { %v3758_v60 = vadd.f32 %v17129_v20, %v3143_v9  ;;  %v4600_v24 = vadd.f32 %v4537_v35, %v4046_v46  ;;  %v17130_v61 = vld [vmem:[#allocation96_spill] sm:$0xff]  ;;  %v2378_v38 = vadd.f32 %v17132_v18, %v17131_v62  ;;  %v17135_v46 = vld [vmem:[#allocation122_spill] sm:$0xff]  ;;  %v17138_v18 = vld [vmem:[#allocation109_spill] sm:$0xff]  ;;  %vm4880_vm8 = vsmask.f32 1280 }
 0x37a   :  { %v2598_v2 = vadd.f32 %v17130_v61, %v2373_v55  ;;  %v17133_v58 = vld [vmem:[#allocation80_spill] sm:$0xff]  ;;  %v3763_v41 = vadd.f32 %v13959_v16, %v3148_v21  ;;  %v4648_v9 = vadd.f32 %v14241_v53, %v4625_v45  ;;  %v4603_v1 = vadd.f32 %v7653_v56, %v4049_v49  ;;  %v17136_v55 = vld [vmem:[#allocation9_spill] sm:$0xff]  ;;  %v4540_v62 = vpop.f32.mrf.mxu0  ;;  %v14259_v16 = vpop.f32.mrf.mxu1  ;;  %vm14374_vm1 = vmor %vm5239_vm9, %vm5240_vm7 }
 0x37b   :  { %v3146_v40 = vadd.f32 %v17133_v58, %v2592_v52  ;;  %v4047_v23 = vadd.f32 %v14155_v10, %v3758_v60  ;;  %v4623_v57 = vmul.f32 %v14228_v33, %v4600_v24  ;;  %v17134_v48 = vld [vmem:[#allocation40_spill] sm:$0xff]  ;;  %v3149_v20 = vadd.f32 %v17136_v55, %v2595_v12  ;;  %v17137_v24 = vld [vmem:[#allocation23_spill] sm:$0xff] }
 0x37c   :  { %v2376_v35 = vadd.f32 %v17135_v46, %v17134_v48  ;;  %v4052_v52 = vadd.f32 %v14178_v28, %v3763_v41  ;;  %v4664_v21 = vmax.f32 %v4648_v9, 0.0  ;;  %v4626_v60 = vmul.f32 %v14228_v33, %v4603_v1 }
 0x37d   :  { %v3761_v61 = vadd.f32 %v13982_v36, %v3146_v40  ;;  %v4646_v10 = vadd.f32 %v14241_v53, %v4623_v57  ;;  %v4601_v45 = vadd.f32 %v4540_v62, %v4047_v23  ;;  %v2596_v49 = vadd.f32 %v17137_v24, %v2371_v32  ;;  %v7656_v36 = vpop.f32.mrf.mxu0  ;;  %v14270_v57 = vpop.f32.mrf.mxu1  ;;  %v17139_v23 = vld [vmem:[#allocation118_spill] sm:$0xff]  ;;  %v17140_v32 = vld [vmem:[#allocation79_spill] sm:$0xff]  ;;  %v17141_v62 = vld [vmem:[#allocation88_spill] sm:$0xff] }
 0x37e   :  { %v3147_v58 = vadd.f32 %v17138_v18, %v2593_v37  ;;  %v3764_v56 = vadd.f32 %v14012_v26, %v3149_v20  ;;  %4681 = vst.msk [vmem:[#allocation3 + $0x10] sm:$0xff] %vm15482_vm0, %v4664_v21  ;;  %v4649_v40 = vadd.f32 %v14241_v53, %v4626_v60  ;;  %v4606_v9 = vadd.f32 %v7656_v36, %v4052_v52  ;;  %v17142_v21 = vld [vmem:[#allocation18_spill] sm:$0xff] }
 0x37f   :  { %v4050_v12 = vadd.f32 %v14193_v51, %v3761_v61  ;;  %v4662_v28 = vmax.f32 %v4646_v10, 0.0  ;;  %v4624_v41 = vmul.f32 %v14228_v33, %v4601_v45  ;;  %v2599_v1 = vadd.f32 %v17139_v23, %v2374_v4  ;;  %v4553_v46 = vpop.f32.mrf.mxu0  ;;  %v7632_v18 = vpop.f32.mrf.mxu1 }
 0x380   :  { %v3152_v48 = vadd.f32 %v17140_v32, %v2598_v2  ;;  %v3762_v37 = vadd.f32 %v14047_v63, %v3147_v58  ;;  %v4053_v26 = vadd.f32 %v7625_v11, %v3764_v56  ;;  %v4665_v51 = vmax.f32 %v4649_v40, 0.0  ;;  %v17143_v58 = vld [vmem:[#allocation116_spill] sm:$0xff]  ;;  %v17146_v32 = vld [vmem:[#allocation106_spill] sm:$0xff] }
 0x381   :  { %4679 = vst.msk [vmem:[#allocation3] sm:$0xff] %vm15482_vm0, %v4662_v28  ;;  %v4647_v55 = vadd.f32 %v14241_v53, %v4624_v41  ;;  %v4629_v20 = vmul.f32 %v14228_v33, %v4606_v9  ;;  %v4604_v61 = vadd.f32 %v4553_v46, %v4050_v12  ;;  %v2597_v52 = vadd.f32 %v17141_v62, %v2372_v59  ;;  %v7657_v2 = vpop.f32.mrf.mxu0  ;;  %v17144_v12 = vld [vmem:[#allocation47_spill] sm:$0xff]  ;;  %v17145_v9 = vld [vmem:[#allocation125_spill] sm:$0xff] }
 0x382   :  { %v3150_v10 = vadd.f32 %v17142_v21, %v2596_v49  ;;  %v3767_v4 = vadd.f32 %v14068_v44, %v3152_v48  ;;  %v4051_v60 = vadd.f32 %v4002_v22, %v3762_v37  ;;  %4682 = vst.msk [vmem:[#allocation3 + $0x18] sm:$0xff] %vm15482_vm0, %v4665_v51  ;;  %v4607_v24 = vadd.f32 %v7657_v2, %v4053_v26  ;;  %v17147_v37 = vld [vmem:[#allocation16_spill] sm:$0xff]  ;;  %v4031_v51 = vpop.f32.mrf.mxu1 }
 0x383   :  { %v4663_v63 = vmax.f32 %v4647_v55, 0.0  ;;  %v4652_v11 = vadd.f32 %v14241_v53, %v4629_v20  ;;  %v4627_v45 = vmul.f32 %v14228_v33, %v4604_v61  ;;  %v2602_v56 = vadd.f32 %v17143_v58, %v14223_v30  ;;  %v4556_v44 = vpop.f32.mrf.mxu0 }
 0x384   :  { %v2600_v59 = vadd.f32 %v17144_v12, %v2375_v27  ;;  %v3765_v49 = vadd.f32 %v14092_v6, %v3150_v10  ;;  %v4056_v36 = vadd.f32 %v7628_v50, %v3767_v4  ;;  %v4630_v40 = vmul.f32 %v14228_v33, %v4607_v24 }
 0x385   :  { %4680 = vst.msk [vmem:[#allocation3 + $0x8] sm:$0xff] %vm15482_vm0, %v4663_v63  ;;  %v4668_v22 = vmax.f32 %v4652_v11, 0.0  ;;  %v4650_v28 = vadd.f32 %v14241_v53, %v4627_v45  ;;  %v4605_v41 = vadd.f32 %v4556_v44, %v4051_v60  ;;  %v2603_v23 = vadd.f32 %v17145_v9, %v2378_v38  ;;  %v7660_v27 = vpop.f32.mrf.mxu0  ;;  %v17148_v38 = vld [vmem:[#allocation72_spill] sm:$0xff]  ;;  %v17150_v9 = vld [vmem:[#allocation74_spill] sm:$0xff] }
 0x386   :  { %v2601_v48 = vadd.f32 %v17146_v32, %v2376_v35  ;;  %v3153_v30 = vadd.f32 %v17147_v37, %v2599_v1  ;;  %v4054_v26 = vadd.f32 %v4015_v14, %v3765_v49  ;;  %v4653_v50 = vadd.f32 %v14241_v53, %v4630_v40  ;;  %v17149_v60 = vld [vmem:[#allocation28_spill] sm:$0xff] }
 0x387   :  { %4685 = vst.msk [vmem:[#allocation3 + $0x30] sm:$0xff] %vm15482_vm0, %v4668_v22  ;;  %v4666_v6 = vmax.f32 %v4650_v28, 0.0  ;;  %v4628_v46 = vmul.f32 %v14228_v33, %v4605_v41  ;;  %v4610_v55 = vadd.f32 %v7660_v27, %v4056_v36  ;;  %v3151_v20 = vadd.f32 %v13961_v42, %v2597_v52  ;;  %v4569_v1 = vpop.f32.mrf.mxu0 }
 0x388   :  { %v3156_v61 = vadd.f32 %v13984_v0, %v2602_v56  ;;  %v3154_v62 = vadd.f32 %v17148_v38, %v2600_v59  ;;  %v3768_v35 = vadd.f32 %v14111_v17, %v3153_v30  ;;  %v4669_v14 = vmax.f32 %v4653_v50, 0.0  ;;  %v7633_v56 = vpop.f32.mrf.mxu1 }
 0x389   :  { %4683 = vst.msk [vmem:[#allocation3 + $0x20] sm:$0xff] %vm15482_vm0, %v4666_v6  ;;  %v4651_v21 = vadd.f32 %v14241_v53, %v4628_v46  ;;  %v4633_v10 = vmul.f32 %v14228_v33, %v4610_v55  ;;  %v4608_v4 = vadd.f32 %v4569_v1, %v4054_v26  ;;  %v3157_v2 = vadd.f32 %v17149_v60, %v2603_v23  ;;  %v4697_v0 = vld [vmem:[#allocation3 + $0x10] ss:$2 sm:$0xff]  ;;  %v4713_v52 = vld [vmem:[#allocation3 + $0x11] ss:$2 sm:$0xff]  ;;  %v7661_v11 = vpop.f32.mrf.mxu0 }
 0x38a   :  { %v3766_v63 = vadd.f32 %v14139_v31, %v3151_v20  ;;  %v3771_v42 = vadd.f32 %v14153_v15, %v3156_v61  ;;  %v4057_v17 = vadd.f32 %v14259_v16, %v3768_v35  ;;  %v4727_v45 = vmax.f32 %v4697_v0, %v4713_v52  ;;  %4686 = vst.msk [vmem:[#allocation3 + $0x38] sm:$0xff] %vm15482_vm0, %v4669_v14  ;;  %v4034_v27 = vpop.f32.mrf.mxu1 }
 0x38b   :  { %v4667_v24 = vmax.f32 %v4651_v21, 0.0  ;;  %v4656_v58 = vadd.f32 %v14241_v53, %v4633_v10  ;;  %v4631_v12 = vmul.f32 %v14228_v33, %v4608_v4  ;;  %v3769_v31 = vadd.f32 %v14176_v5, %v3154_v62  ;;  %v4572_v22 = vpop.f32.mrf.mxu0 }
 0x38c   :  { %v4695_v59 = vld [vmem:[#allocation3] ss:$2 sm:$0xff]  ;;  %v4711_v15 = vld [vmem:[#allocation3 + $0x1] ss:$2 sm:$0xff]  ;;  %v4055_v49 = vadd.f32 %v14270_v57, %v3766_v63  ;;  %v4060_v36 = vadd.f32 %v7632_v18, %v3771_v42  ;;  %v4611_v44 = vadd.f32 %v7661_v11, %v4057_v17  ;;  %v4745_v16 = vrot.slane %v4727_v45, 4 }
 0x38d   :  { %v4726_v28 = vmax.f32 %v4695_v59, %v4711_v15  ;;  %4684 = vst.msk [vmem:[#allocation3 + $0x28] sm:$0xff] %vm15482_vm0, %v4667_v24  ;;  %v4672_v40 = vmax.f32 %v4656_v58, 0.0  ;;  %v4654_v41 = vadd.f32 %v14241_v53, %v4631_v12  ;;  %v3155_v23 = vadd.f32 %v17150_v9, %v2601_v48  ;;  %v7664_v30 = vpop.f32.mrf.mxu0  ;;  %v17151_v24 = vld [vmem:[#allocation15_spill] sm:$0xff] }
 0x38e   :  { %v4058_v32 = vadd.f32 %v4031_v51, %v3769_v31  ;;  %v4634_v5 = vmul.f32 %v14228_v33, %v4611_v44  ;;  %v4609_v37 = vadd.f32 %v4572_v22, %v4055_v49  ;;  %v4747_v57 = vmax.f32 %v4727_v45, %v4745_v16 }
 0x38f   :  { %v4738_v18 = vrot.slane %v4726_v28, 4  ;;  %4689 = vst.msk [vmem:[#allocation3 + $0x50] sm:$0xff] %vm15482_vm0, %v4672_v40  ;;  %v4670_v26 = vmax.f32 %v4654_v41, 0.0  ;;  %v4614_v6 = vadd.f32 %v7664_v30, %v4060_v36  ;;  %v3772_v50 = vadd.f32 %v14191_v43, %v3157_v2  ;;  %v4585_v51 = vpop.f32.mrf.mxu0 }
 0x390   :  { %v3770_v46 = vadd.f32 %v14210_v54, %v3155_v23  ;;  %v4657_v55 = vadd.f32 %v14241_v53, %v4634_v5  ;;  %v4632_v48 = vmul.f32 %v14228_v33, %v4609_v37  ;;  %v7156_v20 = vpack.c.bf16 %v4747_v57, %v4747_v57  ;;  %v14358_v57 = vld [vmem:[#allocation4] sm:$0xc]  ;;  %v7937_v5 = vld [vmem:[%s15063_s8 + $0xa0] sm:$0xff]  }
 0x391   :  { %v4740_v61 = vmax.f32 %v4726_v28, %v4738_v18  ;;  %4687 = vst.msk [vmem:[#allocation3 + $0x40] sm:$0xff] %vm15482_vm0, %v4670_v26  ;;  %v4637_v38 = vmul.f32 %v14228_v33, %v4614_v6  ;;  %v4612_v62 = vadd.f32 %v4585_v51, %v4058_v32  ;;  %v4701_v35 = vld [vmem:[#allocation3 + $0x30] ss:$2 sm:$0xff]  ;;  %v4717_v1 = vld [vmem:[#allocation3 + $0x31] ss:$2 sm:$0xff]  ;;  %v4061_v14 = vadd.f32 %v7633_v56, %v3772_v50  ;;  %v7665_v54 = vpop.f32.mrf.mxu0 }
 0x392   :  { %v4059_v21 = vadd.f32 %v4034_v27, %v3770_v46  ;;  %v4673_v10 = vmax.f32 %v4657_v55, 0.0  ;;  %v4655_v43 = vadd.f32 %v14241_v53, %v4632_v48  ;;  %v4752_v4 = vrot.slane %v7156_v20, 6  ;;  %v17163_v20 = vld [vmem:[#allocation25_spill] sm:$0xff] }
 0x393   :  { %v4741_v60 = vpack.c.bf16 %v4740_v61, %v4740_v61  ;;  %v4729_v2 = vmax.f32 %v4701_v35, %v4717_v1  ;;  %v4660_v63 = vadd.f32 %v14241_v53, %v4637_v38  ;;  %v4635_v17 = vmul.f32 %v14228_v33, %v4612_v62  ;;  %v4588_v45 = vpop.f32.mrf.mxu0  ;;  %v17164_v1 = vld [vmem:[#allocation102_spill] sm:$0xff] }
 0x394   :  { %v4699_v42 = vld [vmem:[#allocation3 + $0x20] ss:$2 sm:$0xff]  ;;  %v4715_v0 = vld [vmem:[#allocation3 + $0x21] ss:$2 sm:$0xff]  ;;  %4690 = vst.msk [vmem:[#allocation3 + $0x58] sm:$0xff] %vm15482_vm0, %v4673_v10  ;;  %v4671_v52 = vmax.f32 %v4655_v43, 0.0  ;;  %v4615_v11 = vadd.f32 %v7665_v54, %v4061_v14  ;;  %v4613_v15 = vadd.f32 %v4588_v45, %v4059_v21  ;;  %v5249_v22 = vor.u32 %v14197_v13, %v14182_v29 }
 0x395   :  { %v17152_v58 = vrot.slane %v17151_v24, 6  ;;  %4755 = vst.msk [vmem:[#allocation4 + $0x4] sm:$0xc] %vm4754_vm15, %v4752_v4  ;;  %v4763_v12 = vrot.slane %v4729_v2, 4  ;;  %v4728_v31 = vmax.f32 %v4699_v42, %v4715_v0  ;;  %v4676_v59 = vmax.f32 %v4660_v63, 0.0  ;;  %v17165_v14 = vld [vmem:[#allocation113_spill] sm:$0xff] }
 0x396   :  { %4743 = vst.msk [vmem:[#allocation4 + $0x4] sm:$0x3] %vm4742_vm5, %v4741_v60  ;;  %v4658_v49 = vadd.f32 %v14241_v53, %v4635_v17  ;;  %v4638_v36 = vmul.f32 %v14228_v33, %v4615_v11  ;;  %v4976_v44 = vrot.slane %v14163_v8, 6  ;;  %v4636_v40 = vmul.f32 %v14228_v33, %v4613_v15  ;;  %v17166_v10 = vld [vmem:[#allocation33_spill] sm:$0xff]  ;;  %v17168_v0 = vld [vmem:[#allocation35_spill] sm:$0xff] }
 0x397   :  { %v4975_v56 = vrot.slane %v17152_v58, 4  ;;  %4688 = vst.msk [vmem:[#allocation3 + $0x48] sm:$0xff] %vm15482_vm0, %v4671_v52  ;;  %v4765_v16 = vmax.f32 %v4729_v2, %v4763_v12  ;;  %v4757_v28 = vrot.slane %v4728_v31, 4  ;;  %4693 = vst.msk [vmem:[#allocation3 + $0x70] sm:$0xff] %vm15482_vm0, %v4676_v59  ;;  %v17153_v41 = vrot.slane %v14129_v7, 6  ;;  %v17172_v59 = vld [vmem:[#allocation110_spill] sm:$0xff] }
 0x398   :  { %v4674_v23 = vmax.f32 %v4658_v49, 0.0  ;;  %v4661_v32 = vadd.f32 %v14241_v53, %v4638_v36  ;;  %v4659_v29 = vadd.f32 %v14241_v53, %v4636_v40  ;;  %v17156_v33 = vmov %v17152_v58  ;;  %v17254_v7 = vld [vmem:[#allocation22_spill] sm:$0xff] }
 0x399   :  { %v4969_v9 = vrot.slane %v17153_v41, 4  ;;  %v7157_v13 = vpack.c.bf16 %v4765_v16, %v4765_v16  ;;  %v4759_v8 = vmax.f32 %v4728_v31, %v4757_v28  ;;  %v14355_v37 = vsel %vm14345_vm4, %v14171_v19, %v17156_v33 }
 0x39a   :  { %4691 = vst.msk [vmem:[#allocation3 + $0x60] sm:$0xff] %vm15482_vm0, %v4674_v23  ;;  %v4677_v30 = vmax.f32 %v4661_v32, 0.0  ;;  %v17157_v18 = vmov %v17153_v41  ;;  %v5250_v27 = vrot.slane %v5249_v22, 4  ;;  %vm5281_vm6 = vcmp.ne.s16.totalorder %v5249_v22, 0  ;;  %v4839_v22 = vld [vmem:[#allocation4] sm:$0xe] }
 0x39b   :  { %vm14362_vm11 = vcmp.ne.s16.totalorder %v17157_v18, 0  ;;  %v4770_v53 = vrot.slane %v7157_v13, 6  ;;  %v4760_v6 = vpack.c.bf16 %v4759_v8, %v4759_v8  ;;  %v4705_v50 = vld [vmem:[#allocation3 + $0x50] ss:$2 sm:$0xff]  ;;  %v4721_v46 = vld [vmem:[#allocation3 + $0x51] ss:$2 sm:$0xff]  ;;  %v14385_v62 = vsel %vm14345_vm4, %v4975_v56, %v4976_v44 }
 0x39c   :  { %v4675_v55 = vmax.f32 %v4659_v29, 0.0  ;;  %v17160_v19 = vrot.slane %v13938_v34, 6  ;;  %v4731_v51 = vmax.f32 %v4705_v50, %v4721_v46  ;;  %4694 = vst.msk [vmem:[#allocation3 + $0x78] sm:$0xff] %vm15482_vm0, %v4677_v30  ;;  %v5260_v61 = vrot.slane %v17163_v20, 4  ;;  %v17173_v41 = vld [vmem:[#allocation114_spill] sm:$0xff]  ;;  %v17175_v32 = vld [vmem:[#allocation8_spill] sm:$0xff] }
 0x39d   :  { %vm4881_vm3 = vsmask.f32 5392  ;;  %4772 = vst.msk [vmem:[#allocation4 + $0x8] sm:$0xc] %vm4754_vm15, %v4770_v53  ;;  %v14389_v35 = vor.u32 %v14100_v39, %v14098_v47  ;;  %v4890_v21 = vor.u32 %v17165_v14, %v17164_v1  ;;  %v4901_v43 = vrot.slane %v17166_v10, 4  ;;  %v17167_v39 = vld [vmem:[#allocation24_spill] sm:$0xff] }
 0x39e   :  { %v14370_v48 = vsel %vm14345_vm4, %v4969_v9, %v17160_v19  ;;  %4761 = vst.msk [vmem:[#allocation4 + $0x8] sm:$0x3] %vm4742_vm5, %v4760_v6  ;;  %v4703_v34 = vld [vmem:[#allocation3 + $0x40] ss:$2 sm:$0xff]  ;;  %v4719_v38 = vld [vmem:[#allocation3 + $0x41] ss:$2 sm:$0xff]  ;;  %v5259_v2 = vsel %vm14374_vm1, %v5250_v27, %v17163_v20  ;;  %v14411_v24 = vsel %vm14374_vm1, %v5260_v61, %v17167_v39  ;;  %vm14415_vm9 = vmor %vm4880_vm8, %vm4881_vm3  ;;  %v14421_v56 = vor.u32 %v14096_v3, %v14082_v25 }
 0x39f   :  { %4692 = vst.msk [vmem:[#allocation3 + $0x68] sm:$0xff] %vm15482_vm0, %v4675_v55  ;;  %v4780_v54 = vrot.slane %v4731_v51, 4  ;;  %v4730_v4 = vmax.f32 %v4703_v34, %v4719_v38  ;;  %v4984_v60 = vsel %vm14362_vm11, %v14358_v57, 0  ;;  %vm4980_vm10 = vcmp.ne.s16.totalorder %v14370_v48, 0  ;;  %v17174_v23 = vld [vmem:[#allocation66_spill] sm:$0xff] }
 0x3a0   :  { %v5286_v47 = vsel %vm5281_vm6, %v14358_v57, 0  ;;  %v5270_v63 = vrot.slane %v17167_v39, 4  ;;  %v14404_v42 = vrot.slane %v4976_v44, 4  ;;  %v17169_v52 = vshll.u32 %v17168_v0, 16  ;;  %v14433_v44 = vld [vmem:[#allocation4 + $0x4] sm:$0xf] }
 0x3a1   :  { %v4782_v11 = vmax.f32 %v4731_v51, %v4780_v54  ;;  %v4774_v45 = vrot.slane %v4730_v4, 4  ;;  %vm5282_vm7 = vcmp.ne.s16.totalorder %v5259_v2, 0  ;;  %v4891_v31 = vrot.slane %v4890_v21, 4  ;;  %v17177_v55 = vld [vmem:[#allocation42_spill] sm:$0xff]  ;;  %v17182_v2 = vld [vmem:[#allocation7_spill] sm:$0xff] }
 0x3a2   :  { %v5455_v17 = vrot.slane %v17169_v52, 5  ;;  %v14426_v12 = vsel %vm14374_vm1, %v5270_v63, %v14389_v35  ;;  %v14431_v15 = vsel %vm14415_vm9, %v4901_v43, %v17172_v59  ;;  %v4911_v25 = vrot.slane %v17172_v59, 4  ;;  %v17178_v19 = vld [vmem:[#allocation38_spill] sm:$0xff]  ;;  %v17186_v59 = vld [vmem:[#allocation41_spill] sm:$0xff] }
 0x3a3   :  { %v7158_v49 = vpack.c.bf16 %v4782_v11, %v4782_v11  ;;  %v4776_v36 = vmax.f32 %v4730_v4, %v4774_v45  ;;  %vm4922_vm6 = vcmp.ne.s16.totalorder %v4890_v21, 0  ;;  %v4709_v3 = vld [vmem:[#allocation3 + $0x70] ss:$2 sm:$0xff]  ;;  %v4725_v16 = vld [vmem:[#allocation3 + $0x71] ss:$2 sm:$0xff]  ;;  %v4900_v28 = vsel %vm14415_vm9, %v4891_v31, %v17166_v10 }
 0x3a4   :  { %v5280_v40 = vrot.slane %v14389_v35, 4  ;;  %v5459_v9 = vor.u32 %v17173_v41, %v5455_v17  ;;  %v17176_v13 = vor.u32 %v17174_v23, %v17175_v32  ;;  %v4733_v30 = vmax.f32 %v4709_v3, %v4725_v16  ;;  %v17180_v38 = vld [vmem:[#allocation34_spill] sm:$0xff]  ;;  %v17181_v35 = vld [vmem:[#allocation39_spill] sm:$0xff]  ;;  %v5422_v10 = vld [vmem:[#allocation4] sm:$0x8] }
 0x3a5   :  { %v4787_v29 = vrot.slane %v7158_v49, 6  ;;  %v4777_v33 = vpack.c.bf16 %v4776_v36, %v4776_v36  ;;  %vm4981_vm8 = vcmp.ne.s16.totalorder %v14355_v37, 0  ;;  %vm5283_vm3 = vcmp.ne.s16.totalorder %v14411_v24, 0  ;;  %v17184_v11 = vld [vmem:[#allocation119_spill] sm:$0xff]  ;;  %v14480_v48 = vld [vmem:[#allocation4 + $0x8] sm:$0xf] }
 0x3a6   :  { %v14444_v8 = vrot.slane %v17176_v13, 4  ;;  %v4707_v18 = vld [vmem:[#allocation3 + $0x60] ss:$2 sm:$0xff]  ;;  %v4723_v27 = vld [vmem:[#allocation3 + $0x61] ss:$2 sm:$0xff]  ;;  %v4920_v53 = vsel %vm14415_vm9, %v4911_v25, %v14421_v56  ;;  %vm4982_vm13 = vcmp.ne.s16.totalorder %v14385_v62, 0  ;;  %v17179_v51 = vor.u32 %v17177_v55, %v17178_v19 }
 0x3a7   :  { %v4732_v6 = vmax.f32 %v4707_v18, %v4723_v27  ;;  %vm5284_vm12 = vcmp.ne.s16.totalorder %v14426_v12, 0  ;;  %v5287_v50 = vsel %vm5282_vm7, %v14433_v44, 0  ;;  %v4927_v46 = vsel %vm4922_vm6, %v4839_v22, 0  ;;  %4789 = vst.msk [vmem:[#allocation4 + $0xc] sm:$0xc] %vm4754_vm15, %v4787_v29  ;;  %v17187_v3 = vld [vmem:[#allocation89_spill] sm:$0xff] }
 0x3a8   :  { %v5480_v20 = vrot.slane %v17179_v51, 4  ;;  %4778 = vst.msk [vmem:[#allocation4 + $0xc] sm:$0x3] %vm4742_vm5, %v4777_v33  ;;  %v4797_v61 = vrot.slane %v4733_v30, 4  ;;  %vm4923_vm0 = vcmp.ne.s16.totalorder %v4900_v28, 0  ;;  %v4921_v34 = vrot.slane %v14421_v56, 4 }
 0x3a9   :  { %v5489_v1 = vor.u32 %v17181_v35, %v17180_v38  ;;  %v4791_v14 = vrot.slane %v4732_v6, 4  ;;  %vm4925_vm7 = vcmp.ne.s16.totalorder %v4920_v53, 0  ;;  %v5460_v21 = vrot.slane %v5459_v9, 4  ;;  %v17200_v35 = vld [vmem:[#allocation21_spill] sm:$0xff] }
 0x3aa   :  { %vm5491_vm6 = vcmp.ne.s16.totalorder %v5455_v17, 0  ;;  %v4799_v43 = vmax.f32 %v4733_v30, %v4797_v61  ;;  %v4985_v54 = vsel %vm4980_vm10, %v14433_v44, 0  ;;  %v7069_v4 = vcombine.low %v5286_v47, %v5287_v50  ;;  %v17185_v17 = vld [vmem:[#allocation14_spill] sm:$0xff]  ;;  %v14590_v27 = vld [vmem:[#allocation4 + $0x8] sm:$0xf] }
 0x3ab   :  { %vm17183_vm14 = vnez %v17182_v2  ;;  %v4793_v63 = vmax.f32 %v4732_v6, %v4791_v14  ;;  %v4928_v0 = vsel %vm4923_vm0, %v14433_v44, 0  ;;  %v14478_v45 = vor.u32 %v17185_v17, %v17184_v11  ;;  %v17210_v61 = vld [vmem:[#allocation13_spill] sm:$0xff] }
 0x3ac   :  { %v5475_v39 = vsel %vm17183_vm14, %v14444_v8, %v17178_v19  ;;  %v5485_v52 = vsel %vm17183_vm14, %v5480_v20, %v17180_v38  ;;  %v7159_v56 = vpack.c.bf16 %v4799_v43, %v4799_v43  ;;  %v14482_v47 = vsel %vm5491_vm6, %v5422_v10, 0  ;;  %v17199_v38 = vld [vmem:[#allocation45_spill] sm:$0xff] }
 0x3ad   :  { %v14484_v31 = vrot.slane %v5489_v1, 4  ;;  %v5970_v49 = vrot.slane %v17186_v59, 4  ;;  %v4794_v36 = vpack.c.bf16 %v4793_v63, %v4793_v63  ;;  %v7051_v22 = vcombine.low %v4984_v60, %v4985_v54  ;;  %v17205_v60 = vld [vmem:[#allocation59_spill] sm:$0xff] }
 0x3ae   :  { %v5465_v25 = vsel %vm17183_vm14, %v5460_v21, %v17175_v32  ;;  %v5980_v16 = vrot.slane %v17187_v3, 4  ;;  %v4804_v28 = vrot.slane %v7159_v56, 6  ;;  %v5314_v41 = vshrl.u32 %v7069_v4, 16 }
 0x3af   :  { %v5317_v9 = vshll.u32 %v7069_v4, 16  ;;  %vm4983_vm0 = vcmp.ne.s16.totalorder %v14404_v42, 0  ;;  %v7060_v23 = vcombine.low %v4927_v46, %v4928_v0  ;;  %4795 = vst.msk [vmem:[#allocation4 + $0x10] sm:$0x3] %vm4742_vm5, %v4794_v36  ;;  %v14497_v13 = vld [vmem:[#allocation4 + $0xc] sm:$0xf]  ;;  %v14545_v1 = vor.u32 %v17200_v35, %v17199_v38 }
 0x3b0   :  { %v4986_v57 = vsel %vm4981_vm8, %v14480_v48, 0  ;;  %vm15483_vm11 = vcmask 1045504   ;;  %v5288_v26 = vsel %vm5283_vm3, %v14480_v48, 0  ;;  %vm14505_vm14 = vcmp.ne.s16.totalorder %v5280_v40, 0  ;;  %4806 = vst.msk [vmem:[#allocation4 + $0x10] sm:$0xc] %vm4754_vm15, %v4804_v28 }
 0x3b1   :  { %v5960_v32 = vrot.slane %v14478_v45, 4  ;;  %v4987_v8 = vsel %vm4982_vm13, %v14497_v13, 0  ;;  %v5289_v37 = vsel %vm5284_vm12, %v14497_v13, 0  ;;  %vm17190_vm5 = vcmp.ne.s16.totalorder %v14431_v15, 0 }
 0x3b2   :  { %v4929_v24 = vsel %vm17190_vm5, %v14480_v48, 0  ;;  %v4930_v40 = vsel %vm4925_vm7, %v14497_v13, 0  ;;  %vm14522_vm10 = vcmp.ne.s16.totalorder %v4921_v34, 0  ;;  %v7052_v33 = vcombine.low %v4986_v57, %v4987_v8 }
 0x3b3   :  { %v5011_v30 = vrot.slane %v7051_v22, 2  ;;  %v7070_v18 = vcombine.low %v5288_v26, %v5289_v37  ;;  %v7061_v62 = vcombine.low %v4929_v24, %v4930_v40  ;;  %vm14526_vm13 = vcmp.ne.s16.totalorder %v5485_v52, 0 }
 0x3b4   :  { %v5316_v12 = vrot.slane %v5314_v41, 2  ;;  %v5319_v6 = vrot.slane %v5317_v9, 3  ;;  %v5110_v50 = vshrl.u32 %v7060_v23, 16  ;;  %v5113_v15 = vshll.u32 %v7060_v23, 16 }
 0x3b5   :  { %v5012_v46 = vrot.slane %v7052_v33, 2  ;;  %v5322_v55 = vshrl.u32 %v7070_v18, 16  ;;  %v5325_v53 = vshll.u32 %v7070_v18, 16  ;;  %v5118_v19 = vshrl.u32 %v7061_v62, 16 }
 0x3b6   :  { %vm14530_vm12 = vcmp.ne.s16.totalorder %v5475_v39, 0  ;;  %v5121_v20 = vshll.u32 %v7061_v62, 16  ;;  %vm14534_vm15 = vcmp.ne.s16.totalorder %v5465_v25, 0  ;;  %v14541_v34 = vsel %vm14415_vm9, %v5970_v49, %v17187_v3  ;;  %v4843_v4 = vld [vmem:[#allocation4 + $0x10] sm:$0x3] }
 0x3b7   :  { %v5013_v14 = vsel %vm15483_vm11, %v5011_v30, %v5012_v46  ;;  %v5324_v10 = vrot.slane %v5322_v55, 2  ;;  %v5327_v21 = vrot.slane %v5325_v53, 3  ;;  %v5120_v43 = vrot.slane %v5118_v19, 1  ;;  %v17202_v39 = vld [vmem:[#allocation70_spill] sm:$0xff]  ;;  %v5922_v19 = vld [vmem:[#allocation4 + $0x4] sm:$0xe] }
 0x3b8   :  { %vm17201_vm8 = vcmask 523264   ;;  %vm15484_vm3 = vsmask.f32 5376  ;;  %v5320_v54 = vor.u32 %v5319_v6, %v5316_v12  ;;  %v5123_v2 = vrot.slane %v5121_v20, 2  ;;  %v5214_v49 = vld [vmem:[#allocation4 + $0x10] sm:$0x7] }
 0x3b9   :  { %7674 = vmatprep.mubr.msk.bf16.mxu1 %vm17201_vm8, %v5013_v14  ;;  %v17203_v63 = vshrl.u32 %v17202_v39, 16  ;;  %v5328_v52 = vor.u32 %v5327_v21, %v5324_v10  ;;  %v4988_v11 = vsel %vm4983_vm0, %v4843_v4, 0  ;;  %v5112_v17 = vrot.slane %v5110_v50, 1  ;;  %vm17204_vm6 = vmmov %vm17201_vm8  ;;  %v14585_v29 = vld [vmem:[#allocation4 + $0x10] sm:$0xf]  ;;  %v7988_v12 = vld [vmem:[%s15063_s8 + $0x18] sm:$0xff]  }
 0x3ba   :  { %v5115_v56 = vrot.slane %v5113_v15, 2  ;;  %v7053_v36 = vcombine.low %v4988_v11, %v4988_v11  ;;  %v5290_v22 = vsel %vm14505_vm14, %v5214_v49, 0  ;;  %v5969_v25 = vsel %vm14415_vm9, %v5960_v32, %v17186_v59  ;;  %vm17206_vm14 = vmmov %vm17204_vm6  ;;  %v14596_v6 = vld [vmem:[#allocation4 + $0xc] sm:$0xf]  ;;  %v7918_v10 = vld [vmem:[%s15063_s8 + $0x8] sm:$0xff]  }
 0x3bb   :  { %v14551_v0 = vrot.slane %v17203_v63, 7  ;;  %v5989_v3 = vsel %vm14415_vm9, %v5980_v16, %v14545_v1  ;;  %v5329_v28 = vsel %vm15484_vm3, %v5320_v54, %v5328_v52  ;;  %v14564_v41 = vor.u32 %v5123_v2, %v5120_v43  ;;  %v7915_v16 = vld [vmem:[%s15063_s8 + $0x10] sm:$0xff]   ;;  %vm17207_vm5 = vmmov %vm17204_vm6  ;;  %v17209_v20 = vld [vmem:[#allocation17_spill] sm:$0xff] }
 0x3bc   :  { %v7071_v42 = vcombine.low %v5290_v22, %v5290_v22  ;;  %v4931_v9 = vsel %vm14522_vm10, %v4843_v4, 0  ;;  %vm5991_vm7 = vcmp.ne.s16.totalorder %v14478_v45, 0  ;;  %7698 = vmatprep.mubr.msk.bf16.mxu0 %vm17204_vm6, %v5329_v28  ;;  %v5014_v23 = vrot.slane %v7053_v36, 2  ;;  %v7919_v21 = vld [vmem:[%s15063_s8 + $0x90] sm:$0xff]   ;;  %vm17216_vm8 = vmmov %vm17207_vm5 }
 0x3bd   :  { %vm15485_vm0 = vsmask.f32 6400  ;;  %v5499_v59 = vsel %vm14526_vm13, %v14497_v13, 0  ;;  %vm5993_vm9 = vcmp.ne.s16.totalorder %v14541_v34, 0  ;;  %v5116_v58 = vor.u32 %v5115_v56, %v5112_v17  ;;  %v17213_v11 = vld [vmem:[#allocation87_spill] sm:$0xff]  ;;  %v17214_v17 = vld [vmem:[#allocation68_spill] sm:$0xff] }
 0x3be   :  { %v5331_v57 = vshrl.u32 %v7071_v42, 16  ;;  %v5334_v26 = vshll.u32 %v7071_v42, 16  ;;  %v5769_v32 = vrot.slane %v17205_v60, 4  ;;  %v5015_v8 = vsel %vm15483_vm11, %v5012_v46, %v5014_v23  ;;  %v7920_v34 = vld [vmem:[%s15063_s8] sm:$0xff]   ;;  %v17227_v60 = vld [vmem:[#allocation31_spill] sm:$0xff] }
 0x3bf   :  { %v7062_v37 = vcombine.low %v4931_v9, %v4931_v9  ;;  %v5497_v24 = vsel %vm14534_vm15, %v14433_v44, 0  ;;  %v5498_v40 = vsel %vm14530_vm12, %v14480_v48, 0  ;;  %7675 = vmatmul.mubr.msk.bf16.vlgmr.msra.gmra.mxu1 %vm17206_vm14, %v5015_v8  ;;  %v5125_v33 = vsel %vm15485_vm0, %v5116_v58, %v14564_v41  ;;  %vm17212_vm15 = vmmov %vm17207_vm5  ;;  %v17217_v9 = vld [vmem:[#allocation75_spill] sm:$0xff]  ;;  %v17218_v23 = vld [vmem:[#allocation94_spill] sm:$0xff] }
 0x3c0   :  { %v5333_v30 = vrot.slane %v5331_v57, 2  ;;  %v5336_v18 = vrot.slane %v5334_v26, 3  ;;  %v7079_v62 = vcombine.low %v5498_v40, %v5499_v59  ;;  %7679 = vmatpush3.bf16.msra.mxu1 %v7988_v12  ;;  %7686 = vmatprep.mubr.msk.bf16.mxu1 %vm17207_vm5, %v5125_v33  ;;  %vm5992_vm10 = vcmp.ne.s16.totalorder %v5969_v25, 0  ;;  %v17220_v58 = vld [vmem:[#allocation12_spill] sm:$0xff] }
 0x3c1   :  { %vm5994_vm13 = vcmp.ne.s16.totalorder %v5989_v3, 0  ;;  %v17208_v50 = vshll.u32 %v17202_v39, 16  ;;  %v5760_v46 = vrot.slane %v14551_v0, 4  ;;  %7680 = vmatprep.subr.bf16.mxu1 %v7915_v16  ;;  %v7078_v53 = vcombine.low %v14482_v47, %v5497_v24  ;;  %v7921_v3 = vld [vmem:[%s15063_s8 + $0x88] sm:$0xff]   ;;  %v14651_v24 = vld [vmem:[#allocation4 + $0x10] sm:$0xf] }
 0x3c2   :  { %v5337_v55 = vor.u32 %v5336_v18, %v5333_v30  ;;  %v5999_v51 = vsel %vm5994_vm13, %v14585_v29, 0  ;;  %v17211_v38 = vshll.u32 %v17210_v61, 16  ;;  %v7087_v14 = vcombine.low %v14433_v44, %v14480_v48  ;;  %v17223_v18 = vld [vmem:[#allocation84_spill] sm:$0xff]  ;;  %v7923_v61 = vld [vmem:[%s15063_s8 + $0x80] sm:$0xff]  }
 0x3c3   :  { %v14601_v15 = vor.u32 %v17208_v50, %v14551_v0  ;;  %v5127_v43 = vshrl.u32 %v7062_v37, 16  ;;  %v5130_v47 = vshll.u32 %v7062_v37, 16  ;;  %vm5495_vm12 = vcmp.ne.s16.totalorder %v14484_v31, 0  ;;  %v7922_v50 = vld [vmem:[%s15063_s8 + $0x78] sm:$0xff]  }
 0x3c4   :  { %v5776_v35 = vor.u32 %v17211_v38, %v17209_v20  ;;  %v5997_v54 = vsel %vm5992_vm10, %v14590_v27, 0  ;;  %v5338_v4 = vsel %vm15484_vm3, %v5328_v52, %v5337_v55  ;;  %v5531_v2 = vshrl.u32 %v7079_v62, 16  ;;  %7681 = vmatpush3.bf16.msra.mxu1 %v7915_v16  ;;  %v7989_v52 = vld [vmem:[%s15063_s8 + $0x98] sm:$0xff]   ;;  %v17221_v16 = vld [vmem:[#allocation126_spill] sm:$0xff] }
 0x3c5   :  { %v5534_v39 = vshll.u32 %v7079_v62, 16  ;;  %v5998_v44 = vsel %vm5993_vm9, %v14596_v6, 0  ;;  %7699 = vmatmul.mubr.msk.bf16.vlgmr.msra.gmra.mxu0 %vm17212_vm15, %v5338_v4  ;;  %v5996_v48 = vsel %vm5991_vm7, %v5922_v19, 0  ;;  %v5778_v0 = vrot.slane %v17209_v20, 4  ;;  %7682 = vmatprep.subr.bf16.mxu1 %v7918_v10  ;;  %v17224_v62 = vld [vmem:[#allocation85_spill] sm:$0xff] }
 0x3c6   :  { %v7105_v63 = vcombine.low %v5998_v44, %v5999_v51  ;;  %v17215_v56 = vshll.u32 %v17214_v17, 16  ;;  %7715 = vmatpush3.bf16.msra.mxu0 %v7989_v52  ;;  %7722 = vmatprep.mubr.msk.bf16.mxu0 %vm17216_vm8, %v7087_v14  ;;  %v5523_v45 = vshrl.u32 %v7078_v53, 16  ;;  %v5526_v36 = vshll.u32 %v7078_v53, 16  ;;  %v17225_v51 = vld [vmem:[#allocation57_spill] sm:$0xff] }
 0x3c7   :  { %v7104_v22 = vcombine.low %v5996_v48, %v5997_v54  ;;  %v5990_v25 = vrot.slane %v14545_v1, 4  ;;  %7716 = vmatprep.subr.bf16.mxu0 %v7919_v21  ;;  %v5129_v28 = vrot.slane %v5127_v43, 1  ;;  %v5132_v42 = vrot.slane %v5130_v47, 2  ;;  %v17222_v1 = vld [vmem:[#allocation50_spill] sm:$0xff]  ;;  %v17232_v47 = vld [vmem:[#allocation97_spill] sm:$0xff]  ;;  %v17234_v54 = vld [vmem:[#allocation60_spill] sm:$0xff] }
 0x3c8   :  { %v5785_v49 = vor.u32 %v17215_v56, %v17213_v11  ;;  %vm17219_vm7 = vnez %v17218_v23  ;;  %v14647_v57 = vor.u32 %v17221_v16, %v17220_v58  ;;  %v5533_v26 = vrot.slane %v5531_v2, 3  ;;  %7683 = vmatpush3.bf16.msra.mxu1 %v7918_v10  ;;  %v7933_v16 = vld [vmem:[%s15063_s8 + $0xb0] sm:$0xff]  }
 0x3c9   :  { %v5768_v59 = vsel %vm17219_vm7, %v5760_v46, %v17217_v9  ;;  %v5536_v8 = vrot.slane %v5534_v39, 4  ;;  %vm5788_vm6 = vcmp.ne.s16.totalorder %v14601_v15, 0  ;;  %v6313_v37 = vrot.slane %v17222_v1, 4  ;;  %7684 = vmatprep.subr.bf16.mxu1 %v7920_v34 }
 0x3ca   :  { %v6031_v40 = vshrl.u32 %v7105_v63, 16  ;;  %v6034_v33 = vshll.u32 %v7105_v63, 16  ;;  %v14657_v30 = vsel %vm17219_vm7, %v5769_v32, %v5776_v35  ;;  %v14661_v12 = vor.u32 %v17224_v62, %v17223_v18  ;;  %7717 = vmatpush3.bf16.msra.mxu0 %v7919_v21  ;;  %v17231_v21 = vld [vmem:[#allocation29_spill] sm:$0xff] }
 0x3cb   :  { %v5525_v46 = vrot.slane %v5523_v45, 3  ;;  %v5528_v55 = vrot.slane %v5526_v36, 4  ;;  %v6023_v53 = vshrl.u32 %v7104_v22, 16  ;;  %v6026_v19 = vshll.u32 %v7104_v22, 16  ;;  %7718 = vmatprep.subr.bf16.mxu0 %v7921_v3  ;;  %v17245_v45 = vld [vmem:[#allocation43_spill] sm:$0xff]  ;;  %v7932_v36 = vld [vmem:[%s15063_s8 + $0xc0] sm:$0xff]  }
 0x3cc   :  { %vm17226_vm9 = vcmp.ge.s32.totalorder %v17225_v51, 0  ;;  %vm17228_vm14 = vnez %v17227_v60  ;;  %v5133_v20 = vor.u32 %v5132_v42, %v5129_v28  ;;  %v5786_v38 = vsel %vm17219_vm7, %v5778_v0, %v5785_v49  ;;  %7685 = vmatpush3.bf16.msra.mxu1 %v7920_v34  ;;  %v7924_v0 = vld [vmem:[%s15063_s8 + $0x70] sm:$0xff]   ;;  %v17243_v34 = vld [vmem:[#allocation93_spill] sm:$0xff]  ;;  %v14731_v42 = vld [vmem:[#allocation4 + $0x14] sm:$0x3] }
 0x3cd   :  { %vm14670_vm5 = vmand %vm17228_vm14, %vm17226_vm9  ;;  %vm5789_vm10 = vcmp.ne.s16.totalorder %v5768_v59, 0  ;;  %v6303_v35 = vrot.slane %v14647_v57, 4  ;;  %v14680_v14 = vor.u32 %v5536_v8, %v5533_v26  ;;  %v5500_v10 = vsel %vm5495_vm12, %v14651_v24, 0  ;;  %7702 = vmatprep.subr.bf16.mxu1 %v7922_v50  ;;  %v5732_v49 = vld [vmem:[#allocation4 + $0x4] sm:$0xf] }
 0x3ce   :  { %vm5790_vm13 = vcmp.ne.s16.totalorder %v14657_v30, 0  ;;  %v6323_v43 = vrot.slane %v17231_v21, 4  ;;  %vm17233_vm15 = vcmp.ge.s32.totalorder %v17232_v47, 0  ;;  %vm17235_vm8 = vnez %v17234_v54  ;;  %7719 = vmatpush3.bf16.msra.mxu0 %v7921_v3  ;;  %v7926_v3 = vld [vmem:[%s15063_s8 + $0xd8] sm:$0xff]  }
 0x3cf   :  { %vm14691_vm9 = vmand %vm17235_vm8, %vm17233_vm15  ;;  %v6033_v2 = vrot.slane %v6031_v40, 1  ;;  %v6036_v39 = vrot.slane %v6034_v33, 2  ;;  %vm14695_vm7 = vcmp.ne.s16.totalorder %v5990_v25, 0  ;;  %v6312_v31 = vsel %vm14374_vm1, %v6303_v35, %v17222_v1  ;;  %7720 = vmatprep.subr.bf16.mxu0 %v7923_v61  ;;  %v7927_v33 = vld [vmem:[%s15063_s8 + $0x68] sm:$0xff]  }
 0x3d0   :  { %vm17240_vm12 = vcmp.le.s32.totalorder %v17225_v51, 3  ;;  %v5529_v63 = vor.u32 %v5528_v55, %v5525_v46  ;;  %v6025_v17 = vrot.slane %v6023_v53, 1  ;;  %v6028_v56 = vrot.slane %v6026_v19, 2  ;;  %v14789_v19 = vld [vmem:[#allocation4 + $0x4] sm:$0xc] }
 0x3d1   :  { %vm14706_vm14 = vmand %vm14670_vm5, %vm17240_vm12  ;;  %v6332_v52 = vsel %vm14374_vm1, %v6323_v43, %v14661_v12  ;;  %vm17244_vm15 = vcmp.ge.s32.totalorder %v17243_v34, 0  ;;  %vm17246_vm5 = vnez %v17245_v45  ;;  %v5134_v22 = vsel %vm15485_vm0, %v14564_v41, %v5133_v20 }
 0x3d2   :  { %vm14720_vm8 = vmand %vm17246_vm5, %vm17244_vm15  ;;  %v7080_v25 = vcombine.low %v5500_v10, %v5500_v10  ;;  %v5794_v28 = vsel %vm5789_vm10, %v14590_v27, 0  ;;  %v6322_v9 = vsel %vm14374_vm1, %v6313_v37, %v17231_v21  ;;  %vm17249_vm12 = vcmp.le.s32.totalorder %v17232_v47, 3  ;;  %7721 = vmatpush3.bf16.msra.mxu0 %v7923_v61  ;;  %v7930_v21 = vld [vmem:[%s15063_s8 + $0xc8] sm:$0xff]  }
 0x3d3   :  { %vm14740_vm15 = vmand %vm14691_vm9, %vm17249_vm12  ;;  %vm17252_vm5 = vcmask 523264   ;;  %vm17253_vm11 = vsmask.f32 4352  ;;  %vm5791_vm10 = vcmp.ne.s16.totalorder %v5786_v38, 0  ;;  %v6000_v59 = vsel %vm14695_vm7, %v14731_v42, 0  ;;  %7738 = vmatprep.subr.bf16.mxu0 %v7926_v3 }
 0x3d4   :  { %7687 = vmatmul.mubr.msk.bf16.vlgmr.msra.gmra.mxu1 %vm17252_vm5, %v5134_v22  ;;  %v5538_v23 = vsel %vm17253_vm11, %v5529_v63, %v14680_v14  ;;  %vm6335_vm3 = vcmp.ne.s16.totalorder %v6312_v31, 0  ;;  %vm17255_vm1 = vcmp.ge.s32.totalorder %v17254_v7, 0  ;;  %vm17259_vm9 = vmmov %vm17252_vm5  ;;  %v14759_v26 = vor.u32 %v6036_v39, %v6033_v2 }
 0x3d5   :  { %vm14754_vm0 = vmand %vm13843_vm2, %vm17255_vm1  ;;  %7703 = vmatpush3.bf16.msra.mxu1 %v7922_v50  ;;  %7710 = vmatprep.mubr.msk.bf16.mxu1 %vm17259_vm9, %v5538_v23  ;;  %v5793_v8 = vsel %vm5788_vm6, %v5732_v49, 0  ;;  %v5796_v1 = vsel %vm5791_vm10, %v14585_v29, 0  ;;  %vm6337_vm11 = vcmp.ne.s16.totalorder %v6332_v52, 0  ;;  %vm17260_vm7 = vcmp.le.s32.totalorder %v17243_v34, 3  ;;  %v7928_v50 = vld [vmem:[%s15063_s8 + $0xd0] sm:$0xff]  }
 0x3d6   :  { %vm14768_vm12 = vmand %vm14720_vm8, %vm17260_vm7  ;;  %7704 = vmatprep.subr.bf16.mxu1 %v7924_v0  ;;  %v6029_v40 = vor.u32 %v6028_v56, %v6025_v17  ;;  %v14775_v15 = vcombine.low %v5793_v8, %v5794_v28  ;;  %vm6336_vm2 = vcmp.ne.s16.totalorder %v6322_v9, 0  ;;  %v6342_v18 = vsel %vm6337_vm11, %v14585_v29, 0  ;;  %v7931_v17 = vld [vmem:[%s15063_s8 + $0xb8] sm:$0xff]  }
 0x3d7   :  { %vm6141_vm6 = vmpackc.low %vm14740_vm15, %vm14740_vm15  ;;  %v7088_v62 = vcombine.low %v14497_v13, %v14651_v24  ;;  %v5540_v46 = vshrl.u32 %v7080_v25, 16  ;;  %v5543_v55 = vshll.u32 %v7080_v25, 16  ;;  %v5795_v53 = vsel %vm5790_vm13, %v14596_v6, 0 }
 0x3d8   :  { %vm17263_vm8 = vcmp.le.s32.totalorder %v17254_v7, 3  ;;  %v14799_v13 = vcombine.low %v5795_v53, %v5796_v1  ;;  %v6340_v24 = vsel %vm6335_vm3, %v14590_v27, 0  ;;  %v6341_v60 = vsel %vm6336_vm2, %v14596_v6, 0  ;;  %vm6142_vm13 = vmpackc.low %vm14768_vm12, %vm14768_vm12 }
 0x3d9   :  { %vm14795_vm5 = vmand %vm14754_vm0, %vm17263_vm8  ;;  %7705 = vmatpush3.bf16.msra.mxu1 %v7924_v0  ;;  %vm17267_vm1 = vsmask.f32 6400  ;;  %v7106_v32 = vcombine.low %v6000_v59, %v6000_v59  ;;  %vm6334_vm0 = vcmp.ne.s16.totalorder %v14647_v57, 0  ;;  %v7123_v20 = vcombine.low %v6341_v60, %v6342_v18  ;;  %v7929_v57 = vld [vmem:[%s15063_s8 + $0x60] sm:$0xff]  }
 0x3da   :  { %vm17266_vm10 = vmmov %vm17259_vm9  ;;  %v6038_v30 = vsel %vm17267_vm1, %v6029_v40, %v14759_v26  ;;  %v17268_v61 = vmov 0   ;;  %v5822_v35 = vshll.u32 %v14775_v15, 16  ;;  %v6339_v10 = vsel %vm6334_vm0, %v14789_v19, 0  ;;  %7706 = vmatprep.subr.bf16.mxu1 %v7927_v33  ;;  %v7934_v40 = vld [vmem:[%s15063_s8 + $0x118] sm:$0xff]   ;;  %v5736_v18 = vld [vmem:[#allocation4 + $0x14] sm:$0x1] }
 0x3db   :  { %7723 = vmatmul.mubr.msk.bf16.vlgmr.msra.gmra.mxu0 %vm17266_vm10, %v7088_v62  ;;  %vm6140_vm3 = vmpackc.low %vm14706_vm14, %vm14706_vm14  ;;  %v14820_v38 = vsel %vm6141_vm6, 65537, %v17268_v61  ;;  %v5542_v43 = vrot.slane %v5540_v46, 3  ;;  %v5545_v47 = vrot.slane %v5543_v55, 4  ;;  %v7122_v54 = vcombine.low %v6339_v10, %v6340_v24  ;;  %v6278_v46 = vld [vmem:[#allocation4 + $0x14] sm:$0x7] }
 0x3dc   :  { %7739 = vmatpush3.bf16.msra.mxu0 %v7926_v3  ;;  %7746 = vmatprep.mubr.msk.bf16.mxu0 %vm17259_vm9, %v6038_v30  ;;  %vm6143_vm11 = vmpackc.low %vm14795_vm5, %vm14795_vm5  ;;  %v14840_v4 = vsel %vm6142_vm13, 65537, %v17268_v61  ;;  %v5827_v2 = vshll.u32 %v14799_v13, 16  ;;  %v5787_v39 = vrot.slane %v17213_v11, 4  ;;  %v6150_v44 = vrot.slane %v14820_v38, 6 }
 0x3dd   :  { %7740 = vmatprep.subr.bf16.mxu0 %v7928_v50  ;;  %7707 = vmatpush3.bf16.msra.mxu1 %v7927_v33  ;;  %v6040_v31 = vshrl.u32 %v7106_v32, 16  ;;  %v6374_v63 = vshrl.u32 %v7123_v20, 16  ;;  %v6377_v0 = vshll.u32 %v7123_v20, 16  ;;  %v5824_v56 = vrot.slane %v5822_v35, 1  ;;  %vm17272_vm7 = vmmov %vm17259_vm9  ;;  %v7936_v20 = vld [vmem:[%s15063_s8 + $0x110] sm:$0xff]  }
 0x3de   :  { %7708 = vmatprep.subr.bf16.mxu1 %v7929_v57  ;;  %v6043_v49 = vshll.u32 %v7106_v32, 16  ;;  %v14854_v11 = vsel %vm6140_vm3, 65537, %v17268_v61  ;;  %v14862_v52 = vsel %vm6143_vm11, 65537, %v17268_v61  ;;  %v6153_v34 = vrot.slane %v14840_v4, 6  ;;  %vm17276_vm6 = vmmov %vm17272_vm7  ;;  %v7935_v32 = vld [vmem:[%s15063_s8 + $0xa8] sm:$0xff]  }
 0x3df   :  { %v5546_v45 = vor.u32 %v5545_v47, %v5542_v43  ;;  %v6366_v48 = vshrl.u32 %v7122_v54, 16  ;;  %v6369_v22 = vshll.u32 %v7122_v54, 16  ;;  %v5820_v25 = vshrl.u32 %v14775_v15, 16  ;;  %vm17277_vm8 = vmmov %vm17267_vm1  ;;  %v7938_v47 = vld [vmem:[%s15063_s8 + $0x108] sm:$0xff]  }
 0x3e0   :  { %7741 = vmatpush3.bf16.msra.mxu0 %v7928_v50  ;;  %v14869_v3 = vrot.slane %v5827_v2, 1  ;;  %vm14871_vm14 = vcmp.ne.s16.totalorder %v5787_v39, 0  ;;  %v6333_v9 = vrot.slane %v14661_v12, 4  ;;  %v6376_v41 = vrot.slane %v6374_v63, 2  ;;  %vm17278_vm13 = vmmov %vm17276_vm6 }
 0x3e1   :  { %7742 = vmatprep.subr.bf16.mxu0 %v7930_v21  ;;  %7709 = vmatpush3.bf16.msra.mxu1 %v7929_v57  ;;  %v6379_v23 = vrot.slane %v6377_v0, 3  ;;  %v6148_v59 = vrot.slane %v14854_v11, 6  ;;  %v6156_v7 = vrot.slane %v14862_v52, 6  ;;  %v5825_v58 = vor.u32 %v5824_v56, %v5820_v25  ;;  %vm17280_vm1 = vmmov %vm17276_vm6  ;;  %v7942_v25 = vld [vmem:[%s15063_s8 + $0xe8] sm:$0xff]   ;;  %v7943_v52 = vld [vmem:[%s15063_s8 + $0xe0] sm:$0xff]  }
 0x3e2   :  { %7726 = vmatprep.subr.bf16.mxu1 %v7931_v17  ;;  %v6042_v8 = vrot.slane %v6040_v31, 1  ;;  %v6045_v1 = vrot.slane %v6043_v49, 2  ;;  %v6152_v37 = vrot.slane %v6150_v44, 4  ;;  %vm17271_vm15 = vsmask.f32 4352  ;;  %v7939_v31 = vld [vmem:[%s15063_s8 + $0xf8] sm:$0xff]   ;;  %vm17282_vm11 = vmmov %vm17280_vm1 }
 0x3e3   :  { %v5547_v12 = vsel %vm17271_vm15, %v14680_v14, %v5546_v45  ;;  %v6368_v33 = vrot.slane %v6366_v48, 2  ;;  %v6371_v15 = vrot.slane %v6369_v22, 3  ;;  %v6155_v62 = vrot.slane %v6153_v34, 4  ;;  %v7941_v49 = vld [vmem:[%s15063_s8 + $0xf0] sm:$0xff]   ;;  %vm17284_vm15 = vmmov %vm17280_vm1 }
 0x3e4   :  { %7743 = vmatpush3.bf16.msra.mxu0 %v7930_v21  ;;  %7711 = vmatmul.mubr.msk.bf16.vlgmr.msra.gmra.mxu1 %vm17272_vm7, %v5547_v12  ;;  %vm17273_vm12 = vsmask.f32 7424  ;;  %vm14889_vm2 = vcmp.ne.s16.totalorder %v6333_v9, 0  ;;  %v14894_v14 = vor.u32 %v6379_v23, %v6376_v41  ;;  %v6149_v53 = vrot.slane %v6148_v59, 4  ;;  %v7951_v12 = vld [vmem:[%s15066_s11 + $0x20] sm:$0xff]  }
 0x3e5   :  { %7744 = vmatprep.subr.bf16.mxu0 %v7932_v36  ;;  %v5830_v50 = vsel %vm17273_vm12, %v5825_v58, %v14869_v3  ;;  %7727 = vmatpush3.bf16.msra.mxu1 %v7931_v17  ;;  %v6157_v51 = vsel %vm14345_vm4, %v6155_v62, %v6156_v7  ;;  %v6046_v24 = vor.u32 %v6045_v1, %v6042_v8  ;;  %v5797_v60 = vsel %vm14871_vm14, %v5736_v18, 0  ;;  %vm17281_vm9 = vmmov %vm17273_vm12  ;;  %v7946_v58 = vld [vmem:[%s15066_s11 + $0x10] sm:$0xff]   ;;  %v7948_v8 = vld [vmem:[%s15066_s11 + $0x8] sm:$0xff]  }
 0x3e6   :  { %7734 = vmatprep.mubr.msk.bf16.mxu1 %vm17276_vm6, %v5830_v50  ;;  %7728 = vmatprep.subr.bf16.mxu1 %v7933_v16  ;;  %v6372_v30 = vor.u32 %v6371_v15, %v6368_v33  ;;  %v6151_v61 = vsel %vm14345_vm4, %v6149_v53, %v6150_v44  ;;  %v6154_v38 = vsel %vm14345_vm4, %v6152_v37, %v6153_v34  ;;  %v6343_v57 = vsel %vm14889_vm2, %v6278_v46, 0  ;;  %vm17286_vm2 = vmmov %vm17280_vm1  ;;  %v7949_v1 = vld [vmem:[%s15066_s11 + $0x28] sm:$0xff]   ;;  %v7950_v37 = vld [vmem:[%s15066_s11] sm:$0xff]  }
 0x3e7   :  { %v6047_v35 = vsel %vm17277_vm8, %v14759_v26, %v6046_v24  ;;  %vm6162_vm5 = vcmp.ne.s16.totalorder %v6157_v51, 0  ;;  %vm17279_vm10 = vsmask.f32 5376  ;;  %v7097_v21 = vcombine.low %v5797_v60, %v5797_v60  ;;  %vm17288_vm8 = vmmov %vm17280_vm1 }
 0x3e8   :  { %7745 = vmatpush3.bf16.msra.mxu0 %v7932_v36  ;;  %v6381_v10 = vsel %vm17279_vm10, %v6372_v30, %v14894_v14  ;;  %v6167_v43 = vsel %vm6162_vm5, %v14585_v29, 0  ;;  %vm6160_vm4 = vcmp.ne.s16.totalorder %v6151_v61, 0  ;;  %vm6161_vm0 = vcmp.ne.s16.totalorder %v6154_v38, 0  ;;  %vm17285_vm12 = vmmov %vm17279_vm10 }
 0x3e9   :  { %7762 = vmatprep.subr.bf16.mxu0 %v7934_v40  ;;  %7729 = vmatpush3.bf16.msra.mxu1 %v7933_v16  ;;  %v7124_v26 = vcombine.low %v6343_v57, %v6343_v57  ;;  %v6165_v54 = vsel %vm6160_vm4, %v14590_v27, 0  ;;  %v6166_v29 = vsel %vm6161_vm0, %v14596_v6, 0  ;;  %vm6159_vm3 = vcmp.ne.s16.totalorder %v6148_v59, 0  ;;  %v7940_v6 = vld [vmem:[%s15063_s8 + $0x100] sm:$0xff]   ;;  %v7947_v16 = vld [vmem:[%s15066_s11 + $0x30] sm:$0xff]   ;;  %vm17290_vm10 = vmmov %vm17280_vm1 }
 0x3ea   :  { %7730 = vmatprep.subr.bf16.mxu1 %v7935_v32  ;;  %v7114_v4 = vcombine.low %v6166_v29, %v6167_v43  ;;  %v5831_v2 = vshrl.u32 %v14799_v13, 16  ;;  %v5835_v39 = vshll.u32 %v7097_v21, 16  ;;  %v6164_v44 = vsel %vm6159_vm3, %v14789_v19, 0  ;;  %vm17291_vm4 = vmmov %vm17280_vm1 }
 0x3eb   :  { %7747 = vmatmul.mubr.msk.bf16.vlgmr.msra.gmra.mxu0 %vm17278_vm13, %v6047_v35  ;;  %v7113_v63 = vcombine.low %v6164_v44, %v6165_v54  ;;  %v6383_v0 = vshrl.u32 %v7124_v26, 16  ;;  %v6386_v17 = vshll.u32 %v7124_v26, 16  ;;  %v6158_v36 = vrot.slane %v6156_v7, 4  ;;  %v7944_v7 = vld [vmem:[%s15066_s11 + $0x18] sm:$0xff]   ;;  %vm17289_vm13 = vmmov %vm17280_vm1 }
 0x3ec   :  { %7763 = vmatpush3.bf16.msra.mxu0 %v7934_v40  ;;  %7770 = vmatprep.mubr.msk.bf16.mxu0 %vm17280_vm1, %v6381_v10  ;;  %v5833_v27 = vor.u32 %v5831_v2, %v14869_v3  ;;  %v6191_v13 = vrot.slane %v7114_v4, 2  ;;  %v5837_v56 = vrot.slane %v5835_v39, 1  ;;  %vm17283_vm14 = vcmask 1045504   ;;  %vm17292_vm0 = vmmov %vm17280_vm1 }
 0x3ed   :  { %7764 = vmatprep.subr.bf16.mxu0 %v7936_v20  ;;  %7731 = vmatpush3.bf16.msra.mxu1 %v7935_v32  ;;  %v6190_v19 = vrot.slane %v7113_v63, 2  ;;  %v6385_v11 = vrot.slane %v6383_v0, 2  ;;  %v6388_v34 = vrot.slane %v6386_v17, 3  ;;  %vm6163_vm7 = vcmp.ne.s16.totalorder %v6158_v36, 0  ;;  %vm17287_vm6 = vmmov %vm17283_vm14 }
 0x3ee   :  { %7732 = vmatprep.subr.bf16.mxu1 %v7937_v5  ;;  %v5838_v45 = vsel %vm17281_vm9, %v5833_v27, %v5837_v56  ;;  %v6168_v28 = vsel %vm6163_vm7, %v14731_v42, 0  ;;  %v7991_v59 = vmov 0.0   ;;  %v7945_v42 = vld [vmem:[%s15066_s11 + $0x38] sm:$0xff]   ;;  %vm7992_vm5 = vmmov 0   ;;  %vm17293_vm3 = vmmov %vm17292_vm0 }
 0x3ef   :  { %v6192_v48 = vsel %vm17283_vm14, %v6190_v19, %v6191_v13  ;;  %v6389_v22 = vor.u32 %v6388_v34, %v6385_v11  ;;  %v7115_v9 = vcombine.low %v6168_v28, %v6168_v28  ;;  %vm17294_vm9 = vmmov %vm17292_vm0  ;;  %vm6872_vm14 = vcmask 58368  }
 0x3f0   :  { %7765 = vmatpush3.bf16.msra.mxu0 %v7936_v20 }
 0x3f1   :  { %7766 = vmatprep.subr.bf16.mxu0 %v7938_v47  ;;  %7733 = vmatpush3.bf16.msra.mxu1 %v7937_v5  ;;  %v6390_v3 = vsel %vm17285_vm12, %v14894_v14, %v6389_v22  ;;  %v6193_v41 = vrot.slane %v7115_v9, 2 }
 0x3f2   :  { %7750 = vmatprep.subr.bf16.mxu1 %v7939_v31 }
 0x3f3   :  { %v6194_v23 = vsel %vm17287_vm6, %v6191_v13, %v6193_v41 }
 0x3f4   :  { %7767 = vmatpush3.bf16.msra.mxu0 %v7938_v47  ;;  %7735 = vmatmul.mubr.msk.bf16.vlgmr.msra.gmra.mxu1 %vm17282_vm11, %v5838_v45  ;;  %vm17295_vm11 = vmmov %vm17292_vm0 }
 0x3f5   :  { %7768 = vmatprep.subr.bf16.mxu0 %v7940_v6  ;;  %7751 = vmatpush3.bf16.msra.mxu1 %v7939_v31 }
 0x3f6   :  { %7758 = vmatprep.mubr.msk.bf16.mxu1 %vm17284_vm15, %v6192_v48  ;;  %7752 = vmatprep.subr.bf16.mxu1 %v7941_v49  ;;  %vm6889_vm15 = vcmask 1024  }
 0x3f8   :  { %7769 = vmatpush3.bf16.msra.mxu0 %v7940_v6 }
 0x3f9   :  { %7753 = vmatpush3.bf16.msra.mxu1 %v7941_v49  ;;  %7786 = vmatprep.subr.bf16.mxu0 %v7991_v59 }
 0x3fa   :  { %7754 = vmatprep.subr.bf16.mxu1 %v7942_v25 }
 0x3fb   :  { %7771 = vmatmul.mubr.msk.bf16.vlgmr.msra.gmra.mxu0 %vm17286_vm2, %v6390_v3 }
 0x3fc   :  { %7794 = vmatprep.mubr.msk.bf16.mxu0 %vm7992_vm5, %v7991_v59  ;;  %7787 = vmatpush3.bf16.msra.mxu0 %v7945_v42 }
 0x3fd   :  { %7755 = vmatpush3.bf16.msra.mxu1 %v7942_v25  ;;  %7788 = vmatprep.subr.bf16.mxu0 %v7991_v59 }
 0x3fe   :  { %7756 = vmatprep.subr.bf16.mxu1 %v7943_v52 }
 0x400   :  { %7789 = vmatpush3.bf16.msra.mxu0 %v7947_v16 }
 0x401   :  { %7757 = vmatpush3.bf16.msra.mxu1 %v7943_v52  ;;  %7790 = vmatprep.subr.bf16.mxu0 %v7991_v59 }
 0x402   :  { %7774 = vmatprep.subr.bf16.mxu1 %v7991_v59 }
 0x404   :  { %7759 = vmatmul.mubr.msk.bf16.vlgmr.msra.gmra.mxu1 %vm17288_vm8, %v6194_v23  ;;  %7791 = vmatpush3.bf16.msra.mxu0 %v7949_v1  ;;  %v7131_v23 = vld [vmem:[%s15067_s9] ss:$0 sm:$0xff] }
 0x405   :  { %7782 = vmatprep.mubr.msk.bf16.mxu1 %vm7992_vm5, %v7991_v59  ;;  %7775 = vmatpush3.bf16.msra.mxu1 %v7944_v7  ;;  %v7132_v1 = vld [vmem:[%s15068_s10] ss:$0 sm:$0xff] }
 0x406   :  { %7776 = vmatprep.subr.bf16.mxu1 %v7991_v59  ;;  %7792 = vmatprep.subr.bf16.mxu0 %v7991_v59 }
 0x408   :  { %7793 = vmatpush3.bf16.msra.mxu0 %v7951_v12 }
 0x409   :  { %7777 = vmatpush3.bf16.msra.mxu1 %v7946_v58  ;;  %7810 = vmatprep.subr.bf16.mxu0 %v7991_v59 }
 0x40a   :  { %7778 = vmatprep.subr.bf16.mxu1 %v7991_v59 }
 0x40d   :  { %7779 = vmatpush3.bf16.msra.mxu1 %v7948_v8 }
 0x40e   :  { %7780 = vmatprep.subr.bf16.mxu1 %v7991_v59 }
 0x411   :  { %7781 = vmatpush3.bf16.msra.mxu1 %v7950_v37 }
 0x412   :  { %7798 = vmatprep.subr.bf16.mxu1 %v7991_v59 }
 0x47f   :  { %v7676_v40 = vpop.f32.mrf.mxu1 }
 0x481   :  { %v5080_v33 = vpop.f32.mrf.mxu1 }
 0x483   :  { %v7677_v15 = vpop.f32.mrf.mxu1 }
 0x485   :  { %v7700_v18 = vpop.f32.mrf.mxu0  ;;  %v5083_v62 = vpop.f32.mrf.mxu1 }
 0x487   :  { %v5403_v50 = vpop.f32.mrf.mxu0 }
 0x489   :  { %v7701_v55 = vpop.f32.mrf.mxu0 }
 0x48b   :  { %v5406_v53 = vpop.f32.mrf.mxu0 }
 0x494   :  { %v7688_v46 = vpop.f32.mrf.mxu1 }
 0x495   :  { %v5208_v10 = vadd.f32 %v7688_v46, %v7676_v40 }
 0x496   :  { %v5199_v14 = vpop.f32.mrf.mxu1 }
 0x497   :  { %v5200_v43 = vadd.f32 %v5199_v14, %v5080_v33  ;;  %v5420_v54 = vadd.f32 %v7700_v18, %v5208_v10 }
 0x498   :  { %v7689_v51 = vpop.f32.mrf.mxu1 }
 0x499   :  { %v5211_v47 = vadd.f32 %v7689_v51, %v7677_v15  ;;  %v5418_v2 = vadd.f32 %v5403_v50, %v5200_v43 }
 0x49a   :  { %v5202_v60 = vpop.f32.mrf.mxu1 }
 0x49b   :  { %v7724_v24 = vpop.f32.mrf.mxu0  ;;  %v5203_v29 = vadd.f32 %v5202_v60, %v5083_v62  ;;  %v5421_v63 = vadd.f32 %v7701_v55, %v5211_v47 }
 0x49d   :  { %v5713_v30 = vpop.f32.mrf.mxu0  ;;  %v5419_v17 = vadd.f32 %v5406_v53, %v5203_v29 }
 0x49f   :  { %v7725_v20 = vpop.f32.mrf.mxu0 }
 0x4a1   :  { %v5716_v38 = vpop.f32.mrf.mxu0 }
 0x4a4   :  { %v7712_v32 = vpop.f32.mrf.mxu1 }
 0x4a5   :  { %v5629_v4 = vadd.f32 %v7712_v32, %v5420_v54 }
 0x4a6   :  { %v5612_v61 = vpop.f32.mrf.mxu1 }
 0x4a7   :  { %v5627_v31 = vadd.f32 %v5612_v61, %v5418_v2  ;;  %v5730_v27 = vadd.f32 %v7724_v24, %v5629_v4 }
 0x4a8   :  { %v7713_v57 = vpop.f32.mrf.mxu1 }
 0x4a9   :  { %v5630_v0 = vadd.f32 %v7713_v57, %v5421_v63  ;;  %v5728_v49 = vadd.f32 %v5713_v30, %v5627_v31  ;;  %v7952_v31 = vld [vmem:[%s15066_s11 + $0x58] sm:$0xff]  }
 0x4aa   :  { %v5615_v21 = vpop.f32.mrf.mxu1 }
 0x4ab   :  { %v7748_v35 = vpop.f32.mrf.mxu0  ;;  %v5628_v56 = vadd.f32 %v5615_v21, %v5419_v17  ;;  %v5731_v45 = vadd.f32 %v7725_v20, %v5630_v0  ;;  %v7953_v17 = vld [vmem:[%s15066_s11 + $0x78] sm:$0xff]  }
 0x4ad   :  { %v6112_v5 = vpop.f32.mrf.mxu0  ;;  %v5729_v22 = vadd.f32 %v5716_v38, %v5628_v56 }
 0x4af   :  { %v7749_v39 = vpop.f32.mrf.mxu0 }
 0x4b1   :  { %v6115_v6 = vpop.f32.mrf.mxu0 }
 0x4b4   :  { %v7736_v26 = vpop.f32.mrf.mxu1 }
 0x4b5   :  { %v5920_v19 = vadd.f32 %v7736_v26, %v5730_v27 }
 0x4b6   :  { %v5903_v44 = vpop.f32.mrf.mxu1 }
 0x4b7   :  { %v5918_v34 = vadd.f32 %v5903_v44, %v5728_v49  ;;  %v6129_v25 = vadd.f32 %v7748_v35, %v5920_v19  ;;  %v7956_v49 = vld [vmem:[%s15066_s11 + $0x48] sm:$0xff]  }
 0x4b8   :  { %v7737_v13 = vpop.f32.mrf.mxu1 }
 0x4b9   :  { %v5921_v48 = vadd.f32 %v7737_v13, %v5731_v45  ;;  %v6127_v41 = vadd.f32 %v6112_v5, %v5918_v34  ;;  %v7955_v13 = vld [vmem:[%s15066_s11 + $0x70] sm:$0xff]  }
 0x4ba   :  { %v5906_v36 = vpop.f32.mrf.mxu1 }
 0x4bb   :  { %v7772_v11 = vpop.f32.mrf.mxu0  ;;  %v5919_v28 = vadd.f32 %v5906_v36, %v5729_v22  ;;  %v6130_v16 = vadd.f32 %v7749_v39, %v5921_v48 }
 0x4bd   :  { %v6455_v3 = vpop.f32.mrf.mxu0  ;;  %v6128_v15 = vadd.f32 %v6115_v6, %v5919_v28  ;;  %v7954_v6 = vld [vmem:[%s15066_s11 + $0x50] sm:$0xff]  }
 0x4bf   :  { %v7773_v8 = vpop.f32.mrf.mxu0 }
 0x4c1   :  { %v6458_v14 = vpop.f32.mrf.mxu0 }
 0x4c4   :  { %v7760_v52 = vpop.f32.mrf.mxu1 }
 0x4c5   :  { %v6276_v9 = vadd.f32 %v7760_v52, %v6129_v25  ;;  %v7957_v52 = vld [vmem:[%s15066_s11 + $0x68] sm:$0xff]  }
 0x4c6   :  { %v6259_v7 = vpop.f32.mrf.mxu1 }
 0x4c7   :  { %v6472_v42 = vadd.f32 %v7772_v11, %v6276_v9  ;;  %v6274_v58 = vadd.f32 %v6259_v7, %v6127_v41  ;;  %v7958_v41 = vld [vmem:[%s15066_s11 + $0x40] sm:$0xff]  }
 0x4c8   :  { %v7761_v37 = vpop.f32.mrf.mxu1  ;;  %v7959_v7 = vld [vmem:[%s15066_s11 + $0x60] sm:$0xff]  }
 0x4c9   :  { %v6483_v12 = vmul.f32 %v7131_v23, %v6472_v42  ;;  %v6470_v40 = vadd.f32 %v6455_v3, %v6274_v58  ;;  %v6277_v33 = vadd.f32 %v7761_v37, %v6130_v16 }
 0x4ca   :  { %v6262_v18 = vpop.f32.mrf.mxu1 }
 0x4cb   :  { %v6494_v62 = vadd.f32 %v7132_v1, %v6483_v12  ;;  %v6481_v50 = vmul.f32 %v7131_v23, %v6470_v40  ;;  %v6473_v46 = vadd.f32 %v7773_v8, %v6277_v33  ;;  %v6275_v55 = vadd.f32 %v6262_v18, %v6128_v15  ;;  %v7133_v18 = vld [vmem:[%s15070_s12] ss:$0 sm:$0xff] }
 0x4cc   :  { %v20_v8 = vstv %s15069_s14 }
 0x4cd   :  { %v6498_v53 = vmax.f32 %v6494_v62, 0.0  ;;  %v6492_v51 = vadd.f32 %v7132_v1, %v6481_v50  ;;  %v6484_v24 = vmul.f32 %v7131_v23, %v6473_v46  ;;  %v6471_v60 = vadd.f32 %v6458_v14, %v6275_v55  ;;  %21 = vst [vmem:[#allocation6] sm:$0x1] %v20_v8 }
 0x4cf   :  { %6502 = vst.msk [vmem:[#allocation5 + $0x10] sm:$0xff] %vm17289_vm13, %v6498_v53  ;;  %v6496_v30 = vmax.f32 %v6492_v51, 0.0  ;;  %v6495_v32 = vadd.f32 %v7132_v1, %v6484_v24  ;;  %v6482_v20 = vmul.f32 %v7131_v23, %v6471_v60 }
 0x4d1   :  { %6500 = vst.msk [vmem:[#allocation5] sm:$0xff] %vm17290_vm10, %v6496_v30  ;;  %v6499_v61 = vmax.f32 %v6495_v32, 0.0  ;;  %v6493_v38 = vadd.f32 %v7132_v1, %v6482_v20  ;;  %v7154_v32 = vld [vmem:[%s15071_s13] ss:$0 sm:$0xff] }
 0x4d3   :  { %6503 = vst.msk [vmem:[#allocation5 + $0x18] sm:$0xff] %vm17280_vm1, %v6499_v61  ;;  %v6497_v57 = vmax.f32 %v6493_v38, 0.0 }
 0x4d5   :  { %6501 = vst.msk [vmem:[#allocation5 + $0x8] sm:$0xff] %vm17291_vm4, %v6497_v57 }
 0x4d8   :  { %v6512_v35 = vld [vmem:[#allocation5] ss:$16 sm:$0x3]  ;;  %v6514_v10 = vld [vmem:[#allocation5 + $0x1] ss:$16 sm:$0x3] }
 0x4d9   :  { %v6516_v21 = vld [vmem:[#allocation5 + $0x4] ss:$16 sm:$0x3]  ;;  %v6518_v43 = vld [vmem:[#allocation5 + $0x5] ss:$16 sm:$0x3]  ;;  %v6519_v5 = vmax.f32 %v6512_v35, %v6514_v10 }
 0x4da   :  { %v6520_v26 = vmax.f32 %v6516_v21, %v6518_v43  ;;  %v6600_v47 = vld [vmem:[#allocation5 + $0x2] ss:$16 sm:$0x3]  ;;  %v6602_v54 = vld [vmem:[#allocation5 + $0x3] ss:$16 sm:$0x3] }
 0x4db   :  { %v6604_v29 = vld [vmem:[#allocation5 + $0x6] ss:$16 sm:$0x3]  ;;  %v6606_v4 = vld [vmem:[#allocation5 + $0x7] ss:$16 sm:$0x3]  ;;  %v6607_v2 = vmax.f32 %v6600_v47, %v6602_v54 }
 0x4dc   :  { %v6521_v39 = vmax.f32 %v6519_v5, %v6520_v26  ;;  %v6608_v44 = vmax.f32 %v6604_v29, %v6606_v4  ;;  %v6688_v56 = vld [vmem:[#allocation5 + $0x8] ss:$16 sm:$0x3]  ;;  %v6690_v19 = vld [vmem:[#allocation5 + $0x9] ss:$16 sm:$0x3] }
 0x4dd   :  { %v6692_v11 = vld [vmem:[#allocation5 + $0xc] ss:$16 sm:$0x3]  ;;  %v6694_v34 = vld [vmem:[#allocation5 + $0xd] ss:$16 sm:$0x3]  ;;  %v6695_v25 = vmax.f32 %v6688_v56, %v6690_v19 }
 0x4de   :  { %v6522_v63 = vpack.c.bf16 %v6521_v39, %v6521_v39  ;;  %v6609_v0 = vmax.f32 %v6607_v2, %v6608_v44  ;;  %v6776_v45 = vld [vmem:[#allocation5 + $0xa] ss:$16 sm:$0x3]  ;;  %v6778_v36 = vld [vmem:[#allocation5 + $0xb] ss:$16 sm:$0x3]  ;;  %v6696_v3 = vmax.f32 %v6692_v11, %v6694_v34 }
 0x4df   :  { %v6780_v48 = vld [vmem:[#allocation5 + $0xe] ss:$16 sm:$0x3]  ;;  %v6782_v22 = vld [vmem:[#allocation5 + $0xf] ss:$16 sm:$0x3]  ;;  %v6783_v28 = vmax.f32 %v6776_v45, %v6778_v36 }
 0x4e0   :  { %7783 = vmatmul.mubr.msk.bf16.vlgmr.msra.gmra.mxu1 %vm17292_vm0, %v6522_v63  ;;  %v6610_v27 = vpack.c.bf16 %v6609_v0, %v6609_v0  ;;  %v6784_v9 = vmax.f32 %v6780_v48, %v6782_v22  ;;  %v6697_v23 = vmax.f32 %v6695_v25, %v6696_v3  ;;  %v7155_v21 = vld [vmem:[#allocation6] ss:$0 sm:$0xff] }
 0x4e1   :  { %7799 = vmatpush3.bf16.msra.mxu1 %v7952_v31  ;;  %7806 = vmatprep.mubr.msk.bf16.mxu1 %vm7992_vm5, %v7991_v59 }
 0x4e2   :  { %7795 = vmatmul.mubr.msk.bf16.vlgmr.msra.gmra.mxu0 %vm17293_vm3, %v6610_v27  ;;  %7800 = vmatprep.subr.bf16.mxu1 %v7991_v59  ;;  %v6785_v42 = vmax.f32 %v6783_v28, %v6784_v9  ;;  %v6698_v58 = vpack.c.bf16 %v6697_v23, %v6697_v23 }
 0x4e3   :  { %7811 = vmatpush3.bf16.msra.mxu0 %v7953_v17  ;;  %7818 = vmatprep.mubr.msk.bf16.mxu0 %vm7992_vm5, %v7991_v59 }
 0x4e4   :  { %7812 = vmatprep.subr.bf16.mxu0 %v7991_v59  ;;  %v6786_v16 = vpack.c.bf16 %v6785_v42, %v6785_v42 }
 0x4e5   :  { %7801 = vmatpush3.bf16.msra.mxu1 %v7954_v6 }
 0x4e6   :  { %7802 = vmatprep.subr.bf16.mxu1 %v7991_v59 }
 0x4e7   :  { %7813 = vmatpush3.bf16.msra.mxu0 %v7955_v13 }
 0x4e8   :  { %7814 = vmatprep.subr.bf16.mxu0 %v7991_v59 }
 0x4e9   :  { %7803 = vmatpush3.bf16.msra.mxu1 %v7956_v49 }
 0x4ea   :  { %7804 = vmatprep.subr.bf16.mxu1 %v7991_v59 }
 0x4eb   :  { %7815 = vmatpush3.bf16.msra.mxu0 %v7957_v52 }
 0x4ec   :  { %7816 = vmatprep.subr.bf16.mxu0 %v7991_v59 }
 0x4ed   :  { %7805 = vmatpush3.bf16.msra.mxu1 %v7958_v41 }
 0x4ef   :  { %7817 = vmatpush3.bf16.msra.mxu0 %v7959_v7 }
 0x4f0   :  { %7807 = vmatmul.mubr.msk.bf16.vlgmr.msra.gmra.mxu1 %vm17294_vm9, %v6698_v58 }
 0x4f2   :  { %7819 = vmatmul.mubr.msk.bf16.vlgmr.msra.gmra.mxu0 %vm17295_vm11, %v6786_v16 }
 0x5a0   :  { %v6592_v1 = vpop.f32.mrf.mxu1 }
 0x5a1   :  { %v6598_v50 = vadd.f32 %v7133_v18, %v6592_v1 }
 0x5a2   :  { %v6680_v37 = vpop.f32.mrf.mxu0  ;;  %v7784_v12 = vpop.f32.mrf.mxu1 }
 0x5a3   :  { %v6686_v46 = vadd.f32 %v6680_v37, %v6598_v50 }
 0x5a4   :  { %v7796_v40 = vpop.f32.mrf.mxu0  ;;  %v6595_v33 = vpop.f32.mrf.mxu1 }
 0x5a6   :  { %v6683_v59 = vpop.f32.mrf.mxu0  ;;  %v7785_v15 = vpop.f32.mrf.mxu1 }
 0x5a8   :  { %v7797_v62 = vpop.f32.mrf.mxu0 }
 0x5b0   :  { %v6768_v55 = vpop.f32.mrf.mxu1 }
 0x5b1   :  { %v6774_v14 = vadd.f32 %v6768_v55, %v6686_v46 }
 0x5b2   :  { %v6856_v53 = vpop.f32.mrf.mxu0  ;;  %v7808_v51 = vpop.f32.mrf.mxu1 }
 0x5b3   :  { %v6862_v24 = vadd.f32 %v6856_v53, %v6774_v14 }
 0x5b4   :  { %v7820_v60 = vpop.f32.mrf.mxu0  ;;  %v6771_v30 = vpop.f32.mrf.mxu1 }
 0x5b5   :  { %v6863_v20 = vmax.f32 %v6862_v24, 0.0 }
 0x5b6   :  { %v6859_v61 = vpop.f32.mrf.mxu0  ;;  %v7809_v38 = vpop.f32.mrf.mxu1 }
 0x5b7   :  { %v6871_v57 = vmul.f32 %v7154_v32, %v6863_v20 }
 0x5b8   :  { %v7821_v35 = vpop.f32.mrf.mxu0 }
 0x5b9   :  { %v6873_v10 = vsel %vm6872_vm14, %v6871_v57, 0.0 }
 0x5ba   :  { %6874 = vadd.xlane.f32.xlu0 %v6873_v10 }
 0x643   :  { %v6875_v43 = vpop.xlane.xlu0 %6874 }
 0x644   :  { %v6883_v5 = vadd.f32 %v7155_v21, %v6875_v43 }
 0x646   :  { %v6884_v26 = vsub.f32 0.0, %v6883_v5 }
 0x648   :  { %v6885_v47 = vmul.f32 1.442695, %v6884_v26 }
 0x64a   :  { %7960 = vpow2.f32 %v6885_v47 }
 0x657   :  { %v7961_v54 = vpop.eup %7960 }
 0x658   :  { %v6887_v29 = vadd.f32 1.0, %v7961_v54 }
 0x65a   :  { %7962 = vrcp.f32 %v6887_v29 }
 0x667   :  { %v7963_v4 = vpop.eup %7962 }
 0x668   :  { %6890 = vst.msk [vmem:[%s15072_s15] sm:$0x3] %vm6889_vm15, %v7963_v4 }

</bundles_post_ra>
